<compile_context>
chip_gen: v5e
topology: v5e:2x2
jax: 0.10.0
libtpu: 0.0.40
codegen_flags: <defaults>
</compile_context>

<pallas_src>
import functools
import math

import jax
import jax.numpy as jnp
import numpy as np
from jax.experimental import pallas as pl
from jax.experimental.pallas import tpu as pltpu


NEG_SLOPE = 0.01  # nn.LeakyReLU default negative_slope


# ----------------------------------------------------------------------------
# Pallas kernels
# ----------------------------------------------------------------------------

def _conv1_matmul_kernel(a_ref, w_ref, b_ref, o_ref):
    """One full-K matmul tile: (tm, K) @ (K, N) + bias, fused LeakyReLU."""
    out = jnp.dot(a_ref[...], w_ref[...], preferred_element_type=jnp.float32)
    out = out + b_ref[...]
    o_ref[...] = jnp.where(out >= 0, out, NEG_SLOPE * out)


def conv1_matmul(patches, wmat, bias):
    """patches (M, K) bf16 @ wmat (K, N) bf16 + bias (1, N) f32, fused LeakyReLU."""
    M, K = patches.shape
    _, N = wmat.shape
    tm = 256 if (M % 256 == 0) else M     # 2 blocks for the reference shapes -> 1 per v7x TC
    grid = (M // tm,)
    return pl.pallas_call(
        _conv1_matmul_kernel,
        out_shape=jax.ShapeDtypeStruct((M, N), jnp.float32),
        grid_spec=pltpu.PrefetchScalarGridSpec(
            num_scalar_prefetch=0,
            grid=grid,
            in_specs=[
                pl.BlockSpec((tm, K), lambda i: (i, 0)),
                pl.BlockSpec((K, N), lambda i: (0, 0)),
                pl.BlockSpec((1, N), lambda i: (0, 0)),
            ],
            out_specs=pl.BlockSpec((tm, N), lambda i: (i, 0)),
        ),
        compiler_params=pltpu.CompilerParams(
            dimension_semantics=("parallel",)),
    )(patches, wmat, bias)


def _conv2_heads_kernel(x_ref, w2_ref, b2_ref, wh_ref, bh_ref, o_ref, *,
                        ksize, wp, m_rows):
    """Fused conv2 (5x5 group-conv as 25 shifted dots) + bias + LeakyReLU + 1x1 heads.

    x_ref : (1, Lpad, C1) f32   zero-padded conv1 activations, spatial flattened (row*Wp+col)
    w2_ref: (k*k, C1, C2) bf16  per-tap weight slices
    b2_ref: (1, C2) f32
    wh_ref: (C2, NH) bf16       block-diagonal (over rotation) fused head weights
    bh_ref: (1, NH) f32
    o_ref : (1, m_rows, NH) f32 head outputs for Ho x Wp positions (right-edge cols are junk)
    """
    c2 = w2_ref.shape[2]
    acc = jnp.zeros((m_rows, c2), jnp.float32)
    for dy in range(ksize):
        for dx in range(ksize):
            off = dy * wp + dx
            patch = x_ref[0, pl.ds(off, m_rows), :].astype(jnp.bfloat16)
            acc = acc + jnp.dot(patch, w2_ref[dy * ksize + dx],
                                preferred_element_type=jnp.float32)
    h = acc + b2_ref[...]
    h = jnp.where(h >= 0, h, NEG_SLOPE * h)
    heads = jnp.dot(h.astype(jnp.bfloat16), wh_ref[...],
                    preferred_element_type=jnp.float32) + bh_ref[...]
    o_ref[0, :, :] = heads


def conv2_heads(xflat, w2col, b2rep, w_big, bh_rep, *, ksize, wp, m_rows):
    B, l_pad, c1 = xflat.shape
    kk, _, c2 = w2col.shape
    nh = w_big.shape[1]
    kernel = functools.partial(_conv2_heads_kernel, ksize=ksize, wp=wp, m_rows=m_rows)
    return pl.pallas_call(
        kernel,
        out_shape=jax.ShapeDtypeStruct((B, m_rows, nh), jnp.float32),
        grid_spec=pltpu.PrefetchScalarGridSpec(
            num_scalar_prefetch=0,
            grid=(B,),
            in_specs=[
                pl.BlockSpec((1, l_pad, c1), lambda b: (b, 0, 0)),
                pl.BlockSpec((kk, c1, c2), lambda b: (0, 0, 0)),
                pl.BlockSpec((1, c2), lambda b: (0, 0)),
                pl.BlockSpec((c2, nh), lambda b: (0, 0)),
                pl.BlockSpec((1, nh), lambda b: (0, 0)),
            ],
            out_specs=pl.BlockSpec((1, m_rows, nh), lambda b: (b, 0, 0)),
        ),
        compiler_params=pltpu.CompilerParams(
            dimension_semantics=("parallel",)),
    )(xflat, w2col, b2rep, w_big, bh_rep)


def _softmax_pair_kernel(x_ref, g_ref, ls_ref, sm_ref):
    """Fused log_softmax(x) and softmax(x + gumbel) over the last axis (shared shift)."""
    x = x_ref[...]
    m = jnp.max(x, axis=-1, keepdims=True)
    sh = x - m
    lse = jnp.log(jnp.sum(jnp.exp(sh), axis=-1, keepdims=True))
    ls_ref[...] = sh - lse
    y = sh + g_ref[...]                       # softmax is shift-invariant: reuse x - m
    my = jnp.max(y, axis=-1, keepdims=True)
    ey = jnp.exp(y - my)
    denom = jnp.sum(ey, axis=-1, keepdims=True)
    sm_ref[...] = ey * pl.reciprocal(denom, approx=True)


def softmax_pair(flat, gumbel):
    B, N = flat.shape
    return pl.pallas_call(
        _softmax_pair_kernel,
        out_shape=(jax.ShapeDtypeStruct((B, N), jnp.float32),
                   jax.ShapeDtypeStruct((B, N), jnp.float32)),
    )(flat, gumbel)


# ----------------------------------------------------------------------------
# GroupConv rotated-filter construction (one-time parameter setup, plain JAX)
# ----------------------------------------------------------------------------

def _trilinear_sample(vol, px, py, pz):
    """grid_sample-style trilinear sample with zero padding.  vol: (..., D, H, W)."""
    D, H, W = vol.shape[-3], vol.shape[-2], vol.shape[-1]
    x0 = jnp.floor(px); y0 = jnp.floor(py); z0 = jnp.floor(pz)
    x1, y1, z1 = x0 + 1.0, y0 + 1.0, z0 + 1.0
    wx1 = px - x0; wx0 = 1.0 - wx1
    wy1 = py - y0; wy0 = 1.0 - wy1
    wz1 = pz - z0; wz0 = 1.0 - wz1

    def gather(zi, yi, xi):
        valid = ((xi >= 0) & (xi <= W - 1) & (yi >= 0) & (yi <= H - 1) &
                 (zi >= 0) & (zi <= D - 1))
        xc = jnp.clip(xi, 0, W - 1).astype(jnp.int32)
        yc = jnp.clip(yi, 0, H - 1).astype(jnp.int32)
        zc = jnp.clip(zi, 0, D - 1).astype(jnp.int32)
        vals = vol[..., zc, yc, xc]
        return jnp.where(valid, vals, 0.0)

    return (gather(z0, y0, x0) * (wz0 * wy0 * wx0) +
            gather(z0, y0, x1) * (wz0 * wy0 * wx1) +
            gather(z0, y1, x0) * (wz0 * wy1 * wx0) +
            gather(z0, y1, x1) * (wz0 * wy1 * wx1) +
            gather(z1, y0, x0) * (wz1 * wy0 * wx0) +
            gather(z1, y0, x1) * (wz1 * wy0 * wx1) +
            gather(z1, y1, x0) * (wz1 * wy1 * wx0) +
            gather(z1, y1, x1) * (wz1 * wy1 * wx1))


def trans_filter(weight, output_rot_dim):
    """Reproduces GroupConv.trans_filter (affine_grid + 5D grid_sample, align_corners=False).
    The reference's 3x4 affine matrix has an all-zero third row, so z' == 0 exactly (for
    D == 1 this selects slice 0; for D == 4 it blends the two middle input-rotation slices,
    exactly as the PyTorch module does).  weight: (O, I, D, K, K) -> (O, R_out, I, D, K, K)."""
    O, I, D, K1, K2 = weight.shape

    def norm_coords(size):
        return (2.0 * jnp.arange(size, dtype=jnp.float32) + 1.0) / size - 1.0

    ys = norm_coords(K1)
    xs = norm_coords(K2)
    Y, X = jnp.meshgrid(ys, xs, indexing="ij")          # (K1, K2)

    res = []
    for i in range(output_rot_dim):
        theta = 2.0 * np.pi * i / output_rot_dim
        c, s = float(np.cos(theta)), float(np.sin(theta))
        gx = c * X + s * Y
        gy = -s * X + c * Y
        gz = jnp.zeros_like(gx)
        gx = jnp.broadcast_to(gx, (D, K1, K2))
        gy = jnp.broadcast_to(gy, (D, K1, K2))
        gz = jnp.broadcast_to(gz, (D, K1, K2))
        # unnormalize (align_corners=False): pix = ((coord + 1) * size - 1) / 2
        px = ((gx + 1.0) * K2 - 1.0) / 2.0
        py = ((gy + 1.0) * K1 - 1.0) / 2.0
        pz = ((gz + 1.0) * D - 1.0) / 2.0
        res.append(_trilinear_sample(weight, px, py, pz))
    return jnp.stack(res, axis=1)                        # (O, R_out, I, D, K1, K2)


def _im2col(x, k, pad):
    """x: (B, C, H, W) -> patches (B*Ho*Wo, C*k*k) flattened in (C, kh, kw) order."""
    B, C, H, W = x.shape
    xp = jnp.pad(x, ((0, 0), (0, 0), (pad, pad), (pad, pad)))
    Ho = H + 2 * pad - k + 1
    Wo = W + 2 * pad - k + 1
    cols = []
    for i in range(k):
        for j in range(k):
            cols.append(xp[:, :, i:i + Ho, j:j + Wo])    # (B, C, Ho, Wo)
    patches = jnp.stack(cols, axis=2)                    # (B, C, k*k, Ho, Wo)
    patches = patches.reshape(B, C * k * k, Ho, Wo)
    patches = patches.transpose(0, 2, 3, 1).reshape(B * Ho * Wo, C * k * k)
    return patches, Ho, Wo


# ----------------------------------------------------------------------------
# One-time weight preparation (rotated filters, matmul layouts, head fusion, bf16 casts)
# ----------------------------------------------------------------------------

def prepare_params(params, cfg):
    KN = cfg["kernels_num"]
    k1, k2 = cfg["kernels_sizes"]
    R0, R1 = cfg["groupconvs"]
    Cin = cfg["in_channels"]
    latent = cfg["latent_dim"]

    # conv1: rotated filters -> (K = Cin*k1*k1, N = KN*R0) matmul weight, columns ordered
    # (c_out * R0 + r_out) to match the PyTorch view (out_channels * output_rot_dim).
    tw1 = trans_filter(params["w1"], R0)                     # (KN, R0, Cin, 1, k1, k1)
    w1mat = tw1.reshape(KN * R0, Cin * 1 * k1 * k1).T        # (Cin*k1*k1, KN*R0)
    b1rep = jnp.repeat(params["b1"], R0).reshape(1, KN * R0)

    # conv2: rotated filters -> tap-major layout (k2*k2, Cin_total, Cout_total),
    # input channels ordered (c_in * R0 + r_in), output channels (c_out * R1 + r_out).
    tw2 = trans_filter(params["w2"], R1)                     # (KN, R1, KN, R0, k2, k2)
    w2col = tw2.transpose(4, 5, 2, 3, 0, 1).reshape(k2 * k2, KN * R0, KN * R1)
    b2rep = jnp.repeat(params["b2"], R1).reshape(1, KN * R1)

    # Fused 1x1 heads: block-diagonal (over rotation) weight (C2_total, R1 * n_heads),
    # so heads = leaky(conv2) @ w_big + bias in a single dot inside the conv2 kernel.
    n_heads = 1 + 2 + 2 * latent
    w_heads = jnp.concatenate([params["wa"].reshape(1, KN),
                               params["wr"].reshape(2, KN),
                               params["wz"].reshape(2 * latent, KN)], axis=0)  # (7, KN)
    b_heads = jnp.concatenate([params["ba"], params["br"], params["bz"]])      # (7,)
    w_big = jnp.einsum("jc,rs->crsj", w_heads, jnp.eye(R1, dtype=jnp.float32))
    w_big = w_big.reshape(KN * R1, R1 * n_heads)             # row c*R1+r, col r*7+j
    bh_rep = jnp.tile(b_heads, R1).reshape(1, R1 * n_heads)

    return {
        "w1mat": w1mat.astype(jnp.bfloat16),
        "b1rep": b1rep.astype(jnp.float32),
        "w2col": w2col.astype(jnp.bfloat16),
        "b2rep": b2rep.astype(jnp.float32),
        "w_big": w_big.astype(jnp.bfloat16),
        "bh_rep": bh_rep.astype(jnp.float32),
    }


# ----------------------------------------------------------------------------
# Full inference-network forward
# ----------------------------------------------------------------------------

def make_forward(cfg):
    k1, k2 = cfg["kernels_sizes"]
    R0, R1 = cfg["groupconvs"]
    KN = cfg["kernels_num"]
    latent = cfg["latent_dim"]
    n = cfg["n"]
    pad1 = cfg["padding"]
    pad2 = (k2 - 1) // 2          # padding='same' with odd kernel
    # TODO(synk): even kernel sizes with padding='same' (asymmetric pad in PyTorch) not handled.
    n_heads = 1 + 2 + 2 * latent
    sigma = float(cfg["theta_prior"])

    # rot_refinement=True, groupconv == 4, normal_prior_over_r=True (as configured)
    offsets_np = np.array([0.0, np.pi / 2, np.pi, -np.pi / 2], dtype=np.float32)
    p_r_np = (-0.5 * (offsets_np / sigma) ** 2 - math.log(sigma)
              - 0.5 * math.log(2.0 * np.pi)).astype(np.float32)

    Ho1 = n + 2 * pad1 - k1 + 1   # conv1 output spatial size
    Wo1 = Ho1
    C1 = KN * R0
    Hp = Ho1 + 2 * pad2
    Wp = Wo1 + 2 * pad2
    m_rows = Ho1 * Wp                                  # conv2 compute rows (incl. junk cols)
    l_need = (k2 - 1) * Wp + (k2 - 1) + m_rows         # max shifted-slice extent
    l_pad = ((max(l_need, Hp * Wp) + 7) // 8) * 8      # sublane-aligned flattened length

    def forward(prep, x, gumbel_key):
        B = x.shape[0]

        # ---- conv1: tiny im2col (K = Cin*k1*k1) + one full-K Pallas matmul, fused LeakyReLU
        patches, _, _ = _im2col(x, k1, pad1)                       # (B*Ho1*Wo1, Cin*k1*k1)
        h1 = conv1_matmul(patches.astype(jnp.bfloat16), prep["w1mat"], prep["b1rep"])

        # ---- arrange conv1 activations as conv2's zero-padded, spatially-flattened NHWC input
        h1 = h1.reshape(B, Ho1, Wo1, C1)
        xpad = jnp.pad(h1, ((0, 0), (pad2, pad2), (pad2, pad2), (0, 0)))
        xflat = xpad.reshape(B, Hp * Wp, C1)
        xflat = jnp.pad(xflat, ((0, 0), (0, l_pad - Hp * Wp), (0, 0)))

        # ---- fused conv2 + LeakyReLU + 1x1 heads (conv_a / conv_r / conv_z), one Pallas call
        ho = conv2_heads(xflat, prep["w2col"], prep["b2rep"], prep["w_big"], prep["bh_rep"],
                         ksize=k2, wp=Wp, m_rows=m_rows)           # (B, m_rows, R1*n_heads)
        ho = ho.reshape(B, Ho1, Wp, R1, n_heads)[:, :, :Wo1]       # drop right-edge junk cols
        attn = ho[..., 0].transpose(0, 3, 1, 2)                    # (B, R, H, W)
        theta_raw = ho[..., 1:3].transpose(0, 4, 3, 1, 2)          # (B, 2, R, H, W)
        z = ho[..., 3:3 + 2 * latent].transpose(0, 4, 3, 1, 2)     # (B, 2*latent, R, H, W)

        offsets = jnp.asarray(offsets_np)
        p_r = jnp.asarray(p_r_np)[:, None, None]                   # (R, 1, 1)
        attn = attn + p_r

        # ---- fused log_softmax + gumbel-softmax over the flattened (R*H*W) axis
        flat = attn.reshape(B, -1)
        g = jax.random.gumbel(gumbel_key, flat.shape, dtype=jnp.float32)
        q_flat, a_flat = softmax_pair(flat, g)
        q_t_r = q_flat.reshape(attn.shape)
        a_sampled = a_flat.reshape(B, R1, Ho1, Wo1)

        rotation_offset = jnp.ones_like(a_sampled) * offsets[None, :, None, None]
        theta_mu = theta_raw[:, 0] + rotation_offset
        theta_std = theta_raw[:, 1]
        theta = jnp.stack((theta_mu, theta_std), axis=1)           # (B, 2, R, H, W)

        return attn, q_t_r, p_r, a_sampled, offsets, theta, z

    return jax.jit(forward)


# ----------------------------------------------------------------------------
# Deterministic parameter init + driver
# ----------------------------------------------------------------------------

def init_params(key, cfg):
    KN = cfg["kernels_num"]
    k1, k2 = cfg["kernels_sizes"]
    R0, _ = cfg["groupconvs"]
    Cin = cfg["in_channels"]
    latent = cfg["latent_dim"]
    ks = jax.random.split(key, 10)

    def u(k, shape, bound):
        return jax.random.uniform(k, shape, jnp.float32, -bound, bound)

    s1 = 1.0 / math.sqrt(Cin * k1 * k1)
    s2 = 1.0 / math.sqrt(KN * k2 * k2)
    s3 = 1.0 / math.sqrt(KN)
    return {
        "w1": u(ks[0], (KN, Cin, 1, k1, k1), s1), "b1": u(ks[1], (KN,), s1),
        "w2": u(ks[2], (KN, KN, R0, k2, k2), s2), "b2": u(ks[3], (KN,), s2),
        "wa": u(ks[4], (1, KN, 1, 1, 1), s3), "ba": u(ks[5], (1,), s3),
        "wr": u(ks[6], (2, KN, 1, 1, 1), s3), "br": u(ks[7], (2,), s3),
        "wz": u(ks[8], (2 * latent, KN, 1, 1, 1), s3), "bz": u(ks[9], (2 * latent,), s3),
    }


if __name__ == "__main__":
    cfg = dict(
        n=16, in_channels=1, latent_dim=2, kernels_num=8,
        kernels_sizes=[5, 5], padding=2, groupconvs=[4, 4],
        rot_refinement=True, theta_prior=float(np.pi), normal_prior_over_r=True,
    )

    key = jax.random.PRNGKey(0)
    pkey, xkey, gkey = jax.random.split(key, 3)
    params = init_params(pkey, cfg)
    prep = prepare_params(params, cfg)        # one-time weight prep (rotated filters, layouts)
    x = jax.random.normal(xkey, (2, cfg["in_channels"], cfg["n"], cfg["n"]), jnp.float32)

    forward = make_forward(cfg)
    outs = forward(prep, x, gkey)
    outs = jax.block_until_ready(outs)

    attn, q_t_r, p_r, a_sampled, offsets, theta, z = outs
    assert attn.shape == (2, 4, 16, 16)
    assert q_t_r.shape == (2, 4, 16, 16)
    assert p_r.shape == (4, 1, 1)
    assert a_sampled.shape == (2, 4, 16, 16)
    assert offsets.shape == (4,)
    assert theta.shape == (2, 2, 4, 16, 16)
    assert z.shape == (2, 4, 4, 16, 16)
    assert bool(jnp.all(jnp.isfinite(q_t_r))) and bool(jnp.all(jnp.isfinite(theta)))
    print("KERNEL_OK")
</pallas_src>

<mosaic_0001>
module attributes {stable_mosaic.version = 11 : i64} {
  func.func @_conv1_matmul_kernel(%arg0: i32, %arg1: memref<256x25xbf16, #tpu.memory_space<vmem>>, %arg2: memref<25x32xbf16, #tpu.memory_space<vmem>>, %arg3: memref<1x32xf32, #tpu.memory_space<vmem>>, %arg4: memref<256x32xf32, #tpu.memory_space<vmem>>) attributes {dimension_semantics = [#tpu.dimension_semantics<parallel>], iteration_bounds = array<i64: 2>, scalar_prefetch = 0 : i64, scratch_operands = 0 : i64, tpu.core_type = #tpu.core_type<tc>, window_params = [{transform_indices = @transform_0, window_bounds = array<i64: 256, 25>}, {pipeline_mode = #tpu.pipeline_mode<synchronous>, transform_indices = @transform_1, window_bounds = array<i64: 25, 32>}, {pipeline_mode = #tpu.pipeline_mode<synchronous>, transform_indices = @transform_2, window_bounds = array<i64: 1, 32>}, {transform_indices = @transform_3, window_bounds = array<i64: 256, 32>}]} {
    %c0 = arith.constant 0 : index
    %c0_0 = arith.constant 0 : index
    %0 = vector.load %arg1[%c0, %c0_0] : memref<256x25xbf16, #tpu.memory_space<vmem>>, vector<256x25xbf16>
    %c0_1 = arith.constant 0 : index
    %c0_2 = arith.constant 0 : index
    %1 = vector.load %arg2[%c0_1, %c0_2] : memref<25x32xbf16, #tpu.memory_space<vmem>>, vector<25x32xbf16>
    %cst = arith.constant dense<0.000000e+00> : vector<256x32xf32>
    %2 = tpu.matmul %0, %1, %cst {dimension_numbers = #tpu.dot_dimension_numbers<[1], [0], [0], [1], [0, 0, 1, 1], [], []>} : vector<256x25xbf16>, vector<25x32xbf16>, vector<256x32xf32> -> vector<256x32xf32>
    %c0_3 = arith.constant 0 : index
    %c0_4 = arith.constant 0 : index
    %3 = vector.load %arg3[%c0_3, %c0_4] : memref<1x32xf32, #tpu.memory_space<vmem>>, vector<1x32xf32>
    %4 = vector.broadcast %3 : vector<1x32xf32> to vector<256x32xf32>
    %5 = arith.addf %2, %4 : vector<256x32xf32>
    %cst_5 = arith.constant 0.000000e+00 : f32
    %6 = vector.broadcast %cst_5 : f32 to vector<256x32xf32>
    %7 = arith.cmpf oge, %5, %6 : vector<256x32xf32>
    %cst_6 = arith.constant 0.00999999977 : f32
    %8 = vector.broadcast %cst_6 : f32 to vector<256x32xf32>
    %9 = arith.mulf %8, %5 : vector<256x32xf32>
    %10 = arith.select %7, %5, %9 : vector<256x32xi1>, vector<256x32xf32>
    %c0_7 = arith.constant 0 : index
    %c0_8 = arith.constant 0 : index
    %11 = vector.load %arg4[%c0_7, %c0_8] : memref<256x32xf32, #tpu.memory_space<vmem>>, vector<256x32xf32>
    tpu.vector_store %arg4[%c0_7, %c0_8], %10 {strides = array<i32>} : memref<256x32xf32, #tpu.memory_space<vmem>>, vector<256x32xf32>,
    return
  }
  func.func @transform_0(%arg0: i32) -> (i32, i32) {
    %c0_i32 = arith.constant 0 : i32
    %c0_i32_0 = arith.constant 0 : i32
    return %arg0, %c0_i32 : i32, i32
  }
  func.func @transform_1(%arg0: i32) -> (i32, i32) {
    %c0_i32 = arith.constant 0 : i32
    %c0_i32_0 = arith.constant 0 : i32
    %c0_i32_1 = arith.constant 0 : i32
    return %c0_i32, %c0_i32_0 : i32, i32
  }
  func.func @transform_2(%arg0: i32) -> (i32, i32) {
    %c0_i32 = arith.constant 0 : i32
    %c0_i32_0 = arith.constant 0 : i32
    %c0_i32_1 = arith.constant 0 : i32
    return %c0_i32, %c0_i32_0 : i32, i32
  }
  func.func @transform_3(%arg0: i32) -> (i32, i32) {
    %c0_i32 = arith.constant 0 : i32
    %c0_i32_0 = arith.constant 0 : i32
    return %arg0, %c0_i32 : i32, i32
  }
}

module attributes {stable_mosaic.version = 11 : i64} {
  func.func @_conv2_heads_kernel(%arg0: i32, %arg1: memref<1x408x32xf32, #tpu.memory_space<vmem>>, %arg2: memref<25x32x32xbf16, #tpu.memory_space<vmem>>, %arg3: memref<1x32xf32, #tpu.memory_space<vmem>>, %arg4: memref<32x28xbf16, #tpu.memory_space<vmem>>, %arg5: memref<1x28xf32, #tpu.memory_space<vmem>>, %arg6: memref<1x320x28xf32, #tpu.memory_space<vmem>>) attributes {dimension_semantics = [#tpu.dimension_semantics<parallel>], iteration_bounds = array<i64: 2>, scalar_prefetch = 0 : i64, scratch_operands = 0 : i64, tpu.core_type = #tpu.core_type<tc>, window_params = [{transform_indices = @transform_0, window_bounds = array<i64: 1, 408, 32>}, {pipeline_mode = #tpu.pipeline_mode<synchronous>, transform_indices = @transform_1, window_bounds = array<i64: 25, 32, 32>}, {pipeline_mode = #tpu.pipeline_mode<synchronous>, transform_indices = @transform_2, window_bounds = array<i64: 1, 32>}, {pipeline_mode = #tpu.pipeline_mode<synchronous>, transform_indices = @transform_3, window_bounds = array<i64: 32, 28>}, {pipeline_mode = #tpu.pipeline_mode<synchronous>, transform_indices = @transform_4, window_bounds = array<i64: 1, 28>}, {transform_indices = @transform_5, window_bounds = array<i64: 1, 320, 28>}]} {
    %cst = arith.constant 0.000000e+00 : f32
    %0 = vector.broadcast %cst : f32 to vector<320x32xf32>
    %c0 = arith.constant 0 : index
    %c0_0 = arith.constant 0 : index
    %c0_1 = arith.constant 0 : index
    %1 = vector.load %arg1[%c0, %c0_0, %c0_1] : memref<1x408x32xf32, #tpu.memory_space<vmem>>, vector<1x320x32xf32>
    %2 = vector.shape_cast %1 : vector<1x320x32xf32> to vector<320x32xf32>
    %3 = arith.truncf %2 : vector<320x32xf32> to vector<320x32xbf16>
    %c0_2 = arith.constant 0 : index
    %c0_3 = arith.constant 0 : index
    %c0_4 = arith.constant 0 : index
    %4 = vector.load %arg2[%c0_2, %c0_3, %c0_4] : memref<25x32x32xbf16, #tpu.memory_space<vmem>>, vector<1x32x32xbf16>
    %5 = vector.shape_cast %4 : vector<1x32x32xbf16> to vector<32x32xbf16>
    %cst_5 = arith.constant dense<0.000000e+00> : vector<320x32xf32>
    %6 = tpu.matmul %3, %5, %cst_5 {dimension_numbers = #tpu.dot_dimension_numbers<[1], [0], [0], [1], [0, 0, 1, 1], [], []>} : vector<320x32xbf16>, vector<32x32xbf16>, vector<320x32xf32> -> vector<320x32xf32>
    %7 = arith.addf %0, %6 : vector<320x32xf32>
    %c0_6 = arith.constant 0 : index
    %c1 = arith.constant 1 : index
    %c0_7 = arith.constant 0 : index
    %8 = vector.load %arg1[%c0_6, %c1, %c0_7] : memref<1x408x32xf32, #tpu.memory_space<vmem>>, vector<1x320x32xf32>
    %9 = vector.shape_cast %8 : vector<1x320x32xf32> to vector<320x32xf32>
    %10 = arith.truncf %9 : vector<320x32xf32> to vector<320x32xbf16>
    %c1_8 = arith.constant 1 : index
    %c0_9 = arith.constant 0 : index
    %c0_10 = arith.constant 0 : index
    %11 = vector.load %arg2[%c1_8, %c0_9, %c0_10] : memref<25x32x32xbf16, #tpu.memory_space<vmem>>, vector<1x32x32xbf16>
    %12 = vector.shape_cast %11 : vector<1x32x32xbf16> to vector<32x32xbf16>
    %cst_11 = arith.constant dense<0.000000e+00> : vector<320x32xf32>
    %13 = tpu.matmul %10, %12, %cst_11 {dimension_numbers = #tpu.dot_dimension_numbers<[1], [0], [0], [1], [0, 0, 1, 1], [], []>} : vector<320x32xbf16>, vector<32x32xbf16>, vector<320x32xf32> -> vector<320x32xf32>
    %14 = arith.addf %7, %13 : vector<320x32xf32>
    %c0_12 = arith.constant 0 : index
    %c2 = arith.constant 2 : index
    %c0_13 = arith.constant 0 : index
    %15 = vector.load %arg1[%c0_12, %c2, %c0_13] : memref<1x408x32xf32, #tpu.memory_space<vmem>>, vector<1x320x32xf32>
    %16 = vector.shape_cast %15 : vector<1x320x32xf32> to vector<320x32xf32>
    %17 = arith.truncf %16 : vector<320x32xf32> to vector<320x32xbf16>
    %c2_14 = arith.constant 2 : index
    %c0_15 = arith.constant 0 : index
    %c0_16 = arith.constant 0 : index
    %18 = vector.load %arg2[%c2_14, %c0_15, %c0_16] : memref<25x32x32xbf16, #tpu.memory_space<vmem>>, vector<1x32x32xbf16>
    %19 = vector.shape_cast %18 : vector<1x32x32xbf16> to vector<32x32xbf16>
    %cst_17 = arith.constant dense<0.000000e+00> : vector<320x32xf32>
    %20 = tpu.matmul %17, %19, %cst_17 {dimension_numbers = #tpu.dot_dimension_numbers<[1], [0], [0], [1], [0, 0, 1, 1], [], []>} : vector<320x32xbf16>, vector<32x32xbf16>, vector<320x32xf32> -> vector<320x32xf32>
    %21 = arith.addf %14, %20 : vector<320x32xf32>
    %c0_18 = arith.constant 0 : index
    %c3 = arith.constant 3 : index
    %c0_19 = arith.constant 0 : index
    %22 = vector.load %arg1[%c0_18, %c3, %c0_19] : memref<1x408x32xf32, #tpu.memory_space<vmem>>, vector<1x320x32xf32>
    %23 = vector.shape_cast %22 : vector<1x320x32xf32> to vector<320x32xf32>
    %24 = arith.truncf %23 : vector<320x32xf32> to vector<320x32xbf16>
    %c3_20 = arith.constant 3 : index
    %c0_21 = arith.constant 0 : index
    %c0_22 = arith.constant 0 : index
    %25 = vector.load %arg2[%c3_20, %c0_21, %c0_22] : memref<25x32x32xbf16, #tpu.memory_space<vmem>>, vector<1x32x32xbf16>
    %26 = vector.shape_cast %25 : vector<1x32x32xbf16> to vector<32x32xbf16>
    %cst_23 = arith.constant dense<0.000000e+00> : vector<320x32xf32>
    %27 = tpu.matmul %24, %26, %cst_23 {dimension_numbers = #tpu.dot_dimension_numbers<[1], [0], [0], [1], [0, 0, 1, 1], [], []>} : vector<320x32xbf16>, vector<32x32xbf16>, vector<320x32xf32> -> vector<320x32xf32>
    %28 = arith.addf %21, %27 : vector<320x32xf32>
    %c0_24 = arith.constant 0 : index
    %c4 = arith.constant 4 : index
    %c0_25 = arith.constant 0 : index
    %29 = vector.load %arg1[%c0_24, %c4, %c0_25] : memref<1x408x32xf32, #tpu.memory_space<vmem>>, vector<1x320x32xf32>
    %30 = vector.shape_cast %29 : vector<1x320x32xf32> to vector<320x32xf32>
    %31 = arith.truncf %30 : vector<320x32xf32> to vector<320x32xbf16>
    %c4_26 = arith.constant 4 : index
    %c0_27 = arith.constant 0 : index
    %c0_28 = arith.constant 0 : index
    %32 = vector.load %arg2[%c4_26, %c0_27, %c0_28] : memref<25x32x32xbf16, #tpu.memory_space<vmem>>, vector<1x32x32xbf16>
    %33 = vector.shape_cast %32 : vector<1x32x32xbf16> to vector<32x32xbf16>
    %cst_29 = arith.constant dense<0.000000e+00> : vector<320x32xf32>
    %34 = tpu.matmul %31, %33, %cst_29 {dimension_numbers = #tpu.dot_dimension_numbers<[1], [0], [0], [1], [0, 0, 1, 1], [], []>} : vector<320x32xbf16>, vector<32x32xbf16>, vector<320x32xf32> -> vector<320x32xf32>
    %35 = arith.addf %28, %34 : vector<320x32xf32>
    %c0_30 = arith.constant 0 : index
    %c20 = arith.constant 20 : index
    %c0_31 = arith.constant 0 : index
    %36 = vector.load %arg1[%c0_30, %c20, %c0_31] : memref<1x408x32xf32, #tpu.memory_space<vmem>>, vector<1x320x32xf32>
    %37 = vector.shape_cast %36 : vector<1x320x32xf32> to vector<320x32xf32>
    %38 = arith.truncf %37 : vector<320x32xf32> to vector<320x32xbf16>
    %c5 = arith.constant 5 : index
    %c0_32 = arith.constant 0 : index
    %c0_33 = arith.constant 0 : index
    %39 = vector.load %arg2[%c5, %c0_32, %c0_33] : memref<25x32x32xbf16, #tpu.memory_space<vmem>>, vector<1x32x32xbf16>
    %40 = vector.shape_cast %39 : vector<1x32x32xbf16> to vector<32x32xbf16>
    %cst_34 = arith.constant dense<0.000000e+00> : vector<320x32xf32>
    %41 = tpu.matmul %38, %40, %cst_34 {dimension_numbers = #tpu.dot_dimension_numbers<[1], [0], [0], [1], [0, 0, 1, 1], [], []>} : vector<320x32xbf16>, vector<32x32xbf16>, vector<320x32xf32> -> vector<320x32xf32>
    %42 = arith.addf %35, %41 : vector<320x32xf32>
    %c0_35 = arith.constant 0 : index
    %c21 = arith.constant 21 : index
    %c0_36 = arith.constant 0 : index
    %43 = vector.load %arg1[%c0_35, %c21, %c0_36] : memref<1x408x32xf32, #tpu.memory_space<vmem>>, vector<1x320x32xf32>
    %44 = vector.shape_cast %43 : vector<1x320x32xf32> to vector<320x32xf32>
    %45 = arith.truncf %44 : vector<320x32xf32> to vector<320x32xbf16>
    %c6 = arith.constant 6 : index
    %c0_37 = arith.constant 0 : index
    %c0_38 = arith.constant 0 : index
    %46 = vector.load %arg2[%c6, %c0_37, %c0_38] : memref<25x32x32xbf16, #tpu.memory_space<vmem>>, vector<1x32x32xbf16>
    %47 = vector.shape_cast %46 : vector<1x32x32xbf16> to vector<32x32xbf16>
    %cst_39 = arith.constant dense<0.000000e+00> : vector<320x32xf32>
    %48 = tpu.matmul %45, %47, %cst_39 {dimension_numbers = #tpu.dot_dimension_numbers<[1], [0], [0], [1], [0, 0, 1, 1], [], []>} : vector<320x32xbf16>, vector<32x32xbf16>, vector<320x32xf32> -> vector<320x32xf32>
    %49 = arith.addf %42, %48 : vector<320x32xf32>
    %c0_40 = arith.constant 0 : index
    %c22 = arith.constant 22 : index
    %c0_41 = arith.constant 0 : index
    %50 = vector.load %arg1[%c0_40, %c22, %c0_41] : memref<1x408x32xf32, #tpu.memory_space<vmem>>, vector<1x320x32xf32>
    %51 = vector.shape_cast %50 : vector<1x320x32xf32> to vector<320x32xf32>
    %52 = arith.truncf %51 : vector<320x32xf32> to vector<320x32xbf16>
    %c7 = arith.constant 7 : index
    %c0_42 = arith.constant 0 : index
    %c0_43 = arith.constant 0 : index
    %53 = vector.load %arg2[%c7, %c0_42, %c0_43] : memref<25x32x32xbf16, #tpu.memory_space<vmem>>, vector<1x32x32xbf16>
    %54 = vector.shape_cast %53 : vector<1x32x32xbf16> to vector<32x32xbf16>
    %cst_44 = arith.constant dense<0.000000e+00> : vector<320x32xf32>
    %55 = tpu.matmul %52, %54, %cst_44 {dimension_numbers = #tpu.dot_dimension_numbers<[1], [0], [0], [1], [0, 0, 1, 1], [], []>} : vector<320x32xbf16>, vector<32x32xbf16>, vector<320x32xf32> -> vector<320x32xf32>
    %56 = arith.addf %49, %55 : vector<320x32xf32>
    %c0_45 = arith.constant 0 : index
    %c23 = arith.constant 23 : index
    %c0_46 = arith.constant 0 : index
    %57 = vector.load %arg1[%c0_45, %c23, %c0_46] : memref<1x408x32xf32, #tpu.memory_space<vmem>>, vector<1x320x32xf32>
    %58 = vector.shape_cast %57 : vector<1x320x32xf32> to vector<320x32xf32>
    %59 = arith.truncf %58 : vector<320x32xf32> to vector<320x32xbf16>
    %c8 = arith.constant 8 : index
    %c0_47 = arith.constant 0 : index
    %c0_48 = arith.constant 0 : index
    %60 = vector.load %arg2[%c8, %c0_47, %c0_48] : memref<25x32x32xbf16, #tpu.memory_space<vmem>>, vector<1x32x32xbf16>
    %61 = vector.shape_cast %60 : vector<1x32x32xbf16> to vector<32x32xbf16>
    %cst_49 = arith.constant dense<0.000000e+00> : vector<320x32xf32>
    %62 = tpu.matmul %59, %61, %cst_49 {dimension_numbers = #tpu.dot_dimension_numbers<[1], [0], [0], [1], [0, 0, 1, 1], [], []>} : vector<320x32xbf16>, vector<32x32xbf16>, vector<320x32xf32> -> vector<320x32xf32>
    %63 = arith.addf %56, %62 : vector<320x32xf32>
    %c0_50 = arith.constant 0 : index
    %c24 = arith.constant 24 : index
    %c0_51 = arith.constant 0 : index
    %64 = vector.load %arg1[%c0_50, %c24, %c0_51] : memref<1x408x32xf32, #tpu.memory_space<vmem>>, vector<1x320x32xf32>
    %65 = vector.shape_cast %64 : vector<1x320x32xf32> to vector<320x32xf32>
    %66 = arith.truncf %65 : vector<320x32xf32> to vector<320x32xbf16>
    %c9 = arith.constant 9 : index
    %c0_52 = arith.constant 0 : index
    %c0_53 = arith.constant 0 : index
    %67 = vector.load %arg2[%c9, %c0_52, %c0_53] : memref<25x32x32xbf16, #tpu.memory_space<vmem>>, vector<1x32x32xbf16>
    %68 = vector.shape_cast %67 : vector<1x32x32xbf16> to vector<32x32xbf16>
    %cst_54 = arith.constant dense<0.000000e+00> : vector<320x32xf32>
    %69 = tpu.matmul %66, %68, %cst_54 {dimension_numbers = #tpu.dot_dimension_numbers<[1], [0], [0], [1], [0, 0, 1, 1], [], []>} : vector<320x32xbf16>, vector<32x32xbf16>, vector<320x32xf32> -> vector<320x32xf32>
    %70 = arith.addf %63, %69 : vector<320x32xf32>
    %c0_55 = arith.constant 0 : index
    %c40 = arith.constant 40 : index
    %c0_56 = arith.constant 0 : index
    %71 = vector.load %arg1[%c0_55, %c40, %c0_56] : memref<1x408x32xf32, #tpu.memory_space<vmem>>, vector<1x320x32xf32>
    %72 = vector.shape_cast %71 : vector<1x320x32xf32> to vector<320x32xf32>
    %73 = arith.truncf %72 : vector<320x32xf32> to vector<320x32xbf16>
    %c10 = arith.constant 10 : index
    %c0_57 = arith.constant 0 : index
    %c0_58 = arith.constant 0 : index
    %74 = vector.load %arg2[%c10, %c0_57, %c0_58] : memref<25x32x32xbf16, #tpu.memory_space<vmem>>, vector<1x32x32xbf16>
    %75 = vector.shape_cast %74 : vector<1x32x32xbf16> to vector<32x32xbf16>
    %cst_59 = arith.constant dense<0.000000e+00> : vector<320x32xf32>
    %76 = tpu.matmul %73, %75, %cst_59 {dimension_numbers = #tpu.dot_dimension_numbers<[1], [0], [0], [1], [0, 0, 1, 1], [], []>} : vector<320x32xbf16>, vector<32x32xbf16>, vector<320x32xf32> -> vector<320x32xf32>
    %77 = arith.addf %70, %76 : vector<320x32xf32>
    %c0_60 = arith.constant 0 : index
    %c41 = arith.constant 41 : index
    %c0_61 = arith.constant 0 : index
    %78 = vector.load %arg1[%c0_60, %c41, %c0_61] : memref<1x408x32xf32, #tpu.memory_space<vmem>>, vector<1x320x32xf32>
    %79 = vector.shape_cast %78 : vector<1x320x32xf32> to vector<320x32xf32>
    %80 = arith.truncf %79 : vector<320x32xf32> to vector<320x32xbf16>
    %c11 = arith.constant 11 : index
    %c0_62 = arith.constant 0 : index
    %c0_63 = arith.constant 0 : index
    %81 = vector.load %arg2[%c11, %c0_62, %c0_63] : memref<25x32x32xbf16, #tpu.memory_space<vmem>>, vector<1x32x32xbf16>
    %82 = vector.shape_cast %81 : vector<1x32x32xbf16> to vector<32x32xbf16>
    %cst_64 = arith.constant dense<0.000000e+00> : vector<320x32xf32>
    %83 = tpu.matmul %80, %82, %cst_64 {dimension_numbers = #tpu.dot_dimension_numbers<[1], [0], [0], [1], [0, 0, 1, 1], [], []>} : vector<320x32xbf16>, vector<32x32xbf16>, vector<320x32xf32> -> vector<320x32xf32>
    %84 = arith.addf %77, %83 : vector<320x32xf32>
    %c0_65 = arith.constant 0 : index
    %c42 = arith.constant 42 : index
    %c0_66 = arith.constant 0 : index
    %85 = vector.load %arg1[%c0_65, %c42, %c0_66] : memref<1x408x32xf32, #tpu.memory_space<vmem>>, vector<1x320x32xf32>
    %86 = vector.shape_cast %85 : vector<1x320x32xf32> to vector<320x32xf32>
    %87 = arith.truncf %86 : vector<320x32xf32> to vector<320x32xbf16>
    %c12 = arith.constant 12 : index
    %c0_67 = arith.constant 0 : index
    %c0_68 = arith.constant 0 : index
    %88 = vector.load %arg2[%c12, %c0_67, %c0_68] : memref<25x32x32xbf16, #tpu.memory_space<vmem>>, vector<1x32x32xbf16>
    %89 = vector.shape_cast %88 : vector<1x32x32xbf16> to vector<32x32xbf16>
    %cst_69 = arith.constant dense<0.000000e+00> : vector<320x32xf32>
    %90 = tpu.matmul %87, %89, %cst_69 {dimension_numbers = #tpu.dot_dimension_numbers<[1], [0], [0], [1], [0, 0, 1, 1], [], []>} : vector<320x32xbf16>, vector<32x32xbf16>, vector<320x32xf32> -> vector<320x32xf32>
    %91 = arith.addf %84, %90 : vector<320x32xf32>
    %c0_70 = arith.constant 0 : index
    %c43 = arith.constant 43 : index
    %c0_71 = arith.constant 0 : index
    %92 = vector.load %arg1[%c0_70, %c43, %c0_71] : memref<1x408x32xf32, #tpu.memory_space<vmem>>, vector<1x320x32xf32>
    %93 = vector.shape_cast %92 : vector<1x320x32xf32> to vector<320x32xf32>
    %94 = arith.truncf %93 : vector<320x32xf32> to vector<320x32xbf16>
    %c13 = arith.constant 13 : index
    %c0_72 = arith.constant 0 : index
    %c0_73 = arith.constant 0 : index
    %95 = vector.load %arg2[%c13, %c0_72, %c0_73] : memref<25x32x32xbf16, #tpu.memory_space<vmem>>, vector<1x32x32xbf16>
    %96 = vector.shape_cast %95 : vector<1x32x32xbf16> to vector<32x32xbf16>
    %cst_74 = arith.constant dense<0.000000e+00> : vector<320x32xf32>
    %97 = tpu.matmul %94, %96, %cst_74 {dimension_numbers = #tpu.dot_dimension_numbers<[1], [0], [0], [1], [0, 0, 1, 1], [], []>} : vector<320x32xbf16>, vector<32x32xbf16>, vector<320x32xf32> -> vector<320x32xf32>
    %98 = arith.addf %91, %97 : vector<320x32xf32>
    %c0_75 = arith.constant 0 : index
    %c44 = arith.constant 44 : index
    %c0_76 = arith.constant 0 : index
    %99 = vector.load %arg1[%c0_75, %c44, %c0_76] : memref<1x408x32xf32, #tpu.memory_space<vmem>>, vector<1x320x32xf32>
    %100 = vector.shape_cast %99 : vector<1x320x32xf32> to vector<320x32xf32>
    %101 = arith.truncf %100 : vector<320x32xf32> to vector<320x32xbf16>
    %c14 = arith.constant 14 : index
    %c0_77 = arith.constant 0 : index
    %c0_78 = arith.constant 0 : index
    %102 = vector.load %arg2[%c14, %c0_77, %c0_78] : memref<25x32x32xbf16, #tpu.memory_space<vmem>>, vector<1x32x32xbf16>
    %103 = vector.shape_cast %102 : vector<1x32x32xbf16> to vector<32x32xbf16>
    %cst_79 = arith.constant dense<0.000000e+00> : vector<320x32xf32>
    %104 = tpu.matmul %101, %103, %cst_79 {dimension_numbers = #tpu.dot_dimension_numbers<[1], [0], [0], [1], [0, 0, 1, 1], [], []>} : vector<320x32xbf16>, vector<32x32xbf16>, vector<320x32xf32> -> vector<320x32xf32>
    %105 = arith.addf %98, %104 : vector<320x32xf32>
    %c0_80 = arith.constant 0 : index
    %c60 = arith.constant 60 : index
    %c0_81 = arith.constant 0 : index
    %106 = vector.load %arg1[%c0_80, %c60, %c0_81] : memref<1x408x32xf32, #tpu.memory_space<vmem>>, vector<1x320x32xf32>
    %107 = vector.shape_cast %106 : vector<1x320x32xf32> to vector<320x32xf32>
    %108 = arith.truncf %107 : vector<320x32xf32> to vector<320x32xbf16>
    %c15 = arith.constant 15 : index
    %c0_82 = arith.constant 0 : index
    %c0_83 = arith.constant 0 : index
    %109 = vector.load %arg2[%c15, %c0_82, %c0_83] : memref<25x32x32xbf16, #tpu.memory_space<vmem>>, vector<1x32x32xbf16>
    %110 = vector.shape_cast %109 : vector<1x32x32xbf16> to vector<32x32xbf16>
    %cst_84 = arith.constant dense<0.000000e+00> : vector<320x32xf32>
    %111 = tpu.matmul %108, %110, %cst_84 {dimension_numbers = #tpu.dot_dimension_numbers<[1], [0], [0], [1], [0, 0, 1, 1], [], []>} : vector<320x32xbf16>, vector<32x32xbf16>, vector<320x32xf32> -> vector<320x32xf32>
    %112 = arith.addf %105, %111 : vector<320x32xf32>
    %c0_85 = arith.constant 0 : index
    %c61 = arith.constant 61 : index
    %c0_86 = arith.constant 0 : index
    %113 = vector.load %arg1[%c0_85, %c61, %c0_86] : memref<1x408x32xf32, #tpu.memory_space<vmem>>, vector<1x320x32xf32>
    %114 = vector.shape_cast %113 : vector<1x320x32xf32> to vector<320x32xf32>
    %115 = arith.truncf %114 : vector<320x32xf32> to vector<320x32xbf16>
    %c16 = arith.constant 16 : index
    %c0_87 = arith.constant 0 : index
    %c0_88 = arith.constant 0 : index
    %116 = vector.load %arg2[%c16, %c0_87, %c0_88] : memref<25x32x32xbf16, #tpu.memory_space<vmem>>, vector<1x32x32xbf16>
    %117 = vector.shape_cast %116 : vector<1x32x32xbf16> to vector<32x32xbf16>
    %cst_89 = arith.constant dense<0.000000e+00> : vector<320x32xf32>
    %118 = tpu.matmul %115, %117, %cst_89 {dimension_numbers = #tpu.dot_dimension_numbers<[1], [0], [0], [1], [0, 0, 1, 1], [], []>} : vector<320x32xbf16>, vector<32x32xbf16>, vector<320x32xf32> -> vector<320x32xf32>
    %119 = arith.addf %112, %118 : vector<320x32xf32>
    %c0_90 = arith.constant 0 : index
    %c62 = arith.constant 62 : index
    %c0_91 = arith.constant 0 : index
    %120 = vector.load %arg1[%c0_90, %c62, %c0_91] : memref<1x408x32xf32, #tpu.memory_space<vmem>>, vector<1x320x32xf32>
    %121 = vector.shape_cast %120 : vector<1x320x32xf32> to vector<320x32xf32>
    %122 = arith.truncf %121 : vector<320x32xf32> to vector<320x32xbf16>
    %c17 = arith.constant 17 : index
    %c0_92 = arith.constant 0 : index
    %c0_93 = arith.constant 0 : index
    %123 = vector.load %arg2[%c17, %c0_92, %c0_93] : memref<25x32x32xbf16, #tpu.memory_space<vmem>>, vector<1x32x32xbf16>
    %124 = vector.shape_cast %123 : vector<1x32x32xbf16> to vector<32x32xbf16>
    %cst_94 = arith.constant dense<0.000000e+00> : vector<320x32xf32>
    %125 = tpu.matmul %122, %124, %cst_94 {dimension_numbers = #tpu.dot_dimension_numbers<[1], [0], [0], [1], [0, 0, 1, 1], [], []>} : vector<320x32xbf16>, vector<32x32xbf16>, vector<320x32xf32> -> vector<320x32xf32>
    %126 = arith.addf %119, %125 : vector<320x32xf32>
    %c0_95 = arith.constant 0 : index
    %c63 = arith.constant 63 : index
    %c0_96 = arith.constant 0 : index
    %127 = vector.load %arg1[%c0_95, %c63, %c0_96] : memref<1x408x32xf32, #tpu.memory_space<vmem>>, vector<1x320x32xf32>
    %128 = vector.shape_cast %127 : vector<1x320x32xf32> to vector<320x32xf32>
    %129 = arith.truncf %128 : vector<320x32xf32> to vector<320x32xbf16>
    %c18 = arith.constant 18 : index
    %c0_97 = arith.constant 0 : index
    %c0_98 = arith.constant 0 : index
    %130 = vector.load %arg2[%c18, %c0_97, %c0_98] : memref<25x32x32xbf16, #tpu.memory_space<vmem>>, vector<1x32x32xbf16>
    %131 = vector.shape_cast %130 : vector<1x32x32xbf16> to vector<32x32xbf16>
    %cst_99 = arith.constant dense<0.000000e+00> : vector<320x32xf32>
    %132 = tpu.matmul %129, %131, %cst_99 {dimension_numbers = #tpu.dot_dimension_numbers<[1], [0], [0], [1], [0, 0, 1, 1], [], []>} : vector<320x32xbf16>, vector<32x32xbf16>, vector<320x32xf32> -> vector<320x32xf32>
    %133 = arith.addf %126, %132 : vector<320x32xf32>
    %c0_100 = arith.constant 0 : index
    %c64 = arith.constant 64 : index
    %c0_101 = arith.constant 0 : index
    %134 = vector.load %arg1[%c0_100, %c64, %c0_101] : memref<1x408x32xf32, #tpu.memory_space<vmem>>, vector<1x320x32xf32>
    %135 = vector.shape_cast %134 : vector<1x320x32xf32> to vector<320x32xf32>
    %136 = arith.truncf %135 : vector<320x32xf32> to vector<320x32xbf16>
    %c19 = arith.constant 19 : index
    %c0_102 = arith.constant 0 : index
    %c0_103 = arith.constant 0 : index
    %137 = vector.load %arg2[%c19, %c0_102, %c0_103] : memref<25x32x32xbf16, #tpu.memory_space<vmem>>, vector<1x32x32xbf16>
    %138 = vector.shape_cast %137 : vector<1x32x32xbf16> to vector<32x32xbf16>
    %cst_104 = arith.constant dense<0.000000e+00> : vector<320x32xf32>
    %139 = tpu.matmul %136, %138, %cst_104 {dimension_numbers = #tpu.dot_dimension_numbers<[1], [0], [0], [1], [0, 0, 1, 1], [], []>} : vector<320x32xbf16>, vector<32x32xbf16>, vector<320x32xf32> -> vector<320x32xf32>
    %140 = arith.addf %133, %139 : vector<320x32xf32>
    %c0_105 = arith.constant 0 : index
    %c80 = arith.constant 80 : index
    %c0_106 = arith.constant 0 : index
    %141 = vector.load %arg1[%c0_105, %c80, %c0_106] : memref<1x408x32xf32, #tpu.memory_space<vmem>>, vector<1x320x32xf32>
    %142 = vector.shape_cast %141 : vector<1x320x32xf32> to vector<320x32xf32>
    %143 = arith.truncf %142 : vector<320x32xf32> to vector<320x32xbf16>
    %c20_107 = arith.constant 20 : index
    %c0_108 = arith.constant 0 : index
    %c0_109 = arith.constant 0 : index
    %144 = vector.load %arg2[%c20_107, %c0_108, %c0_109] : memref<25x32x32xbf16, #tpu.memory_space<vmem>>, vector<1x32x32xbf16>
    %145 = vector.shape_cast %144 : vector<1x32x32xbf16> to vector<32x32xbf16>
    %cst_110 = arith.constant dense<0.000000e+00> : vector<320x32xf32>
    %146 = tpu.matmul %143, %145, %cst_110 {dimension_numbers = #tpu.dot_dimension_numbers<[1], [0], [0], [1], [0, 0, 1, 1], [], []>} : vector<320x32xbf16>, vector<32x32xbf16>, vector<320x32xf32> -> vector<320x32xf32>
    %147 = arith.addf %140, %146 : vector<320x32xf32>
    %c0_111 = arith.constant 0 : index
    %c81 = arith.constant 81 : index
    %c0_112 = arith.constant 0 : index
    %148 = vector.load %arg1[%c0_111, %c81, %c0_112] : memref<1x408x32xf32, #tpu.memory_space<vmem>>, vector<1x320x32xf32>
    %149 = vector.shape_cast %148 : vector<1x320x32xf32> to vector<320x32xf32>
    %150 = arith.truncf %149 : vector<320x32xf32> to vector<320x32xbf16>
    %c21_113 = arith.constant 21 : index
    %c0_114 = arith.constant 0 : index
    %c0_115 = arith.constant 0 : index
    %151 = vector.load %arg2[%c21_113, %c0_114, %c0_115] : memref<25x32x32xbf16, #tpu.memory_space<vmem>>, vector<1x32x32xbf16>
    %152 = vector.shape_cast %151 : vector<1x32x32xbf16> to vector<32x32xbf16>
    %cst_116 = arith.constant dense<0.000000e+00> : vector<320x32xf32>
    %153 = tpu.matmul %150, %152, %cst_116 {dimension_numbers = #tpu.dot_dimension_numbers<[1], [0], [0], [1], [0, 0, 1, 1], [], []>} : vector<320x32xbf16>, vector<32x32xbf16>, vector<320x32xf32> -> vector<320x32xf32>
    %154 = arith.addf %147, %153 : vector<320x32xf32>
    %c0_117 = arith.constant 0 : index
    %c82 = arith.constant 82 : index
    %c0_118 = arith.constant 0 : index
    %155 = vector.load %arg1[%c0_117, %c82, %c0_118] : memref<1x408x32xf32, #tpu.memory_space<vmem>>, vector<1x320x32xf32>
    %156 = vector.shape_cast %155 : vector<1x320x32xf32> to vector<320x32xf32>
    %157 = arith.truncf %156 : vector<320x32xf32> to vector<320x32xbf16>
    %c22_119 = arith.constant 22 : index
    %c0_120 = arith.constant 0 : index
    %c0_121 = arith.constant 0 : index
    %158 = vector.load %arg2[%c22_119, %c0_120, %c0_121] : memref<25x32x32xbf16, #tpu.memory_space<vmem>>, vector<1x32x32xbf16>
    %159 = vector.shape_cast %158 : vector<1x32x32xbf16> to vector<32x32xbf16>
    %cst_122 = arith.constant dense<0.000000e+00> : vector<320x32xf32>
    %160 = tpu.matmul %157, %159, %cst_122 {dimension_numbers = #tpu.dot_dimension_numbers<[1], [0], [0], [1], [0, 0, 1, 1], [], []>} : vector<320x32xbf16>, vector<32x32xbf16>, vector<320x32xf32> -> vector<320x32xf32>
    %161 = arith.addf %154, %160 : vector<320x32xf32>
    %c0_123 = arith.constant 0 : index
    %c83 = arith.constant 83 : index
    %c0_124 = arith.constant 0 : index
    %162 = vector.load %arg1[%c0_123, %c83, %c0_124] : memref<1x408x32xf32, #tpu.memory_space<vmem>>, vector<1x320x32xf32>
    %163 = vector.shape_cast %162 : vector<1x320x32xf32> to vector<320x32xf32>
    %164 = arith.truncf %163 : vector<320x32xf32> to vector<320x32xbf16>
    %c23_125 = arith.constant 23 : index
    %c0_126 = arith.constant 0 : index
    %c0_127 = arith.constant 0 : index
    %165 = vector.load %arg2[%c23_125, %c0_126, %c0_127] : memref<25x32x32xbf16, #tpu.memory_space<vmem>>, vector<1x32x32xbf16>
    %166 = vector.shape_cast %165 : vector<1x32x32xbf16> to vector<32x32xbf16>
    %cst_128 = arith.constant dense<0.000000e+00> : vector<320x32xf32>
    %167 = tpu.matmul %164, %166, %cst_128 {dimension_numbers = #tpu.dot_dimension_numbers<[1], [0], [0], [1], [0, 0, 1, 1], [], []>} : vector<320x32xbf16>, vector<32x32xbf16>, vector<320x32xf32> -> vector<320x32xf32>
    %168 = arith.addf %161, %167 : vector<320x32xf32>
    %c0_129 = arith.constant 0 : index
    %c84 = arith.constant 84 : index
    %c0_130 = arith.constant 0 : index
    %169 = vector.load %arg1[%c0_129, %c84, %c0_130] : memref<1x408x32xf32, #tpu.memory_space<vmem>>, vector<1x320x32xf32>
    %170 = vector.shape_cast %169 : vector<1x320x32xf32> to vector<320x32xf32>
    %171 = arith.truncf %170 : vector<320x32xf32> to vector<320x32xbf16>
    %c24_131 = arith.constant 24 : index
    %c0_132 = arith.constant 0 : index
    %c0_133 = arith.constant 0 : index
    %172 = vector.load %arg2[%c24_131, %c0_132, %c0_133] : memref<25x32x32xbf16, #tpu.memory_space<vmem>>, vector<1x32x32xbf16>
    %173 = vector.shape_cast %172 : vector<1x32x32xbf16> to vector<32x32xbf16>
    %cst_134 = arith.constant dense<0.000000e+00> : vector<320x32xf32>
    %174 = tpu.matmul %171, %173, %cst_134 {dimension_numbers = #tpu.dot_dimension_numbers<[1], [0], [0], [1], [0, 0, 1, 1], [], []>} : vector<320x32xbf16>, vector<32x32xbf16>, vector<320x32xf32> -> vector<320x32xf32>
    %175 = arith.addf %168, %174 : vector<320x32xf32>
    %c0_135 = arith.constant 0 : index
    %c0_136 = arith.constant 0 : index
    %176 = vector.load %arg3[%c0_135, %c0_136] : memref<1x32xf32, #tpu.memory_space<vmem>>, vector<1x32xf32>
    %177 = vector.broadcast %176 : vector<1x32xf32> to vector<320x32xf32>
    %178 = arith.addf %175, %177 : vector<320x32xf32>
    %cst_137 = arith.constant 0.000000e+00 : f32
    %179 = vector.broadcast %cst_137 : f32 to vector<320x32xf32>
    %180 = arith.cmpf oge, %178, %179 : vector<320x32xf32>
    %cst_138 = arith.constant 0.00999999977 : f32
    %181 = vector.broadcast %cst_138 : f32 to vector<320x32xf32>
    %182 = arith.mulf %181, %178 : vector<320x32xf32>
    %183 = arith.select %180, %178, %182 : vector<320x32xi1>, vector<320x32xf32>
    %184 = arith.truncf %183 : vector<320x32xf32> to vector<320x32xbf16>
    %c0_139 = arith.constant 0 : index
    %c0_140 = arith.constant 0 : index
    %185 = vector.load %arg4[%c0_139, %c0_140] : memref<32x28xbf16, #tpu.memory_space<vmem>>, vector<32x28xbf16>
    %cst_141 = arith.constant dense<0.000000e+00> : vector<320x28xf32>
    %186 = tpu.matmul %184, %185, %cst_141 {dimension_numbers = #tpu.dot_dimension_numbers<[1], [0], [0], [1], [0, 0, 1, 1], [], []>} : vector<320x32xbf16>, vector<32x28xbf16>, vector<320x28xf32> -> vector<320x28xf32>
    %c0_142 = arith.constant 0 : index
    %c0_143 = arith.constant 0 : index
    %187 = vector.load %arg5[%c0_142, %c0_143] : memref<1x28xf32, #tpu.memory_space<vmem>>, vector<1x28xf32>
    %188 = vector.broadcast %187 : vector<1x28xf32> to vector<320x28xf32>
    %189 = arith.addf %186, %188 : vector<320x28xf32>
    %c0_144 = arith.constant 0 : index
    %c0_145 = arith.constant 0 : index
    %c0_146 = arith.constant 0 : index
    %190 = vector.load %arg6[%c0_144, %c0_145, %c0_146] : memref<1x320x28xf32, #tpu.memory_space<vmem>>, vector<1x320x28xf32>
    %191 = vector.shape_cast %190 : vector<1x320x28xf32> to vector<320x28xf32>
    %192 = vector.shape_cast %189 : vector<320x28xf32> to vector<1x320x28xf32>
    tpu.vector_store %arg6[%c0_144, %c0_145, %c0_146], %192 {strides = array<i32>} : memref<1x320x28xf32, #tpu.memory_space<vmem>>, vector<1x320x28xf32>,
    return
  }
  func.func @transform_0(%arg0: i32) -> (i32, i32, i32) {
    %c0_i32 = arith.constant 0 : i32
    %c0_i32_0 = arith.constant 0 : i32
    %c0_i32_1 = arith.constant 0 : i32
    return %arg0, %c0_i32, %c0_i32_0 : i32, i32, i32
  }
  func.func @transform_1(%arg0: i32) -> (i32, i32, i32) {
    %c0_i32 = arith.constant 0 : i32
    %c0_i32_0 = arith.constant 0 : i32
    %c0_i32_1 = arith.constant 0 : i32
    %c0_i32_2 = arith.constant 0 : i32
    return %c0_i32, %c0_i32_0, %c0_i32_1 : i32, i32, i32
  }
  func.func @transform_2(%arg0: i32) -> (i32, i32) {
    %c0_i32 = arith.constant 0 : i32
    %c0_i32_0 = arith.constant 0 : i32
    %c0_i32_1 = arith.constant 0 : i32
    return %c0_i32, %c0_i32_0 : i32, i32
  }
  func.func @transform_3(%arg0: i32) -> (i32, i32) {
    %c0_i32 = arith.constant 0 : i32
    %c0_i32_0 = arith.constant 0 : i32
    %c0_i32_1 = arith.constant 0 : i32
    return %c0_i32, %c0_i32_0 : i32, i32
  }
  func.func @transform_4(%arg0: i32) -> (i32, i32) {
    %c0_i32 = arith.constant 0 : i32
    %c0_i32_0 = arith.constant 0 : i32
    %c0_i32_1 = arith.constant 0 : i32
    return %c0_i32, %c0_i32_0 : i32, i32
  }
  func.func @transform_5(%arg0: i32) -> (i32, i32, i32) {
    %c0_i32 = arith.constant 0 : i32
    %c0_i32_0 = arith.constant 0 : i32
    %c0_i32_1 = arith.constant 0 : i32
    return %arg0, %c0_i32, %c0_i32_0 : i32, i32, i32
  }
}

module attributes {stable_mosaic.version = 11 : i64} {
  func.func @_softmax_pair_kernel(%arg0: memref<2x1024xf32, #tpu.memory_space<vmem>>, %arg1: memref<2x1024xf32, #tpu.memory_space<vmem>>, %arg2: memref<2x1024xf32, #tpu.memory_space<vmem>>, %arg3: memref<2x1024xf32, #tpu.memory_space<vmem>>) attributes {dimension_semantics = [], scalar_prefetch = 0 : i64, scratch_operands = 0 : i64, tpu.core_type = #tpu.core_type<tc>} {
    %c0 = arith.constant 0 : index
    %c0_0 = arith.constant 0 : index
    %0 = vector.load %arg0[%c0, %c0_0] : memref<2x1024xf32, #tpu.memory_space<vmem>>, vector<2x1024xf32>
    %cst = arith.constant dense<0xFF800000> : vector<2xf32>
    %1 = vector.multi_reduction <maximumf>, %0, %cst [1] : vector<2x1024xf32> to vector<2xf32>
    %2 = vector.shape_cast %1 : vector<2xf32> to vector<2x1xf32>
    %3 = vector.broadcast %2 : vector<2x1xf32> to vector<2x1024xf32>
    %4 = arith.subf %0, %3 : vector<2x1024xf32>
    %5 = math.exp %4 : vector<2x1024xf32>
    %cst_1 = arith.constant dense<0.000000e+00> : vector<2xf32>
    %6 = vector.multi_reduction <add>, %5, %cst_1 [1] : vector<2x1024xf32> to vector<2xf32>
    %7 = vector.shape_cast %6 : vector<2xf32> to vector<2x1xf32>
    %8 = math.log %7 : vector<2x1xf32>
    %9 = vector.broadcast %8 : vector<2x1xf32> to vector<2x1024xf32>
    %10 = arith.subf %4, %9 : vector<2x1024xf32>
    %c0_2 = arith.constant 0 : index
    %c0_3 = arith.constant 0 : index
    %11 = vector.load %arg2[%c0_2, %c0_3] : memref<2x1024xf32, #tpu.memory_space<vmem>>, vector<2x1024xf32>
    tpu.vector_store %arg2[%c0_2, %c0_3], %10 {strides = array<i32>} : memref<2x1024xf32, #tpu.memory_space<vmem>>, vector<2x1024xf32>,
    %c0_4 = arith.constant 0 : index
    %c0_5 = arith.constant 0 : index
    %12 = vector.load %arg1[%c0_4, %c0_5] : memref<2x1024xf32, #tpu.memory_space<vmem>>, vector<2x1024xf32>
    %13 = arith.addf %4, %12 : vector<2x1024xf32>
    %cst_6 = arith.constant dense<0xFF800000> : vector<2xf32>
    %14 = vector.multi_reduction <maximumf>, %13, %cst_6 [1] : vector<2x1024xf32> to vector<2xf32>
    %15 = vector.shape_cast %14 : vector<2xf32> to vector<2x1xf32>
    %16 = vector.broadcast %15 : vector<2x1xf32> to vector<2x1024xf32>
    %17 = arith.subf %13, %16 : vector<2x1024xf32>
    %18 = math.exp %17 : vector<2x1024xf32>
    %cst_7 = arith.constant dense<0.000000e+00> : vector<2xf32>
    %19 = vector.multi_reduction <add>, %18, %cst_7 [1] : vector<2x1024xf32> to vector<2xf32>
    %20 = vector.shape_cast %19 : vector<2xf32> to vector<2x1xf32>
    %21 = tpu.reciprocal %20 {approx = true} : vector<2x1xf32> -> vector<2x1xf32>
    %22 = vector.broadcast %21 : vector<2x1xf32> to vector<2x1024xf32>
    %23 = arith.mulf %18, %22 : vector<2x1024xf32>
    %c0_8 = arith.constant 0 : index
    %c0_9 = arith.constant 0 : index
    %24 = vector.load %arg3[%c0_8, %c0_9] : memref<2x1024xf32, #tpu.memory_space<vmem>>, vector<2x1024xf32>
    tpu.vector_store %arg3[%c0_8, %c0_9], %23 {strides = array<i32>} : memref<2x1024xf32, #tpu.memory_space<vmem>>, vector<2x1024xf32>,
    return
  }
}

</mosaic_0001>

<bundles_post_ra>
// kernel: forward.3
= control target key start
LH: loop header
LB: loop body
LE: loop exit
PB: predicated region body
PF: predicated region fallthrough
CT: control target
= control target key end

     0   :  { %s798_s12 = smov 0   ;;  %s965_s0 = inlined_call_operand.vmem [shape: bf16[512,25], index: 0, kind: input, shape index: {}]   ;;  %s966_s1 = inlined_call_operand.vmem [shape: bf16[25,32], index: 1, kind: input, shape index: {}]   ;;  %s967_s2 = inlined_call_operand.vmem [shape: f32[1,32], index: 2, kind: input, shape index: {}]   ;;  %s968_s3 = inlined_call_operand.vmem [shape: f32[512,32], index: 3, kind: output, shape index: {}]  }
   0x1 LB: > { %s636_s13 = sadd.s32 4294967295, %s775_s12   ;;  %p640_p0 = scmp.ge.s32.totalorder %s775_s12, 1  ;;  %s775_s12 = sphi %s798_s12, %s13_s12  }
   0x2   : > { %p138_p1 = scmp.lt.s32.totalorder %s775_s12, 3 }
   0x4   : > { %p139_p2 = pnand %p640_p0, %p138_p1 }
   0x5   : > { %s641_s18 = sshll.u32 (!%p139_p2), %s636_s13, 5 }
   0x6   : > { %142 = sbr.rel (%p139_p2) target bundleno = 220 (0xdc), region = 32  ;;  %p163_p3 = scmp.lt.s32.totalorder (!%p139_p2), %s641_s18, 63 }
   0xb   : > { %v715_v0 = vld [vmem:[%s966_s1 + $0x8] sm:$0xf]  ;;  %v752_v1 = vld [vmem:[%s966_s1 + $0x8] sm:$0x10]  ;;  %vm355_vm0 = vcmask 1043456   ;;  %vm356_vm1 = vcmask 1044480  }
   0xc   : > { %v716_v2 = vor.u32 %v752_v1, %v715_v0  ;;  %v777_v3 = vmov 65535   ;;  %s970_s18 = smov (!%p163_p3, %s641_s18), 63  ;;  %v751_v7 = vld [vmem:[%s966_s1] sm:$0xff]  ;;  %vm306_vm2 = vcmask 203776   ;;  %vm547_vm3 = vcmask 261120  }
   0xd   : > { %v357_v4 = vsel %vm355_vm0, 4294967295, %v777_v3  ;;  %s642_s21 = sshll.u32 %s970_s18, 2  ;;  %v858_v24 = vld [vmem:[%s967_s2] ss:$0 sm:$0xff]  ;;  %s644_s27 = sshll.u32 %s970_s18, 3 }
   0xe   : > { %v358_v5 = vsel %vm356_vm1, %v357_v4, 0  ;;  %s821_s24 = scalar_lea.vmem %s965_s0, %s642_s21  ;;  %s866_s30 = scalar_lea.vmem %s968_s3, %s644_s27 }
   0xf   : > { %v360_v6 = vand.u32 %v716_v2, %v358_v5  ;;  %v735_v8 = vld [vmem:[%s821_s24] sm:$0xff]  ;;  %v736_v12 = vld [vmem:[%s821_s24 + $0x8] sm:$0xff]  ;;  %v737_v16 = vld [vmem:[%s821_s24 + $0x10] sm:$0xff] }
  0x10   : > { %v739_v9 = vld [vmem:[%s821_s24 + $0x20] sm:$0xff]  ;;  %v740_v13 = vld [vmem:[%s821_s24 + $0x28] sm:$0xff]  ;;  %v741_v17 = vld [vmem:[%s821_s24 + $0x30] sm:$0xff] }
  0x11   : > { %368 = vmatpush.bf16.msra.mxu0 %v360_v6  ;;  %753 = vmatpush.bf16.msra.mxu1 %v360_v6  ;;  %v743_v10 = vld [vmem:[%s821_s24 + $0x40] sm:$0xff]  ;;  %v744_v14 = vld [vmem:[%s821_s24 + $0x48] sm:$0xff]  ;;  %v745_v18 = vld [vmem:[%s821_s24 + $0x50] sm:$0xff] }
  0x12   : > { %754 = vmatpush.bf16.msra.mxu2 %v360_v6  ;;  %755 = vmatpush.bf16.msra.mxu3 %v360_v6  ;;  %v747_v11 = vld [vmem:[%s821_s24 + $0x60] sm:$0xff]  ;;  %v748_v15 = vld [vmem:[%s821_s24 + $0x68] sm:$0xff]  ;;  %v749_v19 = vld [vmem:[%s821_s24 + $0x70] sm:$0xff] }
  0x13   : > { %v738_v20 = vld [vmem:[%s821_s24 + $0x18] sm:$0xff] }
  0x14   : > { %v742_v21 = vld [vmem:[%s821_s24 + $0x38] sm:$0xff] }
  0x15   : > { %369 = vmatpush.bf16.msra.mxu0 %v751_v7  ;;  %756 = vmatpush.bf16.msra.mxu1 %v751_v7  ;;  %v746_v22 = vld [vmem:[%s821_s24 + $0x58] sm:$0xff] }
  0x16   : > { %757 = vmatpush.bf16.msra.mxu2 %v751_v7  ;;  %758 = vmatpush.bf16.msra.mxu3 %v751_v7  ;;  %v750_v23 = vld [vmem:[%s821_s24 + $0x78] sm:$0xff] }
  0x18   : > { %717 = vmatmul.msk.bf16.vlgmr.msra.gmra.mxu0 %vm306_vm2, %v735_v8  ;;  %721 = vmatmul.msk.bf16.vlgmr.msra.gmra.mxu1 %vm306_vm2, %v739_v9 }
  0x19   : > { %725 = vmatmul.msk.bf16.vlgmr.msra.gmra.mxu2 %vm306_vm2, %v743_v10  ;;  %729 = vmatmul.msk.bf16.vlgmr.msra.gmra.mxu3 %vm306_vm2, %v747_v11 }
  0x28   : > { %718 = vmatmul.msk.bf16.gmra.mxu0 %vm306_vm2, %v736_v12  ;;  %722 = vmatmul.msk.bf16.gmra.mxu1 %vm306_vm2, %v740_v13 }
  0x29   : > { %726 = vmatmul.msk.bf16.gmra.mxu2 %vm306_vm2, %v744_v14  ;;  %730 = vmatmul.msk.bf16.gmra.mxu3 %vm306_vm2, %v748_v15 }
  0x38   : > { %719 = vmatmul.msk.bf16.gmra.mxu0 %vm306_vm2, %v737_v16  ;;  %723 = vmatmul.msk.bf16.gmra.mxu1 %vm306_vm2, %v741_v17 }
  0x39   : > { %727 = vmatmul.msk.bf16.gmra.mxu2 %vm306_vm2, %v745_v18  ;;  %731 = vmatmul.msk.bf16.gmra.mxu3 %vm306_vm2, %v749_v19 }
  0x48   : > { %720 = vmatmul.msk.bf16.gmra.mxu0 %vm306_vm2, %v738_v20  ;;  %724 = vmatmul.msk.bf16.gmra.mxu1 %vm306_vm2, %v742_v21 }
  0x49   : > { %728 = vmatmul.msk.bf16.gmra.mxu2 %vm306_vm2, %v746_v22  ;;  %732 = vmatmul.msk.bf16.gmra.mxu3 %vm306_vm2, %v750_v23 }
  0x95   : > { %v371_v25 = vpop.f32.mrf.mxu0  ;;  %v391_v26 = vpop.f32.mrf.mxu1 }
  0x96   : > { %v372_v27 = vadd.f32 %v858_v24, %v371_v25  ;;  %v392_v28 = vadd.f32 %v858_v24, %v391_v26 }
  0x98   : > { %vm451_vm4 = vcmp.ge.f32.partialorder %v372_v27, 0.0  ;;  %v483_v29 = vmul.f32 0.01, %v372_v27  ;;  %vm459_vm5 = vcmp.ge.f32.partialorder %v392_v28, 0.0  ;;  %v491_v30 = vmul.f32 0.01, %v392_v28 }
  0x9a   : > { %v515_v31 = vsel %vm451_vm4, %v372_v27, %v483_v29  ;;  %v523_v32 = vsel %vm459_vm5, %v392_v28, %v491_v30 }
  0x9b   : > { %548 = vst.msk [vmem:[%s866_s30] sm:$0xff] %vm547_vm3, %v515_v31 }
  0x9c   : > { %556 = vst.msk [vmem:[%s866_s30 + $0x40] sm:$0xff] %vm547_vm3, %v523_v32  ;;  %v411_v33 = vpop.f32.mrf.mxu2  ;;  %v431_v34 = vpop.f32.mrf.mxu3 }
  0x9d   : > { %v412_v35 = vadd.f32 %v858_v24, %v411_v33  ;;  %v432_v36 = vadd.f32 %v858_v24, %v431_v34  ;;  %v373_v37 = vpop.f32.mrf.mxu0  ;;  %v393_v38 = vpop.f32.mrf.mxu1 }
  0x9e   : > { %v374_v39 = vadd.f32 %v858_v24, %v373_v37  ;;  %v394_v40 = vadd.f32 %v858_v24, %v393_v38 }
  0x9f   : > { %vm467_vm6 = vcmp.ge.f32.partialorder %v412_v35, 0.0  ;;  %v499_v41 = vmul.f32 0.01, %v412_v35  ;;  %vm475_vm7 = vcmp.ge.f32.partialorder %v432_v36, 0.0  ;;  %v507_v42 = vmul.f32 0.01, %v432_v36 }
  0xa0   : > { %vm452_vm8 = vcmp.ge.f32.partialorder %v374_v39, 0.0  ;;  %v484_v43 = vmul.f32 0.01, %v374_v39  ;;  %vm460_vm9 = vcmp.ge.f32.partialorder %v394_v40, 0.0  ;;  %v492_v44 = vmul.f32 0.01, %v394_v40 }
  0xa1   : > { %v531_v45 = vsel %vm467_vm6, %v412_v35, %v499_v41  ;;  %v539_v46 = vsel %vm475_vm7, %v432_v36, %v507_v42 }
  0xa2   : > { %564 = vst.msk [vmem:[%s866_s30 + $0x80] sm:$0xff] %vm547_vm3, %v531_v45  ;;  %v516_v47 = vsel %vm452_vm8, %v374_v39, %v484_v43  ;;  %v524_v48 = vsel %vm460_vm9, %v394_v40, %v492_v44 }
  0xa3   : > { %572 = vst.msk [vmem:[%s866_s30 + $0xc0] sm:$0xff] %vm547_vm3, %v539_v46 }
  0xa4   : > { %549 = vst.msk [vmem:[%s866_s30 + $0x8] sm:$0xff] %vm547_vm3, %v516_v47  ;;  %v413_v49 = vpop.f32.mrf.mxu2  ;;  %v433_v50 = vpop.f32.mrf.mxu3 }
  0xa5   : > { %557 = vst.msk [vmem:[%s866_s30 + $0x48] sm:$0xff] %vm547_vm3, %v524_v48  ;;  %v414_v51 = vadd.f32 %v858_v24, %v413_v49  ;;  %v434_v52 = vadd.f32 %v858_v24, %v433_v50  ;;  %v376_v53 = vpop.f32.mrf.mxu0  ;;  %v396_v54 = vpop.f32.mrf.mxu1 }
  0xa6   : > { %v377_v55 = vadd.f32 %v858_v24, %v376_v53  ;;  %v397_v56 = vadd.f32 %v858_v24, %v396_v54 }
  0xa7   : > { %vm468_vm10 = vcmp.ge.f32.partialorder %v414_v51, 0.0  ;;  %v500_v57 = vmul.f32 0.01, %v414_v51  ;;  %vm476_vm11 = vcmp.ge.f32.partialorder %v434_v52, 0.0  ;;  %v508_v58 = vmul.f32 0.01, %v434_v52 }
  0xa8   : > { %vm453_vm12 = vcmp.ge.f32.partialorder %v377_v55, 0.0  ;;  %v485_v59 = vmul.f32 0.01, %v377_v55  ;;  %vm461_vm13 = vcmp.ge.f32.partialorder %v397_v56, 0.0  ;;  %v493_v60 = vmul.f32 0.01, %v397_v56 }
  0xa9   : > { %v532_v61 = vsel %vm468_vm10, %v414_v51, %v500_v57  ;;  %v540_v62 = vsel %vm476_vm11, %v434_v52, %v508_v58 }
  0xaa   : > { %565 = vst.msk [vmem:[%s866_s30 + $0x88] sm:$0xff] %vm547_vm3, %v532_v61  ;;  %v517_v63 = vsel %vm453_vm12, %v377_v55, %v485_v59  ;;  %v525_v0 = vsel %vm461_vm13, %v397_v56, %v493_v60 }
  0xab   : > { %573 = vst.msk [vmem:[%s866_s30 + $0xc8] sm:$0xff] %vm547_vm3, %v540_v62 }
  0xac   : > { %550 = vst.msk [vmem:[%s866_s30 + $0x10] sm:$0xff] %vm547_vm3, %v517_v63  ;;  %v416_v1 = vpop.f32.mrf.mxu2  ;;  %v436_v2 = vpop.f32.mrf.mxu3 }
  0xad   : > { %558 = vst.msk [vmem:[%s866_s30 + $0x50] sm:$0xff] %vm547_vm3, %v525_v0  ;;  %v417_v3 = vadd.f32 %v858_v24, %v416_v1  ;;  %v437_v4 = vadd.f32 %v858_v24, %v436_v2  ;;  %v378_v5 = vpop.f32.mrf.mxu0  ;;  %v398_v6 = vpop.f32.mrf.mxu1 }
  0xae   : > { %v379_v7 = vadd.f32 %v858_v24, %v378_v5  ;;  %v399_v8 = vadd.f32 %v858_v24, %v398_v6 }
  0xaf   : > { %vm469_vm14 = vcmp.ge.f32.partialorder %v417_v3, 0.0  ;;  %v501_v9 = vmul.f32 0.01, %v417_v3  ;;  %vm477_vm15 = vcmp.ge.f32.partialorder %v437_v4, 0.0  ;;  %v509_v10 = vmul.f32 0.01, %v437_v4 }
  0xb0   : > { %vm454_vm0 = vcmp.ge.f32.partialorder %v379_v7, 0.0  ;;  %v486_v11 = vmul.f32 0.01, %v379_v7  ;;  %vm462_vm1 = vcmp.ge.f32.partialorder %v399_v8, 0.0  ;;  %v494_v12 = vmul.f32 0.01, %v399_v8 }
  0xb1   : > { %v533_v13 = vsel %vm469_vm14, %v417_v3, %v501_v9  ;;  %v541_v14 = vsel %vm477_vm15, %v437_v4, %v509_v10 }
  0xb2   : > { %566 = vst.msk [vmem:[%s866_s30 + $0x90] sm:$0xff] %vm547_vm3, %v533_v13  ;;  %v518_v15 = vsel %vm454_vm0, %v379_v7, %v486_v11  ;;  %v526_v16 = vsel %vm462_vm1, %v399_v8, %v494_v12 }
  0xb3   : > { %574 = vst.msk [vmem:[%s866_s30 + $0xd0] sm:$0xff] %vm547_vm3, %v541_v14 }
  0xb4   : > { %551 = vst.msk [vmem:[%s866_s30 + $0x18] sm:$0xff] %vm547_vm3, %v518_v15  ;;  %v418_v17 = vpop.f32.mrf.mxu2  ;;  %v438_v18 = vpop.f32.mrf.mxu3 }
  0xb5   : > { %559 = vst.msk [vmem:[%s866_s30 + $0x58] sm:$0xff] %vm547_vm3, %v526_v16  ;;  %v419_v19 = vadd.f32 %v858_v24, %v418_v17  ;;  %v439_v20 = vadd.f32 %v858_v24, %v438_v18  ;;  %v381_v21 = vpop.f32.mrf.mxu0  ;;  %v401_v22 = vpop.f32.mrf.mxu1 }
  0xb6   : > { %v382_v23 = vadd.f32 %v858_v24, %v381_v21  ;;  %v402_v25 = vadd.f32 %v858_v24, %v401_v22 }
  0xb7   : > { %vm470_vm2 = vcmp.ge.f32.partialorder %v419_v19, 0.0  ;;  %v502_v26 = vmul.f32 0.01, %v419_v19  ;;  %vm478_vm4 = vcmp.ge.f32.partialorder %v439_v20, 0.0  ;;  %v510_v27 = vmul.f32 0.01, %v439_v20 }
  0xb8   : > { %vm455_vm5 = vcmp.ge.f32.partialorder %v382_v23, 0.0  ;;  %v487_v28 = vmul.f32 0.01, %v382_v23  ;;  %vm463_vm6 = vcmp.ge.f32.partialorder %v402_v25, 0.0  ;;  %v495_v29 = vmul.f32 0.01, %v402_v25 }
  0xb9   : > { %v534_v30 = vsel %vm470_vm2, %v419_v19, %v502_v26  ;;  %v542_v31 = vsel %vm478_vm4, %v439_v20, %v510_v27 }
  0xba   : > { %567 = vst.msk [vmem:[%s866_s30 + $0x98] sm:$0xff] %vm547_vm3, %v534_v30  ;;  %v519_v32 = vsel %vm455_vm5, %v382_v23, %v487_v28  ;;  %v527_v33 = vsel %vm463_vm6, %v402_v25, %v495_v29 }
  0xbb   : > { %575 = vst.msk [vmem:[%s866_s30 + $0xd8] sm:$0xff] %vm547_vm3, %v542_v31 }
  0xbc   : > { %552 = vst.msk [vmem:[%s866_s30 + $0x20] sm:$0xff] %vm547_vm3, %v519_v32  ;;  %v421_v34 = vpop.f32.mrf.mxu2  ;;  %v441_v35 = vpop.f32.mrf.mxu3 }
  0xbd   : > { %560 = vst.msk [vmem:[%s866_s30 + $0x60] sm:$0xff] %vm547_vm3, %v527_v33  ;;  %v422_v36 = vadd.f32 %v858_v24, %v421_v34  ;;  %v442_v37 = vadd.f32 %v858_v24, %v441_v35  ;;  %v383_v38 = vpop.f32.mrf.mxu0  ;;  %v403_v39 = vpop.f32.mrf.mxu1 }
  0xbe   : > { %v384_v40 = vadd.f32 %v858_v24, %v383_v38  ;;  %v404_v41 = vadd.f32 %v858_v24, %v403_v39 }
  0xbf   : > { %vm471_vm7 = vcmp.ge.f32.partialorder %v422_v36, 0.0  ;;  %v503_v42 = vmul.f32 0.01, %v422_v36  ;;  %vm479_vm8 = vcmp.ge.f32.partialorder %v442_v37, 0.0  ;;  %v511_v43 = vmul.f32 0.01, %v442_v37 }
  0xc0   : > { %vm456_vm9 = vcmp.ge.f32.partialorder %v384_v40, 0.0  ;;  %v488_v44 = vmul.f32 0.01, %v384_v40  ;;  %vm464_vm10 = vcmp.ge.f32.partialorder %v404_v41, 0.0  ;;  %v496_v45 = vmul.f32 0.01, %v404_v41 }
  0xc1   : > { %v535_v46 = vsel %vm471_vm7, %v422_v36, %v503_v42  ;;  %v543_v47 = vsel %vm479_vm8, %v442_v37, %v511_v43 }
  0xc2   : > { %568 = vst.msk [vmem:[%s866_s30 + $0xa0] sm:$0xff] %vm547_vm3, %v535_v46  ;;  %v520_v48 = vsel %vm456_vm9, %v384_v40, %v488_v44  ;;  %v528_v49 = vsel %vm464_vm10, %v404_v41, %v496_v45 }
  0xc3   : > { %576 = vst.msk [vmem:[%s866_s30 + $0xe0] sm:$0xff] %vm547_vm3, %v543_v47 }
  0xc4   : > { %553 = vst.msk [vmem:[%s866_s30 + $0x28] sm:$0xff] %vm547_vm3, %v520_v48  ;;  %v423_v50 = vpop.f32.mrf.mxu2  ;;  %v443_v51 = vpop.f32.mrf.mxu3 }
  0xc5   : > { %561 = vst.msk [vmem:[%s866_s30 + $0x68] sm:$0xff] %vm547_vm3, %v528_v49  ;;  %v424_v52 = vadd.f32 %v858_v24, %v423_v50  ;;  %v444_v53 = vadd.f32 %v858_v24, %v443_v51  ;;  %v386_v54 = vpop.f32.mrf.mxu0  ;;  %v406_v55 = vpop.f32.mrf.mxu1 }
  0xc6   : > { %v387_v56 = vadd.f32 %v858_v24, %v386_v54  ;;  %v407_v57 = vadd.f32 %v858_v24, %v406_v55 }
  0xc7   : > { %vm472_vm11 = vcmp.ge.f32.partialorder %v424_v52, 0.0  ;;  %v504_v58 = vmul.f32 0.01, %v424_v52  ;;  %vm480_vm12 = vcmp.ge.f32.partialorder %v444_v53, 0.0  ;;  %v512_v59 = vmul.f32 0.01, %v444_v53 }
  0xc8   : > { %vm457_vm13 = vcmp.ge.f32.partialorder %v387_v56, 0.0  ;;  %v489_v60 = vmul.f32 0.01, %v387_v56  ;;  %vm465_vm14 = vcmp.ge.f32.partialorder %v407_v57, 0.0  ;;  %v497_v61 = vmul.f32 0.01, %v407_v57 }
  0xc9   : > { %v536_v62 = vsel %vm472_vm11, %v424_v52, %v504_v58  ;;  %v544_v63 = vsel %vm480_vm12, %v444_v53, %v512_v59 }
  0xca   : > { %569 = vst.msk [vmem:[%s866_s30 + $0xa8] sm:$0xff] %vm547_vm3, %v536_v62  ;;  %v521_v0 = vsel %vm457_vm13, %v387_v56, %v489_v60  ;;  %v529_v1 = vsel %vm465_vm14, %v407_v57, %v497_v61 }
  0xcb   : > { %577 = vst.msk [vmem:[%s866_s30 + $0xe8] sm:$0xff] %vm547_vm3, %v544_v63 }
  0xcc   : > { %554 = vst.msk [vmem:[%s866_s30 + $0x30] sm:$0xff] %vm547_vm3, %v521_v0  ;;  %v426_v2 = vpop.f32.mrf.mxu2  ;;  %v446_v3 = vpop.f32.mrf.mxu3 }
  0xcd   : > { %562 = vst.msk [vmem:[%s866_s30 + $0x70] sm:$0xff] %vm547_vm3, %v529_v1  ;;  %v427_v4 = vadd.f32 %v858_v24, %v426_v2  ;;  %v447_v5 = vadd.f32 %v858_v24, %v446_v3  ;;  %v388_v6 = vpop.f32.mrf.mxu0  ;;  %v408_v7 = vpop.f32.mrf.mxu1 }
  0xce   : > { %v389_v8 = vadd.f32 %v858_v24, %v388_v6  ;;  %v409_v9 = vadd.f32 %v858_v24, %v408_v7 }
  0xcf   : > { %vm473_vm15 = vcmp.ge.f32.partialorder %v427_v4, 0.0  ;;  %v505_v10 = vmul.f32 0.01, %v427_v4  ;;  %vm481_vm0 = vcmp.ge.f32.partialorder %v447_v5, 0.0  ;;  %v513_v11 = vmul.f32 0.01, %v447_v5 }
  0xd0   : > { %vm458_vm1 = vcmp.ge.f32.partialorder %v389_v8, 0.0  ;;  %v490_v12 = vmul.f32 0.01, %v389_v8  ;;  %vm466_vm2 = vcmp.ge.f32.partialorder %v409_v9, 0.0  ;;  %v498_v13 = vmul.f32 0.01, %v409_v9 }
  0xd1   : > { %v537_v14 = vsel %vm473_vm15, %v427_v4, %v505_v10  ;;  %v545_v15 = vsel %vm481_vm0, %v447_v5, %v513_v11 }
  0xd2   : > { %570 = vst.msk [vmem:[%s866_s30 + $0xb0] sm:$0xff] %vm547_vm3, %v537_v14  ;;  %v522_v16 = vsel %vm458_vm1, %v389_v8, %v490_v12  ;;  %v530_v17 = vsel %vm466_vm2, %v409_v9, %v498_v13 }
  0xd3   : > { %578 = vst.msk [vmem:[%s866_s30 + $0xf0] sm:$0xff] %vm547_vm3, %v545_v15 }
  0xd4   : > { %555 = vst.msk [vmem:[%s866_s30 + $0x38] sm:$0xff] %vm547_vm3, %v522_v16  ;;  %v428_v18 = vpop.f32.mrf.mxu2  ;;  %v448_v19 = vpop.f32.mrf.mxu3 }
  0xd5   : > { %563 = vst.msk [vmem:[%s866_s30 + $0x78] sm:$0xff] %vm547_vm3, %v530_v17  ;;  %v429_v20 = vadd.f32 %v858_v24, %v428_v18  ;;  %v449_v21 = vadd.f32 %v858_v24, %v448_v19 }
  0xd7   : > { %vm474_vm4 = vcmp.ge.f32.partialorder %v429_v20, 0.0  ;;  %v506_v22 = vmul.f32 0.01, %v429_v20  ;;  %vm482_vm5 = vcmp.ge.f32.partialorder %v449_v21, 0.0  ;;  %v514_v23 = vmul.f32 0.01, %v449_v21 }
  0xd9   : > { %v538_v25 = vsel %vm474_vm4, %v429_v20, %v506_v22  ;;  %v546_v26 = vsel %vm482_vm5, %v449_v21, %v514_v23 }
  0xda   : > { %571 = vst.msk [vmem:[%s866_s30 + $0xb8] sm:$0xff] %vm547_vm3, %v538_v25 }
  0xdb   : > { %579 = vst.msk [vmem:[%s866_s30 + $0xf8] sm:$0xff] %vm547_vm3, %v546_v26 }
  0xdc PF: > { %s13_s12 = sadd.s32 1, %s775_s12  }
  0xdd   : > { %p10_p4 = scmp.ge.s32.totalorder %s13_s12, 4  }
  0xdf   :  { %12 = sbr.rel (!%p10_p4) target bundleno = 1 (0x1), region = 62 }

// kernel: forward.5
= control target key start
LH: loop header
LB: loop body
LE: loop exit
PB: predicated region body
PF: predicated region fallthrough
CT: control target
= control target key end

     0   :  { %vm36_vm0 = vcmask 1041408   ;;  %v240_v25 = vmov 269488144   ;;  %s333_s0 = inlined_call_operand.vmem [shape: f32[2,1024], index: 0, kind: input, shape index: {}]   ;;  %s334_s1 = inlined_call_operand.vmem [shape: f32[2,1024], index: 1, kind: input, shape index: {}]   ;;  %s335_s2 = inlined_call_operand.vmem [shape: f32[2,1024], index: 2, kind: output, shape index: {0}]   ;;  %s336_s3 = inlined_call_operand.vmem [shape: f32[2,1024], index: 3, kind: output, shape index: {1}]  }
   0x1   :  { %v13_v0 = vld [vmem:[%s333_s0] sm:$0xff]  ;;  %v14_v1 = vld [vmem:[%s333_s0 + $0x8] sm:$0xff]  ;;  %v56_v26 = vunpack.c.l.s4 %v240_v25 }
   0x2   :  { %17 = vst [vmem:[#allocation1] ss:$4 sm:$0xff] %v13_v0  ;;  %v116_v36 = vld [vmem:[%s334_s1] sm:$0xff]  ;;  %v117_v37 = vld [vmem:[%s334_s1 + $0x8] sm:$0xff] }
   0x3   :  { %19 = vst [vmem:[#allocation1 + $0x20] ss:$4 sm:$0xff] %v14_v1  ;;  %v275_v27 = vunpack.c.0.s8 %v56_v26 }
   0x9   :  { %v20_v2 = vld.sshfl [vmem:[#allocation1] sm:$0xff pattern:$0x73625140]  ;;  %v21_v3 = vld.sshfl [vmem:[#allocation1 + $0x8] sm:$0xff pattern:$0x73625140] }
   0xa   :  { %v22_v4 = vld.sshfl [vmem:[#allocation1 + $0x10] sm:$0xff pattern:$0x73625140]  ;;  %v23_v5 = vld.sshfl [vmem:[#allocation1 + $0x18] sm:$0xff pattern:$0x73625140] }
   0xb   :  { %v24_v6 = vld.sshfl [vmem:[#allocation1 + $0x20] sm:$0xff pattern:$0x73625140]  ;;  %v25_v7 = vld.sshfl [vmem:[#allocation1 + $0x28] sm:$0xff pattern:$0x73625140] }
   0xc   :  { %v26_v8 = vld.sshfl [vmem:[#allocation1 + $0x30] sm:$0xff pattern:$0x73625140]  ;;  %v27_v9 = vld.sshfl [vmem:[#allocation1 + $0x38] sm:$0xff pattern:$0x73625140] }
   0xd   :  { %v37_v10 = vsel %vm36_vm0, %v20_v2, -inf  ;;  %v38_v11 = vsel %vm36_vm0, %v21_v3, -inf  ;;  %v39_v12 = vsel %vm36_vm0, %v22_v4, -inf  ;;  %v40_v13 = vsel %vm36_vm0, %v23_v5, -inf }
   0xe   :  { %v41_v14 = vsel %vm36_vm0, %v24_v6, -inf  ;;  %v43_v15 = vsel %vm36_vm0, %v25_v7, -inf  ;;  %v45_v16 = vsel %vm36_vm0, %v26_v8, -inf  ;;  %v47_v17 = vsel %vm36_vm0, %v27_v9, -inf }
   0xf   :  { %v42_v18 = vmax.f32 %v37_v10, %v41_v14  ;;  %v44_v19 = vmax.f32 %v38_v11, %v43_v15  ;;  %v46_v20 = vmax.f32 %v39_v12, %v45_v16  ;;  %v48_v21 = vmax.f32 %v40_v13, %v47_v17 }
  0x11   :  { %v49_v22 = vmax.f32 %v42_v18, %v44_v19  ;;  %v50_v23 = vmax.f32 %v46_v20, %v48_v21 }
  0x13   :  { %v51_v24 = vmax.f32 %v49_v22, %v50_v23 }
  0x15   :  { %52 = vmax.xlane.f32.xlu0 %v51_v24 }
  0x88   :  { %v53_v28 = vpop.xlane.xlu0 %52 }
  0x89   :  { %v58_v29 = vperm.slane %v53_v28, %v275_v27 }
  0x8b   :  { %v278_v30 = vsub.f32 %v13_v0, %v58_v29  ;;  %v280_v31 = vsub.f32 %v14_v1, %v58_v29 }
  0x8d   :  { %v62_v32 = vmul.f32 1.442695, %v278_v30  ;;  %v64_v33 = vmul.f32 1.442695, %v280_v31  ;;  %v118_v42 = vadd.f32 %v116_v36, %v278_v30  ;;  %v119_v45 = vadd.f32 %v117_v37, %v280_v31 }
  0x8f   :  { %228 = vpow2.f32 %v62_v32 }
  0x90   :  { %230 = vpow2.f32 %v64_v33 }
  0x95   :  { %v229_v34 = vpop.eup %228 }
  0x96   :  { %v231_v35 = vpop.eup %230  ;;  %68 = vst [vmem:[#allocation1] ss:$4 sm:$0xff] %v229_v34 }
  0x97   :  { %70 = vst [vmem:[#allocation1 + $0x20] ss:$4 sm:$0xff] %v231_v35 }
  0x9d   :  { %v71_v38 = vld.sshfl [vmem:[#allocation1] sm:$0xff pattern:$0x73625140]  ;;  %v72_v39 = vld.sshfl [vmem:[#allocation1 + $0x8] sm:$0xff pattern:$0x73625140] }
  0x9e   :  { %v73_v40 = vld.sshfl [vmem:[#allocation1 + $0x10] sm:$0xff pattern:$0x73625140]  ;;  %v74_v41 = vld.sshfl [vmem:[#allocation1 + $0x18] sm:$0xff pattern:$0x73625140] }
  0x9f   :  { %v75_v43 = vld.sshfl [vmem:[#allocation1 + $0x20] sm:$0xff pattern:$0x73625140]  ;;  %v76_v44 = vld.sshfl [vmem:[#allocation1 + $0x28] sm:$0xff pattern:$0x73625140] }
  0xa0   :  { %v77_v46 = vld.sshfl [vmem:[#allocation1 + $0x30] sm:$0xff pattern:$0x73625140]  ;;  %v78_v47 = vld.sshfl [vmem:[#allocation1 + $0x38] sm:$0xff pattern:$0x73625140] }
  0xa1   :  { %122 = vst [vmem:[#allocation1] ss:$4 sm:$0xff] %v118_v42  ;;  %v87_v48 = vsel %vm36_vm0, %v71_v38, 0.0  ;;  %v88_v49 = vsel %vm36_vm0, %v72_v39, 0.0  ;;  %v90_v51 = vsel %vm36_vm0, %v73_v40, 0.0  ;;  %v92_v53 = vsel %vm36_vm0, %v74_v41, 0.0 }
  0xa2   :  { %124 = vst [vmem:[#allocation1 + $0x20] ss:$4 sm:$0xff] %v119_v45  ;;  %v89_v50 = vadd.f32 %v88_v49, %v87_v48  ;;  %v94_v55 = vsel %vm36_vm0, %v75_v43, 0.0  ;;  %v96_v56 = vsel %vm36_vm0, %v76_v44, 0.0  ;;  %v98_v57 = vsel %vm36_vm0, %v77_v46, 0.0 }
  0xa3   :  { %v100_v19 = vsel %vm36_vm0, %v78_v47, 0.0 }
  0xa4   :  { %v91_v52 = vadd.f32 %v90_v51, %v89_v50 }
  0xa6   :  { %v93_v54 = vadd.f32 %v92_v53, %v91_v52 }
  0xa8   :  { %v125_v58 = vld.sshfl [vmem:[#allocation1] sm:$0xff pattern:$0x73625140]  ;;  %v126_v59 = vld.sshfl [vmem:[#allocation1 + $0x8] sm:$0xff pattern:$0x73625140]  ;;  %v95_v60 = vadd.f32 %v94_v55, %v93_v54 }
  0xa9   :  { %v127_v61 = vld.sshfl [vmem:[#allocation1 + $0x10] sm:$0xff pattern:$0x73625140]  ;;  %v128_v62 = vld.sshfl [vmem:[#allocation1 + $0x18] sm:$0xff pattern:$0x73625140] }
  0xaa   :  { %v129_v63 = vld.sshfl [vmem:[#allocation1 + $0x20] sm:$0xff pattern:$0x73625140]  ;;  %v130_v0 = vld.sshfl [vmem:[#allocation1 + $0x28] sm:$0xff pattern:$0x73625140]  ;;  %v97_v3 = vadd.f32 %v96_v56, %v95_v60 }
  0xab   :  { %v131_v1 = vld.sshfl [vmem:[#allocation1 + $0x30] sm:$0xff pattern:$0x73625140]  ;;  %v132_v2 = vld.sshfl [vmem:[#allocation1 + $0x38] sm:$0xff pattern:$0x73625140] }
  0xac   :  { %v141_v4 = vsel %vm36_vm0, %v125_v58, -inf  ;;  %v142_v5 = vsel %vm36_vm0, %v126_v59, -inf  ;;  %v143_v6 = vsel %vm36_vm0, %v127_v61, -inf  ;;  %v144_v7 = vsel %vm36_vm0, %v128_v62, -inf }
  0xad   :  { %v145_v8 = vsel %vm36_vm0, %v129_v63, -inf  ;;  %v147_v9 = vsel %vm36_vm0, %v130_v0, -inf  ;;  %v149_v10 = vsel %vm36_vm0, %v131_v1, -inf  ;;  %v151_v11 = vsel %vm36_vm0, %v132_v2, -inf }
  0xae   :  { %v146_v12 = vmax.f32 %v141_v4, %v145_v8  ;;  %v148_v13 = vmax.f32 %v142_v5, %v147_v9  ;;  %v150_v14 = vmax.f32 %v143_v6, %v149_v10  ;;  %v152_v15 = vmax.f32 %v144_v7, %v151_v11 }
  0xaf   :  { %v99_v16 = vadd.f32 %v98_v57, %v97_v3 }
  0xb0   :  { %v153_v17 = vmax.f32 %v146_v12, %v148_v13  ;;  %v154_v18 = vmax.f32 %v150_v14, %v152_v15 }
  0xb1   :  { %v101_v20 = vadd.f32 %v100_v19, %v99_v16 }
  0xb2   :  { %v155_v21 = vmax.f32 %v153_v17, %v154_v18 }
  0xb3   :  { %102 = vadd.xlane.f32.xlu1 %v101_v20 }
  0xb4   :  { %156 = vmax.xlane.f32.xlu0 %v155_v21 }
 0x126   :  { %v103_v22 = vpop.xlane.xlu1 %102 }
 0x127   :  { %v157_v23 = vpop.xlane.xlu0 %156  ;;  %232 = vlog2.f32 %v103_v22 }
 0x128   :  { %v162_v24 = vperm.slane %v157_v23, %v275_v27 }
 0x12a   :  { %v164_v25 = vsub.f32 %v118_v42, %v162_v24  ;;  %v165_v26 = vsub.f32 %v119_v45, %v162_v24 }
 0x12c   :  { %v166_v28 = vmul.f32 1.442695, %v164_v25  ;;  %v168_v29 = vmul.f32 1.442695, %v165_v26 }
 0x12d   :  { %v233_v32 = vpop.eup %232 }
 0x12e   :  { %234 = vpow2.f32 %v166_v28  ;;  %v105_v33 = vmul.f32 0.6931472, %v233_v32 }
 0x12f   :  { %236 = vpow2.f32 %v168_v29 }
 0x130   :  { %v110_v34 = vperm.slane %v105_v33, %v275_v27 }
 0x132   :  { %v112_v35 = vsub.f32 %v278_v30, %v110_v34  ;;  %v113_v36 = vsub.f32 %v280_v31, %v110_v34 }
 0x134   :  { %v235_v37 = vpop.eup %234  ;;  %114 = vst [vmem:[%s335_s2] sm:$0xff] %v112_v35 }
 0x135   :  { %v237_v38 = vpop.eup %236  ;;  %172 = vst [vmem:[#allocation1] ss:$4 sm:$0xff] %v235_v37 }
 0x136   :  { %174 = vst [vmem:[#allocation1 + $0x20] ss:$4 sm:$0xff] %v237_v38 }
 0x137   :  { %115 = vst [vmem:[%s335_s2 + $0x8] sm:$0xff] %v113_v36 }
 0x13c   :  { %v175_v39 = vld.sshfl [vmem:[#allocation1] sm:$0xff pattern:$0x73625140]  ;;  %v176_v40 = vld.sshfl [vmem:[#allocation1 + $0x8] sm:$0xff pattern:$0x73625140] }
 0x13d   :  { %v177_v41 = vld.sshfl [vmem:[#allocation1 + $0x10] sm:$0xff pattern:$0x73625140]  ;;  %v191_v42 = vsel %vm36_vm0, %v175_v39, 0.0  ;;  %v192_v30 = vsel %vm36_vm0, %v176_v40, 0.0 }
 0x13e   :  { %v178_v31 = vld.sshfl [vmem:[#allocation1 + $0x18] sm:$0xff pattern:$0x73625140]  ;;  %v193_v43 = vadd.f32 %v192_v30, %v191_v42  ;;  %v194_v44 = vsel %vm36_vm0, %v177_v41, 0.0 }
 0x13f   :  { %v179_v45 = vld.sshfl [vmem:[#allocation1 + $0x20] sm:$0xff pattern:$0x73625140]  ;;  %v196_v47 = vsel %vm36_vm0, %v178_v31, 0.0 }
 0x140   :  { %v195_v46 = vadd.f32 %v194_v44, %v193_v43  ;;  %v180_v48 = vld.sshfl [vmem:[#allocation1 + $0x28] sm:$0xff pattern:$0x73625140]  ;;  %v198_v50 = vsel %vm36_vm0, %v179_v45, 0.0 }
 0x141   :  { %v181_v51 = vld.sshfl [vmem:[#allocation1 + $0x30] sm:$0xff pattern:$0x73625140]  ;;  %v200_v53 = vsel %vm36_vm0, %v180_v48, 0.0 }
 0x142   :  { %v197_v49 = vadd.f32 %v196_v47, %v195_v46  ;;  %v182_v54 = vld.sshfl [vmem:[#allocation1 + $0x38] sm:$0xff pattern:$0x73625140]  ;;  %v202_v56 = vsel %vm36_vm0, %v181_v51, 0.0 }
 0x143   :  { %v204_v58 = vsel %vm36_vm0, %v182_v54, 0.0 }
 0x144   :  { %v199_v52 = vadd.f32 %v198_v50, %v197_v49 }
 0x146   :  { %v201_v55 = vadd.f32 %v200_v53, %v199_v52 }
 0x148   :  { %v203_v57 = vadd.f32 %v202_v56, %v201_v55 }
 0x14a   :  { %v205_v59 = vadd.f32 %v204_v58, %v203_v57 }
 0x14c   :  { %206 = vadd.xlane.f32.xlu1 %v205_v59 }
 0x1bf   :  { %v207_v60 = vpop.xlane.xlu1 %206 }
 0x1c0   :  { %238 = vrcp.f32 %v207_v60 }
 0x1c6   :  { %v239_v61 = vpop.eup %238 }
 0x1c7   :  { %v213_v62 = vperm.slane %v239_v61, %v275_v27 }
 0x1c9   :  { %v215_v63 = vmul.f32 %v235_v37, %v213_v62  ;;  %v216_v0 = vmul.f32 %v237_v38, %v213_v62 }
 0x1cb   :  { %217 = vst [vmem:[%s336_s3] sm:$0xff] %v215_v63 }
 0x1cc   :  { %218 = vst [vmem:[%s336_s3 + $0x8] sm:$0xff] %v216_v0 }

// kernel: forward.4
= control target key start
LH: loop header
LB: loop body
LE: loop exit
PB: predicated region body
PF: predicated region fallthrough
CT: control target
= control target key end

     0   :  { %s8705_s18 = smov 0   ;;  %s11223_s0 = inlined_call_operand.vmem [shape: f32[2,408,32], index: 0, kind: input, shape index: {}]   ;;  %s11224_s1 = inlined_call_operand.vmem [shape: bf16[25,32,32], index: 1, kind: input, shape index: {}]   ;;  %s11225_s2 = inlined_call_operand.vmem [shape: f32[1,32], index: 2, kind: input, shape index: {}]   ;;  %s11226_s3 = inlined_call_operand.vmem [shape: bf16[32,28], index: 3, kind: input, shape index: {}]   ;;  %s11227_s4 = inlined_call_operand.vmem [shape: f32[1,28], index: 4, kind: input, shape index: {}]   ;;  %s11228_s5 = inlined_call_operand.vmem [shape: f32[2,320,28], index: 5, kind: output, shape index: {}]  }
   0x1 LB: > { %s7765_s19 = sadd.s32 4294967295, %s8673_s18   ;;  %p7769_p0 = scmp.ge.s32.totalorder %s8673_s18, 1  ;;  %s8673_s18 = sphi %s8705_s18, %s15_s18  }
   0x2   : > { %p187_p1 = scmp.lt.s32.totalorder %s8673_s18, 3 }
   0x4   : > { %p188_p2 = pnand %p7769_p0, %p187_p1 }
   0x6   : > { %191 = sbr.rel (%p188_p2) target bundleno = 2375 (0x947), region = 40 }
   0xb   : > { %v8601_v0 = vld [vmem:[%s11224_s1 + $0x18] sm:$0xff]  ;;  %v8599_v1 = vld [vmem:[%s11224_s1 + $0x8] sm:$0xff]  ;;  %p215_p3 = scmp.lt.s32.totalorder %s7765_s19, 1  ;;  %v8600_v2 = vld [vmem:[%s11224_s1 + $0x10] sm:$0xff]  ;;  %vm367_vm0 = vcmask 261120  }
   0xc   : > { %8650 = vmatpush.bf16.msra.mxu2 %v8601_v0  ;;  %8652 = vmatpush.bf16.msra.mxu3 %v8599_v1  ;;  %v8598_v3 = vld [vmem:[%s11224_s1] sm:$0xff]  ;;  %v8603_v4 = vld [vmem:[%s11224_s1 + $0x28] sm:$0xff]  ;;  %v8605_v5 = vld [vmem:[%s11224_s1 + $0x38] sm:$0xff] }
   0xd   : > { %s11248_s19 = smov (!%p215_p3, %s7765_s19), 1  ;;  %434 = vmatpush.bf16.msra.mxu0 %v8601_v0  ;;  %615 = vmatpush.bf16.msra.mxu1 %v8599_v1  ;;  %v8607_v6 = vld [vmem:[%s11224_s1 + $0x48] sm:$0xff]  ;;  %v8602_v55 = vld [vmem:[%s11224_s1 + $0x20] sm:$0xff]  ;;  %v8604_v56 = vld [vmem:[%s11224_s1 + $0x30] sm:$0xff] }
   0xe   : > { %s8654_s28 = smul.u32 408, %s11248_s19  ;;  %v8606_v57 = vld [vmem:[%s11224_s1 + $0x40] sm:$0xff] }
   0xf   : > { %s8655_s17 = smul.u32 320, %s11248_s19 }
  0x10   : > { %8651 = vmatpush.bf16.msra.mxu2 %v8600_v2  ;;  %8653 = vmatpush.bf16.msra.mxu3 %v8598_v3  ;;  %s8740_s12 = scalar_lea.vmem %s11223_s0, %s8654_s28 }
  0x11   : > { %435 = vmatpush.bf16.msra.mxu0 %v8600_v2  ;;  %616 = vmatpush.bf16.msra.mxu1 %v8598_v3  ;;  %v310_v7 = vld [vmem:[%s8740_s12 + $0xa1] sm:$0xff]  ;;  %v311_v8 = vld [vmem:[%s8740_s12 + $0xa9] sm:$0xff]  ;;  %v312_v19 = vld [vmem:[%s8740_s12 + $0xb1] sm:$0xff]  ;;  %s11009_s19 = scalar_lea.vmem %s11228_s5, %s8655_s17 }
  0x12   : > { %v246_v9 = vld [vmem:[%s8740_s12 + $0xa0] sm:$0xff]  ;;  %v340_v10 = vpack.c.bf16 %v311_v8, %v310_v7  ;;  %v247_v11 = vld [vmem:[%s8740_s12 + $0xa8] sm:$0xff]  ;;  %v248_v21 = vld [vmem:[%s8740_s12 + $0xb0] sm:$0xff] }
  0x13   : > { %v290_v12 = vld [vmem:[%s8740_s12 + $0x1] sm:$0xff]  ;;  %v291_v13 = vld [vmem:[%s8740_s12 + $0x9] sm:$0xff]  ;;  %v276_v14 = vpack.c.bf16 %v247_v11, %v246_v9  ;;  %v313_v20 = vld [vmem:[%s8740_s12 + $0xb9] sm:$0xff] }
  0x14   : > { %861 = vmatpush.bf16.msrb.mxu2 %v8603_v4  ;;  %1147 = vmatpush.bf16.msrb.mxu3 %v8605_v5  ;;  %v330_v15 = vpack.c.bf16 %v291_v13, %v290_v12  ;;  %v226_v16 = vld [vmem:[%s8740_s12] sm:$0xff]  ;;  %v227_v17 = vld [vmem:[%s8740_s12 + $0x8] sm:$0xff]  ;;  %v249_v22 = vld [vmem:[%s8740_s12 + $0xb8] sm:$0xff]  ;;  %v341_v27 = vpack.c.bf16 %v313_v20, %v312_v19 }
  0x15   : > { %1433 = vmatpush.bf16.msrb.mxu0 %v8607_v6  ;;  %7794 = vmatmul.msk.bf16.vlgmr.msra.gmra.mxu2 %vm367_vm0, %v340_v10  ;;  %v266_v18 = vpack.c.bf16 %v227_v17, %v226_v16  ;;  %v292_v23 = vld [vmem:[%s8740_s12 + $0x11] sm:$0xff]  ;;  %v293_v24 = vld [vmem:[%s8740_s12 + $0x19] sm:$0xff]  ;;  %v277_v28 = vpack.c.bf16 %v249_v22, %v248_v21  ;;  %v314_v31 = vld [vmem:[%s8740_s12 + $0xc1] sm:$0xff] }
  0x16   : > { %7822 = vmatmul.msk.bf16.vlgmr.msra.gmra.mxu3 %vm367_vm0, %v276_v14  ;;  %7784 = vmatmul.msk.bf16.vlgmr.msra.gmra.mxu0 %vm367_vm0, %v330_v15  ;;  %v228_v25 = vld [vmem:[%s8740_s12 + $0x10] sm:$0xff]  ;;  %v229_v26 = vld [vmem:[%s8740_s12 + $0x18] sm:$0xff]  ;;  %v331_v29 = vpack.c.bf16 %v293_v24, %v292_v23  ;;  %v250_v33 = vld [vmem:[%s8740_s12 + $0xc0] sm:$0xff] }
  0x17   : > { %7812 = vmatmul.msk.bf16.vlgmr.msra.gmra.mxu1 %vm367_vm0, %v266_v18  ;;  %v267_v30 = vpack.c.bf16 %v229_v26, %v228_v25  ;;  %v315_v32 = vld [vmem:[%s8740_s12 + $0xc9] sm:$0xff]  ;;  %v294_v35 = vld [vmem:[%s8740_s12 + $0x21] sm:$0xff]  ;;  %v316_v43 = vld [vmem:[%s8740_s12 + $0xd1] sm:$0xff] }
  0x18   : > { %v251_v34 = vld [vmem:[%s8740_s12 + $0xc8] sm:$0xff]  ;;  %v230_v37 = vld [vmem:[%s8740_s12 + $0x20] sm:$0xff]  ;;  %v342_v39 = vpack.c.bf16 %v315_v32, %v314_v31  ;;  %v252_v45 = vld [vmem:[%s8740_s12 + $0xd0] sm:$0xff]  ;;  %862 = vmatpush.bf16.msrb.mxu2 %v8602_v55  ;;  %1148 = vmatpush.bf16.msrb.mxu3 %v8604_v56 }
  0x19   : > { %v295_v36 = vld [vmem:[%s8740_s12 + $0x29] sm:$0xff]  ;;  %v278_v40 = vpack.c.bf16 %v251_v34, %v250_v33  ;;  %v317_v44 = vld [vmem:[%s8740_s12 + $0xd9] sm:$0xff]  ;;  %v296_v47 = vld [vmem:[%s8740_s12 + $0x31] sm:$0xff]  ;;  %1434 = vmatpush.bf16.msrb.mxu0 %v8606_v57 }
  0x1a   : > { %v231_v38 = vld [vmem:[%s8740_s12 + $0x28] sm:$0xff]  ;;  %v332_v41 = vpack.c.bf16 %v295_v36, %v294_v35  ;;  %v253_v46 = vld [vmem:[%s8740_s12 + $0xd8] sm:$0xff]  ;;  %v232_v49 = vld [vmem:[%s8740_s12 + $0x30] sm:$0xff]  ;;  %v343_v51 = vpack.c.bf16 %v317_v44, %v316_v43 }
  0x1b   : > { %v268_v42 = vpack.c.bf16 %v231_v38, %v230_v37  ;;  %v297_v48 = vld [vmem:[%s8740_s12 + $0x39] sm:$0xff]  ;;  %v279_v52 = vpack.c.bf16 %v253_v46, %v252_v45  ;;  %v318_v58 = vld [vmem:[%s8740_s12 + $0xe1] sm:$0xff]  ;;  %v319_v59 = vld [vmem:[%s8740_s12 + $0xe9] sm:$0xff] }
  0x1c   : > { %v233_v50 = vld [vmem:[%s8740_s12 + $0x38] sm:$0xff]  ;;  %v333_v53 = vpack.c.bf16 %v297_v48, %v296_v47  ;;  %v254_v60 = vld [vmem:[%s8740_s12 + $0xe0] sm:$0xff]  ;;  %v255_v61 = vld [vmem:[%s8740_s12 + $0xe8] sm:$0xff]  ;;  %v344_v2 = vpack.c.bf16 %v319_v59, %v318_v58 }
  0x1d   : > { %v269_v54 = vpack.c.bf16 %v233_v50, %v232_v49  ;;  %v298_v62 = vld [vmem:[%s8740_s12 + $0x41] sm:$0xff]  ;;  %v299_v63 = vld [vmem:[%s8740_s12 + $0x49] sm:$0xff]  ;;  %v280_v3 = vpack.c.bf16 %v255_v61, %v254_v60  ;;  %v320_v6 = vld [vmem:[%s8740_s12 + $0xf1] sm:$0xff] }
  0x1e   : > { %v234_v0 = vld [vmem:[%s8740_s12 + $0x40] sm:$0xff]  ;;  %v235_v1 = vld [vmem:[%s8740_s12 + $0x48] sm:$0xff]  ;;  %v334_v4 = vpack.c.bf16 %v299_v63, %v298_v62  ;;  %v256_v8 = vld [vmem:[%s8740_s12 + $0xf0] sm:$0xff] }
  0x1f   : > { %v270_v5 = vpack.c.bf16 %v235_v1, %v234_v0  ;;  %v321_v7 = vld [vmem:[%s8740_s12 + $0xf9] sm:$0xff]  ;;  %v300_v10 = vld [vmem:[%s8740_s12 + $0x51] sm:$0xff]  ;;  %v322_v18 = vld [vmem:[%s8740_s12 + $0x101] sm:$0xff] }
  0x20   : > { %v257_v9 = vld [vmem:[%s8740_s12 + $0xf8] sm:$0xff]  ;;  %v236_v12 = vld [vmem:[%s8740_s12 + $0x50] sm:$0xff]  ;;  %v345_v14 = vpack.c.bf16 %v321_v7, %v320_v6  ;;  %v258_v20 = vld [vmem:[%s8740_s12 + $0x100] sm:$0xff] }
  0x21   : > { %v301_v11 = vld [vmem:[%s8740_s12 + $0x59] sm:$0xff]  ;;  %v281_v15 = vpack.c.bf16 %v257_v9, %v256_v8  ;;  %v323_v19 = vld [vmem:[%s8740_s12 + $0x109] sm:$0xff]  ;;  %v302_v22 = vld [vmem:[%s8740_s12 + $0x61] sm:$0xff] }
  0x22   : > { %v237_v13 = vld [vmem:[%s8740_s12 + $0x58] sm:$0xff]  ;;  %v335_v16 = vpack.c.bf16 %v301_v11, %v300_v10  ;;  %v259_v21 = vld [vmem:[%s8740_s12 + $0x108] sm:$0xff]  ;;  %v238_v24 = vld [vmem:[%s8740_s12 + $0x60] sm:$0xff]  ;;  %v346_v26 = vpack.c.bf16 %v323_v19, %v322_v18 }
  0x23   : > { %v271_v17 = vpack.c.bf16 %v237_v13, %v236_v12  ;;  %v303_v23 = vld [vmem:[%s8740_s12 + $0x69] sm:$0xff]  ;;  %v325_v31 = vld [vmem:[%s8740_s12 + $0x119] sm:$0xff]  ;;  %v304_v34 = vld [vmem:[%s8740_s12 + $0x71] sm:$0xff] }
  0x24   : > { %v239_v25 = vld [vmem:[%s8740_s12 + $0x68] sm:$0xff]  ;;  %v260_v32 = vld [vmem:[%s8740_s12 + $0x110] sm:$0xff]  ;;  %v261_v33 = vld [vmem:[%s8740_s12 + $0x118] sm:$0xff] }
  0x25   : > { %7795 = vmatmul.msk.bf16.gmra.mxu2 %vm367_vm0, %v341_v27  ;;  %v282_v27 = vpack.c.bf16 %v259_v21, %v258_v20  ;;  %v305_v35 = vld [vmem:[%s8740_s12 + $0x79] sm:$0xff]  ;;  %v240_v36 = vld [vmem:[%s8740_s12 + $0x70] sm:$0xff]  ;;  %v326_v43 = vld [vmem:[%s8740_s12 + $0x121] sm:$0xff] }
  0x26   : > { %7823 = vmatmul.msk.bf16.gmra.mxu3 %vm367_vm0, %v277_v28  ;;  %7785 = vmatmul.msk.bf16.gmra.mxu0 %vm367_vm0, %v331_v29  ;;  %v336_v28 = vpack.c.bf16 %v303_v23, %v302_v22  ;;  %v272_v29 = vpack.c.bf16 %v239_v25, %v238_v24  ;;  %v241_v37 = vld [vmem:[%s8740_s12 + $0x78] sm:$0xff]  ;;  %v327_v44 = vld [vmem:[%s8740_s12 + $0x129] sm:$0xff]  ;;  %v262_v45 = vld [vmem:[%s8740_s12 + $0x120] sm:$0xff] }
  0x27   : > { %7813 = vmatmul.msk.bf16.gmra.mxu1 %vm367_vm0, %v267_v30  ;;  %v324_v30 = vld [vmem:[%s8740_s12 + $0x111] sm:$0xff]  ;;  %v263_v46 = vld [vmem:[%s8740_s12 + $0x128] sm:$0xff]  ;;  %v242_v49 = vld [vmem:[%s8740_s12 + $0x80] sm:$0xff] }
  0x28   : > { %v347_v38 = vpack.c.bf16 %v325_v31, %v324_v30  ;;  %v306_v47 = vld [vmem:[%s8740_s12 + $0x81] sm:$0xff]  ;;  %v307_v48 = vld [vmem:[%s8740_s12 + $0x89] sm:$0xff]  ;;  %v8613_v59 = vld [vmem:[%s11224_s1 + $0x78] sm:$0xff] }
  0x29   : > { %v243_v50 = vld [vmem:[%s8740_s12 + $0x88] sm:$0xff]  ;;  %2291 = vmatpush.bf16.msra.mxu3 %v8613_v59  ;;  %v264_v6 = vld [vmem:[%s8740_s12 + $0x130] sm:$0xff]  ;;  %v265_v7 = vld [vmem:[%s8740_s12 + $0x138] sm:$0xff] }
  0x2a   : > { %v274_v55 = vpack.c.bf16 %v243_v50, %v242_v49  ;;  %v8611_v58 = vld [vmem:[%s11224_s1 + $0x68] sm:$0xff]  ;;  %v308_v8 = vld [vmem:[%s8740_s12 + $0x91] sm:$0xff]  ;;  %v309_v9 = vld [vmem:[%s8740_s12 + $0x99] sm:$0xff] }
  0x2b   : > { %2005 = vmatpush.bf16.msra.mxu2 %v8611_v58  ;;  %v244_v11 = vld [vmem:[%s8740_s12 + $0x90] sm:$0xff]  ;;  %v245_v12 = vld [vmem:[%s8740_s12 + $0x98] sm:$0xff]  ;;  %v1004_v30 = vld [vmem:[%s8740_s12 + $0x3] sm:$0xff] }
  0x2c   : > { %v275_v19 = vpack.c.bf16 %v245_v12, %v244_v11  ;;  %v1005_v31 = vld [vmem:[%s8740_s12 + $0xb] sm:$0xff]  ;;  %v722_v12 = vld [vmem:[%s8740_s12 + $0x22] sm:$0xff] }
  0x2d   : > { %v1578_v58 = vld [vmem:[%s8740_s12 + $0x24] sm:$0xff]  ;;  %v1579_v59 = vld [vmem:[%s8740_s12 + $0x2c] sm:$0xff] }
  0x35   : > { %7796 = vmatmul.msk.bf16.gmra.mxu2 %vm367_vm0, %v342_v39  ;;  %v283_v39 = vpack.c.bf16 %v261_v33, %v260_v32  ;;  %v1290_v32 = vld [vmem:[%s8740_s12 + $0x4] sm:$0xff]  ;;  %v1291_v33 = vld [vmem:[%s8740_s12 + $0xc] sm:$0xff] }
  0x36   : > { %7824 = vmatmul.msk.bf16.gmra.mxu3 %vm367_vm0, %v278_v40  ;;  %7786 = vmatmul.msk.bf16.gmra.mxu0 %vm367_vm0, %v332_v41  ;;  %v337_v40 = vpack.c.bf16 %v305_v35, %v304_v34  ;;  %v273_v41 = vpack.c.bf16 %v241_v37, %v240_v36  ;;  %v1576_v35 = vld [vmem:[%s8740_s12 + $0x14] sm:$0xff]  ;;  %v1577_v36 = vld [vmem:[%s8740_s12 + $0x1c] sm:$0xff] }
  0x37   : > { %7814 = vmatmul.msk.bf16.gmra.mxu1 %vm367_vm0, %v268_v42  ;;  %v8609_v42 = vld [vmem:[%s11224_s1 + $0x58] sm:$0xff] }
  0x38   : > { %1719 = vmatpush.bf16.msrb.mxu1 %v8609_v42 }
  0x45   : > { %7797 = vmatmul.msk.bf16.gmra.mxu2 %vm367_vm0, %v343_v51  ;;  %v348_v51 = vpack.c.bf16 %v327_v44, %v326_v43  ;;  %v1616_v43 = vpack.c.bf16 %v1577_v36, %v1576_v35 }
  0x46   : > { %7825 = vmatmul.msk.bf16.gmra.mxu3 %vm367_vm0, %v279_v52  ;;  %7787 = vmatmul.msk.bf16.gmra.mxu0 %vm367_vm0, %v333_v53  ;;  %v284_v52 = vpack.c.bf16 %v263_v46, %v262_v45  ;;  %v338_v53 = vpack.c.bf16 %v307_v48, %v306_v47 }
  0x47   : > { %7815 = vmatmul.msk.bf16.gmra.mxu1 %vm367_vm0, %v269_v54 }
  0x55   : > { %7798 = vmatmul.msk.bf16.gmra.mxu2 %vm367_vm0, %v344_v2  ;;  %v8608_v2 = vld [vmem:[%s11224_s1 + $0x50] sm:$0xff] }
  0x56   : > { %7826 = vmatmul.msk.bf16.gmra.mxu3 %vm367_vm0, %v280_v3  ;;  %7788 = vmatmul.msk.bf16.gmra.mxu0 %vm367_vm0, %v334_v4  ;;  %v8615_v3 = vld [vmem:[%s11224_s1 + $0x88] sm:$0xff]  ;;  %v328_v4 = vld [vmem:[%s8740_s12 + $0x131] sm:$0xff] }
  0x57   : > { %7816 = vmatmul.msk.bf16.gmra.mxu1 %vm367_vm0, %v270_v5  ;;  %v329_v5 = vld [vmem:[%s8740_s12 + $0x139] sm:$0xff]  ;;  %2577 = vmatpush.bf16.msra.mxu0 %v8615_v3  ;;  %v1617_v3 = vpack.c.bf16 %v1579_v59, %v1578_v58 }
  0x58   : > { %1720 = vmatpush.bf16.msrb.mxu1 %v8608_v2 }
  0x65   : > { %7799 = vmatmul.msk.bf16.gmra.mxu2 %vm367_vm0, %v345_v14  ;;  %v349_v14 = vpack.c.bf16 %v329_v5, %v328_v4 }
  0x66   : > { %7827 = vmatmul.msk.bf16.gmra.mxu3 %vm367_vm0, %v281_v15  ;;  %7789 = vmatmul.msk.bf16.gmra.mxu0 %vm367_vm0, %v335_v16  ;;  %v285_v16 = vpack.c.bf16 %v265_v7, %v264_v6 }
  0x67   : > { %7817 = vmatmul.msk.bf16.gmra.mxu1 %vm367_vm0, %v271_v17  ;;  %v339_v17 = vpack.c.bf16 %v309_v9, %v308_v8 }
  0x75   : > { %7800 = vmatmul.msk.bf16.gmra.mxu2 %vm367_vm0, %v346_v26 }
  0x76   : > { %7828 = vmatmul.msk.bf16.gmra.mxu3 %vm367_vm0, %v282_v27  ;;  %7790 = vmatmul.msk.bf16.gmra.mxu0 %vm367_vm0, %v336_v28  ;;  %v718_v28 = vld [vmem:[%s8740_s12 + $0x2] sm:$0xff] }
  0x77   : > { %7818 = vmatmul.msk.bf16.gmra.mxu1 %vm367_vm0, %v272_v29  ;;  %v719_v29 = vld [vmem:[%s8740_s12 + $0xa] sm:$0xff] }
  0x85   : > { %7801 = vmatmul.msk.bf16.gmra.mxu2 %vm367_vm0, %v347_v38  ;;  %v758_v38 = vpack.c.bf16 %v719_v29, %v718_v28 }
  0x86   : > { %7829 = vmatmul.msk.bf16.gmra.mxu3 %vm367_vm0, %v283_v39  ;;  %7791 = vmatmul.msk.bf16.gmra.mxu0 %vm367_vm0, %v337_v40  ;;  %v1044_v40 = vpack.c.bf16 %v1005_v31, %v1004_v30 }
  0x87   : > { %7819 = vmatmul.msk.bf16.gmra.mxu1 %vm367_vm0, %v273_v41  ;;  %v1330_v41 = vpack.c.bf16 %v1291_v33, %v1290_v32 }
  0x93   : > { %v437_v54 = vpop.f32.mrf.mxu0 }
  0x94   : > { %v618_v56 = vpop.f32.mrf.mxu1 }
  0x95   : > { %v8858_v57 = vadd.f32 %v618_v56, %v437_v54  ;;  %7802 = vmatmul.msk.bf16.gmra.mxu2 %vm367_vm0, %v348_v51  ;;  %v1006_v54 = vld [vmem:[%s8740_s12 + $0x13] sm:$0xff] }
  0x96   : > { %7830 = vmatmul.msk.bf16.gmra.mxu3 %vm367_vm0, %v284_v52  ;;  %7792 = vmatmul.msk.bf16.gmra.mxu0 %vm367_vm0, %v338_v53  ;;  %v720_v52 = vld [vmem:[%s8740_s12 + $0x12] sm:$0xff]  ;;  %v721_v53 = vld [vmem:[%s8740_s12 + $0x1a] sm:$0xff] }
  0x97   : > { %7820 = vmatmul.msk.bf16.gmra.mxu1 %vm367_vm0, %v274_v55  ;;  %v1007_v55 = vld [vmem:[%s8740_s12 + $0x1b] sm:$0xff] }
  0x98   : > { %v487_v60 = vpop.f32.mrf.mxu2 }
  0x99   : > { %v668_v61 = vpop.f32.mrf.mxu3 }
  0x9a   : > { %v8870_v62 = vadd.f32 %v668_v61, %v487_v60  ;;  %v759_v61 = vpack.c.bf16 %v721_v53, %v720_v52 }
  0x9b   : > { %v439_v63 = vpop.f32.mrf.mxu0 }
  0x9c   : > { %v620_v0 = vpop.f32.mrf.mxu1 }
  0x9d   : > { %v8872_v1 = vadd.f32 %v620_v0, %v439_v63  ;;  %v1045_v0 = vpack.c.bf16 %v1007_v55, %v1006_v54 }
  0xa0   : > { %v489_v10 = vpop.f32.mrf.mxu2 }
  0xa1   : > { %v670_v13 = vpop.f32.mrf.mxu3 }
  0xa2   : > { %v8888_v15 = vadd.f32 %v670_v13, %v489_v10  ;;  %v723_v13 = vld [vmem:[%s8740_s12 + $0x2a] sm:$0xff] }
  0xa3   : > { %v442_v18 = vpop.f32.mrf.mxu0 }
  0xa4   : > { %v623_v20 = vpop.f32.mrf.mxu1 }
  0xa5   : > { %v8890_v21 = vadd.f32 %v623_v20, %v442_v18  ;;  %7803 = vmatmul.msk.bf16.gmra.mxu2 %vm367_vm0, %v349_v14  ;;  %v1008_v14 = vld [vmem:[%s8740_s12 + $0x23] sm:$0xff]  ;;  %v1580_v18 = vld [vmem:[%s8740_s12 + $0x34] sm:$0xff] }
  0xa6   : > { %7831 = vmatmul.msk.bf16.gmra.mxu3 %vm367_vm0, %v285_v16  ;;  %7793 = vmatmul.msk.bf16.gmra.mxu0 %vm367_vm0, %v339_v17  ;;  %v1009_v16 = vld [vmem:[%s8740_s12 + $0x2b] sm:$0xff] }
  0xa7   : > { %7821 = vmatmul.msk.bf16.gmra.mxu1 %vm367_vm0, %v275_v19  ;;  %v1581_v19 = vld [vmem:[%s8740_s12 + $0x3c] sm:$0xff] }
  0xa8   : > { %v492_v22 = vpop.f32.mrf.mxu2  ;;  %v1618_v28 = vpack.c.bf16 %v1581_v19, %v1580_v18 }
  0xa9   : > { %v673_v23 = vpop.f32.mrf.mxu3 }
  0xaa   : > { %v8896_v24 = vadd.f32 %v673_v23, %v492_v22  ;;  %v760_v22 = vpack.c.bf16 %v723_v13, %v722_v12 }
  0xab   : > { %v444_v25 = vpop.f32.mrf.mxu0 }
  0xac   : > { %v625_v26 = vpop.f32.mrf.mxu1 }
  0xad   : > { %v8898_v27 = vadd.f32 %v625_v26, %v444_v25  ;;  %v1046_v25 = vpack.c.bf16 %v1009_v16, %v1008_v14 }
  0xb0   : > { %v494_v34 = vpop.f32.mrf.mxu2 }
  0xb1   : > { %v675_v37 = vpop.f32.mrf.mxu3 }
  0xb2   : > { %v8908_v39 = vadd.f32 %v675_v37, %v494_v34  ;;  %v724_v37 = vld [vmem:[%s8740_s12 + $0x32] sm:$0xff] }
  0xb3   : > { %v447_v42 = vpop.f32.mrf.mxu0 }
  0xb4   : > { %v628_v44 = vpop.f32.mrf.mxu1 }
  0xb5   : > { %v8910_v45 = vadd.f32 %v628_v44, %v447_v42  ;;  %7844 = vmatmul.msk.bf16.vlgmr.msrb.gmra.mxu2 %vm367_vm0, %v758_v38  ;;  %v725_v38 = vld [vmem:[%s8740_s12 + $0x3a] sm:$0xff]  ;;  %v1583_v44 = vld [vmem:[%s8740_s12 + $0x4c] sm:$0xff] }
  0xb6   : > { %7876 = vmatmul.msk.bf16.vlgmr.msrb.gmra.mxu3 %vm367_vm0, %v1044_v40  ;;  %7908 = vmatmul.msk.bf16.vlgmr.msrb.gmra.mxu0 %vm367_vm0, %v1330_v41  ;;  %v1010_v40 = vld [vmem:[%s8740_s12 + $0x33] sm:$0xff]  ;;  %v1011_v41 = vld [vmem:[%s8740_s12 + $0x3b] sm:$0xff] }
  0xb7   : > { %7940 = vmatmul.msk.bf16.vlgmr.msrb.gmra.mxu1 %vm367_vm0, %v1616_v43 }
  0xb8   : > { %v497_v46 = vpop.f32.mrf.mxu2 }
  0xb9   : > { %v678_v47 = vpop.f32.mrf.mxu3 }
  0xba   : > { %v8916_v48 = vadd.f32 %v678_v47, %v497_v46  ;;  %v761_v47 = vpack.c.bf16 %v725_v38, %v724_v37  ;;  %v1015_v37 = vld [vmem:[%s8740_s12 + $0x5b] sm:$0xff] }
  0xbb   : > { %v449_v49 = vpop.f32.mrf.mxu0 }
  0xbc   : > { %v630_v50 = vpop.f32.mrf.mxu1 }
  0xbd   : > { %v8918_v51 = vadd.f32 %v630_v50, %v449_v49  ;;  %v1047_v50 = vpack.c.bf16 %v1011_v41, %v1010_v40  ;;  %v1586_v40 = vld [vmem:[%s8740_s12 + $0x64] sm:$0xff]  ;;  %v1587_v41 = vld [vmem:[%s8740_s12 + $0x6c] sm:$0xff] }
  0xc0   : > { %v499_v56 = vpop.f32.mrf.mxu2 }
  0xc1   : > { %v680_v60 = vpop.f32.mrf.mxu3 }
  0xc2   : > { %v8926_v63 = vadd.f32 %v680_v60, %v499_v56 }
  0xc3   : > { %v452_v2 = vpop.f32.mrf.mxu0 }
  0xc4   : > { %v633_v4 = vpop.f32.mrf.mxu1 }
  0xc5   : > { %v8928_v5 = vadd.f32 %v633_v4, %v452_v2  ;;  %7845 = vmatmul.msk.bf16.gmra.mxu2 %vm367_vm0, %v759_v61  ;;  %v726_v2 = vld [vmem:[%s8740_s12 + $0x42] sm:$0xff] }
  0xc6   : > { %7877 = vmatmul.msk.bf16.gmra.mxu3 %vm367_vm0, %v1045_v0  ;;  %7909 = vmatmul.msk.bf16.gmra.mxu0 %vm367_vm0, %v1616_v43  ;;  %v1582_v43 = vld [vmem:[%s8740_s12 + $0x44] sm:$0xff] }
  0xc7   : > { %7941 = vmatmul.msk.bf16.gmra.mxu1 %vm367_vm0, %v1617_v3  ;;  %v1619_v53 = vpack.c.bf16 %v1583_v44, %v1582_v43  ;;  %v1012_v4 = vld [vmem:[%s8740_s12 + $0x43] sm:$0xff] }
  0xc8   : > { %v502_v6 = vpop.f32.mrf.mxu2 }
  0xc9   : > { %v683_v7 = vpop.f32.mrf.mxu3 }
  0xca   : > { %v8934_v8 = vadd.f32 %v683_v7, %v502_v6  ;;  %v1013_v6 = vld [vmem:[%s8740_s12 + $0x4b] sm:$0xff] }
  0xcb   : > { %v454_v9 = vpop.f32.mrf.mxu0  ;;  %v1048_v16 = vpack.c.bf16 %v1013_v6, %v1012_v4  ;;  %v731_v4 = vld [vmem:[%s8740_s12 + $0x6a] sm:$0xff] }
  0xcc   : > { %v635_v10 = vpop.f32.mrf.mxu1  ;;  %v1016_v6 = vld [vmem:[%s8740_s12 + $0x63] sm:$0xff] }
  0xcd   : > { %v8936_v11 = vadd.f32 %v635_v10, %v454_v9  ;;  %v1584_v9 = vld [vmem:[%s8740_s12 + $0x54] sm:$0xff]  ;;  %v1585_v10 = vld [vmem:[%s8740_s12 + $0x5c] sm:$0xff] }
  0xce   : > { %v1620_v18 = vpack.c.bf16 %v1585_v10, %v1584_v9  ;;  %v1588_v10 = vld [vmem:[%s8740_s12 + $0x74] sm:$0xff] }
  0xd0   : > { %v504_v17 = vpop.f32.mrf.mxu2 }
  0xd1   : > { %v685_v20 = vpop.f32.mrf.mxu3 }
  0xd2   : > { %v8944_v23 = vadd.f32 %v685_v20, %v504_v17 }
  0xd3   : > { %v457_v26 = vpop.f32.mrf.mxu0 }
  0xd4   : > { %v638_v29 = vpop.f32.mrf.mxu1 }
  0xd5   : > { %v8946_v30 = vadd.f32 %v638_v29, %v457_v26  ;;  %7846 = vmatmul.msk.bf16.gmra.mxu2 %vm367_vm0, %v760_v22 }
  0xd6   : > { %7878 = vmatmul.msk.bf16.gmra.mxu3 %vm367_vm0, %v1046_v25  ;;  %7910 = vmatmul.msk.bf16.gmra.mxu0 %vm367_vm0, %v1617_v3  ;;  %v727_v3 = vld [vmem:[%s8740_s12 + $0x4a] sm:$0xff] }
  0xd7   : > { %7942 = vmatmul.msk.bf16.gmra.mxu1 %vm367_vm0, %v1618_v28  ;;  %v762_v13 = vpack.c.bf16 %v727_v3, %v726_v2  ;;  %v730_v3 = vld [vmem:[%s8740_s12 + $0x62] sm:$0xff] }
  0xd8   : > { %v507_v31 = vpop.f32.mrf.mxu2 }
  0xd9   : > { %v688_v32 = vpop.f32.mrf.mxu3 }
  0xda   : > { %v8952_v33 = vadd.f32 %v688_v32, %v507_v31  ;;  %v728_v32 = vld [vmem:[%s8740_s12 + $0x52] sm:$0xff] }
  0xdb   : > { %v459_v34 = vpop.f32.mrf.mxu0 }
  0xdc   : > { %v640_v35 = vpop.f32.mrf.mxu1 }
  0xdd   : > { %v8954_v36 = vadd.f32 %v640_v35, %v459_v34  ;;  %v729_v34 = vld [vmem:[%s8740_s12 + $0x5a] sm:$0xff] }
  0xde   : > { %v1014_v35 = vld [vmem:[%s8740_s12 + $0x53] sm:$0xff]  ;;  %v763_v43 = vpack.c.bf16 %v729_v34, %v728_v32 }
  0xe0   : > { %v509_v42 = vpop.f32.mrf.mxu2 }
  0xe1   : > { %v690_v46 = vpop.f32.mrf.mxu3 }
  0xe2   : > { %v8962_v49 = vadd.f32 %v690_v46, %v509_v42  ;;  %v1049_v46 = vpack.c.bf16 %v1015_v37, %v1014_v35 }
  0xe3   : > { %v462_v52 = vpop.f32.mrf.mxu0 }
  0xe4   : > { %v643_v54 = vpop.f32.mrf.mxu1 }
  0xe5   : > { %v8964_v55 = vadd.f32 %v643_v54, %v462_v52  ;;  %7847 = vmatmul.msk.bf16.gmra.mxu2 %vm367_vm0, %v761_v47 }
  0xe6   : > { %7879 = vmatmul.msk.bf16.gmra.mxu3 %vm367_vm0, %v1047_v50  ;;  %7911 = vmatmul.msk.bf16.gmra.mxu0 %vm367_vm0, %v1618_v28  ;;  %v1621_v50 = vpack.c.bf16 %v1587_v41, %v1586_v40  ;;  %v732_v40 = vld [vmem:[%s8740_s12 + $0x72] sm:$0xff]  ;;  %v733_v41 = vld [vmem:[%s8740_s12 + $0x7a] sm:$0xff] }
  0xe7   : > { %7943 = vmatmul.msk.bf16.gmra.mxu1 %vm367_vm0, %v1619_v53 }
  0xe8   : > { %v512_v56 = vpop.f32.mrf.mxu2 }
  0xe9   : > { %v693_v58 = vpop.f32.mrf.mxu3 }
  0xea   : > { %v8970_v59 = vadd.f32 %v693_v58, %v512_v56 }
  0xeb   : > { %v464_v60 = vpop.f32.mrf.mxu0 }
  0xec   : > { %v645_v61 = vpop.f32.mrf.mxu1 }
  0xed   : > { %v8972_v0 = vadd.f32 %v645_v61, %v464_v60 }
  0xf0   : > { %v514_v7 = vpop.f32.mrf.mxu2 }
  0xf1   : > { %v695_v12 = vpop.f32.mrf.mxu3 }
  0xf2   : > { %v8980_v14 = vadd.f32 %v695_v12, %v514_v7  ;;  %v1017_v7 = vld [vmem:[%s8740_s12 + $0x6b] sm:$0xff]  ;;  %v1589_v12 = vld [vmem:[%s8740_s12 + $0x7c] sm:$0xff] }
  0xf3   : > { %v467_v17 = vpop.f32.mrf.mxu0 }
  0xf4   : > { %v648_v19 = vpop.f32.mrf.mxu1 }
  0xf5   : > { %v8982_v20 = vadd.f32 %v648_v19, %v467_v17  ;;  %7848 = vmatmul.msk.bf16.gmra.mxu2 %vm367_vm0, %v762_v13 }
  0xf6   : > { %7880 = vmatmul.msk.bf16.gmra.mxu3 %vm367_vm0, %v1048_v16  ;;  %7912 = vmatmul.msk.bf16.gmra.mxu0 %vm367_vm0, %v1619_v53  ;;  %v764_v16 = vpack.c.bf16 %v731_v4, %v730_v3 }
  0xf7   : > { %7944 = vmatmul.msk.bf16.gmra.mxu1 %vm367_vm0, %v1620_v18 }
  0xf8   : > { %v517_v22 = vpop.f32.mrf.mxu2 }
  0xf9   : > { %v698_v25 = vpop.f32.mrf.mxu3 }
  0xfa   : > { %v8988_v26 = vadd.f32 %v698_v25, %v517_v22  ;;  %v1622_v22 = vpack.c.bf16 %v1589_v12, %v1588_v10 }
  0xfb   : > { %v469_v28 = vpop.f32.mrf.mxu0 }
  0xfc   : > { %v650_v29 = vpop.f32.mrf.mxu1 }
  0xfd   : > { %v8990_v31 = vadd.f32 %v650_v29, %v469_v28 }
 0x100   : > { %v519_v38 = vpop.f32.mrf.mxu2 }
 0x101   : > { %v700_v42 = vpop.f32.mrf.mxu3 }
 0x102   : > { %v8998_v44 = vadd.f32 %v700_v42, %v519_v38  ;;  %v1018_v42 = vld [vmem:[%s8740_s12 + $0x73] sm:$0xff] }
 0x103   : > { %v472_v47 = vpop.f32.mrf.mxu0 }
 0x104   : > { %v653_v52 = vpop.f32.mrf.mxu1 }
 0x105   : > { %v9000_v53 = vadd.f32 %v653_v52, %v472_v47  ;;  %7849 = vmatmul.msk.bf16.gmra.mxu2 %vm367_vm0, %v763_v43  ;;  %v1019_v43 = vld [vmem:[%s8740_s12 + $0x7b] sm:$0xff]  ;;  %v1590_v47 = vld [vmem:[%s8740_s12 + $0x84] sm:$0xff]  ;;  %v1591_v52 = vld [vmem:[%s8740_s12 + $0x8c] sm:$0xff] }
 0x106   : > { %7881 = vmatmul.msk.bf16.gmra.mxu3 %vm367_vm0, %v1049_v46  ;;  %7913 = vmatmul.msk.bf16.gmra.mxu0 %vm367_vm0, %v1620_v18  ;;  %v1050_v18 = vpack.c.bf16 %v1017_v7, %v1016_v6  ;;  %v1623_v3 = vpack.c.bf16 %v1591_v52, %v1590_v47 }
 0x107   : > { %7945 = vmatmul.msk.bf16.gmra.mxu1 %vm367_vm0, %v1621_v50 }
 0x108   : > { %v522_v54 = vpop.f32.mrf.mxu2 }
 0x109   : > { %v703_v56 = vpop.f32.mrf.mxu3 }
 0x10a   : > { %v9006_v58 = vadd.f32 %v703_v56, %v522_v54  ;;  %v765_v56 = vpack.c.bf16 %v733_v41, %v732_v40 }
 0x10b   : > { %v474_v60 = vpop.f32.mrf.mxu0 }
 0x10c   : > { %v655_v61 = vpop.f32.mrf.mxu1 }
 0x10d   : > { %v9008_v2 = vadd.f32 %v655_v61, %v474_v60  ;;  %v1051_v60 = vpack.c.bf16 %v1019_v43, %v1018_v42 }
 0x110   : > { %v524_v9 = vpop.f32.mrf.mxu2 }
 0x111   : > { %v705_v13 = vpop.f32.mrf.mxu3 }
 0x112   : > { %v9016_v17 = vadd.f32 %v705_v13, %v524_v9 }
 0x113   : > { %v477_v19 = vpop.f32.mrf.mxu0 }
 0x114   : > { %v658_v25 = vpop.f32.mrf.mxu1 }
 0x115   : > { %v9018_v28 = vadd.f32 %v658_v25, %v477_v19  ;;  %7850 = vmatmul.msk.bf16.gmra.mxu2 %vm367_vm0, %v764_v16  ;;  %v735_v19 = vld [vmem:[%s8740_s12 + $0x8a] sm:$0xff] }
 0x116   : > { %7882 = vmatmul.msk.bf16.gmra.mxu3 %vm367_vm0, %v1050_v18  ;;  %7914 = vmatmul.msk.bf16.gmra.mxu0 %vm367_vm0, %v1621_v50  ;;  %v734_v18 = vld [vmem:[%s8740_s12 + $0x82] sm:$0xff] }
 0x117   : > { %7946 = vmatmul.msk.bf16.gmra.mxu1 %vm367_vm0, %v1622_v22  ;;  %v1020_v25 = vld [vmem:[%s8740_s12 + $0x83] sm:$0xff]  ;;  %v766_v41 = vpack.c.bf16 %v735_v19, %v734_v18  ;;  %v737_v18 = vld [vmem:[%s8740_s12 + $0x9a] sm:$0xff] }
 0x118   : > { %v527_v29 = vpop.f32.mrf.mxu2 }
 0x119   : > { %v708_v32 = vpop.f32.mrf.mxu3 }
 0x11a   : > { %v9024_v34 = vadd.f32 %v708_v32, %v527_v29  ;;  %v1021_v29 = vld [vmem:[%s8740_s12 + $0x8b] sm:$0xff]  ;;  %v8617_v32 = vld [vmem:[%s11224_s1 + $0x98] sm:$0xff] }
 0x11b   : > { %v479_v35 = vpop.f32.mrf.mxu0  ;;  %2863 = vmatpush.bf16.msra.mxu1 %v8617_v32  ;;  %v1052_v43 = vpack.c.bf16 %v1021_v29, %v1020_v25  ;;  %v1022_v25 = vld [vmem:[%s8740_s12 + $0x93] sm:$0xff]  ;;  %v1023_v29 = vld [vmem:[%s8740_s12 + $0x9b] sm:$0xff] }
 0x11c   : > { %v660_v37 = vpop.f32.mrf.mxu1  ;;  %v8614_v32 = vld [vmem:[%s11224_s1 + $0x80] sm:$0xff] }
 0x11d   : > { %v9026_v38 = vadd.f32 %v660_v37, %v479_v35  ;;  %v1593_v37 = vld [vmem:[%s8740_s12 + $0x9c] sm:$0xff]  ;;  %2578 = vmatpush.bf16.msra.mxu0 %v8614_v32 }
 0x120   : > { %v529_v46 = vpop.f32.mrf.mxu2 }
 0x121   : > { %v710_v54 = vpop.f32.mrf.mxu3 }
 0x122   : > { %v9034_v50 = vadd.f32 %v710_v54, %v529_v46  ;;  %v8610_v54 = vld [vmem:[%s11224_s1 + $0x60] sm:$0xff] }
 0x123   : > { %v482_v61 = vpop.f32.mrf.mxu0  ;;  %2006 = vmatpush.bf16.msra.mxu2 %v8610_v54 }
 0x124   : > { %v663_v4 = vpop.f32.mrf.mxu1 }
 0x125   : > { %v9036_v6 = vadd.f32 %v663_v4, %v482_v61  ;;  %7851 = vmatmul.msk.bf16.gmra.mxu2 %vm367_vm0, %v765_v56  ;;  %v8612_v56 = vld [vmem:[%s11224_s1 + $0x70] sm:$0xff] }
 0x126   : > { %7883 = vmatmul.msk.bf16.gmra.mxu3 %vm367_vm0, %v1051_v60  ;;  %7915 = vmatmul.msk.bf16.gmra.mxu0 %vm367_vm0, %v1622_v22  ;;  %v1592_v22 = vld [vmem:[%s8740_s12 + $0x94] sm:$0xff] }
 0x127   : > { %7947 = vmatmul.msk.bf16.gmra.mxu1 %vm367_vm0, %v1623_v3  ;;  %v1624_v47 = vpack.c.bf16 %v1593_v37, %v1592_v22  ;;  %2292 = vmatpush.bf16.msra.mxu3 %v8612_v56  ;;  %v1594_v22 = vld [vmem:[%s8740_s12 + $0xa4] sm:$0xff]  ;;  %v1595_v37 = vld [vmem:[%s8740_s12 + $0xac] sm:$0xff] }
 0x128   : > { %v532_v7 = vpop.f32.mrf.mxu2 }
 0x129   : > { %v713_v9 = vpop.f32.mrf.mxu3 }
 0x12a   : > { %v9042_v10 = vadd.f32 %v713_v9, %v532_v7 }
 0x12b   : > { %v484_v12 = vpop.f32.mrf.mxu0 }
 0x12c   : > { %v665_v13 = vpop.f32.mrf.mxu1 }
 0x12d   : > { %v9044_v16 = vadd.f32 %v665_v13, %v484_v12  ;;  %v736_v13 = vld [vmem:[%s8740_s12 + $0x92] sm:$0xff] }
 0x130   : > { %v534_v35 = vpop.f32.mrf.mxu2 }
 0x131   : > { %v715_v40 = vpop.f32.mrf.mxu3 }
 0x132   : > { %v9055_v42 = vadd.f32 %v715_v40, %v534_v35 }
 0x133   : > { %v1436_v46 = vpop.f32.mrf.mxu0 }
 0x134   : > { %v1722_v52 = vpop.f32.mrf.mxu1 }
 0x135   : > { %7852 = vmatmul.msk.bf16.gmra.mxu2 %vm367_vm0, %v766_v41  ;;  %v767_v41 = vpack.c.bf16 %v737_v18, %v736_v13 }
 0x136   : > { %7884 = vmatmul.msk.bf16.gmra.mxu3 %vm367_vm0, %v1052_v43  ;;  %7916 = vmatmul.msk.bf16.gmra.mxu0 %vm367_vm0, %v1623_v3  ;;  %v1053_v43 = vpack.c.bf16 %v1023_v29, %v1022_v25  ;;  %v739_v29 = vld [vmem:[%s8740_s12 + $0xaa] sm:$0xff] }
 0x137   : > { %7948 = vmatmul.msk.bf16.gmra.mxu1 %vm367_vm0, %v1624_v47 }
 0x138   : > { %v864_v60 = vpop.f32.mrf.mxu2 }
 0x139   : > { %v964_v61 = vadd.f32 %v864_v60, %v8858_v57  ;;  %v1150_v4 = vpop.f32.mrf.mxu3 }
 0x13b   : > { %v1250_v3 = vadd.f32 %v1150_v4, %v964_v61  ;;  %v1438_v7 = vpop.f32.mrf.mxu0 }
 0x13c   : > { %v1724_v9 = vpop.f32.mrf.mxu1 }
 0x13d   : > { %v1536_v12 = vadd.f32 %v1436_v46, %v1250_v3 }
 0x13f   : > { %v9070_v19 = vadd.f32 %v1722_v52, %v1536_v12  ;;  %v1625_v52 = vpack.c.bf16 %v1595_v37, %v1594_v22  ;;  %v1597_v37 = vld [vmem:[%s8740_s12 + $0xbc] sm:$0xff] }
 0x140   : > { %v866_v35 = vpop.f32.mrf.mxu2 }
 0x141   : > { %v965_v57 = vadd.f32 %v866_v35, %v8872_v1  ;;  %v1152_v40 = vpop.f32.mrf.mxu3  ;;  %v1024_v35 = vld [vmem:[%s8740_s12 + $0xa3] sm:$0xff] }
 0x143   : > { %v1251_v46 = vadd.f32 %v1152_v40, %v965_v57  ;;  %v1441_v54 = vpop.f32.mrf.mxu0 }
 0x144   : > { %v1727_v56 = vpop.f32.mrf.mxu1 }
 0x145   : > { %7853 = vmatmul.msk.bf16.gmra.mxu2 %vm367_vm0, %v767_v41  ;;  %v1537_v60 = vadd.f32 %v1438_v7, %v1251_v46  ;;  %v738_v7 = vld [vmem:[%s8740_s12 + $0xa2] sm:$0xff] }
 0x146   : > { %7885 = vmatmul.msk.bf16.gmra.mxu3 %vm367_vm0, %v1053_v43  ;;  %7917 = vmatmul.msk.bf16.gmra.mxu0 %vm367_vm0, %v1624_v47  ;;  %v1025_v47 = vld [vmem:[%s8740_s12 + $0xab] sm:$0xff]  ;;  %v768_v41 = vpack.c.bf16 %v739_v29, %v738_v7 }
 0x147   : > { %v9083_v1 = vadd.f32 %v1724_v9, %v1537_v60  ;;  %7949 = vmatmul.msk.bf16.gmra.mxu1 %vm367_vm0, %v1625_v52  ;;  %v1596_v9 = vld [vmem:[%s8740_s12 + $0xb4] sm:$0xff]  ;;  %v1054_v43 = vpack.c.bf16 %v1025_v47, %v1024_v35 }
 0x148   : > { %v869_v61 = vpop.f32.mrf.mxu2  ;;  %v1626_v60 = vpack.c.bf16 %v1597_v37, %v1596_v9  ;;  %v741_v35 = vld [vmem:[%s8740_s12 + $0xba] sm:$0xff]  ;;  %v1599_v37 = vld [vmem:[%s8740_s12 + $0xcc] sm:$0xff] }
 0x149   : > { %v966_v4 = vadd.f32 %v869_v61, %v8890_v21  ;;  %v1155_v3 = vpop.f32.mrf.mxu3 }
 0x14b   : > { %v1252_v12 = vadd.f32 %v1155_v3, %v966_v4  ;;  %v1443_v13 = vpop.f32.mrf.mxu0 }
 0x14c   : > { %v1729_v18 = vpop.f32.mrf.mxu1 }
 0x14d   : > { %v1538_v25 = vadd.f32 %v1441_v54, %v1252_v12 }
 0x14f   : > { %v9089_v32 = vadd.f32 %v1727_v56, %v1538_v25 }
 0x150   : > { %v871_v22 = vpop.f32.mrf.mxu2 }
 0x151   : > { %v967_v57 = vadd.f32 %v871_v22, %v8898_v27  ;;  %v1157_v40 = vpop.f32.mrf.mxu3  ;;  %v1026_v22 = vld [vmem:[%s8740_s12 + $0xb3] sm:$0xff] }
 0x153   : > { %v1253_v21 = vadd.f32 %v1157_v40, %v967_v57  ;;  %v1446_v46 = vpop.f32.mrf.mxu0 }
 0x154   : > { %v1732_v54 = vpop.f32.mrf.mxu1 }
 0x155   : > { %7854 = vmatmul.msk.bf16.gmra.mxu2 %vm367_vm0, %v768_v41  ;;  %v1539_v56 = vadd.f32 %v1443_v13, %v1253_v21  ;;  %v740_v13 = vld [vmem:[%s8740_s12 + $0xb2] sm:$0xff] }
 0x156   : > { %7886 = vmatmul.msk.bf16.gmra.mxu3 %vm367_vm0, %v1054_v43  ;;  %7918 = vmatmul.msk.bf16.gmra.mxu0 %vm367_vm0, %v1625_v52  ;;  %v1027_v52 = vld [vmem:[%s8740_s12 + $0xbb] sm:$0xff]  ;;  %v769_v41 = vpack.c.bf16 %v741_v35, %v740_v13 }
 0x157   : > { %v9099_v27 = vadd.f32 %v1729_v18, %v1539_v56  ;;  %7950 = vmatmul.msk.bf16.gmra.mxu1 %vm367_vm0, %v1626_v60  ;;  %v1598_v18 = vld [vmem:[%s8740_s12 + $0xc4] sm:$0xff]  ;;  %v1055_v43 = vpack.c.bf16 %v1027_v52, %v1026_v22 }
 0x158   : > { %v874_v61 = vpop.f32.mrf.mxu2  ;;  %v1627_v56 = vpack.c.bf16 %v1599_v37, %v1598_v18  ;;  %v743_v22 = vld [vmem:[%s8740_s12 + $0xca] sm:$0xff]  ;;  %v1601_v37 = vld [vmem:[%s8740_s12 + $0xdc] sm:$0xff] }
 0x159   : > { %v968_v4 = vadd.f32 %v874_v61, %v8910_v45  ;;  %v1160_v3 = vpop.f32.mrf.mxu3 }
 0x15b   : > { %v1254_v12 = vadd.f32 %v1160_v3, %v968_v4  ;;  %v1448_v25 = vpop.f32.mrf.mxu0 }
 0x15c   : > { %v1734_v7 = vpop.f32.mrf.mxu1 }
 0x15d   : > { %v1540_v29 = vadd.f32 %v1446_v46, %v1254_v12 }
 0x15f   : > { %v9105_v47 = vadd.f32 %v1732_v54, %v1540_v29 }
 0x160   : > { %v876_v9 = vpop.f32.mrf.mxu2 }
 0x161   : > { %v969_v57 = vadd.f32 %v876_v9, %v8918_v51  ;;  %v1162_v40 = vpop.f32.mrf.mxu3  ;;  %v1028_v9 = vld [vmem:[%s8740_s12 + $0xc3] sm:$0xff] }
 0x163   : > { %v1255_v45 = vadd.f32 %v1162_v40, %v969_v57  ;;  %v1451_v21 = vpop.f32.mrf.mxu0 }
 0x164   : > { %v1737_v46 = vpop.f32.mrf.mxu1 }
 0x165   : > { %7855 = vmatmul.msk.bf16.gmra.mxu2 %vm367_vm0, %v769_v41  ;;  %v1541_v54 = vadd.f32 %v1448_v25, %v1255_v45  ;;  %v742_v25 = vld [vmem:[%s8740_s12 + $0xc2] sm:$0xff] }
 0x166   : > { %7887 = vmatmul.msk.bf16.gmra.mxu3 %vm367_vm0, %v1055_v43  ;;  %7919 = vmatmul.msk.bf16.gmra.mxu0 %vm367_vm0, %v1626_v60  ;;  %v1029_v60 = vld [vmem:[%s8740_s12 + $0xcb] sm:$0xff]  ;;  %v770_v41 = vpack.c.bf16 %v743_v22, %v742_v25 }
 0x167   : > { %v9115_v51 = vadd.f32 %v1734_v7, %v1541_v54  ;;  %7951 = vmatmul.msk.bf16.gmra.mxu1 %vm367_vm0, %v1627_v56  ;;  %v1600_v7 = vld [vmem:[%s8740_s12 + $0xd4] sm:$0xff]  ;;  %v1056_v43 = vpack.c.bf16 %v1029_v60, %v1028_v9 }
 0x168   : > { %v879_v61 = vpop.f32.mrf.mxu2  ;;  %v1628_v54 = vpack.c.bf16 %v1601_v37, %v1600_v7  ;;  %v745_v9 = vld [vmem:[%s8740_s12 + $0xda] sm:$0xff]  ;;  %v1603_v37 = vld [vmem:[%s8740_s12 + $0xec] sm:$0xff] }
 0x169   : > { %v970_v4 = vadd.f32 %v879_v61, %v8928_v5  ;;  %v1165_v3 = vpop.f32.mrf.mxu3 }
 0x16b   : > { %v1256_v12 = vadd.f32 %v1165_v3, %v970_v4  ;;  %v1453_v29 = vpop.f32.mrf.mxu0 }
 0x16c   : > { %v1739_v13 = vpop.f32.mrf.mxu1 }
 0x16d   : > { %v1542_v35 = vadd.f32 %v1451_v21, %v1256_v12 }
 0x16f   : > { %v9121_v52 = vadd.f32 %v1737_v46, %v1542_v35 }
 0x170   : > { %v881_v18 = vpop.f32.mrf.mxu2 }
 0x171   : > { %v971_v57 = vadd.f32 %v881_v18, %v8936_v11  ;;  %v1167_v40 = vpop.f32.mrf.mxu3  ;;  %v1030_v18 = vld [vmem:[%s8740_s12 + $0xd3] sm:$0xff] }
 0x173   : > { %v1257_v5 = vadd.f32 %v1167_v40, %v971_v57  ;;  %v1456_v45 = vpop.f32.mrf.mxu0 }
 0x174   : > { %v1742_v21 = vpop.f32.mrf.mxu1 }
 0x175   : > { %7856 = vmatmul.msk.bf16.gmra.mxu2 %vm367_vm0, %v770_v41  ;;  %v1543_v46 = vadd.f32 %v1453_v29, %v1257_v5  ;;  %v744_v29 = vld [vmem:[%s8740_s12 + $0xd2] sm:$0xff] }
 0x176   : > { %7888 = vmatmul.msk.bf16.gmra.mxu3 %vm367_vm0, %v1056_v43  ;;  %7920 = vmatmul.msk.bf16.gmra.mxu0 %vm367_vm0, %v1627_v56  ;;  %v1031_v56 = vld [vmem:[%s8740_s12 + $0xdb] sm:$0xff]  ;;  %v771_v41 = vpack.c.bf16 %v745_v9, %v744_v29 }
 0x177   : > { %v9131_v11 = vadd.f32 %v1739_v13, %v1543_v46  ;;  %7952 = vmatmul.msk.bf16.gmra.mxu1 %vm367_vm0, %v1628_v54  ;;  %v1602_v13 = vld [vmem:[%s8740_s12 + $0xe4] sm:$0xff]  ;;  %v1057_v43 = vpack.c.bf16 %v1031_v56, %v1030_v18 }
 0x178   : > { %v884_v61 = vpop.f32.mrf.mxu2  ;;  %v1629_v46 = vpack.c.bf16 %v1603_v37, %v1602_v13  ;;  %v747_v18 = vld [vmem:[%s8740_s12 + $0xea] sm:$0xff]  ;;  %v1605_v37 = vld [vmem:[%s8740_s12 + $0xfc] sm:$0xff] }
 0x179   : > { %v972_v4 = vadd.f32 %v884_v61, %v8946_v30  ;;  %v1170_v3 = vpop.f32.mrf.mxu3 }
 0x17b   : > { %v1258_v12 = vadd.f32 %v1170_v3, %v972_v4  ;;  %v1458_v35 = vpop.f32.mrf.mxu0 }
 0x17c   : > { %v1744_v25 = vpop.f32.mrf.mxu1 }
 0x17d   : > { %v1544_v22 = vadd.f32 %v1456_v45, %v1258_v12 }
 0x17f   : > { %v9137_v60 = vadd.f32 %v1742_v21, %v1544_v22 }
 0x180   : > { %v886_v7 = vpop.f32.mrf.mxu2 }
 0x181   : > { %v973_v57 = vadd.f32 %v886_v7, %v8954_v36  ;;  %v1172_v40 = vpop.f32.mrf.mxu3  ;;  %v1032_v7 = vld [vmem:[%s8740_s12 + $0xe3] sm:$0xff] }
 0x183   : > { %v1259_v30 = vadd.f32 %v1172_v40, %v973_v57  ;;  %v1461_v5 = vpop.f32.mrf.mxu0 }
 0x184   : > { %v1747_v45 = vpop.f32.mrf.mxu1 }
 0x185   : > { %7857 = vmatmul.msk.bf16.gmra.mxu2 %vm367_vm0, %v771_v41  ;;  %v1545_v21 = vadd.f32 %v1458_v35, %v1259_v30  ;;  %v746_v35 = vld [vmem:[%s8740_s12 + $0xe2] sm:$0xff] }
 0x186   : > { %7889 = vmatmul.msk.bf16.gmra.mxu3 %vm367_vm0, %v1057_v43  ;;  %7921 = vmatmul.msk.bf16.gmra.mxu0 %vm367_vm0, %v1628_v54  ;;  %v1033_v54 = vld [vmem:[%s8740_s12 + $0xeb] sm:$0xff]  ;;  %v772_v41 = vpack.c.bf16 %v747_v18, %v746_v35 }
 0x187   : > { %v9147_v36 = vadd.f32 %v1744_v25, %v1545_v21  ;;  %7953 = vmatmul.msk.bf16.gmra.mxu1 %vm367_vm0, %v1629_v46  ;;  %v1604_v25 = vld [vmem:[%s8740_s12 + $0xf4] sm:$0xff]  ;;  %v1058_v43 = vpack.c.bf16 %v1033_v54, %v1032_v7 }
 0x188   : > { %v889_v61 = vpop.f32.mrf.mxu2  ;;  %v1630_v21 = vpack.c.bf16 %v1605_v37, %v1604_v25  ;;  %v749_v7 = vld [vmem:[%s8740_s12 + $0xfa] sm:$0xff]  ;;  %v1607_v37 = vld [vmem:[%s8740_s12 + $0x10c] sm:$0xff] }
 0x189   : > { %v974_v4 = vadd.f32 %v889_v61, %v8964_v55  ;;  %v1175_v3 = vpop.f32.mrf.mxu3 }
 0x18b   : > { %v1260_v12 = vadd.f32 %v1175_v3, %v974_v4  ;;  %v1463_v22 = vpop.f32.mrf.mxu0 }
 0x18c   : > { %v1749_v29 = vpop.f32.mrf.mxu1 }
 0x18d   : > { %v1546_v9 = vadd.f32 %v1461_v5, %v1260_v12 }
 0x18f   : > { %v9153_v56 = vadd.f32 %v1747_v45, %v1546_v9 }
 0x190   : > { %v891_v13 = vpop.f32.mrf.mxu2 }
 0x191   : > { %v975_v57 = vadd.f32 %v891_v13, %v8972_v0  ;;  %v1177_v40 = vpop.f32.mrf.mxu3  ;;  %v1034_v13 = vld [vmem:[%s8740_s12 + $0xf3] sm:$0xff] }
 0x193   : > { %v1261_v55 = vadd.f32 %v1177_v40, %v975_v57  ;;  %v1466_v30 = vpop.f32.mrf.mxu0 }
 0x194   : > { %v1752_v5 = vpop.f32.mrf.mxu1 }
 0x195   : > { %7858 = vmatmul.msk.bf16.gmra.mxu2 %vm367_vm0, %v772_v41  ;;  %v1547_v45 = vadd.f32 %v1463_v22, %v1261_v55  ;;  %v748_v22 = vld [vmem:[%s8740_s12 + $0xf2] sm:$0xff] }
 0x196   : > { %7890 = vmatmul.msk.bf16.gmra.mxu3 %vm367_vm0, %v1058_v43  ;;  %7922 = vmatmul.msk.bf16.gmra.mxu0 %vm367_vm0, %v1629_v46  ;;  %v1035_v46 = vld [vmem:[%s8740_s12 + $0xfb] sm:$0xff]  ;;  %v773_v41 = vpack.c.bf16 %v749_v7, %v748_v22 }
 0x197   : > { %v9163_v0 = vadd.f32 %v1749_v29, %v1547_v45  ;;  %7954 = vmatmul.msk.bf16.gmra.mxu1 %vm367_vm0, %v1630_v21  ;;  %v1606_v29 = vld [vmem:[%s8740_s12 + $0x104] sm:$0xff]  ;;  %v1059_v43 = vpack.c.bf16 %v1035_v46, %v1034_v13 }
 0x198   : > { %v894_v61 = vpop.f32.mrf.mxu2  ;;  %v1631_v45 = vpack.c.bf16 %v1607_v37, %v1606_v29  ;;  %v751_v13 = vld [vmem:[%s8740_s12 + $0x10a] sm:$0xff]  ;;  %v1609_v37 = vld [vmem:[%s8740_s12 + $0x11c] sm:$0xff] }
 0x199   : > { %v976_v4 = vadd.f32 %v894_v61, %v8982_v20  ;;  %v1180_v3 = vpop.f32.mrf.mxu3 }
 0x19b   : > { %v1262_v12 = vadd.f32 %v1180_v3, %v976_v4  ;;  %v1468_v9 = vpop.f32.mrf.mxu0 }
 0x19c   : > { %v1754_v35 = vpop.f32.mrf.mxu1 }
 0x19d   : > { %v1548_v18 = vadd.f32 %v1466_v30, %v1262_v12 }
 0x19f   : > { %v9169_v54 = vadd.f32 %v1752_v5, %v1548_v18 }
 0x1a0   : > { %v896_v25 = vpop.f32.mrf.mxu2 }
 0x1a1   : > { %v977_v57 = vadd.f32 %v896_v25, %v8990_v31  ;;  %v1182_v40 = vpop.f32.mrf.mxu3  ;;  %v1036_v25 = vld [vmem:[%s8740_s12 + $0x103] sm:$0xff] }
 0x1a3   : > { %v1263_v20 = vadd.f32 %v1182_v40, %v977_v57  ;;  %v1471_v55 = vpop.f32.mrf.mxu0 }
 0x1a4   : > { %v1757_v30 = vpop.f32.mrf.mxu1 }
 0x1a5   : > { %7859 = vmatmul.msk.bf16.gmra.mxu2 %vm367_vm0, %v773_v41  ;;  %v1549_v5 = vadd.f32 %v1468_v9, %v1263_v20  ;;  %v750_v9 = vld [vmem:[%s8740_s12 + $0x102] sm:$0xff] }
 0x1a6   : > { %7891 = vmatmul.msk.bf16.gmra.mxu3 %vm367_vm0, %v1059_v43  ;;  %7923 = vmatmul.msk.bf16.gmra.mxu0 %vm367_vm0, %v1630_v21  ;;  %v1037_v21 = vld [vmem:[%s8740_s12 + $0x10b] sm:$0xff]  ;;  %v774_v41 = vpack.c.bf16 %v751_v13, %v750_v9 }
 0x1a7   : > { %v9179_v31 = vadd.f32 %v1754_v35, %v1549_v5  ;;  %7955 = vmatmul.msk.bf16.gmra.mxu1 %vm367_vm0, %v1631_v45  ;;  %v1608_v35 = vld [vmem:[%s8740_s12 + $0x114] sm:$0xff]  ;;  %v1060_v43 = vpack.c.bf16 %v1037_v21, %v1036_v25 }
 0x1a8   : > { %v899_v61 = vpop.f32.mrf.mxu2  ;;  %v1632_v5 = vpack.c.bf16 %v1609_v37, %v1608_v35  ;;  %v753_v25 = vld [vmem:[%s8740_s12 + $0x11a] sm:$0xff]  ;;  %v1611_v37 = vld [vmem:[%s8740_s12 + $0x12c] sm:$0xff] }
 0x1a9   : > { %v978_v4 = vadd.f32 %v899_v61, %v9000_v53  ;;  %v1185_v3 = vpop.f32.mrf.mxu3 }
 0x1ab   : > { %v1264_v12 = vadd.f32 %v1185_v3, %v978_v4  ;;  %v1473_v18 = vpop.f32.mrf.mxu0 }
 0x1ac   : > { %v1759_v22 = vpop.f32.mrf.mxu1 }
 0x1ad   : > { %v1550_v7 = vadd.f32 %v1471_v55, %v1264_v12 }
 0x1af   : > { %v9185_v46 = vadd.f32 %v1757_v30, %v1550_v7 }
 0x1b0   : > { %v901_v29 = vpop.f32.mrf.mxu2 }
 0x1b1   : > { %v979_v57 = vadd.f32 %v901_v29, %v9008_v2  ;;  %v1187_v40 = vpop.f32.mrf.mxu3  ;;  %v1038_v29 = vld [vmem:[%s8740_s12 + $0x113] sm:$0xff] }
 0x1b3   : > { %v1265_v53 = vadd.f32 %v1187_v40, %v979_v57  ;;  %v1476_v20 = vpop.f32.mrf.mxu0 }
 0x1b4   : > { %v1762_v55 = vpop.f32.mrf.mxu1 }
 0x1b5   : > { %7860 = vmatmul.msk.bf16.gmra.mxu2 %vm367_vm0, %v774_v41  ;;  %v1551_v30 = vadd.f32 %v1473_v18, %v1265_v53  ;;  %v752_v18 = vld [vmem:[%s8740_s12 + $0x112] sm:$0xff] }
 0x1b6   : > { %7892 = vmatmul.msk.bf16.gmra.mxu3 %vm367_vm0, %v1060_v43  ;;  %7924 = vmatmul.msk.bf16.gmra.mxu0 %vm367_vm0, %v1631_v45  ;;  %v1039_v45 = vld [vmem:[%s8740_s12 + $0x11b] sm:$0xff]  ;;  %v775_v41 = vpack.c.bf16 %v753_v25, %v752_v18 }
 0x1b7   : > { %v9195_v2 = vadd.f32 %v1759_v22, %v1551_v30  ;;  %7956 = vmatmul.msk.bf16.gmra.mxu1 %vm367_vm0, %v1632_v5  ;;  %v1610_v22 = vld [vmem:[%s8740_s12 + $0x124] sm:$0xff]  ;;  %v1061_v43 = vpack.c.bf16 %v1039_v45, %v1038_v29 }
 0x1b8   : > { %v904_v61 = vpop.f32.mrf.mxu2  ;;  %v1633_v30 = vpack.c.bf16 %v1611_v37, %v1610_v22  ;;  %v755_v29 = vld [vmem:[%s8740_s12 + $0x12a] sm:$0xff]  ;;  %v1612_v37 = vld [vmem:[%s8740_s12 + $0x134] sm:$0xff] }
 0x1b9   : > { %v980_v4 = vadd.f32 %v904_v61, %v9018_v28  ;;  %v1190_v3 = vpop.f32.mrf.mxu3 }
 0x1bb   : > { %v1266_v12 = vadd.f32 %v1190_v3, %v980_v4  ;;  %v1478_v7 = vpop.f32.mrf.mxu0 }
 0x1bc   : > { %v1764_v9 = vpop.f32.mrf.mxu1 }
 0x1bd   : > { %v1552_v13 = vadd.f32 %v1476_v20, %v1266_v12 }
 0x1bf   : > { %v9201_v21 = vadd.f32 %v1762_v55, %v1552_v13 }
 0x1c0   : > { %v906_v35 = vpop.f32.mrf.mxu2 }
 0x1c1   : > { %v981_v57 = vadd.f32 %v906_v35, %v9026_v38  ;;  %v1192_v40 = vpop.f32.mrf.mxu3  ;;  %v1040_v35 = vld [vmem:[%s8740_s12 + $0x123] sm:$0xff] }
 0x1c3   : > { %v1267_v28 = vadd.f32 %v1192_v40, %v981_v57  ;;  %v1481_v53 = vpop.f32.mrf.mxu0  ;;  %v1613_v57 = vld [vmem:[%s8740_s12 + $0x13c] sm:$0xff] }
 0x1c4   : > { %v1767_v20 = vpop.f32.mrf.mxu1 }
 0x1c5   : > { %7861 = vmatmul.msk.bf16.gmra.mxu2 %vm367_vm0, %v775_v41  ;;  %v1553_v55 = vadd.f32 %v1478_v7, %v1267_v28  ;;  %v754_v7 = vld [vmem:[%s8740_s12 + $0x122] sm:$0xff] }
 0x1c6   : > { %7893 = vmatmul.msk.bf16.gmra.mxu3 %vm367_vm0, %v1061_v43  ;;  %7925 = vmatmul.msk.bf16.gmra.mxu0 %vm367_vm0, %v1632_v5  ;;  %v1041_v5 = vld [vmem:[%s8740_s12 + $0x12b] sm:$0xff]  ;;  %v776_v41 = vpack.c.bf16 %v755_v29, %v754_v7 }
 0x1c7   : > { %v9211_v61 = vadd.f32 %v1764_v9, %v1553_v55  ;;  %7957 = vmatmul.msk.bf16.gmra.mxu1 %vm367_vm0, %v1633_v30  ;;  %v8616_v9 = vld [vmem:[%s11224_s1 + $0x90] sm:$0xff]  ;;  %v1062_v43 = vpack.c.bf16 %v1041_v5, %v1040_v35  ;;  %v1634_v55 = vpack.c.bf16 %v1613_v57, %v1612_v37  ;;  %v757_v5 = vld [vmem:[%s8740_s12 + $0x13a] sm:$0xff]  ;;  %v8623_v57 = vld [vmem:[%s11224_s1 + $0xc8] sm:$0xff] }
 0x1c8   : > { %v909_v38 = vpop.f32.mrf.mxu2  ;;  %2864 = vmatpush.bf16.msra.mxu1 %v8616_v9  ;;  %v756_v35 = vld [vmem:[%s8740_s12 + $0x132] sm:$0xff]  ;;  %v1043_v37 = vld [vmem:[%s8740_s12 + $0x13b] sm:$0xff]  ;;  %3721 = vmatpush.bf16.msrb.mxu0 %v8623_v57 }
 0x1c9   : > { %v982_v4 = vadd.f32 %v909_v38, %v9036_v6  ;;  %v1195_v3 = vpop.f32.mrf.mxu3  ;;  %v2148_v57 = vld [vmem:[%s8740_s12 + $0x16] sm:$0xff] }
 0x1cb   : > { %v1268_v12 = vadd.f32 %v1195_v3, %v982_v4  ;;  %v1483_v13 = vpop.f32.mrf.mxu0  ;;  %v8621_v3 = vld [vmem:[%s11224_s1 + $0xb8] sm:$0xff] }
 0x1cc   : > { %v1769_v18 = vpop.f32.mrf.mxu1  ;;  %3435 = vmatpush.bf16.msrb.mxu3 %v8621_v3 }
 0x1cd   : > { %v1554_v25 = vadd.f32 %v1481_v53, %v1268_v12 }
 0x1cf   : > { %v9217_v45 = vadd.f32 %v1767_v20, %v1554_v25 }
 0x1d0   : > { %v911_v22 = vpop.f32.mrf.mxu2 }
 0x1d1   : > { %v983_v6 = vadd.f32 %v911_v22, %v9044_v16  ;;  %v1197_v40 = vpop.f32.mrf.mxu3  ;;  %v8619_v16 = vld [vmem:[%s11224_s1 + $0xa8] sm:$0xff]  ;;  %v1042_v22 = vld [vmem:[%s8740_s12 + $0x133] sm:$0xff] }
 0x1d2   : > { %3149 = vmatpush.bf16.msrb.mxu2 %v8619_v16 }
 0x1d3   : > { %v1269_v28 = vadd.f32 %v1197_v40, %v983_v6  ;;  %v1486_v53 = vpop.f32.mrf.mxu0  ;;  %v1614_v40 = vld [vmem:[%s8740_s12 + $0x144] sm:$0xff] }
 0x1d4   : > { %v1772_v20 = vpop.f32.mrf.mxu1 }
 0x1d5   : > { %7862 = vmatmul.msk.bf16.gmra.mxu2 %vm367_vm0, %v776_v41  ;;  %v1555_v38 = vadd.f32 %v1483_v13, %v1269_v28  ;;  %v1615_v41 = vld [vmem:[%s8740_s12 + $0x14c] sm:$0xff]  ;;  %v777_v28 = vpack.c.bf16 %v757_v5, %v756_v35 }
 0x1d6   : > { %7894 = vmatmul.msk.bf16.gmra.mxu3 %vm367_vm0, %v1062_v43  ;;  %7926 = vmatmul.msk.bf16.gmra.mxu0 %vm367_vm0, %v1633_v30 }
 0x1d7   : > { %v9233_v4 = vadd.f32 %v1769_v18, %v1555_v38  ;;  %7958 = vmatmul.msk.bf16.gmra.mxu1 %vm367_vm0, %v1634_v55  ;;  %v1063_v38 = vpack.c.bf16 %v1043_v37, %v1042_v22  ;;  %v1862_v22 = vld [vmem:[%s8740_s12 + $0x15] sm:$0xff]  ;;  %v1863_v37 = vld [vmem:[%s8740_s12 + $0x1d] sm:$0xff] }
 0x1d8   : > { %v914_v12 = vpop.f32.mrf.mxu2 }
 0x1d9   : > { %v984_v30 = vadd.f32 %v914_v12, %v8870_v62  ;;  %v1200_v13 = vpop.f32.mrf.mxu3 }
 0x1db   : > { %v1270_v25 = vadd.f32 %v1200_v13, %v984_v30  ;;  %v1488_v7 = vpop.f32.mrf.mxu0 }
 0x1dc   : > { %v1774_v29 = vpop.f32.mrf.mxu1 }
 0x1dd   : > { %v1556_v18 = vadd.f32 %v1486_v53, %v1270_v25 }
 0x1df   : > { %v9242_v9 = vadd.f32 %v1772_v20, %v1556_v18  ;;  %v1635_v20 = vpack.c.bf16 %v1615_v41, %v1614_v40  ;;  %v2435_v40 = vld [vmem:[%s8740_s12 + $0x1f] sm:$0xff] }
 0x1e0   : > { %v916_v6 = vpop.f32.mrf.mxu2 }
 0x1e1   : > { %v985_v62 = vadd.f32 %v916_v6, %v8888_v15  ;;  %v1202_v43 = vpop.f32.mrf.mxu3 }
 0x1e3   : > { %v1271_v53 = vadd.f32 %v1202_v43, %v985_v62  ;;  %v1491_v16 = vpop.f32.mrf.mxu0  ;;  %v2720_v62 = vld [vmem:[%s8740_s12 + $0x18] sm:$0xff]  ;;  %v2721_v43 = vld [vmem:[%s8740_s12 + $0x20] sm:$0xff] }
 0x1e4   : > { %v1777_v3 = vpop.f32.mrf.mxu1 }
 0x1e5   : > { %7863 = vmatmul.msk.bf16.gmra.mxu2 %vm367_vm0, %v777_v28  ;;  %v1557_v12 = vadd.f32 %v1488_v7, %v1271_v53 }
 0x1e6   : > { %7895 = vmatmul.msk.bf16.gmra.mxu3 %vm367_vm0, %v1063_v38  ;;  %7927 = vmatmul.msk.bf16.gmra.mxu0 %vm367_vm0, %v1634_v55  ;;  %v2149_v55 = vld [vmem:[%s8740_s12 + $0x1e] sm:$0xff] }
 0x1e7   : > { %v9255_v15 = vadd.f32 %v1774_v29, %v1557_v12  ;;  %7959 = vmatmul.msk.bf16.gmra.mxu1 %vm367_vm0, %v1635_v20  ;;  %v2434_v29 = vld [vmem:[%s8740_s12 + $0x17] sm:$0xff]  ;;  %v2188_v53 = vpack.c.bf16 %v2149_v55, %v2148_v57  ;;  %v1864_v55 = vld [vmem:[%s8740_s12 + $0x25] sm:$0xff] }
 0x1e8   : > { %v919_v30 = vpop.f32.mrf.mxu2  ;;  %v2474_v20 = vpack.c.bf16 %v2435_v40, %v2434_v29  ;;  %v1865_v29 = vld [vmem:[%s8740_s12 + $0x2d] sm:$0xff] }
 0x1e9   : > { %v986_v13 = vadd.f32 %v919_v30, %v8896_v24  ;;  %v1205_v25 = vpop.f32.mrf.mxu3  ;;  %v1902_v24 = vpack.c.bf16 %v1863_v37, %v1862_v22  ;;  %v2150_v40 = vld [vmem:[%s8740_s12 + $0x26] sm:$0xff] }
 0x1eb   : > { %v1272_v18 = vadd.f32 %v1205_v25, %v986_v13  ;;  %v1493_v35 = vpop.f32.mrf.mxu0 }
 0x1ec   : > { %v1779_v7 = vpop.f32.mrf.mxu1 }
 0x1ed   : > { %v1558_v5 = vadd.f32 %v1491_v16, %v1272_v18  ;;  %v2760_v16 = vpack.c.bf16 %v2721_v43, %v2720_v62  ;;  %v2151_v62 = vld [vmem:[%s8740_s12 + $0x2e] sm:$0xff] }
 0x1ee   : > { %v2437_v43 = vld [vmem:[%s8740_s12 + $0x2f] sm:$0xff] }
 0x1ef   : > { %v9262_v6 = vadd.f32 %v1777_v3, %v1558_v5 }
 0x1f0   : > { %v921_v41 = vpop.f32.mrf.mxu2 }
 0x1f1   : > { %v987_v28 = vadd.f32 %v921_v41, %v8908_v39  ;;  %v1207_v38 = vpop.f32.mrf.mxu3 }
 0x1f3   : > { %v1273_v12 = vadd.f32 %v1207_v38, %v987_v28  ;;  %v1496_v30 = vpop.f32.mrf.mxu0  ;;  %v2722_v38 = vld [vmem:[%s8740_s12 + $0x28] sm:$0xff] }
 0x1f4   : > { %v1782_v13 = vpop.f32.mrf.mxu1 }
 0x1f5   : > { %7972 = vmatmul.msk.bf16.vlgmr.msra.gmra.mxu2 %vm367_vm0, %v1902_v24  ;;  %v1559_v3 = vadd.f32 %v1493_v35, %v1273_v12  ;;  %v2723_v24 = vld [vmem:[%s8740_s12 + $0x30] sm:$0xff]  ;;  %v2189_v12 = vpack.c.bf16 %v2151_v62, %v2150_v40 }
 0x1f6   : > { %8004 = vmatmul.msk.bf16.vlgmr.msra.gmra.mxu3 %vm367_vm0, %v2188_v53  ;;  %8036 = vmatmul.msk.bf16.vlgmr.msra.gmra.mxu0 %vm367_vm0, %v2474_v20  ;;  %v1866_v62 = vld [vmem:[%s8740_s12 + $0x35] sm:$0xff] }
 0x1f7   : > { %v9273_v39 = vadd.f32 %v1779_v7, %v1559_v3  ;;  %8068 = vmatmul.msk.bf16.vlgmr.msra.gmra.mxu1 %vm367_vm0, %v2760_v16  ;;  %v2436_v7 = vld [vmem:[%s8740_s12 + $0x27] sm:$0xff] }
 0x1f8   : > { %v924_v25 = vpop.f32.mrf.mxu2  ;;  %v2475_v16 = vpack.c.bf16 %v2437_v43, %v2436_v7  ;;  %v1867_v7 = vld [vmem:[%s8740_s12 + $0x3d] sm:$0xff] }
 0x1f9   : > { %v988_v18 = vadd.f32 %v924_v25, %v8916_v48  ;;  %v1210_v5 = vpop.f32.mrf.mxu3  ;;  %v1903_v48 = vpack.c.bf16 %v1865_v29, %v1864_v55  ;;  %v2152_v43 = vld [vmem:[%s8740_s12 + $0x36] sm:$0xff] }
 0x1fb   : > { %v1274_v22 = vadd.f32 %v1210_v5, %v988_v18  ;;  %v1498_v37 = vpop.f32.mrf.mxu0 }
 0x1fc   : > { %v1784_v35 = vpop.f32.mrf.mxu1 }
 0x1fd   : > { %v1560_v57 = vadd.f32 %v1496_v30, %v1274_v22  ;;  %v2761_v30 = vpack.c.bf16 %v2723_v24, %v2722_v38  ;;  %v2153_v38 = vld [vmem:[%s8740_s12 + $0x3e] sm:$0xff] }
 0x1fe   : > { %v2439_v24 = vld [vmem:[%s8740_s12 + $0x3f] sm:$0xff] }
 0x1ff   : > { %v9280_v41 = vadd.f32 %v1782_v13, %v1560_v57 }
 0x200   : > { %v926_v28 = vpop.f32.mrf.mxu2 }
 0x201   : > { %v989_v53 = vadd.f32 %v926_v28, %v8926_v63  ;;  %v1212_v20 = vpop.f32.mrf.mxu3 }
 0x203   : > { %v1275_v3 = vadd.f32 %v1212_v20, %v989_v53  ;;  %v1501_v25 = vpop.f32.mrf.mxu0  ;;  %v2724_v20 = vld [vmem:[%s8740_s12 + $0x38] sm:$0xff] }
 0x204   : > { %v1787_v18 = vpop.f32.mrf.mxu1 }
 0x205   : > { %7973 = vmatmul.msk.bf16.gmra.mxu2 %vm367_vm0, %v1903_v48  ;;  %v1561_v13 = vadd.f32 %v1498_v37, %v1275_v3  ;;  %v2725_v48 = vld [vmem:[%s8740_s12 + $0x40] sm:$0xff]  ;;  %v2190_v3 = vpack.c.bf16 %v2153_v38, %v2152_v43 }
 0x206   : > { %8005 = vmatmul.msk.bf16.gmra.mxu3 %vm367_vm0, %v2189_v12  ;;  %8037 = vmatmul.msk.bf16.gmra.mxu0 %vm367_vm0, %v2475_v16  ;;  %v1868_v38 = vld [vmem:[%s8740_s12 + $0x45] sm:$0xff] }
 0x207   : > { %v9291_v63 = vadd.f32 %v1784_v35, %v1561_v13  ;;  %8069 = vmatmul.msk.bf16.gmra.mxu1 %vm367_vm0, %v2761_v30  ;;  %v2438_v35 = vld [vmem:[%s8740_s12 + $0x37] sm:$0xff] }
 0x208   : > { %v929_v5 = vpop.f32.mrf.mxu2  ;;  %v2476_v30 = vpack.c.bf16 %v2439_v24, %v2438_v35  ;;  %v1869_v35 = vld [vmem:[%s8740_s12 + $0x4d] sm:$0xff] }
 0x209   : > { %v990_v22 = vadd.f32 %v929_v5, %v8934_v8  ;;  %v1215_v57 = vpop.f32.mrf.mxu3  ;;  %v1904_v8 = vpack.c.bf16 %v1867_v7, %v1866_v62  ;;  %v2154_v24 = vld [vmem:[%s8740_s12 + $0x46] sm:$0xff] }
 0x20b   : > { %v1276_v55 = vadd.f32 %v1215_v57, %v990_v22  ;;  %v1503_v29 = vpop.f32.mrf.mxu0 }
 0x20c   : > { %v1789_v37 = vpop.f32.mrf.mxu1 }
 0x20d   : > { %v1562_v40 = vadd.f32 %v1501_v25, %v1276_v55  ;;  %v2762_v25 = vpack.c.bf16 %v2725_v48, %v2724_v20  ;;  %v2155_v20 = vld [vmem:[%s8740_s12 + $0x4e] sm:$0xff] }
 0x20e   : > { %v2441_v48 = vld [vmem:[%s8740_s12 + $0x4f] sm:$0xff] }
 0x20f   : > { %v9298_v28 = vadd.f32 %v1787_v18, %v1562_v40 }
 0x210   : > { %v931_v53 = vpop.f32.mrf.mxu2 }
 0x211   : > { %v991_v12 = vadd.f32 %v931_v53, %v8944_v23  ;;  %v1217_v16 = vpop.f32.mrf.mxu3 }
 0x213   : > { %v1277_v13 = vadd.f32 %v1217_v16, %v991_v12  ;;  %v1506_v5 = vpop.f32.mrf.mxu0  ;;  %v2726_v16 = vld [vmem:[%s8740_s12 + $0x48] sm:$0xff] }
 0x214   : > { %v1792_v22 = vpop.f32.mrf.mxu1 }
 0x215   : > { %7974 = vmatmul.msk.bf16.gmra.mxu2 %vm367_vm0, %v1904_v8  ;;  %v1563_v18 = vadd.f32 %v1503_v29, %v1277_v13  ;;  %v2727_v8 = vld [vmem:[%s8740_s12 + $0x50] sm:$0xff]  ;;  %v2191_v13 = vpack.c.bf16 %v2155_v20, %v2154_v24 }
 0x216   : > { %8006 = vmatmul.msk.bf16.gmra.mxu3 %vm367_vm0, %v2190_v3  ;;  %8038 = vmatmul.msk.bf16.gmra.mxu0 %vm367_vm0, %v2476_v30  ;;  %v1870_v20 = vld [vmem:[%s8740_s12 + $0x55] sm:$0xff] }
 0x217   : > { %v9309_v23 = vadd.f32 %v1789_v37, %v1563_v18  ;;  %8070 = vmatmul.msk.bf16.gmra.mxu1 %vm367_vm0, %v2762_v25  ;;  %v2440_v37 = vld [vmem:[%s8740_s12 + $0x47] sm:$0xff] }
 0x218   : > { %v934_v57 = vpop.f32.mrf.mxu2  ;;  %v2477_v25 = vpack.c.bf16 %v2441_v48, %v2440_v37  ;;  %v1871_v37 = vld [vmem:[%s8740_s12 + $0x5d] sm:$0xff] }
 0x219   : > { %v992_v55 = vadd.f32 %v934_v57, %v8952_v33  ;;  %v1220_v40 = vpop.f32.mrf.mxu3  ;;  %v1905_v33 = vpack.c.bf16 %v1869_v35, %v1868_v38  ;;  %v2156_v48 = vld [vmem:[%s8740_s12 + $0x56] sm:$0xff] }
 0x21b   : > { %v1278_v62 = vadd.f32 %v1220_v40, %v992_v55  ;;  %v1508_v7 = vpop.f32.mrf.mxu0 }
 0x21c   : > { %v1794_v29 = vpop.f32.mrf.mxu1 }
 0x21d   : > { %v1564_v43 = vadd.f32 %v1506_v5, %v1278_v62  ;;  %v2763_v5 = vpack.c.bf16 %v2727_v8, %v2726_v16  ;;  %v2157_v16 = vld [vmem:[%s8740_s12 + $0x5e] sm:$0xff] }
 0x21e   : > { %v2443_v8 = vld [vmem:[%s8740_s12 + $0x5f] sm:$0xff] }
 0x21f   : > { %v9316_v53 = vadd.f32 %v1792_v22, %v1564_v43 }
 0x220   : > { %v936_v12 = vpop.f32.mrf.mxu2 }
 0x221   : > { %v993_v3 = vadd.f32 %v936_v12, %v8962_v49  ;;  %v1222_v30 = vpop.f32.mrf.mxu3 }
 0x223   : > { %v1279_v18 = vadd.f32 %v1222_v30, %v993_v3  ;;  %v1511_v57 = vpop.f32.mrf.mxu0  ;;  %v2728_v30 = vld [vmem:[%s8740_s12 + $0x58] sm:$0xff] }
 0x224   : > { %v1797_v55 = vpop.f32.mrf.mxu1 }
 0x225   : > { %7975 = vmatmul.msk.bf16.gmra.mxu2 %vm367_vm0, %v1905_v33  ;;  %v1565_v22 = vadd.f32 %v1508_v7, %v1279_v18  ;;  %v2729_v33 = vld [vmem:[%s8740_s12 + $0x60] sm:$0xff]  ;;  %v2192_v18 = vpack.c.bf16 %v2157_v16, %v2156_v48 }
 0x226   : > { %8007 = vmatmul.msk.bf16.gmra.mxu3 %vm367_vm0, %v2191_v13  ;;  %8039 = vmatmul.msk.bf16.gmra.mxu0 %vm367_vm0, %v2477_v25  ;;  %v1872_v16 = vld [vmem:[%s8740_s12 + $0x65] sm:$0xff] }
 0x227   : > { %v9327_v49 = vadd.f32 %v1794_v29, %v1565_v22  ;;  %8071 = vmatmul.msk.bf16.gmra.mxu1 %vm367_vm0, %v2763_v5  ;;  %v2442_v29 = vld [vmem:[%s8740_s12 + $0x57] sm:$0xff] }
 0x228   : > { %v939_v40 = vpop.f32.mrf.mxu2  ;;  %v2478_v5 = vpack.c.bf16 %v2443_v8, %v2442_v29  ;;  %v1873_v29 = vld [vmem:[%s8740_s12 + $0x6d] sm:$0xff] }
 0x229   : > { %v994_v62 = vadd.f32 %v939_v40, %v8970_v59  ;;  %v1225_v43 = vpop.f32.mrf.mxu3  ;;  %v1906_v59 = vpack.c.bf16 %v1871_v37, %v1870_v20  ;;  %v2158_v8 = vld [vmem:[%s8740_s12 + $0x66] sm:$0xff] }
 0x22b   : > { %v1280_v38 = vadd.f32 %v1225_v43, %v994_v62  ;;  %v1513_v35 = vpop.f32.mrf.mxu0 }
 0x22c   : > { %v1799_v7 = vpop.f32.mrf.mxu1 }
 0x22d   : > { %v1566_v24 = vadd.f32 %v1511_v57, %v1280_v38  ;;  %v2764_v57 = vpack.c.bf16 %v2729_v33, %v2728_v30  ;;  %v2159_v30 = vld [vmem:[%s8740_s12 + $0x6e] sm:$0xff] }
 0x22e   : > { %v2445_v33 = vld [vmem:[%s8740_s12 + $0x6f] sm:$0xff] }
 0x22f   : > { %v9334_v12 = vadd.f32 %v1797_v55, %v1566_v24 }
 0x230   : > { %v941_v3 = vpop.f32.mrf.mxu2 }
 0x231   : > { %v995_v13 = vadd.f32 %v941_v3, %v8980_v14  ;;  %v1227_v25 = vpop.f32.mrf.mxu3 }
 0x233   : > { %v1281_v22 = vadd.f32 %v1227_v25, %v995_v13  ;;  %v1516_v40 = vpop.f32.mrf.mxu0  ;;  %v2730_v25 = vld [vmem:[%s8740_s12 + $0x68] sm:$0xff] }
 0x234   : > { %v1802_v62 = vpop.f32.mrf.mxu1 }
 0x235   : > { %7976 = vmatmul.msk.bf16.gmra.mxu2 %vm367_vm0, %v1906_v59  ;;  %v1567_v55 = vadd.f32 %v1513_v35, %v1281_v22  ;;  %v2731_v59 = vld [vmem:[%s8740_s12 + $0x70] sm:$0xff]  ;;  %v2193_v22 = vpack.c.bf16 %v2159_v30, %v2158_v8 }
 0x236   : > { %8008 = vmatmul.msk.bf16.gmra.mxu3 %vm367_vm0, %v2192_v18  ;;  %8040 = vmatmul.msk.bf16.gmra.mxu0 %vm367_vm0, %v2478_v5  ;;  %v1874_v30 = vld [vmem:[%s8740_s12 + $0x75] sm:$0xff] }
 0x237   : > { %v9345_v14 = vadd.f32 %v1799_v7, %v1567_v55  ;;  %8072 = vmatmul.msk.bf16.gmra.mxu1 %vm367_vm0, %v2764_v57  ;;  %v2444_v7 = vld [vmem:[%s8740_s12 + $0x67] sm:$0xff] }
 0x238   : > { %v944_v43 = vpop.f32.mrf.mxu2  ;;  %v2479_v57 = vpack.c.bf16 %v2445_v33, %v2444_v7  ;;  %v1875_v7 = vld [vmem:[%s8740_s12 + $0x7d] sm:$0xff] }
 0x239   : > { %v996_v38 = vadd.f32 %v944_v43, %v8988_v26  ;;  %v1230_v24 = vpop.f32.mrf.mxu3  ;;  %v1907_v26 = vpack.c.bf16 %v1873_v29, %v1872_v16  ;;  %v2160_v33 = vld [vmem:[%s8740_s12 + $0x76] sm:$0xff] }
 0x23b   : > { %v1282_v20 = vadd.f32 %v1230_v24, %v996_v38  ;;  %v1518_v37 = vpop.f32.mrf.mxu0 }
 0x23c   : > { %v1804_v35 = vpop.f32.mrf.mxu1 }
 0x23d   : > { %v1568_v48 = vadd.f32 %v1516_v40, %v1282_v20  ;;  %v2765_v40 = vpack.c.bf16 %v2731_v59, %v2730_v25  ;;  %v2161_v25 = vld [vmem:[%s8740_s12 + $0x7e] sm:$0xff] }
 0x23e   : > { %v2447_v59 = vld [vmem:[%s8740_s12 + $0x7f] sm:$0xff] }
 0x23f   : > { %v9352_v3 = vadd.f32 %v1802_v62, %v1568_v48 }
 0x240   : > { %v946_v13 = vpop.f32.mrf.mxu2 }
 0x241   : > { %v997_v18 = vadd.f32 %v946_v13, %v8998_v44  ;;  %v1232_v5 = vpop.f32.mrf.mxu3 }
 0x243   : > { %v1283_v55 = vadd.f32 %v1232_v5, %v997_v18  ;;  %v1521_v43 = vpop.f32.mrf.mxu0  ;;  %v2732_v5 = vld [vmem:[%s8740_s12 + $0x78] sm:$0xff] }
 0x244   : > { %v1807_v38 = vpop.f32.mrf.mxu1 }
 0x245   : > { %7977 = vmatmul.msk.bf16.gmra.mxu2 %vm367_vm0, %v1907_v26  ;;  %v1569_v62 = vadd.f32 %v1518_v37, %v1283_v55  ;;  %v2733_v26 = vld [vmem:[%s8740_s12 + $0x80] sm:$0xff]  ;;  %v2194_v55 = vpack.c.bf16 %v2161_v25, %v2160_v33 }
 0x246   : > { %8009 = vmatmul.msk.bf16.gmra.mxu3 %vm367_vm0, %v2193_v22  ;;  %8041 = vmatmul.msk.bf16.gmra.mxu0 %vm367_vm0, %v2479_v57  ;;  %v1876_v25 = vld [vmem:[%s8740_s12 + $0x85] sm:$0xff] }
 0x247   : > { %v9363_v44 = vadd.f32 %v1804_v35, %v1569_v62  ;;  %8073 = vmatmul.msk.bf16.gmra.mxu1 %vm367_vm0, %v2765_v40  ;;  %v2446_v35 = vld [vmem:[%s8740_s12 + $0x77] sm:$0xff] }
 0x248   : > { %v949_v24 = vpop.f32.mrf.mxu2  ;;  %v2480_v40 = vpack.c.bf16 %v2447_v59, %v2446_v35  ;;  %v1877_v35 = vld [vmem:[%s8740_s12 + $0x8d] sm:$0xff] }
 0x249   : > { %v998_v20 = vadd.f32 %v949_v24, %v9006_v58  ;;  %v1235_v48 = vpop.f32.mrf.mxu3  ;;  %v1908_v58 = vpack.c.bf16 %v1875_v7, %v1874_v30  ;;  %v2162_v59 = vld [vmem:[%s8740_s12 + $0x86] sm:$0xff] }
 0x24b   : > { %v1284_v16 = vadd.f32 %v1235_v48, %v998_v20  ;;  %v1523_v29 = vpop.f32.mrf.mxu0 }
 0x24c   : > { %v1809_v37 = vpop.f32.mrf.mxu1 }
 0x24d   : > { %v1570_v8 = vadd.f32 %v1521_v43, %v1284_v16  ;;  %v2766_v43 = vpack.c.bf16 %v2733_v26, %v2732_v5  ;;  %v2163_v5 = vld [vmem:[%s8740_s12 + $0x8e] sm:$0xff] }
 0x24e   : > { %v2449_v26 = vld [vmem:[%s8740_s12 + $0x8f] sm:$0xff] }
 0x24f   : > { %v9370_v13 = vadd.f32 %v1807_v38, %v1570_v8 }
 0x250   : > { %v951_v18 = vpop.f32.mrf.mxu2 }
 0x251   : > { %v999_v22 = vadd.f32 %v951_v18, %v9016_v17  ;;  %v1237_v57 = vpop.f32.mrf.mxu3 }
 0x253   : > { %v1285_v62 = vadd.f32 %v1237_v57, %v999_v22  ;;  %v1526_v24 = vpop.f32.mrf.mxu0  ;;  %v2734_v57 = vld [vmem:[%s8740_s12 + $0x88] sm:$0xff] }
 0x254   : > { %v1812_v20 = vpop.f32.mrf.mxu1 }
 0x255   : > { %7978 = vmatmul.msk.bf16.gmra.mxu2 %vm367_vm0, %v1908_v58  ;;  %v1571_v38 = vadd.f32 %v1523_v29, %v1285_v62  ;;  %v2735_v58 = vld [vmem:[%s8740_s12 + $0x90] sm:$0xff]  ;;  %v2195_v62 = vpack.c.bf16 %v2163_v5, %v2162_v59 }
 0x256   : > { %8010 = vmatmul.msk.bf16.gmra.mxu3 %vm367_vm0, %v2194_v55  ;;  %8042 = vmatmul.msk.bf16.gmra.mxu0 %vm367_vm0, %v2480_v40  ;;  %v1878_v5 = vld [vmem:[%s8740_s12 + $0x95] sm:$0xff] }
 0x257   : > { %v9381_v17 = vadd.f32 %v1809_v37, %v1571_v38  ;;  %8074 = vmatmul.msk.bf16.gmra.mxu1 %vm367_vm0, %v2766_v43  ;;  %v2448_v37 = vld [vmem:[%s8740_s12 + $0x87] sm:$0xff] }
 0x258   : > { %v954_v48 = vpop.f32.mrf.mxu2  ;;  %v2481_v43 = vpack.c.bf16 %v2449_v26, %v2448_v37  ;;  %v1879_v37 = vld [vmem:[%s8740_s12 + $0x9d] sm:$0xff] }
 0x259   : > { %v1000_v16 = vadd.f32 %v954_v48, %v9024_v34  ;;  %v1240_v8 = vpop.f32.mrf.mxu3  ;;  %v1909_v34 = vpack.c.bf16 %v1877_v35, %v1876_v25  ;;  %v2164_v26 = vld [vmem:[%s8740_s12 + $0x96] sm:$0xff] }
 0x25b   : > { %v1286_v30 = vadd.f32 %v1240_v8, %v1000_v16  ;;  %v1528_v7 = vpop.f32.mrf.mxu0 }
 0x25c   : > { %v1814_v29 = vpop.f32.mrf.mxu1 }
 0x25d   : > { %v1572_v33 = vadd.f32 %v1526_v24, %v1286_v30  ;;  %v2767_v24 = vpack.c.bf16 %v2735_v58, %v2734_v57  ;;  %v2451_v58 = vld [vmem:[%s8740_s12 + $0x9f] sm:$0xff] }
 0x25f   : > { %v9388_v18 = vadd.f32 %v1812_v20, %v1572_v33 }
 0x260   : > { %v956_v22 = vpop.f32.mrf.mxu2 }
 0x261   : > { %v1001_v55 = vadd.f32 %v956_v22, %v9034_v50  ;;  %v1242_v40 = vpop.f32.mrf.mxu3  ;;  %v2165_v22 = vld [vmem:[%s8740_s12 + $0x9e] sm:$0xff] }
 0x263   : > { %v1287_v38 = vadd.f32 %v1242_v40, %v1001_v55  ;;  %v1531_v48 = vpop.f32.mrf.mxu0  ;;  %v8625_v55 = vld [vmem:[%s11224_s1 + $0xd8] sm:$0xff] }
 0x264   : > { %v1817_v16 = vpop.f32.mrf.mxu1  ;;  %4007 = vmatpush.bf16.msrb.mxu1 %v8625_v55  ;;  %v1881_v55 = vld [vmem:[%s8740_s12 + $0xad] sm:$0xff] }
 0x265   : > { %7979 = vmatmul.msk.bf16.gmra.mxu2 %vm367_vm0, %v1909_v34  ;;  %v1573_v20 = vadd.f32 %v1528_v7, %v1287_v38  ;;  %v2737_v34 = vld [vmem:[%s8740_s12 + $0xa0] sm:$0xff]  ;;  %v1910_v38 = vpack.c.bf16 %v1879_v37, %v1878_v5 }
 0x266   : > { %8011 = vmatmul.msk.bf16.gmra.mxu3 %vm367_vm0, %v2195_v62  ;;  %8043 = vmatmul.msk.bf16.gmra.mxu0 %vm367_vm0, %v2481_v43 }
 0x267   : > { %v9399_v50 = vadd.f32 %v1814_v29, %v1573_v20  ;;  %8075 = vmatmul.msk.bf16.gmra.mxu1 %vm367_vm0, %v2767_v24  ;;  %v2450_v29 = vld [vmem:[%s8740_s12 + $0x97] sm:$0xff] }
 0x268   : > { %v959_v8 = vpop.f32.mrf.mxu2  ;;  %v2482_v24 = vpack.c.bf16 %v2451_v58, %v2450_v29  ;;  %v1880_v58 = vld [vmem:[%s8740_s12 + $0xa5] sm:$0xff] }
 0x269   : > { %v1002_v30 = vadd.f32 %v959_v8, %v9042_v10  ;;  %v1245_v33 = vpop.f32.mrf.mxu3  ;;  %v2736_v10 = vld [vmem:[%s8740_s12 + $0x98] sm:$0xff] }
 0x26b   : > { %v1288_v25 = vadd.f32 %v1245_v33, %v1002_v30  ;;  %v1533_v35 = vpop.f32.mrf.mxu0 }
 0x26c   : > { %v1819_v59 = vpop.f32.mrf.mxu1 }
 0x26d   : > { %v1574_v7 = vadd.f32 %v1531_v48, %v1288_v25  ;;  %v2196_v48 = vpack.c.bf16 %v2165_v22, %v2164_v26 }
 0x26f   : > { %v9407_v57 = vadd.f32 %v1817_v16, %v1574_v7  ;;  %v2768_v16 = vpack.c.bf16 %v2737_v34, %v2736_v10  ;;  %v2167_v10 = vld [vmem:[%s8740_s12 + $0xae] sm:$0xff] }
 0x270   : > { %v961_v40 = vpop.f32.mrf.mxu2 }
 0x271   : > { %v1003_v62 = vadd.f32 %v961_v40, %v9055_v42  ;;  %v1247_v43 = vpop.f32.mrf.mxu3  ;;  %v8618_v42 = vld [vmem:[%s11224_s1 + $0xa0] sm:$0xff] }
 0x272   : > { %3150 = vmatpush.bf16.msrb.mxu2 %v8618_v42  ;;  %v2166_v40 = vld [vmem:[%s8740_s12 + $0xa6] sm:$0xff] }
 0x273   : > { %v1289_v20 = vadd.f32 %v1247_v43, %v1003_v62  ;;  %v2580_v8 = vpop.f32.mrf.mxu0  ;;  %v2452_v62 = vld [vmem:[%s8740_s12 + $0xa7] sm:$0xff]  ;;  %v2453_v43 = vld [vmem:[%s8740_s12 + $0xaf] sm:$0xff] }
 0x274   : > { %v2866_v30 = vpop.f32.mrf.mxu1  ;;  %v2483_v42 = vpack.c.bf16 %v2453_v43, %v2452_v62  ;;  %v1882_v62 = vld [vmem:[%s8740_s12 + $0xb5] sm:$0xff]  ;;  %v1883_v43 = vld [vmem:[%s8740_s12 + $0xbd] sm:$0xff] }
 0x275   : > { %7980 = vmatmul.msk.bf16.gmra.mxu2 %vm367_vm0, %v1910_v38  ;;  %v1575_v33 = vadd.f32 %v1533_v35, %v1289_v20  ;;  %v8620_v35 = vld [vmem:[%s11224_s1 + $0xb0] sm:$0xff] }
 0x276   : > { %8012 = vmatmul.msk.bf16.gmra.mxu3 %vm367_vm0, %v2196_v48  ;;  %8044 = vmatmul.msk.bf16.gmra.mxu0 %vm367_vm0, %v2482_v24  ;;  %v2738_v48 = vld [vmem:[%s8740_s12 + $0xa8] sm:$0xff]  ;;  %v2739_v24 = vld [vmem:[%s8740_s12 + $0xb0] sm:$0xff] }
 0x277   : > { %v9423_v25 = vadd.f32 %v1819_v59, %v1575_v33  ;;  %8076 = vmatmul.msk.bf16.gmra.mxu1 %vm367_vm0, %v2768_v16  ;;  %3436 = vmatpush.bf16.msrb.mxu3 %v8620_v35  ;;  %v1911_v33 = vpack.c.bf16 %v1881_v55, %v1880_v58 }
 0x278   : > { %v2008_v7 = vpop.f32.mrf.mxu2 }
 0x279   : > { %v2108_v5 = vadd.f32 %v2008_v7, %v9070_v19  ;;  %v2294_v37 = vpop.f32.mrf.mxu3  ;;  %v8622_v19 = vld [vmem:[%s11224_s1 + $0xc0] sm:$0xff] }
 0x27a   : > { %3722 = vmatpush.bf16.msrb.mxu0 %v8622_v19  ;;  %v2168_v19 = vld [vmem:[%s8740_s12 + $0xb6] sm:$0xff] }
 0x27b   : > { %v2394_v26 = vadd.f32 %v2294_v37, %v2108_v5  ;;  %v2582_v22 = vpop.f32.mrf.mxu0 }
 0x27c   : > { %v2868_v59 = vpop.f32.mrf.mxu1 }
 0x27d   : > { %v2680_v29 = vadd.f32 %v2580_v8, %v2394_v26  ;;  %v2197_v8 = vpack.c.bf16 %v2167_v10, %v2166_v40 }
 0x27f   : > { %v9434_v34 = vadd.f32 %v2866_v30, %v2680_v29  ;;  %v2769_v30 = vpack.c.bf16 %v2739_v24, %v2738_v48  ;;  %v2169_v48 = vld [vmem:[%s8740_s12 + $0xbe] sm:$0xff] }
 0x280   : > { %v2010_v38 = vpop.f32.mrf.mxu2  ;;  %v2455_v24 = vld [vmem:[%s8740_s12 + $0xbf] sm:$0xff] }
 0x281   : > { %v2109_v20 = vadd.f32 %v2010_v38, %v9083_v1  ;;  %v2296_v16 = vpop.f32.mrf.mxu3 }
 0x283   : > { %v2395_v35 = vadd.f32 %v2296_v16, %v2109_v20  ;;  %v2585_v7 = vpop.f32.mrf.mxu0  ;;  %v2740_v16 = vld [vmem:[%s8740_s12 + $0xb8] sm:$0xff] }
 0x284   : > { %v2871_v5 = vpop.f32.mrf.mxu1 }
 0x285   : > { %7981 = vmatmul.msk.bf16.gmra.mxu2 %vm367_vm0, %v1911_v33  ;;  %v2681_v37 = vadd.f32 %v2582_v22, %v2395_v35  ;;  %v2741_v33 = vld [vmem:[%s8740_s12 + $0xc0] sm:$0xff]  ;;  %v2198_v35 = vpack.c.bf16 %v2169_v48, %v2168_v19 }
 0x286   : > { %8013 = vmatmul.msk.bf16.gmra.mxu3 %vm367_vm0, %v2197_v8  ;;  %8045 = vmatmul.msk.bf16.gmra.mxu0 %vm367_vm0, %v2483_v42  ;;  %v1884_v48 = vld [vmem:[%s8740_s12 + $0xc5] sm:$0xff] }
 0x287   : > { %v9447_v1 = vadd.f32 %v2868_v59, %v2681_v37  ;;  %8077 = vmatmul.msk.bf16.gmra.mxu1 %vm367_vm0, %v2769_v30  ;;  %v2454_v59 = vld [vmem:[%s8740_s12 + $0xb7] sm:$0xff] }
 0x288   : > { %v2013_v26 = vpop.f32.mrf.mxu2  ;;  %v2484_v30 = vpack.c.bf16 %v2455_v24, %v2454_v59  ;;  %v1885_v59 = vld [vmem:[%s8740_s12 + $0xcd] sm:$0xff] }
 0x289   : > { %v2110_v29 = vadd.f32 %v2013_v26, %v9089_v32  ;;  %v2299_v58 = vpop.f32.mrf.mxu3  ;;  %v1912_v32 = vpack.c.bf16 %v1883_v43, %v1882_v62  ;;  %v2170_v24 = vld [vmem:[%s8740_s12 + $0xc6] sm:$0xff] }
 0x28b   : > { %v2396_v55 = vadd.f32 %v2299_v58, %v2110_v29  ;;  %v2587_v40 = vpop.f32.mrf.mxu0 }
 0x28c   : > { %v2873_v22 = vpop.f32.mrf.mxu1 }
 0x28d   : > { %v2682_v10 = vadd.f32 %v2585_v7, %v2396_v55  ;;  %v2770_v7 = vpack.c.bf16 %v2741_v33, %v2740_v16  ;;  %v2171_v16 = vld [vmem:[%s8740_s12 + $0xce] sm:$0xff] }
 0x28e   : > { %v2457_v33 = vld [vmem:[%s8740_s12 + $0xcf] sm:$0xff] }
 0x28f   : > { %v9454_v38 = vadd.f32 %v2871_v5, %v2682_v10 }
 0x290   : > { %v2015_v20 = vpop.f32.mrf.mxu2 }
 0x291   : > { %v2111_v8 = vadd.f32 %v2015_v20, %v9099_v27  ;;  %v2301_v42 = vpop.f32.mrf.mxu3 }
 0x293   : > { %v2397_v37 = vadd.f32 %v2301_v42, %v2111_v8  ;;  %v2590_v26 = vpop.f32.mrf.mxu0  ;;  %v2742_v42 = vld [vmem:[%s8740_s12 + $0xc8] sm:$0xff] }
 0x294   : > { %v2876_v29 = vpop.f32.mrf.mxu1 }
 0x295   : > { %7982 = vmatmul.msk.bf16.gmra.mxu2 %vm367_vm0, %v1912_v32  ;;  %v2683_v5 = vadd.f32 %v2587_v40, %v2397_v37  ;;  %v2743_v32 = vld [vmem:[%s8740_s12 + $0xd0] sm:$0xff]  ;;  %v2199_v37 = vpack.c.bf16 %v2171_v16, %v2170_v24 }
 0x296   : > { %8014 = vmatmul.msk.bf16.gmra.mxu3 %vm367_vm0, %v2198_v35  ;;  %8046 = vmatmul.msk.bf16.gmra.mxu0 %vm367_vm0, %v2484_v30  ;;  %v1886_v16 = vld [vmem:[%s8740_s12 + $0xd5] sm:$0xff] }
 0x297   : > { %v9465_v27 = vadd.f32 %v2873_v22, %v2683_v5  ;;  %8078 = vmatmul.msk.bf16.gmra.mxu1 %vm367_vm0, %v2770_v7  ;;  %v2456_v22 = vld [vmem:[%s8740_s12 + $0xc7] sm:$0xff] }
 0x298   : > { %v2018_v58 = vpop.f32.mrf.mxu2  ;;  %v2485_v7 = vpack.c.bf16 %v2457_v33, %v2456_v22  ;;  %v1887_v22 = vld [vmem:[%s8740_s12 + $0xdd] sm:$0xff] }
 0x299   : > { %v2112_v55 = vadd.f32 %v2018_v58, %v9105_v47  ;;  %v2304_v10 = vpop.f32.mrf.mxu3  ;;  %v1913_v47 = vpack.c.bf16 %v1885_v59, %v1884_v48  ;;  %v2172_v33 = vld [vmem:[%s8740_s12 + $0xd6] sm:$0xff] }
 0x29b   : > { %v2398_v62 = vadd.f32 %v2304_v10, %v2112_v55  ;;  %v2592_v43 = vpop.f32.mrf.mxu0 }
 0x29c   : > { %v2878_v40 = vpop.f32.mrf.mxu1 }
 0x29d   : > { %v2684_v19 = vadd.f32 %v2590_v26, %v2398_v62  ;;  %v2771_v26 = vpack.c.bf16 %v2743_v32, %v2742_v42  ;;  %v2173_v42 = vld [vmem:[%s8740_s12 + $0xde] sm:$0xff] }
 0x29e   : > { %v2459_v32 = vld [vmem:[%s8740_s12 + $0xdf] sm:$0xff] }
 0x29f   : > { %v9472_v20 = vadd.f32 %v2876_v29, %v2684_v19 }
 0x2a0   : > { %v2020_v8 = vpop.f32.mrf.mxu2 }
 0x2a1   : > { %v2113_v35 = vadd.f32 %v2020_v8, %v9115_v51  ;;  %v2306_v30 = vpop.f32.mrf.mxu3 }
 0x2a3   : > { %v2399_v5 = vadd.f32 %v2306_v30, %v2113_v35  ;;  %v2595_v58 = vpop.f32.mrf.mxu0  ;;  %v2744_v30 = vld [vmem:[%s8740_s12 + $0xd8] sm:$0xff] }
 0x2a4   : > { %v2881_v55 = vpop.f32.mrf.mxu1 }
 0x2a5   : > { %7983 = vmatmul.msk.bf16.gmra.mxu2 %vm367_vm0, %v1913_v47  ;;  %v2685_v29 = vadd.f32 %v2592_v43, %v2399_v5  ;;  %v2745_v47 = vld [vmem:[%s8740_s12 + $0xe0] sm:$0xff]  ;;  %v2200_v5 = vpack.c.bf16 %v2173_v42, %v2172_v33 }
 0x2a6   : > { %8015 = vmatmul.msk.bf16.gmra.mxu3 %vm367_vm0, %v2199_v37  ;;  %8047 = vmatmul.msk.bf16.gmra.mxu0 %vm367_vm0, %v2485_v7  ;;  %v1888_v42 = vld [vmem:[%s8740_s12 + $0xe5] sm:$0xff] }
 0x2a7   : > { %v9483_v51 = vadd.f32 %v2878_v40, %v2685_v29  ;;  %8079 = vmatmul.msk.bf16.gmra.mxu1 %vm367_vm0, %v2771_v26  ;;  %v2458_v40 = vld [vmem:[%s8740_s12 + $0xd7] sm:$0xff] }
 0x2a8   : > { %v2023_v10 = vpop.f32.mrf.mxu2  ;;  %v2486_v26 = vpack.c.bf16 %v2459_v32, %v2458_v40  ;;  %v1889_v40 = vld [vmem:[%s8740_s12 + $0xed] sm:$0xff] }
 0x2a9   : > { %v2114_v62 = vadd.f32 %v2023_v10, %v9121_v52  ;;  %v2309_v19 = vpop.f32.mrf.mxu3  ;;  %v1914_v52 = vpack.c.bf16 %v1887_v22, %v1886_v16  ;;  %v2174_v32 = vld [vmem:[%s8740_s12 + $0xe6] sm:$0xff] }
 0x2ab   : > { %v2400_v48 = vadd.f32 %v2309_v19, %v2114_v62  ;;  %v2597_v59 = vpop.f32.mrf.mxu0 }
 0x2ac   : > { %v2883_v43 = vpop.f32.mrf.mxu1 }
 0x2ad   : > { %v2686_v24 = vadd.f32 %v2595_v58, %v2400_v48  ;;  %v2772_v58 = vpack.c.bf16 %v2745_v47, %v2744_v30  ;;  %v2175_v30 = vld [vmem:[%s8740_s12 + $0xee] sm:$0xff] }
 0x2ae   : > { %v2461_v47 = vld [vmem:[%s8740_s12 + $0xef] sm:$0xff] }
 0x2af   : > { %v9490_v8 = vadd.f32 %v2881_v55, %v2686_v24 }
 0x2b0   : > { %v2025_v35 = vpop.f32.mrf.mxu2 }
 0x2b1   : > { %v2115_v37 = vadd.f32 %v2025_v35, %v9131_v11  ;;  %v2311_v7 = vpop.f32.mrf.mxu3 }
 0x2b3   : > { %v2401_v29 = vadd.f32 %v2311_v7, %v2115_v37  ;;  %v2600_v10 = vpop.f32.mrf.mxu0  ;;  %v2746_v7 = vld [vmem:[%s8740_s12 + $0xe8] sm:$0xff] }
 0x2b4   : > { %v2886_v62 = vpop.f32.mrf.mxu1 }
 0x2b5   : > { %7984 = vmatmul.msk.bf16.gmra.mxu2 %vm367_vm0, %v1914_v52  ;;  %v2687_v55 = vadd.f32 %v2597_v59, %v2401_v29  ;;  %v2747_v52 = vld [vmem:[%s8740_s12 + $0xf0] sm:$0xff]  ;;  %v2201_v29 = vpack.c.bf16 %v2175_v30, %v2174_v32 }
 0x2b6   : > { %8016 = vmatmul.msk.bf16.gmra.mxu3 %vm367_vm0, %v2200_v5  ;;  %8048 = vmatmul.msk.bf16.gmra.mxu0 %vm367_vm0, %v2486_v26  ;;  %v1890_v30 = vld [vmem:[%s8740_s12 + $0xf5] sm:$0xff] }
 0x2b7   : > { %v9501_v11 = vadd.f32 %v2883_v43, %v2687_v55  ;;  %8080 = vmatmul.msk.bf16.gmra.mxu1 %vm367_vm0, %v2772_v58  ;;  %v2460_v43 = vld [vmem:[%s8740_s12 + $0xe7] sm:$0xff] }
 0x2b8   : > { %v2028_v19 = vpop.f32.mrf.mxu2  ;;  %v2487_v58 = vpack.c.bf16 %v2461_v47, %v2460_v43  ;;  %v1891_v43 = vld [vmem:[%s8740_s12 + $0xfd] sm:$0xff] }
 0x2b9   : > { %v2116_v48 = vadd.f32 %v2028_v19, %v9137_v60  ;;  %v2314_v24 = vpop.f32.mrf.mxu3  ;;  %v1915_v60 = vpack.c.bf16 %v1889_v40, %v1888_v42  ;;  %v2176_v47 = vld [vmem:[%s8740_s12 + $0xf6] sm:$0xff] }
 0x2bb   : > { %v2402_v16 = vadd.f32 %v2314_v24, %v2116_v48  ;;  %v2602_v22 = vpop.f32.mrf.mxu0 }
 0x2bc   : > { %v2888_v59 = vpop.f32.mrf.mxu1 }
 0x2bd   : > { %v2688_v33 = vadd.f32 %v2600_v10, %v2402_v16  ;;  %v2773_v10 = vpack.c.bf16 %v2747_v52, %v2746_v7  ;;  %v2177_v7 = vld [vmem:[%s8740_s12 + $0xfe] sm:$0xff] }
 0x2be   : > { %v2463_v52 = vld [vmem:[%s8740_s12 + $0xff] sm:$0xff] }
 0x2bf   : > { %v9508_v35 = vadd.f32 %v2886_v62, %v2688_v33 }
 0x2c0   : > { %v2030_v37 = vpop.f32.mrf.mxu2 }
 0x2c1   : > { %v2117_v5 = vadd.f32 %v2030_v37, %v9147_v36  ;;  %v2316_v26 = vpop.f32.mrf.mxu3 }
 0x2c3   : > { %v2403_v55 = vadd.f32 %v2316_v26, %v2117_v5  ;;  %v2605_v19 = vpop.f32.mrf.mxu0  ;;  %v2748_v26 = vld [vmem:[%s8740_s12 + $0xf8] sm:$0xff] }
 0x2c4   : > { %v2891_v48 = vpop.f32.mrf.mxu1 }
 0x2c5   : > { %7985 = vmatmul.msk.bf16.gmra.mxu2 %vm367_vm0, %v1915_v60  ;;  %v2689_v62 = vadd.f32 %v2602_v22, %v2403_v55  ;;  %v2749_v60 = vld [vmem:[%s8740_s12 + $0x100] sm:$0xff]  ;;  %v2202_v55 = vpack.c.bf16 %v2177_v7, %v2176_v47 }
 0x2c6   : > { %8017 = vmatmul.msk.bf16.gmra.mxu3 %vm367_vm0, %v2201_v29  ;;  %8049 = vmatmul.msk.bf16.gmra.mxu0 %vm367_vm0, %v2487_v58  ;;  %v1892_v7 = vld [vmem:[%s8740_s12 + $0x105] sm:$0xff] }
 0x2c7   : > { %v9519_v36 = vadd.f32 %v2888_v59, %v2689_v62  ;;  %8081 = vmatmul.msk.bf16.gmra.mxu1 %vm367_vm0, %v2773_v10  ;;  %v2462_v59 = vld [vmem:[%s8740_s12 + $0xf7] sm:$0xff] }
 0x2c8   : > { %v2033_v24 = vpop.f32.mrf.mxu2  ;;  %v2488_v10 = vpack.c.bf16 %v2463_v52, %v2462_v59  ;;  %v1893_v59 = vld [vmem:[%s8740_s12 + $0x10d] sm:$0xff] }
 0x2c9   : > { %v2118_v16 = vadd.f32 %v2033_v24, %v9153_v56  ;;  %v2319_v33 = vpop.f32.mrf.mxu3  ;;  %v1916_v56 = vpack.c.bf16 %v1891_v43, %v1890_v30  ;;  %v2178_v52 = vld [vmem:[%s8740_s12 + $0x106] sm:$0xff] }
 0x2cb   : > { %v2404_v42 = vadd.f32 %v2319_v33, %v2118_v16  ;;  %v2607_v40 = vpop.f32.mrf.mxu0 }
 0x2cc   : > { %v2893_v22 = vpop.f32.mrf.mxu1 }
 0x2cd   : > { %v2690_v32 = vadd.f32 %v2605_v19, %v2404_v42  ;;  %v2774_v19 = vpack.c.bf16 %v2749_v60, %v2748_v26  ;;  %v2179_v26 = vld [vmem:[%s8740_s12 + $0x10e] sm:$0xff] }
 0x2ce   : > { %v2465_v60 = vld [vmem:[%s8740_s12 + $0x10f] sm:$0xff] }
 0x2cf   : > { %v9526_v37 = vadd.f32 %v2891_v48, %v2690_v32 }
 0x2d0   : > { %v2035_v5 = vpop.f32.mrf.mxu2 }
 0x2d1   : > { %v2119_v29 = vadd.f32 %v2035_v5, %v9163_v0  ;;  %v2321_v58 = vpop.f32.mrf.mxu3 }
 0x2d3   : > { %v2405_v62 = vadd.f32 %v2321_v58, %v2119_v29  ;;  %v2610_v24 = vpop.f32.mrf.mxu0  ;;  %v2750_v58 = vld [vmem:[%s8740_s12 + $0x108] sm:$0xff] }
 0x2d4   : > { %v2896_v16 = vpop.f32.mrf.mxu1 }
 0x2d5   : > { %7986 = vmatmul.msk.bf16.gmra.mxu2 %vm367_vm0, %v1916_v56  ;;  %v2691_v48 = vadd.f32 %v2607_v40, %v2405_v62  ;;  %v2751_v56 = vld [vmem:[%s8740_s12 + $0x110] sm:$0xff]  ;;  %v2203_v62 = vpack.c.bf16 %v2179_v26, %v2178_v52 }
 0x2d6   : > { %8018 = vmatmul.msk.bf16.gmra.mxu3 %vm367_vm0, %v2202_v55  ;;  %8050 = vmatmul.msk.bf16.gmra.mxu0 %vm367_vm0, %v2488_v10  ;;  %v1894_v26 = vld [vmem:[%s8740_s12 + $0x115] sm:$0xff] }
 0x2d7   : > { %v9537_v0 = vadd.f32 %v2893_v22, %v2691_v48  ;;  %8082 = vmatmul.msk.bf16.gmra.mxu1 %vm367_vm0, %v2774_v19  ;;  %v2464_v22 = vld [vmem:[%s8740_s12 + $0x107] sm:$0xff] }
 0x2d8   : > { %v2038_v33 = vpop.f32.mrf.mxu2  ;;  %v2489_v19 = vpack.c.bf16 %v2465_v60, %v2464_v22  ;;  %v1895_v22 = vld [vmem:[%s8740_s12 + $0x11d] sm:$0xff] }
 0x2d9   : > { %v2120_v42 = vadd.f32 %v2038_v33, %v9169_v54  ;;  %v2324_v32 = vpop.f32.mrf.mxu3  ;;  %v1917_v54 = vpack.c.bf16 %v1893_v59, %v1892_v7  ;;  %v2180_v60 = vld [vmem:[%s8740_s12 + $0x116] sm:$0xff] }
 0x2db   : > { %v2406_v30 = vadd.f32 %v2324_v32, %v2120_v42  ;;  %v2612_v43 = vpop.f32.mrf.mxu0 }
 0x2dc   : > { %v2898_v40 = vpop.f32.mrf.mxu1 }
 0x2dd   : > { %v2692_v47 = vadd.f32 %v2610_v24, %v2406_v30  ;;  %v2775_v24 = vpack.c.bf16 %v2751_v56, %v2750_v58  ;;  %v2181_v58 = vld [vmem:[%s8740_s12 + $0x11e] sm:$0xff] }
 0x2de   : > { %v2467_v56 = vld [vmem:[%s8740_s12 + $0x11f] sm:$0xff] }
 0x2df   : > { %v9544_v5 = vadd.f32 %v2896_v16, %v2692_v47 }
 0x2e0   : > { %v2040_v29 = vpop.f32.mrf.mxu2 }
 0x2e1   : > { %v2121_v55 = vadd.f32 %v2040_v29, %v9179_v31  ;;  %v2326_v10 = vpop.f32.mrf.mxu3 }
 0x2e3   : > { %v2407_v48 = vadd.f32 %v2326_v10, %v2121_v55  ;;  %v2615_v33 = vpop.f32.mrf.mxu0  ;;  %v2752_v10 = vld [vmem:[%s8740_s12 + $0x118] sm:$0xff] }
 0x2e4   : > { %v2901_v42 = vpop.f32.mrf.mxu1 }
 0x2e5   : > { %7987 = vmatmul.msk.bf16.gmra.mxu2 %vm367_vm0, %v1917_v54  ;;  %v2693_v16 = vadd.f32 %v2612_v43, %v2407_v48  ;;  %v2753_v54 = vld [vmem:[%s8740_s12 + $0x120] sm:$0xff]  ;;  %v2204_v48 = vpack.c.bf16 %v2181_v58, %v2180_v60 }
 0x2e6   : > { %8019 = vmatmul.msk.bf16.gmra.mxu3 %vm367_vm0, %v2203_v62  ;;  %8051 = vmatmul.msk.bf16.gmra.mxu0 %vm367_vm0, %v2489_v19  ;;  %v1896_v58 = vld [vmem:[%s8740_s12 + $0x125] sm:$0xff] }
 0x2e7   : > { %v9555_v31 = vadd.f32 %v2898_v40, %v2693_v16  ;;  %8083 = vmatmul.msk.bf16.gmra.mxu1 %vm367_vm0, %v2775_v24  ;;  %v2466_v40 = vld [vmem:[%s8740_s12 + $0x117] sm:$0xff] }
 0x2e8   : > { %v2043_v32 = vpop.f32.mrf.mxu2  ;;  %v2490_v24 = vpack.c.bf16 %v2467_v56, %v2466_v40  ;;  %v1897_v40 = vld [vmem:[%s8740_s12 + $0x12d] sm:$0xff] }
 0x2e9   : > { %v2122_v30 = vadd.f32 %v2043_v32, %v9185_v46  ;;  %v2329_v47 = vpop.f32.mrf.mxu3  ;;  %v1918_v46 = vpack.c.bf16 %v1895_v22, %v1894_v26  ;;  %v2182_v56 = vld [vmem:[%s8740_s12 + $0x126] sm:$0xff] }
 0x2eb   : > { %v2408_v7 = vadd.f32 %v2329_v47, %v2122_v30  ;;  %v2617_v59 = vpop.f32.mrf.mxu0 }
 0x2ec   : > { %v2903_v43 = vpop.f32.mrf.mxu1 }
 0x2ed   : > { %v2694_v52 = vadd.f32 %v2615_v33, %v2408_v7  ;;  %v2776_v33 = vpack.c.bf16 %v2753_v54, %v2752_v10  ;;  %v2183_v10 = vld [vmem:[%s8740_s12 + $0x12e] sm:$0xff] }
 0x2ee   : > { %v2469_v54 = vld [vmem:[%s8740_s12 + $0x12f] sm:$0xff] }
 0x2ef   : > { %v9562_v29 = vadd.f32 %v2901_v42, %v2694_v52 }
 0x2f0   : > { %v2045_v55 = vpop.f32.mrf.mxu2 }
 0x2f1   : > { %v2123_v62 = vadd.f32 %v2045_v55, %v9195_v2  ;;  %v2331_v19 = vpop.f32.mrf.mxu3 }
 0x2f3   : > { %v2409_v16 = vadd.f32 %v2331_v19, %v2123_v62  ;;  %v2620_v32 = vpop.f32.mrf.mxu0  ;;  %v2754_v19 = vld [vmem:[%s8740_s12 + $0x128] sm:$0xff] }
 0x2f4   : > { %v2906_v30 = vpop.f32.mrf.mxu1 }
 0x2f5   : > { %7988 = vmatmul.msk.bf16.gmra.mxu2 %vm367_vm0, %v1918_v46  ;;  %v2695_v42 = vadd.f32 %v2617_v59, %v2409_v16  ;;  %v2755_v46 = vld [vmem:[%s8740_s12 + $0x130] sm:$0xff]  ;;  %v2205_v16 = vpack.c.bf16 %v2183_v10, %v2182_v56 }
 0x2f6   : > { %8020 = vmatmul.msk.bf16.gmra.mxu3 %vm367_vm0, %v2204_v48  ;;  %8052 = vmatmul.msk.bf16.gmra.mxu0 %vm367_vm0, %v2490_v24  ;;  %v1898_v10 = vld [vmem:[%s8740_s12 + $0x135] sm:$0xff] }
 0x2f7   : > { %v9573_v2 = vadd.f32 %v2903_v43, %v2695_v42  ;;  %8084 = vmatmul.msk.bf16.gmra.mxu1 %vm367_vm0, %v2776_v33  ;;  %v2468_v43 = vld [vmem:[%s8740_s12 + $0x127] sm:$0xff] }
 0x2f8   : > { %v2048_v47 = vpop.f32.mrf.mxu2  ;;  %v2491_v33 = vpack.c.bf16 %v2469_v54, %v2468_v43  ;;  %v1899_v43 = vld [vmem:[%s8740_s12 + $0x13d] sm:$0xff] }
 0x2f9   : > { %v2124_v7 = vadd.f32 %v2048_v47, %v9201_v21  ;;  %v2334_v52 = vpop.f32.mrf.mxu3  ;;  %v1919_v21 = vpack.c.bf16 %v1897_v40, %v1896_v58  ;;  %v2184_v54 = vld [vmem:[%s8740_s12 + $0x136] sm:$0xff] }
 0x2fb   : > { %v2410_v26 = vadd.f32 %v2334_v52, %v2124_v7  ;;  %v2622_v22 = vpop.f32.mrf.mxu0 }
 0x2fc   : > { %v2908_v59 = vpop.f32.mrf.mxu1 }
 0x2fd   : > { %v2696_v60 = vadd.f32 %v2620_v32, %v2410_v26  ;;  %v2777_v32 = vpack.c.bf16 %v2755_v46, %v2754_v19  ;;  %v2471_v46 = vld [vmem:[%s8740_s12 + $0x13f] sm:$0xff] }
 0x2ff   : > { %v9580_v55 = vadd.f32 %v2906_v30, %v2696_v60 }
 0x300   : > { %v2050_v62 = vpop.f32.mrf.mxu2 }
 0x301   : > { %v2125_v48 = vadd.f32 %v2050_v62, %v9211_v61  ;;  %v2336_v24 = vpop.f32.mrf.mxu3  ;;  %v2185_v62 = vld [vmem:[%s8740_s12 + $0x13e] sm:$0xff] }
 0x303   : > { %v2411_v42 = vadd.f32 %v2336_v24, %v2125_v48  ;;  %v2625_v47 = vpop.f32.mrf.mxu0  ;;  %v8624_v48 = vld [vmem:[%s11224_s1 + $0xd0] sm:$0xff] }
 0x304   : > { %v2911_v7 = vpop.f32.mrf.mxu1  ;;  %4008 = vmatpush.bf16.msrb.mxu1 %v8624_v48  ;;  %v1901_v48 = vld [vmem:[%s8740_s12 + $0x14d] sm:$0xff] }
 0x305   : > { %7989 = vmatmul.msk.bf16.gmra.mxu2 %vm367_vm0, %v1919_v21  ;;  %v2697_v30 = vadd.f32 %v2622_v22, %v2411_v42  ;;  %v2757_v21 = vld [vmem:[%s8740_s12 + $0x140] sm:$0xff]  ;;  %v1920_v42 = vpack.c.bf16 %v1899_v43, %v1898_v10 }
 0x306   : > { %8021 = vmatmul.msk.bf16.gmra.mxu3 %vm367_vm0, %v2205_v16  ;;  %8053 = vmatmul.msk.bf16.gmra.mxu0 %vm367_vm0, %v2491_v33 }
 0x307   : > { %v9591_v61 = vadd.f32 %v2908_v59, %v2697_v30  ;;  %8085 = vmatmul.msk.bf16.gmra.mxu1 %vm367_vm0, %v2777_v32  ;;  %v2470_v59 = vld [vmem:[%s8740_s12 + $0x137] sm:$0xff] }
 0x308   : > { %v2053_v52 = vpop.f32.mrf.mxu2  ;;  %v2492_v32 = vpack.c.bf16 %v2471_v46, %v2470_v59  ;;  %v1900_v46 = vld [vmem:[%s8740_s12 + $0x145] sm:$0xff] }
 0x309   : > { %v2126_v26 = vadd.f32 %v2053_v52, %v9217_v45  ;;  %v2339_v60 = vpop.f32.mrf.mxu3  ;;  %v2756_v45 = vld [vmem:[%s8740_s12 + $0x138] sm:$0xff] }
 0x30b   : > { %v2412_v58 = vadd.f32 %v2339_v60, %v2126_v26  ;;  %v2627_v40 = vpop.f32.mrf.mxu0 }
 0x30c   : > { %v2913_v56 = vpop.f32.mrf.mxu1 }
 0x30d   : > { %v2698_v22 = vadd.f32 %v2625_v47, %v2412_v58  ;;  %v2206_v47 = vpack.c.bf16 %v2185_v62, %v2184_v54 }
 0x30f   : > { %v9599_v19 = vadd.f32 %v2911_v7, %v2698_v22  ;;  %v2778_v7 = vpack.c.bf16 %v2757_v21, %v2756_v45  ;;  %v2187_v45 = vld [vmem:[%s8740_s12 + $0x14e] sm:$0xff] }
 0x310   : > { %v2055_v24 = vpop.f32.mrf.mxu2 }
 0x311   : > { %v2127_v16 = vadd.f32 %v2055_v24, %v9233_v4  ;;  %v2341_v33 = vpop.f32.mrf.mxu3  ;;  %v8627_v4 = vld [vmem:[%s11224_s1 + $0xe8] sm:$0xff] }
 0x312   : > { %4293 = vmatpush.bf16.msra.mxu2 %v8627_v4  ;;  %v2186_v24 = vld [vmem:[%s8740_s12 + $0x146] sm:$0xff] }
 0x313   : > { %v2413_v30 = vadd.f32 %v2341_v33, %v2127_v16  ;;  %v2630_v52 = vpop.f32.mrf.mxu0  ;;  %v2472_v16 = vld [vmem:[%s8740_s12 + $0x147] sm:$0xff]  ;;  %v2473_v33 = vld [vmem:[%s8740_s12 + $0x14f] sm:$0xff] }
 0x314   : > { %v2916_v26 = vpop.f32.mrf.mxu1  ;;  %v2493_v4 = vpack.c.bf16 %v2473_v33, %v2472_v16  ;;  %v3006_v16 = vld [vmem:[%s8740_s12 + $0x28] sm:$0xff]  ;;  %v3007_v33 = vld [vmem:[%s8740_s12 + $0x30] sm:$0xff] }
 0x315   : > { %7990 = vmatmul.msk.bf16.gmra.mxu2 %vm367_vm0, %v1920_v42  ;;  %v2699_v60 = vadd.f32 %v2627_v40, %v2413_v30  ;;  %v8629_v40 = vld [vmem:[%s11224_s1 + $0xf8] sm:$0xff] }
 0x316   : > { %8022 = vmatmul.msk.bf16.gmra.mxu3 %vm367_vm0, %v2206_v47  ;;  %8054 = vmatmul.msk.bf16.gmra.mxu0 %vm367_vm0, %v2492_v32  ;;  %v2758_v47 = vld [vmem:[%s8740_s12 + $0x148] sm:$0xff]  ;;  %v2759_v32 = vld [vmem:[%s8740_s12 + $0x150] sm:$0xff] }
 0x317   : > { %v9615_v58 = vadd.f32 %v2913_v56, %v2699_v60  ;;  %8086 = vmatmul.msk.bf16.gmra.mxu1 %vm367_vm0, %v2778_v7  ;;  %4579 = vmatpush.bf16.msra.mxu3 %v8629_v40  ;;  %v1921_v60 = vpack.c.bf16 %v1901_v48, %v1900_v46 }
 0x318   : > { %v2058_v22 = vpop.f32.mrf.mxu2 }
 0x319   : > { %v2128_v10 = vadd.f32 %v2058_v22, %v9242_v9  ;;  %v2344_v43 = vpop.f32.mrf.mxu3  ;;  %v8631_v9 = vld [vmem:[%s11224_s1 + $0x108] sm:$0xff] }
 0x31a   : > { %4865 = vmatpush.bf16.msra.mxu0 %v8631_v9  ;;  %v3292_v9 = vld [vmem:[%s8740_s12 + $0x29] sm:$0xff] }
 0x31b   : > { %v2414_v54 = vadd.f32 %v2344_v43, %v2128_v10  ;;  %v2632_v62 = vpop.f32.mrf.mxu0 }
 0x31c   : > { %v2918_v56 = vpop.f32.mrf.mxu1 }
 0x31d   : > { %v2700_v59 = vadd.f32 %v2630_v52, %v2414_v54  ;;  %v2207_v52 = vpack.c.bf16 %v2187_v45, %v2186_v24 }
 0x31f   : > { %v9626_v21 = vadd.f32 %v2916_v26, %v2700_v59  ;;  %v2779_v26 = vpack.c.bf16 %v2759_v32, %v2758_v47  ;;  %v3293_v47 = vld [vmem:[%s8740_s12 + $0x31] sm:$0xff] }
 0x320   : > { %v2060_v42 = vpop.f32.mrf.mxu2  ;;  %v3579_v32 = vld [vmem:[%s8740_s12 + $0x32] sm:$0xff] }
 0x321   : > { %v2129_v30 = vadd.f32 %v2060_v42, %v9255_v15  ;;  %v2346_v7 = vpop.f32.mrf.mxu3 }
 0x323   : > { %v2415_v40 = vadd.f32 %v2346_v7, %v2129_v30  ;;  %v2635_v22 = vpop.f32.mrf.mxu0  ;;  %v3864_v7 = vld [vmem:[%s8740_s12 + $0x2b] sm:$0xff] }
 0x324   : > { %v2921_v10 = vpop.f32.mrf.mxu1 }
 0x325   : > { %7991 = vmatmul.msk.bf16.gmra.mxu2 %vm367_vm0, %v1921_v60  ;;  %v2701_v43 = vadd.f32 %v2632_v62, %v2415_v40  ;;  %v3865_v60 = vld [vmem:[%s8740_s12 + $0x33] sm:$0xff]  ;;  %v3332_v40 = vpack.c.bf16 %v3293_v47, %v3292_v9 }
 0x326   : > { %8023 = vmatmul.msk.bf16.gmra.mxu3 %vm367_vm0, %v2207_v52  ;;  %8055 = vmatmul.msk.bf16.gmra.mxu0 %vm367_vm0, %v2493_v4  ;;  %v3008_v47 = vld [vmem:[%s8740_s12 + $0x38] sm:$0xff] }
 0x327   : > { %v9639_v15 = vadd.f32 %v2918_v56, %v2701_v43  ;;  %8087 = vmatmul.msk.bf16.gmra.mxu1 %vm367_vm0, %v2779_v26  ;;  %v3578_v56 = vld [vmem:[%s8740_s12 + $0x2a] sm:$0xff] }
 0x328   : > { %v2063_v54 = vpop.f32.mrf.mxu2  ;;  %v3618_v26 = vpack.c.bf16 %v3579_v32, %v3578_v56  ;;  %v3009_v56 = vld [vmem:[%s8740_s12 + $0x40] sm:$0xff] }
 0x329   : > { %v2130_v59 = vadd.f32 %v2063_v54, %v9262_v6  ;;  %v2349_v46 = vpop.f32.mrf.mxu3  ;;  %v3046_v6 = vpack.c.bf16 %v3007_v33, %v3006_v16  ;;  %v3294_v32 = vld [vmem:[%s8740_s12 + $0x39] sm:$0xff] }
 0x32b   : > { %v2416_v48 = vadd.f32 %v2349_v46, %v2130_v59  ;;  %v2637_v24 = vpop.f32.mrf.mxu0 }
 0x32c   : > { %v2923_v62 = vpop.f32.mrf.mxu1 }
 0x32d   : > { %v2702_v45 = vadd.f32 %v2635_v22, %v2416_v48  ;;  %v3904_v22 = vpack.c.bf16 %v3865_v60, %v3864_v7  ;;  %v3295_v7 = vld [vmem:[%s8740_s12 + $0x41] sm:$0xff] }
 0x32e   : > { %v3581_v60 = vld [vmem:[%s8740_s12 + $0x42] sm:$0xff] }
 0x32f   : > { %v9646_v42 = vadd.f32 %v2921_v10, %v2702_v45 }
 0x330   : > { %v2065_v30 = vpop.f32.mrf.mxu2 }
 0x331   : > { %v2131_v52 = vadd.f32 %v2065_v30, %v9273_v39  ;;  %v2351_v4 = vpop.f32.mrf.mxu3 }
 0x333   : > { %v2417_v43 = vadd.f32 %v2351_v4, %v2131_v52  ;;  %v2640_v54 = vpop.f32.mrf.mxu0  ;;  %v3866_v4 = vld [vmem:[%s8740_s12 + $0x3b] sm:$0xff] }
 0x334   : > { %v2926_v59 = vpop.f32.mrf.mxu1 }
 0x335   : > { %8100 = vmatmul.msk.bf16.vlgmr.msrb.gmra.mxu2 %vm367_vm0, %v3046_v6  ;;  %v2703_v10 = vadd.f32 %v2637_v24, %v2417_v43  ;;  %v3867_v6 = vld [vmem:[%s8740_s12 + $0x43] sm:$0xff]  ;;  %v3333_v43 = vpack.c.bf16 %v3295_v7, %v3294_v32 }
 0x336   : > { %8132 = vmatmul.msk.bf16.vlgmr.msrb.gmra.mxu3 %vm367_vm0, %v3332_v40  ;;  %8164 = vmatmul.msk.bf16.vlgmr.msrb.gmra.mxu0 %vm367_vm0, %v3618_v26  ;;  %v3010_v7 = vld [vmem:[%s8740_s12 + $0x48] sm:$0xff] }
 0x337   : > { %v9657_v39 = vadd.f32 %v2923_v62, %v2703_v10  ;;  %8196 = vmatmul.msk.bf16.vlgmr.msrb.gmra.mxu1 %vm367_vm0, %v3904_v22  ;;  %v3580_v62 = vld [vmem:[%s8740_s12 + $0x3a] sm:$0xff] }
 0x338   : > { %v2068_v46 = vpop.f32.mrf.mxu2  ;;  %v3619_v22 = vpack.c.bf16 %v3581_v60, %v3580_v62  ;;  %v3011_v62 = vld [vmem:[%s8740_s12 + $0x50] sm:$0xff] }
 0x339   : > { %v2132_v48 = vadd.f32 %v2068_v46, %v9280_v41  ;;  %v2354_v45 = vpop.f32.mrf.mxu3  ;;  %v3047_v41 = vpack.c.bf16 %v3009_v56, %v3008_v47  ;;  %v3296_v60 = vld [vmem:[%s8740_s12 + $0x49] sm:$0xff] }
 0x33b   : > { %v2418_v16 = vadd.f32 %v2354_v45, %v2132_v48  ;;  %v2642_v33 = vpop.f32.mrf.mxu0 }
 0x33c   : > { %v2928_v24 = vpop.f32.mrf.mxu1 }
 0x33d   : > { %v2704_v9 = vadd.f32 %v2640_v54, %v2418_v16  ;;  %v3905_v54 = vpack.c.bf16 %v3867_v6, %v3866_v4  ;;  %v3297_v4 = vld [vmem:[%s8740_s12 + $0x51] sm:$0xff] }
 0x33e   : > { %v3583_v6 = vld [vmem:[%s8740_s12 + $0x52] sm:$0xff] }
 0x33f   : > { %v9664_v30 = vadd.f32 %v2926_v59, %v2704_v9 }
 0x340   : > { %v2070_v52 = vpop.f32.mrf.mxu2 }
 0x341   : > { %v2133_v40 = vadd.f32 %v2070_v52, %v9291_v63  ;;  %v2356_v26 = vpop.f32.mrf.mxu3 }
 0x343   : > { %v2419_v10 = vadd.f32 %v2356_v26, %v2133_v40  ;;  %v2645_v46 = vpop.f32.mrf.mxu0  ;;  %v3868_v26 = vld [vmem:[%s8740_s12 + $0x4b] sm:$0xff] }
 0x344   : > { %v2931_v48 = vpop.f32.mrf.mxu1 }
 0x345   : > { %8101 = vmatmul.msk.bf16.gmra.mxu2 %vm367_vm0, %v3047_v41  ;;  %v2705_v59 = vadd.f32 %v2642_v33, %v2419_v10  ;;  %v3869_v41 = vld [vmem:[%s8740_s12 + $0x53] sm:$0xff]  ;;  %v3334_v10 = vpack.c.bf16 %v3297_v4, %v3296_v60 }
 0x346   : > { %8133 = vmatmul.msk.bf16.gmra.mxu3 %vm367_vm0, %v3333_v43  ;;  %8165 = vmatmul.msk.bf16.gmra.mxu0 %vm367_vm0, %v3619_v22  ;;  %v3012_v4 = vld [vmem:[%s8740_s12 + $0x58] sm:$0xff] }
 0x347   : > { %v9675_v63 = vadd.f32 %v2928_v24, %v2705_v59  ;;  %8197 = vmatmul.msk.bf16.gmra.mxu1 %vm367_vm0, %v3905_v54  ;;  %v3582_v24 = vld [vmem:[%s8740_s12 + $0x4a] sm:$0xff] }
 0x348   : > { %v2073_v45 = vpop.f32.mrf.mxu2  ;;  %v3620_v54 = vpack.c.bf16 %v3583_v6, %v3582_v24  ;;  %v3013_v24 = vld [vmem:[%s8740_s12 + $0x60] sm:$0xff] }
 0x349   : > { %v2134_v16 = vadd.f32 %v2073_v45, %v9298_v28  ;;  %v2359_v9 = vpop.f32.mrf.mxu3  ;;  %v3048_v28 = vpack.c.bf16 %v3011_v62, %v3010_v7  ;;  %v3298_v6 = vld [vmem:[%s8740_s12 + $0x59] sm:$0xff] }
 0x34b   : > { %v2420_v47 = vadd.f32 %v2359_v9, %v2134_v16  ;;  %v2647_v56 = vpop.f32.mrf.mxu0 }
 0x34c   : > { %v2933_v33 = vpop.f32.mrf.mxu1 }
 0x34d   : > { %v2706_v32 = vadd.f32 %v2645_v46, %v2420_v47  ;;  %v3906_v46 = vpack.c.bf16 %v3869_v41, %v3868_v26  ;;  %v3299_v26 = vld [vmem:[%s8740_s12 + $0x61] sm:$0xff] }
 0x34e   : > { %v3585_v41 = vld [vmem:[%s8740_s12 + $0x62] sm:$0xff] }
 0x34f   : > { %v9682_v52 = vadd.f32 %v2931_v48, %v2706_v32 }
 0x350   : > { %v2075_v40 = vpop.f32.mrf.mxu2 }
 0x351   : > { %v2135_v43 = vadd.f32 %v2075_v40, %v9309_v23  ;;  %v2361_v22 = vpop.f32.mrf.mxu3 }
 0x353   : > { %v2421_v59 = vadd.f32 %v2361_v22, %v2135_v43  ;;  %v2650_v45 = vpop.f32.mrf.mxu0  ;;  %v3870_v22 = vld [vmem:[%s8740_s12 + $0x5b] sm:$0xff] }
 0x354   : > { %v2936_v16 = vpop.f32.mrf.mxu1 }
 0x355   : > { %8102 = vmatmul.msk.bf16.gmra.mxu2 %vm367_vm0, %v3048_v28  ;;  %v2707_v48 = vadd.f32 %v2647_v56, %v2421_v59  ;;  %v3871_v28 = vld [vmem:[%s8740_s12 + $0x63] sm:$0xff]  ;;  %v3335_v59 = vpack.c.bf16 %v3299_v26, %v3298_v6 }
 0x356   : > { %8134 = vmatmul.msk.bf16.gmra.mxu3 %vm367_vm0, %v3334_v10  ;;  %8166 = vmatmul.msk.bf16.gmra.mxu0 %vm367_vm0, %v3620_v54  ;;  %v3014_v26 = vld [vmem:[%s8740_s12 + $0x68] sm:$0xff] }
 0x357   : > { %v9693_v23 = vadd.f32 %v2933_v33, %v2707_v48  ;;  %8198 = vmatmul.msk.bf16.gmra.mxu1 %vm367_vm0, %v3906_v46  ;;  %v3584_v33 = vld [vmem:[%s8740_s12 + $0x5a] sm:$0xff] }
 0x358   : > { %v2078_v9 = vpop.f32.mrf.mxu2  ;;  %v3621_v46 = vpack.c.bf16 %v3585_v41, %v3584_v33  ;;  %v3015_v33 = vld [vmem:[%s8740_s12 + $0x70] sm:$0xff] }
 0x359   : > { %v2136_v47 = vadd.f32 %v2078_v9, %v9316_v53  ;;  %v2364_v32 = vpop.f32.mrf.mxu3  ;;  %v3049_v53 = vpack.c.bf16 %v3013_v24, %v3012_v4  ;;  %v3300_v41 = vld [vmem:[%s8740_s12 + $0x69] sm:$0xff] }
 0x35b   : > { %v2422_v7 = vadd.f32 %v2364_v32, %v2136_v47  ;;  %v2652_v62 = vpop.f32.mrf.mxu0 }
 0x35c   : > { %v2938_v56 = vpop.f32.mrf.mxu1 }
 0x35d   : > { %v2708_v60 = vadd.f32 %v2650_v45, %v2422_v7  ;;  %v3907_v45 = vpack.c.bf16 %v3871_v28, %v3870_v22  ;;  %v3301_v22 = vld [vmem:[%s8740_s12 + $0x71] sm:$0xff] }
 0x35e   : > { %v3587_v28 = vld [vmem:[%s8740_s12 + $0x72] sm:$0xff] }
 0x35f   : > { %v9700_v40 = vadd.f32 %v2936_v16, %v2708_v60 }
 0x360   : > { %v2080_v43 = vpop.f32.mrf.mxu2 }
 0x361   : > { %v2137_v10 = vadd.f32 %v2080_v43, %v9327_v49  ;;  %v2366_v54 = vpop.f32.mrf.mxu3 }
 0x363   : > { %v2423_v48 = vadd.f32 %v2366_v54, %v2137_v10  ;;  %v2655_v9 = vpop.f32.mrf.mxu0  ;;  %v3872_v54 = vld [vmem:[%s8740_s12 + $0x6b] sm:$0xff] }
 0x364   : > { %v2941_v47 = vpop.f32.mrf.mxu1 }
 0x365   : > { %8103 = vmatmul.msk.bf16.gmra.mxu2 %vm367_vm0, %v3049_v53  ;;  %v2709_v16 = vadd.f32 %v2652_v62, %v2423_v48  ;;  %v3873_v53 = vld [vmem:[%s8740_s12 + $0x73] sm:$0xff]  ;;  %v3336_v48 = vpack.c.bf16 %v3301_v22, %v3300_v41 }
 0x366   : > { %8135 = vmatmul.msk.bf16.gmra.mxu3 %vm367_vm0, %v3335_v59  ;;  %8167 = vmatmul.msk.bf16.gmra.mxu0 %vm367_vm0, %v3621_v46  ;;  %v3016_v22 = vld [vmem:[%s8740_s12 + $0x78] sm:$0xff] }
 0x367   : > { %v9711_v49 = vadd.f32 %v2938_v56, %v2709_v16  ;;  %8199 = vmatmul.msk.bf16.gmra.mxu1 %vm367_vm0, %v3907_v45  ;;  %v3586_v56 = vld [vmem:[%s8740_s12 + $0x6a] sm:$0xff] }
 0x368   : > { %v2083_v32 = vpop.f32.mrf.mxu2  ;;  %v3622_v45 = vpack.c.bf16 %v3587_v28, %v3586_v56  ;;  %v3017_v56 = vld [vmem:[%s8740_s12 + $0x80] sm:$0xff] }
 0x369   : > { %v2138_v7 = vadd.f32 %v2083_v32, %v9334_v12  ;;  %v2369_v60 = vpop.f32.mrf.mxu3  ;;  %v3050_v12 = vpack.c.bf16 %v3015_v33, %v3014_v26  ;;  %v3302_v28 = vld [vmem:[%s8740_s12 + $0x79] sm:$0xff] }
 0x36b   : > { %v2424_v4 = vadd.f32 %v2369_v60, %v2138_v7  ;;  %v2657_v24 = vpop.f32.mrf.mxu0 }
 0x36c   : > { %v2943_v62 = vpop.f32.mrf.mxu1 }
 0x36d   : > { %v2710_v6 = vadd.f32 %v2655_v9, %v2424_v4  ;;  %v3908_v9 = vpack.c.bf16 %v3873_v53, %v3872_v54  ;;  %v3303_v54 = vld [vmem:[%s8740_s12 + $0x81] sm:$0xff] }
 0x36e   : > { %v3589_v53 = vld [vmem:[%s8740_s12 + $0x82] sm:$0xff] }
 0x36f   : > { %v9718_v43 = vadd.f32 %v2941_v47, %v2710_v6 }
 0x370   : > { %v2085_v10 = vpop.f32.mrf.mxu2 }
 0x371   : > { %v2139_v59 = vadd.f32 %v2085_v10, %v9345_v14  ;;  %v2371_v46 = vpop.f32.mrf.mxu3 }
 0x373   : > { %v2425_v16 = vadd.f32 %v2371_v46, %v2139_v59  ;;  %v2660_v32 = vpop.f32.mrf.mxu0  ;;  %v3874_v46 = vld [vmem:[%s8740_s12 + $0x7b] sm:$0xff] }
 0x374   : > { %v2946_v7 = vpop.f32.mrf.mxu1 }
 0x375   : > { %8104 = vmatmul.msk.bf16.gmra.mxu2 %vm367_vm0, %v3050_v12  ;;  %v2711_v47 = vadd.f32 %v2657_v24, %v2425_v16  ;;  %v3875_v12 = vld [vmem:[%s8740_s12 + $0x83] sm:$0xff]  ;;  %v3337_v16 = vpack.c.bf16 %v3303_v54, %v3302_v28 }
 0x376   : > { %8136 = vmatmul.msk.bf16.gmra.mxu3 %vm367_vm0, %v3336_v48  ;;  %8168 = vmatmul.msk.bf16.gmra.mxu0 %vm367_vm0, %v3622_v45  ;;  %v3018_v54 = vld [vmem:[%s8740_s12 + $0x88] sm:$0xff] }
 0x377   : > { %v9729_v14 = vadd.f32 %v2943_v62, %v2711_v47  ;;  %8200 = vmatmul.msk.bf16.gmra.mxu1 %vm367_vm0, %v3908_v9  ;;  %v3588_v62 = vld [vmem:[%s8740_s12 + $0x7a] sm:$0xff] }
 0x378   : > { %v2088_v60 = vpop.f32.mrf.mxu2  ;;  %v3623_v9 = vpack.c.bf16 %v3589_v53, %v3588_v62  ;;  %v3019_v62 = vld [vmem:[%s8740_s12 + $0x90] sm:$0xff] }
 0x379   : > { %v2140_v4 = vadd.f32 %v2088_v60, %v9352_v3  ;;  %v2374_v6 = vpop.f32.mrf.mxu3  ;;  %v3051_v3 = vpack.c.bf16 %v3017_v56, %v3016_v22  ;;  %v3304_v53 = vld [vmem:[%s8740_s12 + $0x89] sm:$0xff] }
 0x37b   : > { %v2426_v26 = vadd.f32 %v2374_v6, %v2140_v4  ;;  %v2662_v33 = vpop.f32.mrf.mxu0 }
 0x37c   : > { %v2948_v24 = vpop.f32.mrf.mxu1 }
 0x37d   : > { %v2712_v41 = vadd.f32 %v2660_v32, %v2426_v26  ;;  %v3909_v32 = vpack.c.bf16 %v3875_v12, %v3874_v46  ;;  %v3305_v46 = vld [vmem:[%s8740_s12 + $0x91] sm:$0xff] }
 0x37e   : > { %v3591_v12 = vld [vmem:[%s8740_s12 + $0x92] sm:$0xff] }
 0x37f   : > { %v9736_v10 = vadd.f32 %v2946_v7, %v2712_v41 }
 0x380   : > { %v2090_v59 = vpop.f32.mrf.mxu2 }
 0x381   : > { %v2141_v48 = vadd.f32 %v2090_v59, %v9363_v44  ;;  %v2376_v45 = vpop.f32.mrf.mxu3 }
 0x383   : > { %v2427_v47 = vadd.f32 %v2376_v45, %v2141_v48  ;;  %v2665_v60 = vpop.f32.mrf.mxu0  ;;  %v3876_v45 = vld [vmem:[%s8740_s12 + $0x8b] sm:$0xff] }
 0x384   : > { %v2951_v4 = vpop.f32.mrf.mxu1 }
 0x385   : > { %8105 = vmatmul.msk.bf16.gmra.mxu2 %vm367_vm0, %v3051_v3  ;;  %v2713_v7 = vadd.f32 %v2662_v33, %v2427_v47  ;;  %v3877_v3 = vld [vmem:[%s8740_s12 + $0x93] sm:$0xff]  ;;  %v3338_v47 = vpack.c.bf16 %v3305_v46, %v3304_v53 }
 0x386   : > { %8137 = vmatmul.msk.bf16.gmra.mxu3 %vm367_vm0, %v3337_v16  ;;  %8169 = vmatmul.msk.bf16.gmra.mxu0 %vm367_vm0, %v3623_v9  ;;  %v3020_v46 = vld [vmem:[%s8740_s12 + $0x98] sm:$0xff] }
 0x387   : > { %v9747_v44 = vadd.f32 %v2948_v24, %v2713_v7  ;;  %8201 = vmatmul.msk.bf16.gmra.mxu1 %vm367_vm0, %v3909_v32  ;;  %v3590_v24 = vld [vmem:[%s8740_s12 + $0x8a] sm:$0xff] }
 0x388   : > { %v2093_v6 = vpop.f32.mrf.mxu2  ;;  %v3624_v32 = vpack.c.bf16 %v3591_v12, %v3590_v24  ;;  %v3021_v24 = vld [vmem:[%s8740_s12 + $0xa0] sm:$0xff] }
 0x389   : > { %v2142_v26 = vadd.f32 %v2093_v6, %v9370_v13  ;;  %v2379_v41 = vpop.f32.mrf.mxu3  ;;  %v3052_v13 = vpack.c.bf16 %v3019_v62, %v3018_v54  ;;  %v3306_v12 = vld [vmem:[%s8740_s12 + $0x99] sm:$0xff] }
 0x38b   : > { %v2428_v22 = vadd.f32 %v2379_v41, %v2142_v26  ;;  %v2667_v56 = vpop.f32.mrf.mxu0 }
 0x38c   : > { %v2953_v33 = vpop.f32.mrf.mxu1 }
 0x38d   : > { %v2714_v28 = vadd.f32 %v2665_v60, %v2428_v22  ;;  %v3910_v60 = vpack.c.bf16 %v3877_v3, %v3876_v45  ;;  %v3307_v45 = vld [vmem:[%s8740_s12 + $0xa1] sm:$0xff] }
 0x38e   : > { %v3593_v3 = vld [vmem:[%s8740_s12 + $0xa2] sm:$0xff] }
 0x38f   : > { %v9754_v59 = vadd.f32 %v2951_v4, %v2714_v28 }
 0x390   : > { %v2095_v48 = vpop.f32.mrf.mxu2 }
 0x391   : > { %v2143_v16 = vadd.f32 %v2095_v48, %v9381_v17  ;;  %v2381_v9 = vpop.f32.mrf.mxu3 }
 0x393   : > { %v2429_v7 = vadd.f32 %v2381_v9, %v2143_v16  ;;  %v2670_v6 = vpop.f32.mrf.mxu0  ;;  %v3878_v9 = vld [vmem:[%s8740_s12 + $0x9b] sm:$0xff] }
 0x394   : > { %v2956_v26 = vpop.f32.mrf.mxu1 }
 0x395   : > { %8106 = vmatmul.msk.bf16.gmra.mxu2 %vm367_vm0, %v3052_v13  ;;  %v2715_v4 = vadd.f32 %v2667_v56, %v2429_v7  ;;  %v3879_v13 = vld [vmem:[%s8740_s12 + $0xa3] sm:$0xff]  ;;  %v3339_v7 = vpack.c.bf16 %v3307_v45, %v3306_v12 }
 0x396   : > { %8138 = vmatmul.msk.bf16.gmra.mxu3 %vm367_vm0, %v3338_v47  ;;  %8170 = vmatmul.msk.bf16.gmra.mxu0 %vm367_vm0, %v3624_v32  ;;  %v3022_v45 = vld [vmem:[%s8740_s12 + $0xa8] sm:$0xff] }
 0x397   : > { %v9765_v17 = vadd.f32 %v2953_v33, %v2715_v4  ;;  %8202 = vmatmul.msk.bf16.gmra.mxu1 %vm367_vm0, %v3910_v60  ;;  %v3592_v33 = vld [vmem:[%s8740_s12 + $0x9a] sm:$0xff] }
 0x398   : > { %v2098_v41 = vpop.f32.mrf.mxu2  ;;  %v3625_v60 = vpack.c.bf16 %v3593_v3, %v3592_v33  ;;  %v3023_v33 = vld [vmem:[%s8740_s12 + $0xb0] sm:$0xff] }
 0x399   : > { %v2144_v22 = vadd.f32 %v2098_v41, %v9388_v18  ;;  %v2384_v28 = vpop.f32.mrf.mxu3  ;;  %v3053_v18 = vpack.c.bf16 %v3021_v24, %v3020_v46  ;;  %v3308_v3 = vld [vmem:[%s8740_s12 + $0xa9] sm:$0xff] }
 0x39b   : > { %v2430_v54 = vadd.f32 %v2384_v28, %v2144_v22  ;;  %v2672_v62 = vpop.f32.mrf.mxu0 }
 0x39c   : > { %v2958_v56 = vpop.f32.mrf.mxu1 }
 0x39d   : > { %v2716_v53 = vadd.f32 %v2670_v6, %v2430_v54  ;;  %v3911_v6 = vpack.c.bf16 %v3879_v13, %v3878_v9  ;;  %v3595_v13 = vld [vmem:[%s8740_s12 + $0xb2] sm:$0xff] }
 0x39f   : > { %v9772_v48 = vadd.f32 %v2956_v26, %v2716_v53 }
 0x3a0   : > { %v2100_v16 = vpop.f32.mrf.mxu2 }
 0x3a1   : > { %v2145_v47 = vadd.f32 %v2100_v16, %v9399_v50  ;;  %v2386_v32 = vpop.f32.mrf.mxu3  ;;  %v3309_v16 = vld [vmem:[%s8740_s12 + $0xb1] sm:$0xff] }
 0x3a3   : > { %v2431_v4 = vadd.f32 %v2386_v32, %v2145_v47  ;;  %v2675_v41 = vpop.f32.mrf.mxu0  ;;  %v8633_v47 = vld [vmem:[%s11224_s1 + $0x118] sm:$0xff] }
 0x3a4   : > { %v2961_v22 = vpop.f32.mrf.mxu1  ;;  %5151 = vmatpush.bf16.msra.mxu1 %v8633_v47  ;;  %v3025_v47 = vld [vmem:[%s8740_s12 + $0xc0] sm:$0xff] }
 0x3a5   : > { %8107 = vmatmul.msk.bf16.gmra.mxu2 %vm367_vm0, %v3053_v18  ;;  %v2717_v26 = vadd.f32 %v2672_v62, %v2431_v4  ;;  %v3881_v18 = vld [vmem:[%s8740_s12 + $0xb3] sm:$0xff]  ;;  %v3054_v4 = vpack.c.bf16 %v3023_v33, %v3022_v45 }
 0x3a6   : > { %8139 = vmatmul.msk.bf16.gmra.mxu3 %vm367_vm0, %v3339_v7  ;;  %8171 = vmatmul.msk.bf16.gmra.mxu0 %vm367_vm0, %v3625_v60 }
 0x3a7   : > { %v9783_v50 = vadd.f32 %v2958_v56, %v2717_v26  ;;  %8203 = vmatmul.msk.bf16.gmra.mxu1 %vm367_vm0, %v3911_v6  ;;  %v3594_v56 = vld [vmem:[%s8740_s12 + $0xaa] sm:$0xff] }
 0x3a8   : > { %v2103_v28 = vpop.f32.mrf.mxu2  ;;  %v3626_v6 = vpack.c.bf16 %v3595_v13, %v3594_v56  ;;  %v3024_v13 = vld [vmem:[%s8740_s12 + $0xb8] sm:$0xff] }
 0x3a9   : > { %v2146_v54 = vadd.f32 %v2103_v28, %v9407_v57  ;;  %v2389_v53 = vpop.f32.mrf.mxu3  ;;  %v3880_v57 = vld [vmem:[%s8740_s12 + $0xab] sm:$0xff] }
 0x3ab   : > { %v2432_v46 = vadd.f32 %v2389_v53, %v2146_v54  ;;  %v2677_v24 = vpop.f32.mrf.mxu0 }
 0x3ac   : > { %v2963_v12 = vpop.f32.mrf.mxu1 }
 0x3ad   : > { %v2718_v62 = vadd.f32 %v2675_v41, %v2432_v46  ;;  %v3340_v41 = vpack.c.bf16 %v3309_v16, %v3308_v3 }
 0x3af   : > { %v9791_v9 = vadd.f32 %v2961_v22, %v2718_v62  ;;  %v3912_v22 = vpack.c.bf16 %v3881_v18, %v3880_v57  ;;  %v3311_v57 = vld [vmem:[%s8740_s12 + $0xc1] sm:$0xff] }
 0x3b0   : > { %v2105_v32 = vpop.f32.mrf.mxu2 }
 0x3b1   : > { %v2147_v7 = vadd.f32 %v2105_v32, %v9423_v25  ;;  %v2391_v60 = vpop.f32.mrf.mxu3  ;;  %v8626_v25 = vld [vmem:[%s11224_s1 + $0xe0] sm:$0xff] }
 0x3b2   : > { %4294 = vmatpush.bf16.msra.mxu2 %v8626_v25  ;;  %v3310_v32 = vld [vmem:[%s8740_s12 + $0xb9] sm:$0xff] }
 0x3b3   : > { %v2433_v26 = vadd.f32 %v2391_v60, %v2147_v7  ;;  %v3724_v28 = vpop.f32.mrf.mxu0  ;;  %v3596_v7 = vld [vmem:[%s8740_s12 + $0xba] sm:$0xff]  ;;  %v3597_v60 = vld [vmem:[%s8740_s12 + $0xc2] sm:$0xff] }
 0x3b4   : > { %v4010_v54 = vpop.f32.mrf.mxu1  ;;  %v3627_v25 = vpack.c.bf16 %v3597_v60, %v3596_v7  ;;  %v3026_v7 = vld [vmem:[%s8740_s12 + $0xc8] sm:$0xff]  ;;  %v3027_v60 = vld [vmem:[%s8740_s12 + $0xd0] sm:$0xff] }
 0x3b5   : > { %8108 = vmatmul.msk.bf16.gmra.mxu2 %vm367_vm0, %v3054_v4  ;;  %v2719_v53 = vadd.f32 %v2677_v24, %v2433_v26  ;;  %v8628_v24 = vld [vmem:[%s11224_s1 + $0xf0] sm:$0xff] }
 0x3b6   : > { %8140 = vmatmul.msk.bf16.gmra.mxu3 %vm367_vm0, %v3340_v41  ;;  %8172 = vmatmul.msk.bf16.gmra.mxu0 %vm367_vm0, %v3626_v6  ;;  %v3882_v41 = vld [vmem:[%s8740_s12 + $0xbb] sm:$0xff]  ;;  %v3883_v6 = vld [vmem:[%s8740_s12 + $0xc3] sm:$0xff] }
 0x3b7   : > { %v9807_v46 = vadd.f32 %v2963_v12, %v2719_v53  ;;  %8204 = vmatmul.msk.bf16.gmra.mxu1 %vm367_vm0, %v3912_v22  ;;  %4580 = vmatpush.bf16.msra.mxu3 %v8628_v24  ;;  %v3055_v53 = vpack.c.bf16 %v3025_v47, %v3024_v13 }
 0x3b8   : > { %v3152_v62 = vpop.f32.mrf.mxu2 }
 0x3b9   : > { %v3252_v45 = vadd.f32 %v3152_v62, %v9434_v34  ;;  %v3438_v33 = vpop.f32.mrf.mxu3  ;;  %v8630_v34 = vld [vmem:[%s11224_s1 + $0x100] sm:$0xff] }
 0x3ba   : > { %4866 = vmatpush.bf16.msra.mxu0 %v8630_v34  ;;  %v3312_v34 = vld [vmem:[%s8740_s12 + $0xc9] sm:$0xff] }
 0x3bb   : > { %v3538_v3 = vadd.f32 %v3438_v33, %v3252_v45  ;;  %v3726_v16 = vpop.f32.mrf.mxu0 }
 0x3bc   : > { %v4012_v12 = vpop.f32.mrf.mxu1 }
 0x3bd   : > { %v3824_v56 = vadd.f32 %v3724_v28, %v3538_v3  ;;  %v3341_v28 = vpack.c.bf16 %v3311_v57, %v3310_v32 }
 0x3bf   : > { %v9818_v18 = vadd.f32 %v4010_v54, %v3824_v56  ;;  %v3913_v54 = vpack.c.bf16 %v3883_v6, %v3882_v41  ;;  %v3313_v41 = vld [vmem:[%s8740_s12 + $0xd1] sm:$0xff] }
 0x3c0   : > { %v3154_v4 = vpop.f32.mrf.mxu2  ;;  %v3599_v6 = vld [vmem:[%s8740_s12 + $0xd2] sm:$0xff] }
 0x3c1   : > { %v3253_v26 = vadd.f32 %v3154_v4, %v9447_v1  ;;  %v3440_v22 = vpop.f32.mrf.mxu3 }
 0x3c3   : > { %v3539_v24 = vadd.f32 %v3440_v22, %v3253_v26  ;;  %v3729_v62 = vpop.f32.mrf.mxu0  ;;  %v3884_v22 = vld [vmem:[%s8740_s12 + $0xcb] sm:$0xff] }
 0x3c4   : > { %v4015_v45 = vpop.f32.mrf.mxu1 }
 0x3c5   : > { %8109 = vmatmul.msk.bf16.gmra.mxu2 %vm367_vm0, %v3055_v53  ;;  %v3825_v33 = vadd.f32 %v3726_v16, %v3539_v24  ;;  %v3885_v53 = vld [vmem:[%s8740_s12 + $0xd3] sm:$0xff]  ;;  %v3342_v24 = vpack.c.bf16 %v3313_v41, %v3312_v34 }
 0x3c6   : > { %8141 = vmatmul.msk.bf16.gmra.mxu3 %vm367_vm0, %v3341_v28  ;;  %8173 = vmatmul.msk.bf16.gmra.mxu0 %vm367_vm0, %v3627_v25  ;;  %v3028_v41 = vld [vmem:[%s8740_s12 + $0xd8] sm:$0xff] }
 0x3c7   : > { %v9831_v1 = vadd.f32 %v4012_v12, %v3825_v33  ;;  %8205 = vmatmul.msk.bf16.gmra.mxu1 %vm367_vm0, %v3913_v54  ;;  %v3598_v12 = vld [vmem:[%s8740_s12 + $0xca] sm:$0xff] }
 0x3c8   : > { %v3157_v3 = vpop.f32.mrf.mxu2  ;;  %v3628_v54 = vpack.c.bf16 %v3599_v6, %v3598_v12  ;;  %v3029_v12 = vld [vmem:[%s8740_s12 + $0xe0] sm:$0xff] }
 0x3c9   : > { %v3254_v56 = vadd.f32 %v3157_v3, %v9454_v38  ;;  %v3443_v13 = vpop.f32.mrf.mxu3  ;;  %v3056_v38 = vpack.c.bf16 %v3027_v60, %v3026_v7  ;;  %v3314_v6 = vld [vmem:[%s8740_s12 + $0xd9] sm:$0xff] }
 0x3cb   : > { %v3540_v47 = vadd.f32 %v3443_v13, %v3254_v56  ;;  %v3731_v32 = vpop.f32.mrf.mxu0 }
 0x3cc   : > { %v4017_v16 = vpop.f32.mrf.mxu1 }
 0x3cd   : > { %v3826_v57 = vadd.f32 %v3729_v62, %v3540_v47  ;;  %v3914_v62 = vpack.c.bf16 %v3885_v53, %v3884_v22  ;;  %v3315_v22 = vld [vmem:[%s8740_s12 + $0xe1] sm:$0xff] }
 0x3ce   : > { %v3601_v53 = vld [vmem:[%s8740_s12 + $0xe2] sm:$0xff] }
 0x3cf   : > { %v9838_v4 = vadd.f32 %v4015_v45, %v3826_v57 }
 0x3d0   : > { %v3159_v26 = vpop.f32.mrf.mxu2 }
 0x3d1   : > { %v3255_v28 = vadd.f32 %v3159_v26, %v9465_v27  ;;  %v3445_v25 = vpop.f32.mrf.mxu3 }
 0x3d3   : > { %v3541_v33 = vadd.f32 %v3445_v25, %v3255_v28  ;;  %v3734_v3 = vpop.f32.mrf.mxu0  ;;  %v3886_v25 = vld [vmem:[%s8740_s12 + $0xdb] sm:$0xff] }
 0x3d4   : > { %v4020_v56 = vpop.f32.mrf.mxu1 }
 0x3d5   : > { %8110 = vmatmul.msk.bf16.gmra.mxu2 %vm367_vm0, %v3056_v38  ;;  %v3827_v45 = vadd.f32 %v3731_v32, %v3541_v33  ;;  %v3887_v38 = vld [vmem:[%s8740_s12 + $0xe3] sm:$0xff]  ;;  %v3343_v33 = vpack.c.bf16 %v3315_v22, %v3314_v6 }
 0x3d6   : > { %8142 = vmatmul.msk.bf16.gmra.mxu3 %vm367_vm0, %v3342_v24  ;;  %8174 = vmatmul.msk.bf16.gmra.mxu0 %vm367_vm0, %v3628_v54  ;;  %v3030_v22 = vld [vmem:[%s8740_s12 + $0xe8] sm:$0xff] }
 0x3d7   : > { %v9849_v27 = vadd.f32 %v4017_v16, %v3827_v45  ;;  %8206 = vmatmul.msk.bf16.gmra.mxu1 %vm367_vm0, %v3914_v62  ;;  %v3600_v16 = vld [vmem:[%s8740_s12 + $0xda] sm:$0xff] }
 0x3d8   : > { %v3162_v13 = vpop.f32.mrf.mxu2  ;;  %v3629_v62 = vpack.c.bf16 %v3601_v53, %v3600_v16  ;;  %v3031_v16 = vld [vmem:[%s8740_s12 + $0xf0] sm:$0xff] }
 0x3d9   : > { %v3256_v47 = vadd.f32 %v3162_v13, %v9472_v20  ;;  %v3448_v57 = vpop.f32.mrf.mxu3  ;;  %v3057_v20 = vpack.c.bf16 %v3029_v12, %v3028_v41  ;;  %v3316_v53 = vld [vmem:[%s8740_s12 + $0xe9] sm:$0xff] }
 0x3db   : > { %v3542_v7 = vadd.f32 %v3448_v57, %v3256_v47  ;;  %v3736_v60 = vpop.f32.mrf.mxu0 }
 0x3dc   : > { %v4022_v32 = vpop.f32.mrf.mxu1 }
 0x3dd   : > { %v3828_v34 = vadd.f32 %v3734_v3, %v3542_v7  ;;  %v3915_v3 = vpack.c.bf16 %v3887_v38, %v3886_v25  ;;  %v3317_v25 = vld [vmem:[%s8740_s12 + $0xf1] sm:$0xff] }
 0x3de   : > { %v3603_v38 = vld [vmem:[%s8740_s12 + $0xf2] sm:$0xff] }
 0x3df   : > { %v9856_v26 = vadd.f32 %v4020_v56, %v3828_v34 }
 0x3e0   : > { %v3164_v28 = vpop.f32.mrf.mxu2 }
 0x3e1   : > { %v3257_v24 = vadd.f32 %v3164_v28, %v9483_v51  ;;  %v3450_v54 = vpop.f32.mrf.mxu3 }
 0x3e3   : > { %v3543_v45 = vadd.f32 %v3450_v54, %v3257_v24  ;;  %v3739_v13 = vpop.f32.mrf.mxu0  ;;  %v3888_v54 = vld [vmem:[%s8740_s12 + $0xeb] sm:$0xff] }
 0x3e4   : > { %v4025_v47 = vpop.f32.mrf.mxu1 }
 0x3e5   : > { %8111 = vmatmul.msk.bf16.gmra.mxu2 %vm367_vm0, %v3057_v20  ;;  %v3829_v56 = vadd.f32 %v3736_v60, %v3543_v45  ;;  %v3889_v20 = vld [vmem:[%s8740_s12 + $0xf3] sm:$0xff]  ;;  %v3344_v45 = vpack.c.bf16 %v3317_v25, %v3316_v53 }
 0x3e6   : > { %8143 = vmatmul.msk.bf16.gmra.mxu3 %vm367_vm0, %v3343_v33  ;;  %8175 = vmatmul.msk.bf16.gmra.mxu0 %vm367_vm0, %v3629_v62  ;;  %v3032_v25 = vld [vmem:[%s8740_s12 + $0xf8] sm:$0xff] }
 0x3e7   : > { %v9867_v51 = vadd.f32 %v4022_v32, %v3829_v56  ;;  %8207 = vmatmul.msk.bf16.gmra.mxu1 %vm367_vm0, %v3915_v3  ;;  %v3602_v32 = vld [vmem:[%s8740_s12 + $0xea] sm:$0xff] }
 0x3e8   : > { %v3167_v57 = vpop.f32.mrf.mxu2  ;;  %v3630_v3 = vpack.c.bf16 %v3603_v38, %v3602_v32  ;;  %v3033_v32 = vld [vmem:[%s8740_s12 + $0x100] sm:$0xff] }
 0x3e9   : > { %v3258_v7 = vadd.f32 %v3167_v57, %v9490_v8  ;;  %v3453_v34 = vpop.f32.mrf.mxu3  ;;  %v3058_v8 = vpack.c.bf16 %v3031_v16, %v3030_v22  ;;  %v3318_v38 = vld [vmem:[%s8740_s12 + $0xf9] sm:$0xff] }
 0x3eb   : > { %v3544_v41 = vadd.f32 %v3453_v34, %v3258_v7  ;;  %v3741_v12 = vpop.f32.mrf.mxu0 }
 0x3ec   : > { %v4027_v60 = vpop.f32.mrf.mxu1 }
 0x3ed   : > { %v3830_v6 = vadd.f32 %v3739_v13, %v3544_v41  ;;  %v3916_v13 = vpack.c.bf16 %v3889_v20, %v3888_v54  ;;  %v3319_v54 = vld [vmem:[%s8740_s12 + $0x101] sm:$0xff] }
 0x3ee   : > { %v3605_v20 = vld [vmem:[%s8740_s12 + $0x102] sm:$0xff] }
 0x3ef   : > { %v9874_v28 = vadd.f32 %v4025_v47, %v3830_v6 }
 0x3f0   : > { %v3169_v24 = vpop.f32.mrf.mxu2 }
 0x3f1   : > { %v3259_v33 = vadd.f32 %v3169_v24, %v9501_v11  ;;  %v3455_v62 = vpop.f32.mrf.mxu3 }
 0x3f3   : > { %v3545_v56 = vadd.f32 %v3455_v62, %v3259_v33  ;;  %v3744_v57 = vpop.f32.mrf.mxu0  ;;  %v3890_v62 = vld [vmem:[%s8740_s12 + $0xfb] sm:$0xff] }
 0x3f4   : > { %v4030_v7 = vpop.f32.mrf.mxu1 }
 0x3f5   : > { %8112 = vmatmul.msk.bf16.gmra.mxu2 %vm367_vm0, %v3058_v8  ;;  %v3831_v47 = vadd.f32 %v3741_v12, %v3545_v56  ;;  %v3891_v8 = vld [vmem:[%s8740_s12 + $0x103] sm:$0xff]  ;;  %v3345_v56 = vpack.c.bf16 %v3319_v54, %v3318_v38 }
 0x3f6   : > { %8144 = vmatmul.msk.bf16.gmra.mxu3 %vm367_vm0, %v3344_v45  ;;  %8176 = vmatmul.msk.bf16.gmra.mxu0 %vm367_vm0, %v3630_v3  ;;  %v3034_v54 = vld [vmem:[%s8740_s12 + $0x108] sm:$0xff] }
 0x3f7   : > { %v9885_v11 = vadd.f32 %v4027_v60, %v3831_v47  ;;  %8208 = vmatmul.msk.bf16.gmra.mxu1 %vm367_vm0, %v3916_v13  ;;  %v3604_v60 = vld [vmem:[%s8740_s12 + $0xfa] sm:$0xff] }
 0x3f8   : > { %v3172_v34 = vpop.f32.mrf.mxu2  ;;  %v3631_v13 = vpack.c.bf16 %v3605_v20, %v3604_v60  ;;  %v3035_v60 = vld [vmem:[%s8740_s12 + $0x110] sm:$0xff] }
 0x3f9   : > { %v3260_v41 = vadd.f32 %v3172_v34, %v9508_v35  ;;  %v3458_v6 = vpop.f32.mrf.mxu3  ;;  %v3059_v35 = vpack.c.bf16 %v3033_v32, %v3032_v25  ;;  %v3320_v20 = vld [vmem:[%s8740_s12 + $0x109] sm:$0xff] }
 0x3fb   : > { %v3546_v22 = vadd.f32 %v3458_v6, %v3260_v41  ;;  %v3746_v16 = vpop.f32.mrf.mxu0 }
 0x3fc   : > { %v4032_v12 = vpop.f32.mrf.mxu1 }
 0x3fd   : > { %v3832_v53 = vadd.f32 %v3744_v57, %v3546_v22  ;;  %v3917_v57 = vpack.c.bf16 %v3891_v8, %v3890_v62  ;;  %v3321_v62 = vld [vmem:[%s8740_s12 + $0x111] sm:$0xff] }
 0x3fe   : > { %v3607_v8 = vld [vmem:[%s8740_s12 + $0x112] sm:$0xff] }
 0x3ff   : > { %v9892_v24 = vadd.f32 %v4030_v7, %v3832_v53 }
 0x400   : > { %v3174_v33 = vpop.f32.mrf.mxu2 }
 0x401   : > { %v3261_v45 = vadd.f32 %v3174_v33, %v9519_v36  ;;  %v3460_v3 = vpop.f32.mrf.mxu3 }
 0x403   : > { %v3547_v47 = vadd.f32 %v3460_v3, %v3261_v45  ;;  %v3749_v34 = vpop.f32.mrf.mxu0  ;;  %v3892_v3 = vld [vmem:[%s8740_s12 + $0x10b] sm:$0xff] }
 0x404   : > { %v4035_v41 = vpop.f32.mrf.mxu1 }
 0x405   : > { %8113 = vmatmul.msk.bf16.gmra.mxu2 %vm367_vm0, %v3059_v35  ;;  %v3833_v7 = vadd.f32 %v3746_v16, %v3547_v47  ;;  %v3893_v35 = vld [vmem:[%s8740_s12 + $0x113] sm:$0xff]  ;;  %v3346_v47 = vpack.c.bf16 %v3321_v62, %v3320_v20 }
 0x406   : > { %8145 = vmatmul.msk.bf16.gmra.mxu3 %vm367_vm0, %v3345_v56  ;;  %8177 = vmatmul.msk.bf16.gmra.mxu0 %vm367_vm0, %v3631_v13  ;;  %v3036_v62 = vld [vmem:[%s8740_s12 + $0x118] sm:$0xff] }
 0x407   : > { %v9903_v36 = vadd.f32 %v4032_v12, %v3833_v7  ;;  %8209 = vmatmul.msk.bf16.gmra.mxu1 %vm367_vm0, %v3917_v57  ;;  %v3606_v12 = vld [vmem:[%s8740_s12 + $0x10a] sm:$0xff] }
 0x408   : > { %v3177_v6 = vpop.f32.mrf.mxu2  ;;  %v3632_v57 = vpack.c.bf16 %v3607_v8, %v3606_v12  ;;  %v3037_v12 = vld [vmem:[%s8740_s12 + $0x120] sm:$0xff] }
 0x409   : > { %v3262_v22 = vadd.f32 %v3177_v6, %v9526_v37  ;;  %v3463_v53 = vpop.f32.mrf.mxu3  ;;  %v3060_v37 = vpack.c.bf16 %v3035_v60, %v3034_v54  ;;  %v3322_v8 = vld [vmem:[%s8740_s12 + $0x119] sm:$0xff] }
 0x40b   : > { %v3548_v25 = vadd.f32 %v3463_v53, %v3262_v22  ;;  %v3751_v32 = vpop.f32.mrf.mxu0 }
 0x40c   : > { %v4037_v16 = vpop.f32.mrf.mxu1 }
 0x40d   : > { %v3834_v38 = vadd.f32 %v3749_v34, %v3548_v25  ;;  %v3918_v34 = vpack.c.bf16 %v3893_v35, %v3892_v3  ;;  %v3323_v3 = vld [vmem:[%s8740_s12 + $0x121] sm:$0xff] }
 0x40e   : > { %v3609_v35 = vld [vmem:[%s8740_s12 + $0x122] sm:$0xff] }
 0x40f   : > { %v9910_v33 = vadd.f32 %v4035_v41, %v3834_v38 }
 0x410   : > { %v3179_v45 = vpop.f32.mrf.mxu2 }
 0x411   : > { %v3263_v56 = vadd.f32 %v3179_v45, %v9537_v0  ;;  %v3465_v13 = vpop.f32.mrf.mxu3 }
 0x413   : > { %v3549_v7 = vadd.f32 %v3465_v13, %v3263_v56  ;;  %v3754_v6 = vpop.f32.mrf.mxu0  ;;  %v3894_v13 = vld [vmem:[%s8740_s12 + $0x11b] sm:$0xff] }
 0x414   : > { %v4040_v22 = vpop.f32.mrf.mxu1 }
 0x415   : > { %8114 = vmatmul.msk.bf16.gmra.mxu2 %vm367_vm0, %v3060_v37  ;;  %v3835_v41 = vadd.f32 %v3751_v32, %v3549_v7  ;;  %v3895_v37 = vld [vmem:[%s8740_s12 + $0x123] sm:$0xff]  ;;  %v3347_v7 = vpack.c.bf16 %v3323_v3, %v3322_v8 }
 0x416   : > { %8146 = vmatmul.msk.bf16.gmra.mxu3 %vm367_vm0, %v3346_v47  ;;  %8178 = vmatmul.msk.bf16.gmra.mxu0 %vm367_vm0, %v3632_v57  ;;  %v3038_v3 = vld [vmem:[%s8740_s12 + $0x128] sm:$0xff] }
 0x417   : > { %v9921_v0 = vadd.f32 %v4037_v16, %v3835_v41  ;;  %8210 = vmatmul.msk.bf16.gmra.mxu1 %vm367_vm0, %v3918_v34  ;;  %v3608_v16 = vld [vmem:[%s8740_s12 + $0x11a] sm:$0xff] }
 0x418   : > { %v3182_v53 = vpop.f32.mrf.mxu2  ;;  %v3633_v34 = vpack.c.bf16 %v3609_v35, %v3608_v16  ;;  %v3039_v16 = vld [vmem:[%s8740_s12 + $0x130] sm:$0xff] }
 0x419   : > { %v3264_v25 = vadd.f32 %v3182_v53, %v9544_v5  ;;  %v3468_v38 = vpop.f32.mrf.mxu3  ;;  %v3061_v5 = vpack.c.bf16 %v3037_v12, %v3036_v62  ;;  %v3324_v35 = vld [vmem:[%s8740_s12 + $0x129] sm:$0xff] }
 0x41b   : > { %v3550_v54 = vadd.f32 %v3468_v38, %v3264_v25  ;;  %v3756_v60 = vpop.f32.mrf.mxu0 }
 0x41c   : > { %v4042_v32 = vpop.f32.mrf.mxu1 }
 0x41d   : > { %v3836_v20 = vadd.f32 %v3754_v6, %v3550_v54  ;;  %v3919_v6 = vpack.c.bf16 %v3895_v37, %v3894_v13  ;;  %v3325_v13 = vld [vmem:[%s8740_s12 + $0x131] sm:$0xff] }
 0x41e   : > { %v3611_v37 = vld [vmem:[%s8740_s12 + $0x132] sm:$0xff] }
 0x41f   : > { %v9928_v45 = vadd.f32 %v4040_v22, %v3836_v20 }
 0x420   : > { %v3184_v56 = vpop.f32.mrf.mxu2 }
 0x421   : > { %v3265_v47 = vadd.f32 %v3184_v56, %v9555_v31  ;;  %v3470_v57 = vpop.f32.mrf.mxu3 }
 0x423   : > { %v3551_v41 = vadd.f32 %v3470_v57, %v3265_v47  ;;  %v3759_v53 = vpop.f32.mrf.mxu0  ;;  %v3896_v57 = vld [vmem:[%s8740_s12 + $0x12b] sm:$0xff] }
 0x424   : > { %v4045_v25 = vpop.f32.mrf.mxu1 }
 0x425   : > { %8115 = vmatmul.msk.bf16.gmra.mxu2 %vm367_vm0, %v3061_v5  ;;  %v3837_v22 = vadd.f32 %v3756_v60, %v3551_v41  ;;  %v3897_v5 = vld [vmem:[%s8740_s12 + $0x133] sm:$0xff]  ;;  %v3348_v41 = vpack.c.bf16 %v3325_v13, %v3324_v35 }
 0x426   : > { %8147 = vmatmul.msk.bf16.gmra.mxu3 %vm367_vm0, %v3347_v7  ;;  %8179 = vmatmul.msk.bf16.gmra.mxu0 %vm367_vm0, %v3633_v34  ;;  %v3040_v13 = vld [vmem:[%s8740_s12 + $0x138] sm:$0xff] }
 0x427   : > { %v9939_v31 = vadd.f32 %v4042_v32, %v3837_v22  ;;  %8211 = vmatmul.msk.bf16.gmra.mxu1 %vm367_vm0, %v3919_v6  ;;  %v3610_v32 = vld [vmem:[%s8740_s12 + $0x12a] sm:$0xff] }
 0x428   : > { %v3187_v38 = vpop.f32.mrf.mxu2  ;;  %v3634_v6 = vpack.c.bf16 %v3611_v37, %v3610_v32  ;;  %v3041_v32 = vld [vmem:[%s8740_s12 + $0x140] sm:$0xff] }
 0x429   : > { %v3266_v54 = vadd.f32 %v3187_v38, %v9562_v29  ;;  %v3473_v20 = vpop.f32.mrf.mxu3  ;;  %v3062_v29 = vpack.c.bf16 %v3039_v16, %v3038_v3  ;;  %v3326_v37 = vld [vmem:[%s8740_s12 + $0x139] sm:$0xff] }
 0x42b   : > { %v3552_v62 = vadd.f32 %v3473_v20, %v3266_v54  ;;  %v3761_v12 = vpop.f32.mrf.mxu0 }
 0x42c   : > { %v4047_v60 = vpop.f32.mrf.mxu1 }
 0x42d   : > { %v3838_v8 = vadd.f32 %v3759_v53, %v3552_v62  ;;  %v3920_v53 = vpack.c.bf16 %v3897_v5, %v3896_v57  ;;  %v3327_v57 = vld [vmem:[%s8740_s12 + $0x141] sm:$0xff] }
 0x42e   : > { %v3613_v5 = vld [vmem:[%s8740_s12 + $0x142] sm:$0xff] }
 0x42f   : > { %v9946_v56 = vadd.f32 %v4045_v25, %v3838_v8 }
 0x430   : > { %v3189_v47 = vpop.f32.mrf.mxu2 }
 0x431   : > { %v3267_v7 = vadd.f32 %v3189_v47, %v9573_v2  ;;  %v3475_v34 = vpop.f32.mrf.mxu3 }
 0x433   : > { %v3553_v22 = vadd.f32 %v3475_v34, %v3267_v7  ;;  %v3764_v38 = vpop.f32.mrf.mxu0  ;;  %v3898_v34 = vld [vmem:[%s8740_s12 + $0x13b] sm:$0xff] }
 0x434   : > { %v4050_v54 = vpop.f32.mrf.mxu1 }
 0x435   : > { %8116 = vmatmul.msk.bf16.gmra.mxu2 %vm367_vm0, %v3062_v29  ;;  %v3839_v25 = vadd.f32 %v3761_v12, %v3553_v22  ;;  %v3899_v29 = vld [vmem:[%s8740_s12 + $0x143] sm:$0xff]  ;;  %v3349_v22 = vpack.c.bf16 %v3327_v57, %v3326_v37 }
 0x436   : > { %8148 = vmatmul.msk.bf16.gmra.mxu3 %vm367_vm0, %v3348_v41  ;;  %8180 = vmatmul.msk.bf16.gmra.mxu0 %vm367_vm0, %v3634_v6  ;;  %v3042_v57 = vld [vmem:[%s8740_s12 + $0x148] sm:$0xff] }
 0x437   : > { %v9957_v2 = vadd.f32 %v4047_v60, %v3839_v25  ;;  %8212 = vmatmul.msk.bf16.gmra.mxu1 %vm367_vm0, %v3920_v53  ;;  %v3612_v60 = vld [vmem:[%s8740_s12 + $0x13a] sm:$0xff] }
 0x438   : > { %v3192_v20 = vpop.f32.mrf.mxu2  ;;  %v3635_v53 = vpack.c.bf16 %v3613_v5, %v3612_v60  ;;  %v3043_v60 = vld [vmem:[%s8740_s12 + $0x150] sm:$0xff] }
 0x439   : > { %v3268_v62 = vadd.f32 %v3192_v20, %v9580_v55  ;;  %v3478_v8 = vpop.f32.mrf.mxu3  ;;  %v3063_v55 = vpack.c.bf16 %v3041_v32, %v3040_v13  ;;  %v3328_v5 = vld [vmem:[%s8740_s12 + $0x149] sm:$0xff] }
 0x43b   : > { %v3554_v3 = vadd.f32 %v3478_v8, %v3268_v62  ;;  %v3766_v16 = vpop.f32.mrf.mxu0 }
 0x43c   : > { %v4052_v12 = vpop.f32.mrf.mxu1 }
 0x43d   : > { %v3840_v35 = vadd.f32 %v3764_v38, %v3554_v3  ;;  %v3921_v38 = vpack.c.bf16 %v3899_v29, %v3898_v34  ;;  %v3615_v29 = vld [vmem:[%s8740_s12 + $0x152] sm:$0xff] }
 0x43f   : > { %v9964_v47 = vadd.f32 %v4050_v54, %v3840_v35 }
 0x440   : > { %v3194_v7 = vpop.f32.mrf.mxu2 }
 0x441   : > { %v3269_v41 = vadd.f32 %v3194_v7, %v9591_v61  ;;  %v3480_v6 = vpop.f32.mrf.mxu3  ;;  %v3329_v7 = vld [vmem:[%s8740_s12 + $0x151] sm:$0xff] }
 0x443   : > { %v3555_v25 = vadd.f32 %v3480_v6, %v3269_v41  ;;  %v3769_v20 = vpop.f32.mrf.mxu0  ;;  %v8632_v41 = vld [vmem:[%s11224_s1 + $0x110] sm:$0xff] }
 0x444   : > { %v4055_v62 = vpop.f32.mrf.mxu1  ;;  %5152 = vmatpush.bf16.msra.mxu1 %v8632_v41  ;;  %v3045_v41 = vld [vmem:[%s8740_s12 + $0x160] sm:$0xff] }
 0x445   : > { %8117 = vmatmul.msk.bf16.gmra.mxu2 %vm367_vm0, %v3063_v55  ;;  %v3841_v54 = vadd.f32 %v3766_v16, %v3555_v25  ;;  %v3901_v55 = vld [vmem:[%s8740_s12 + $0x153] sm:$0xff]  ;;  %v3064_v25 = vpack.c.bf16 %v3043_v60, %v3042_v57 }
 0x446   : > { %8149 = vmatmul.msk.bf16.gmra.mxu3 %vm367_vm0, %v3349_v22  ;;  %8181 = vmatmul.msk.bf16.gmra.mxu0 %vm367_vm0, %v3635_v53 }
 0x447   : > { %v9975_v61 = vadd.f32 %v4052_v12, %v3841_v54  ;;  %8213 = vmatmul.msk.bf16.gmra.mxu1 %vm367_vm0, %v3921_v38  ;;  %v3614_v12 = vld [vmem:[%s8740_s12 + $0x14a] sm:$0xff] }
 0x448   : > { %v3197_v8 = vpop.f32.mrf.mxu2  ;;  %v3636_v38 = vpack.c.bf16 %v3615_v29, %v3614_v12  ;;  %v3044_v29 = vld [vmem:[%s8740_s12 + $0x158] sm:$0xff] }
 0x449   : > { %v3270_v3 = vadd.f32 %v3197_v8, %v9599_v19  ;;  %v3483_v35 = vpop.f32.mrf.mxu3  ;;  %v3900_v19 = vld [vmem:[%s8740_s12 + $0x14b] sm:$0xff] }
 0x44b   : > { %v3556_v13 = vadd.f32 %v3483_v35, %v3270_v3  ;;  %v3771_v32 = vpop.f32.mrf.mxu0 }
 0x44c   : > { %v4057_v37 = vpop.f32.mrf.mxu1 }
 0x44d   : > { %v3842_v16 = vadd.f32 %v3769_v20, %v3556_v13  ;;  %v3350_v20 = vpack.c.bf16 %v3329_v7, %v3328_v5 }
 0x44f   : > { %v9983_v34 = vadd.f32 %v4055_v62, %v3842_v16  ;;  %v3922_v62 = vpack.c.bf16 %v3901_v55, %v3900_v19  ;;  %v3331_v19 = vld [vmem:[%s8740_s12 + $0x161] sm:$0xff] }
 0x450   : > { %v3199_v6 = vpop.f32.mrf.mxu2 }
 0x451   : > { %v3271_v22 = vadd.f32 %v3199_v6, %v9615_v58  ;;  %v3485_v53 = vpop.f32.mrf.mxu3  ;;  %v8635_v58 = vld [vmem:[%s11224_s1 + $0x128] sm:$0xff]  ;;  %v3330_v6 = vld [vmem:[%s8740_s12 + $0x159] sm:$0xff] }
 0x452   : > { %5437 = vmatpush.bf16.msrb.mxu2 %v8635_v58 }
 0x453   : > { %v3557_v54 = vadd.f32 %v3485_v53, %v3271_v22  ;;  %v3774_v8 = vpop.f32.mrf.mxu0  ;;  %v3616_v22 = vld [vmem:[%s8740_s12 + $0x15a] sm:$0xff]  ;;  %v3617_v53 = vld [vmem:[%s8740_s12 + $0x162] sm:$0xff] }
 0x454   : > { %v4060_v3 = vpop.f32.mrf.mxu1  ;;  %v3637_v58 = vpack.c.bf16 %v3617_v53, %v3616_v22  ;;  %v4150_v22 = vld [vmem:[%s8740_s12 + $0x2c] sm:$0xff]  ;;  %v4151_v53 = vld [vmem:[%s8740_s12 + $0x34] sm:$0xff] }
 0x455   : > { %8118 = vmatmul.msk.bf16.gmra.mxu2 %vm367_vm0, %v3064_v25  ;;  %v3843_v35 = vadd.f32 %v3771_v32, %v3557_v54  ;;  %v8637_v32 = vld [vmem:[%s11224_s1 + $0x138] sm:$0xff] }
 0x456   : > { %8150 = vmatmul.msk.bf16.gmra.mxu3 %vm367_vm0, %v3350_v20  ;;  %8182 = vmatmul.msk.bf16.gmra.mxu0 %vm367_vm0, %v3636_v38  ;;  %v3902_v20 = vld [vmem:[%s8740_s12 + $0x15b] sm:$0xff]  ;;  %v3903_v38 = vld [vmem:[%s8740_s12 + $0x163] sm:$0xff] }
 0x457   : > { %v9999_v13 = vadd.f32 %v4057_v37, %v3843_v35  ;;  %8214 = vmatmul.msk.bf16.gmra.mxu1 %vm367_vm0, %v3922_v62  ;;  %5723 = vmatpush.bf16.msrb.mxu3 %v8637_v32  ;;  %v3065_v35 = vpack.c.bf16 %v3045_v41, %v3044_v29 }
 0x458   : > { %v3202_v16 = vpop.f32.mrf.mxu2 }
 0x459   : > { %v3272_v57 = vadd.f32 %v3202_v16, %v9626_v21  ;;  %v3488_v60 = vpop.f32.mrf.mxu3  ;;  %v8639_v21 = vld [vmem:[%s11224_s1 + $0x148] sm:$0xff] }
 0x45a   : > { %6009 = vmatpush.bf16.msrb.mxu0 %v8639_v21  ;;  %v4436_v21 = vld [vmem:[%s8740_s12 + $0x3c] sm:$0xff] }
 0x45b   : > { %v3558_v5 = vadd.f32 %v3488_v60, %v3272_v57  ;;  %v3776_v7 = vpop.f32.mrf.mxu0 }
 0x45c   : > { %v4062_v37 = vpop.f32.mrf.mxu1 }
 0x45d   : > { %v3844_v12 = vadd.f32 %v3774_v8, %v3558_v5  ;;  %v3351_v8 = vpack.c.bf16 %v3331_v19, %v3330_v6 }
 0x45f   : > { %v10010_v55 = vadd.f32 %v4060_v3, %v3844_v12  ;;  %v3923_v3 = vpack.c.bf16 %v3903_v38, %v3902_v20  ;;  %v4437_v20 = vld [vmem:[%s8740_s12 + $0x44] sm:$0xff] }
 0x460   : > { %v3204_v25 = vpop.f32.mrf.mxu2  ;;  %v4723_v38 = vld [vmem:[%s8740_s12 + $0x45] sm:$0xff] }
 0x461   : > { %v3273_v54 = vadd.f32 %v3204_v25, %v9639_v15  ;;  %v3490_v62 = vpop.f32.mrf.mxu3 }
 0x463   : > { %v3559_v32 = vadd.f32 %v3490_v62, %v3273_v54  ;;  %v3779_v16 = vpop.f32.mrf.mxu0  ;;  %v5008_v62 = vld [vmem:[%s8740_s12 + $0x3e] sm:$0xff] }
 0x464   : > { %v4065_v57 = vpop.f32.mrf.mxu1 }
 0x465   : > { %8119 = vmatmul.msk.bf16.gmra.mxu2 %vm367_vm0, %v3065_v35  ;;  %v3845_v60 = vadd.f32 %v3776_v7, %v3559_v32  ;;  %v5009_v35 = vld [vmem:[%s8740_s12 + $0x46] sm:$0xff]  ;;  %v4476_v32 = vpack.c.bf16 %v4437_v20, %v4436_v21 }
 0x466   : > { %8151 = vmatmul.msk.bf16.gmra.mxu3 %vm367_vm0, %v3351_v8  ;;  %8183 = vmatmul.msk.bf16.gmra.mxu0 %vm367_vm0, %v3637_v58 }
 0x467   : > { %v10023_v15 = vadd.f32 %v4062_v37, %v3845_v60  ;;  %8215 = vmatmul.msk.bf16.gmra.mxu1 %vm367_vm0, %v3923_v3  ;;  %v4722_v37 = vld [vmem:[%s8740_s12 + $0x3d] sm:$0xff] }
 0x468   : > { %v3207_v5 = vpop.f32.mrf.mxu2  ;;  %v4762_v3 = vpack.c.bf16 %v4723_v38, %v4722_v37  ;;  %v4439_v38 = vld [vmem:[%s8740_s12 + $0x54] sm:$0xff] }
 0x469   : > { %v3274_v12 = vadd.f32 %v3207_v5, %v9646_v42  ;;  %v3493_v29 = vpop.f32.mrf.mxu3  ;;  %v4190_v42 = vpack.c.bf16 %v4151_v53, %v4150_v22 }
 0x46b   : > { %v3560_v41 = vadd.f32 %v3493_v29, %v3274_v12  ;;  %v3781_v6 = vpop.f32.mrf.mxu0 }
 0x46c   : > { %v4067_v7 = vpop.f32.mrf.mxu1 }
 0x46d   : > { %v3846_v19 = vadd.f32 %v3779_v16, %v3560_v41  ;;  %v5048_v16 = vpack.c.bf16 %v5009_v35, %v5008_v62  ;;  %v4725_v62 = vld [vmem:[%s8740_s12 + $0x55] sm:$0xff] }
 0x46f   : > { %v10030_v25 = vadd.f32 %v4065_v57, %v3846_v19 }
 0x470   : > { %v3209_v54 = vpop.f32.mrf.mxu2 }
 0x471   : > { %v3275_v8 = vadd.f32 %v3209_v54, %v9657_v39  ;;  %v3495_v58 = vpop.f32.mrf.mxu3  ;;  %v4724_v54 = vld [vmem:[%s8740_s12 + $0x4d] sm:$0xff] }
 0x473   : > { %v3561_v60 = vadd.f32 %v3495_v58, %v3275_v8  ;;  %v3784_v5 = vpop.f32.mrf.mxu0  ;;  %v5011_v8 = vld [vmem:[%s8740_s12 + $0x56] sm:$0xff] }
 0x474   : > { %v4070_v12 = vpop.f32.mrf.mxu1 }
 0x475   : > { %8228 = vmatmul.msk.bf16.vlgmr.msra.gmra.mxu2 %vm367_vm0, %v4190_v42  ;;  %v3847_v57 = vadd.f32 %v3781_v6, %v3561_v60  ;;  %v4438_v6 = vld [vmem:[%s8740_s12 + $0x4c] sm:$0xff]  ;;  %v4763_v60 = vpack.c.bf16 %v4725_v62, %v4724_v54  ;;  %v4441_v54 = vld [vmem:[%s8740_s12 + $0x64] sm:$0xff] }
 0x476   : > { %8260 = vmatmul.msk.bf16.vlgmr.msra.gmra.mxu3 %vm367_vm0, %v4476_v32  ;;  %8292 = vmatmul.msk.bf16.vlgmr.msra.gmra.mxu0 %vm367_vm0, %v4762_v3  ;;  %v4477_v3 = vpack.c.bf16 %v4439_v38, %v4438_v6  ;;  %v4726_v62 = vld [vmem:[%s8740_s12 + $0x5d] sm:$0xff] }
 0x477   : > { %v10041_v39 = vadd.f32 %v4067_v7, %v3847_v57  ;;  %8324 = vmatmul.msk.bf16.vlgmr.msra.gmra.mxu1 %vm367_vm0, %v5048_v16  ;;  %v5010_v7 = vld [vmem:[%s8740_s12 + $0x4e] sm:$0xff] }
 0x478   : > { %v3212_v29 = vpop.f32.mrf.mxu2  ;;  %v5049_v57 = vpack.c.bf16 %v5011_v8, %v5010_v7  ;;  %v5013_v8 = vld [vmem:[%s8740_s12 + $0x66] sm:$0xff] }
 0x479   : > { %v3276_v41 = vadd.f32 %v3212_v29, %v9664_v30  ;;  %v3498_v19 = vpop.f32.mrf.mxu3 }
 0x47b   : > { %v3562_v22 = vadd.f32 %v3498_v19, %v3276_v41  ;;  %v3786_v53 = vpop.f32.mrf.mxu0 }
 0x47c   : > { %v4072_v21 = vpop.f32.mrf.mxu1 }
 0x47d   : > { %v3848_v20 = vadd.f32 %v3784_v5, %v3562_v22 }
 0x47f   : > { %v10046_v37 = vadd.f32 %v4070_v12, %v3848_v20 }
 0x480   : > { %v3214_v35 = vpop.f32.mrf.mxu2 }
 0x481   : > { %v3277_v58 = vadd.f32 %v3214_v35, %v9675_v63  ;;  %v3500_v42 = vpop.f32.mrf.mxu3  ;;  %v4727_v35 = vld [vmem:[%s8740_s12 + $0x65] sm:$0xff] }
 0x483   : > { %v3563_v30 = vadd.f32 %v3500_v42, %v3277_v58  ;;  %v3789_v16 = vpop.f32.mrf.mxu0 }
 0x484   : > { %v4075_v29 = vpop.f32.mrf.mxu1 }
 0x485   : > { %8229 = vmatmul.msk.bf16.gmra.mxu2 %vm367_vm0, %v4476_v32  ;;  %v3849_v5 = vadd.f32 %v3786_v53, %v3563_v30  ;;  %v4440_v53 = vld [vmem:[%s8740_s12 + $0x5c] sm:$0xff]  ;;  %v4764_v30 = vpack.c.bf16 %v4727_v35, %v4726_v62  ;;  %v4443_v62 = vld [vmem:[%s8740_s12 + $0x74] sm:$0xff] }
 0x486   : > { %8261 = vmatmul.msk.bf16.gmra.mxu3 %vm367_vm0, %v4477_v3  ;;  %8293 = vmatmul.msk.bf16.gmra.mxu0 %vm367_vm0, %v4763_v60  ;;  %v4478_v60 = vpack.c.bf16 %v4441_v54, %v4440_v53  ;;  %v4728_v35 = vld [vmem:[%s8740_s12 + $0x6d] sm:$0xff] }
 0x487   : > { %v10057_v63 = vadd.f32 %v4072_v21, %v3849_v5  ;;  %8325 = vmatmul.msk.bf16.gmra.mxu1 %vm367_vm0, %v5049_v57  ;;  %v5012_v21 = vld [vmem:[%s8740_s12 + $0x5e] sm:$0xff] }
 0x488   : > { %v3217_v12 = vpop.f32.mrf.mxu2  ;;  %v5050_v5 = vpack.c.bf16 %v5013_v8, %v5012_v21  ;;  %v5015_v8 = vld [vmem:[%s8740_s12 + $0x76] sm:$0xff] }
 0x489   : > { %v3278_v41 = vadd.f32 %v3217_v12, %v9682_v52  ;;  %v3503_v19 = vpop.f32.mrf.mxu3 }
 0x48b   : > { %v3564_v22 = vadd.f32 %v3503_v19, %v3278_v41  ;;  %v3791_v20 = vpop.f32.mrf.mxu0 }
 0x48c   : > { %v4077_v32 = vpop.f32.mrf.mxu1 }
 0x48d   : > { %v3850_v6 = vadd.f32 %v3789_v16, %v3564_v22 }
 0x48f   : > { %v10062_v38 = vadd.f32 %v4075_v29, %v3850_v6 }
 0x490   : > { %v3219_v7 = vpop.f32.mrf.mxu2 }
 0x491   : > { %v3279_v58 = vadd.f32 %v3219_v7, %v9693_v23  ;;  %v3505_v42 = vpop.f32.mrf.mxu3  ;;  %v4729_v7 = vld [vmem:[%s8740_s12 + $0x75] sm:$0xff] }
 0x493   : > { %v3565_v52 = vadd.f32 %v3505_v42, %v3279_v58  ;;  %v3794_v57 = vpop.f32.mrf.mxu0 }
 0x494   : > { %v4080_v12 = vpop.f32.mrf.mxu1 }
 0x495   : > { %8230 = vmatmul.msk.bf16.gmra.mxu2 %vm367_vm0, %v4477_v3  ;;  %v3851_v16 = vadd.f32 %v3791_v20, %v3565_v52  ;;  %v4442_v20 = vld [vmem:[%s8740_s12 + $0x6c] sm:$0xff]  ;;  %v4765_v52 = vpack.c.bf16 %v4729_v7, %v4728_v35  ;;  %v4445_v35 = vld [vmem:[%s8740_s12 + $0x84] sm:$0xff] }
 0x496   : > { %8262 = vmatmul.msk.bf16.gmra.mxu3 %vm367_vm0, %v4478_v60  ;;  %8294 = vmatmul.msk.bf16.gmra.mxu0 %vm367_vm0, %v4764_v30  ;;  %v4479_v30 = vpack.c.bf16 %v4443_v62, %v4442_v20  ;;  %v4730_v7 = vld [vmem:[%s8740_s12 + $0x7d] sm:$0xff] }
 0x497   : > { %v10073_v23 = vadd.f32 %v4077_v32, %v3851_v16  ;;  %8326 = vmatmul.msk.bf16.gmra.mxu1 %vm367_vm0, %v5050_v5  ;;  %v5014_v32 = vld [vmem:[%s8740_s12 + $0x6e] sm:$0xff] }
 0x498   : > { %v3222_v29 = vpop.f32.mrf.mxu2  ;;  %v5051_v16 = vpack.c.bf16 %v5015_v8, %v5014_v32  ;;  %v5017_v8 = vld [vmem:[%s8740_s12 + $0x86] sm:$0xff] }
 0x499   : > { %v3280_v41 = vadd.f32 %v3222_v29, %v9700_v40  ;;  %v3508_v19 = vpop.f32.mrf.mxu3 }
 0x49b   : > { %v3566_v22 = vadd.f32 %v3508_v19, %v3280_v41  ;;  %v3796_v6 = vpop.f32.mrf.mxu0 }
 0x49c   : > { %v4082_v3 = vpop.f32.mrf.mxu1 }
 0x49d   : > { %v3852_v53 = vadd.f32 %v3794_v57, %v3566_v22 }
 0x49f   : > { %v10078_v54 = vadd.f32 %v4080_v12, %v3852_v53 }
 0x4a0   : > { %v3224_v21 = vpop.f32.mrf.mxu2 }
 0x4a1   : > { %v3281_v58 = vadd.f32 %v3224_v21, %v9711_v49  ;;  %v3510_v42 = vpop.f32.mrf.mxu3  ;;  %v4731_v21 = vld [vmem:[%s8740_s12 + $0x85] sm:$0xff] }
 0x4a3   : > { %v3567_v40 = vadd.f32 %v3510_v42, %v3281_v58  ;;  %v3799_v5 = vpop.f32.mrf.mxu0 }
 0x4a4   : > { %v4085_v29 = vpop.f32.mrf.mxu1 }
 0x4a5   : > { %8231 = vmatmul.msk.bf16.gmra.mxu2 %vm367_vm0, %v4478_v60  ;;  %v3853_v57 = vadd.f32 %v3796_v6, %v3567_v40  ;;  %v4444_v6 = vld [vmem:[%s8740_s12 + $0x7c] sm:$0xff]  ;;  %v4766_v40 = vpack.c.bf16 %v4731_v21, %v4730_v7  ;;  %v4447_v7 = vld [vmem:[%s8740_s12 + $0x94] sm:$0xff] }
 0x4a6   : > { %8263 = vmatmul.msk.bf16.gmra.mxu3 %vm367_vm0, %v4479_v30  ;;  %8295 = vmatmul.msk.bf16.gmra.mxu0 %vm367_vm0, %v4765_v52  ;;  %v4480_v52 = vpack.c.bf16 %v4445_v35, %v4444_v6  ;;  %v4732_v21 = vld [vmem:[%s8740_s12 + $0x8d] sm:$0xff] }
 0x4a7   : > { %v10089_v49 = vadd.f32 %v4082_v3, %v3853_v57  ;;  %8327 = vmatmul.msk.bf16.gmra.mxu1 %vm367_vm0, %v5051_v16  ;;  %v5016_v3 = vld [vmem:[%s8740_s12 + $0x7e] sm:$0xff] }
 0x4a8   : > { %v3227_v12 = vpop.f32.mrf.mxu2  ;;  %v5052_v57 = vpack.c.bf16 %v5017_v8, %v5016_v3  ;;  %v5019_v8 = vld [vmem:[%s8740_s12 + $0x96] sm:$0xff] }
 0x4a9   : > { %v3282_v41 = vadd.f32 %v3227_v12, %v9718_v43  ;;  %v3513_v19 = vpop.f32.mrf.mxu3 }
 0x4ab   : > { %v3568_v22 = vadd.f32 %v3513_v19, %v3282_v41  ;;  %v3801_v53 = vpop.f32.mrf.mxu0 }
 0x4ac   : > { %v4087_v60 = vpop.f32.mrf.mxu1 }
 0x4ad   : > { %v3854_v20 = vadd.f32 %v3799_v5, %v3568_v22 }
 0x4af   : > { %v10094_v62 = vadd.f32 %v4085_v29, %v3854_v20 }
 0x4b0   : > { %v3229_v32 = vpop.f32.mrf.mxu2 }
 0x4b1   : > { %v3283_v58 = vadd.f32 %v3229_v32, %v9729_v14  ;;  %v3515_v42 = vpop.f32.mrf.mxu3  ;;  %v4733_v32 = vld [vmem:[%s8740_s12 + $0x95] sm:$0xff] }
 0x4b3   : > { %v3569_v43 = vadd.f32 %v3515_v42, %v3283_v58  ;;  %v3804_v16 = vpop.f32.mrf.mxu0 }
 0x4b4   : > { %v4090_v12 = vpop.f32.mrf.mxu1 }
 0x4b5   : > { %8232 = vmatmul.msk.bf16.gmra.mxu2 %vm367_vm0, %v4479_v30  ;;  %v3855_v5 = vadd.f32 %v3801_v53, %v3569_v43  ;;  %v4446_v53 = vld [vmem:[%s8740_s12 + $0x8c] sm:$0xff]  ;;  %v4767_v43 = vpack.c.bf16 %v4733_v32, %v4732_v21  ;;  %v4449_v21 = vld [vmem:[%s8740_s12 + $0xa4] sm:$0xff] }
 0x4b6   : > { %8264 = vmatmul.msk.bf16.gmra.mxu3 %vm367_vm0, %v4480_v52  ;;  %8296 = vmatmul.msk.bf16.gmra.mxu0 %vm367_vm0, %v4766_v40  ;;  %v4481_v40 = vpack.c.bf16 %v4447_v7, %v4446_v53  ;;  %v4734_v32 = vld [vmem:[%s8740_s12 + $0x9d] sm:$0xff] }
 0x4b7   : > { %v10105_v14 = vadd.f32 %v4087_v60, %v3855_v5  ;;  %8328 = vmatmul.msk.bf16.gmra.mxu1 %vm367_vm0, %v5052_v57  ;;  %v5018_v60 = vld [vmem:[%s8740_s12 + $0x8e] sm:$0xff] }
 0x4b8   : > { %v3232_v29 = vpop.f32.mrf.mxu2  ;;  %v5053_v5 = vpack.c.bf16 %v5019_v8, %v5018_v60  ;;  %v5021_v8 = vld [vmem:[%s8740_s12 + $0xa6] sm:$0xff] }
 0x4b9   : > { %v3284_v41 = vadd.f32 %v3232_v29, %v9736_v10  ;;  %v3518_v19 = vpop.f32.mrf.mxu3 }
 0x4bb   : > { %v3570_v22 = vadd.f32 %v3518_v19, %v3284_v41  ;;  %v3806_v20 = vpop.f32.mrf.mxu0 }
 0x4bc   : > { %v4092_v30 = vpop.f32.mrf.mxu1 }
 0x4bd   : > { %v3856_v6 = vadd.f32 %v3804_v16, %v3570_v22 }
 0x4bf   : > { %v10110_v35 = vadd.f32 %v4090_v12, %v3856_v6 }
 0x4c0   : > { %v3234_v3 = vpop.f32.mrf.mxu2 }
 0x4c1   : > { %v3285_v58 = vadd.f32 %v3234_v3, %v9747_v44  ;;  %v3520_v42 = vpop.f32.mrf.mxu3  ;;  %v4735_v3 = vld [vmem:[%s8740_s12 + $0xa5] sm:$0xff] }
 0x4c3   : > { %v3571_v10 = vadd.f32 %v3520_v42, %v3285_v58  ;;  %v3809_v57 = vpop.f32.mrf.mxu0 }
 0x4c4   : > { %v4095_v29 = vpop.f32.mrf.mxu1 }
 0x4c5   : > { %8233 = vmatmul.msk.bf16.gmra.mxu2 %vm367_vm0, %v4480_v52  ;;  %v3857_v16 = vadd.f32 %v3806_v20, %v3571_v10  ;;  %v4448_v20 = vld [vmem:[%s8740_s12 + $0x9c] sm:$0xff]  ;;  %v4768_v10 = vpack.c.bf16 %v4735_v3, %v4734_v32  ;;  %v4451_v32 = vld [vmem:[%s8740_s12 + $0xb4] sm:$0xff] }
 0x4c6   : > { %8265 = vmatmul.msk.bf16.gmra.mxu3 %vm367_vm0, %v4481_v40  ;;  %8297 = vmatmul.msk.bf16.gmra.mxu0 %vm367_vm0, %v4767_v43  ;;  %v4482_v43 = vpack.c.bf16 %v4449_v21, %v4448_v20  ;;  %v4736_v3 = vld [vmem:[%s8740_s12 + $0xad] sm:$0xff] }
 0x4c7   : > { %v10121_v44 = vadd.f32 %v4092_v30, %v3857_v16  ;;  %8329 = vmatmul.msk.bf16.gmra.mxu1 %vm367_vm0, %v5053_v5  ;;  %v5020_v30 = vld [vmem:[%s8740_s12 + $0x9e] sm:$0xff] }
 0x4c8   : > { %v3237_v12 = vpop.f32.mrf.mxu2  ;;  %v5054_v16 = vpack.c.bf16 %v5021_v8, %v5020_v30  ;;  %v5023_v8 = vld [vmem:[%s8740_s12 + $0xb6] sm:$0xff] }
 0x4c9   : > { %v3286_v41 = vadd.f32 %v3237_v12, %v9754_v59  ;;  %v3523_v19 = vpop.f32.mrf.mxu3 }
 0x4cb   : > { %v3572_v22 = vadd.f32 %v3523_v19, %v3286_v41  ;;  %v3811_v6 = vpop.f32.mrf.mxu0 }
 0x4cc   : > { %v4097_v52 = vpop.f32.mrf.mxu1 }
 0x4cd   : > { %v3858_v53 = vadd.f32 %v3809_v57, %v3572_v22 }
 0x4cf   : > { %v10126_v7 = vadd.f32 %v4095_v29, %v3858_v53 }
 0x4d0   : > { %v3239_v60 = vpop.f32.mrf.mxu2 }
 0x4d1   : > { %v3287_v58 = vadd.f32 %v3239_v60, %v9765_v17  ;;  %v3525_v42 = vpop.f32.mrf.mxu3  ;;  %v4737_v60 = vld [vmem:[%s8740_s12 + $0xb5] sm:$0xff] }
 0x4d3   : > { %v3573_v59 = vadd.f32 %v3525_v42, %v3287_v58  ;;  %v3814_v5 = vpop.f32.mrf.mxu0 }
 0x4d4   : > { %v4100_v12 = vpop.f32.mrf.mxu1 }
 0x4d5   : > { %8234 = vmatmul.msk.bf16.gmra.mxu2 %vm367_vm0, %v4481_v40  ;;  %v3859_v57 = vadd.f32 %v3811_v6, %v3573_v59  ;;  %v4450_v6 = vld [vmem:[%s8740_s12 + $0xac] sm:$0xff]  ;;  %v4769_v59 = vpack.c.bf16 %v4737_v60, %v4736_v3  ;;  %v4738_v60 = vld [vmem:[%s8740_s12 + $0xbd] sm:$0xff] }
 0x4d6   : > { %8266 = vmatmul.msk.bf16.gmra.mxu3 %vm367_vm0, %v4482_v43  ;;  %8298 = vmatmul.msk.bf16.gmra.mxu0 %vm367_vm0, %v4768_v10  ;;  %v4483_v10 = vpack.c.bf16 %v4451_v32, %v4450_v6  ;;  %v4453_v32 = vld [vmem:[%s8740_s12 + $0xc4] sm:$0xff] }
 0x4d7   : > { %v10137_v17 = vadd.f32 %v4097_v52, %v3859_v57  ;;  %8330 = vmatmul.msk.bf16.gmra.mxu1 %vm367_vm0, %v5054_v16  ;;  %v5022_v52 = vld [vmem:[%s8740_s12 + $0xae] sm:$0xff] }
 0x4d8   : > { %v3242_v29 = vpop.f32.mrf.mxu2  ;;  %v5055_v57 = vpack.c.bf16 %v5023_v8, %v5022_v52  ;;  %v5024_v8 = vld [vmem:[%s8740_s12 + $0xbe] sm:$0xff] }
 0x4d9   : > { %v3288_v41 = vadd.f32 %v3242_v29, %v9772_v48  ;;  %v3528_v19 = vpop.f32.mrf.mxu3 }
 0x4db   : > { %v3574_v22 = vadd.f32 %v3528_v19, %v3288_v41  ;;  %v3816_v53 = vpop.f32.mrf.mxu0 }
 0x4dc   : > { %v4102_v40 = vpop.f32.mrf.mxu1 }
 0x4dd   : > { %v3860_v20 = vadd.f32 %v3814_v5, %v3574_v22 }
 0x4df   : > { %v10142_v21 = vadd.f32 %v4100_v12, %v3860_v20 }
 0x4e0   : > { %v3244_v30 = vpop.f32.mrf.mxu2 }
 0x4e1   : > { %v3289_v58 = vadd.f32 %v3244_v30, %v9783_v50  ;;  %v3530_v42 = vpop.f32.mrf.mxu3  ;;  %v4739_v30 = vld [vmem:[%s8740_s12 + $0xc5] sm:$0xff] }
 0x4e3   : > { %v3575_v48 = vadd.f32 %v3530_v42, %v3289_v58  ;;  %v3819_v16 = vpop.f32.mrf.mxu0  ;;  %v5025_v58 = vld [vmem:[%s8740_s12 + $0xc6] sm:$0xff] }
 0x4e4   : > { %v4105_v5 = vpop.f32.mrf.mxu1 }
 0x4e5   : > { %8235 = vmatmul.msk.bf16.gmra.mxu2 %vm367_vm0, %v4482_v43  ;;  %v3861_v12 = vadd.f32 %v3816_v53, %v3575_v48  ;;  %v4452_v53 = vld [vmem:[%s8740_s12 + $0xbc] sm:$0xff]  ;;  %v4770_v48 = vpack.c.bf16 %v4739_v30, %v4738_v60  ;;  %v4454_v60 = vld [vmem:[%s8740_s12 + $0xcc] sm:$0xff]  ;;  %v4455_v30 = vld [vmem:[%s8740_s12 + $0xd4] sm:$0xff] }
 0x4e6   : > { %8267 = vmatmul.msk.bf16.gmra.mxu3 %vm367_vm0, %v4483_v10  ;;  %8299 = vmatmul.msk.bf16.gmra.mxu0 %vm367_vm0, %v4769_v59  ;;  %v4484_v59 = vpack.c.bf16 %v4453_v32, %v4452_v53 }
 0x4e7   : > { %v10153_v29 = vadd.f32 %v4102_v40, %v3861_v12  ;;  %8331 = vmatmul.msk.bf16.gmra.mxu1 %vm367_vm0, %v5055_v57  ;;  %v8641_v40 = vld [vmem:[%s11224_s1 + $0x158] sm:$0xff]  ;;  %v5056_v12 = vpack.c.bf16 %v5025_v58, %v5024_v8  ;;  %v8638_v58 = vld [vmem:[%s11224_s1 + $0x140] sm:$0xff] }
 0x4e8   : > { %v3247_v50 = vpop.f32.mrf.mxu2  ;;  %6295 = vmatpush.bf16.msrb.mxu1 %v8641_v40  ;;  %v4741_v8 = vld [vmem:[%s8740_s12 + $0xd5] sm:$0xff]  ;;  %6010 = vmatpush.bf16.msrb.mxu0 %v8638_v58  ;;  %v4742_v58 = vld [vmem:[%s8740_s12 + $0xdd] sm:$0xff] }
 0x4e9   : > { %v3290_v41 = vadd.f32 %v3247_v50, %v9791_v9  ;;  %v3533_v19 = vpop.f32.mrf.mxu3 }
 0x4eb   : > { %v3576_v22 = vadd.f32 %v3533_v19, %v3290_v41  ;;  %v3821_v20 = vpop.f32.mrf.mxu0 }
 0x4ec   : > { %v4107_v43 = vpop.f32.mrf.mxu1 }
 0x4ed   : > { %v3862_v6 = vadd.f32 %v3819_v16, %v3576_v22 }
 0x4ef   : > { %v10159_v3 = vadd.f32 %v4105_v5, %v3862_v6 }
 0x4f0   : > { %v3249_v52 = vpop.f32.mrf.mxu2 }
 0x4f1   : > { %v3291_v9 = vadd.f32 %v3249_v52, %v9807_v46  ;;  %v3535_v42 = vpop.f32.mrf.mxu3  ;;  %v8634_v46 = vld [vmem:[%s11224_s1 + $0x120] sm:$0xff]  ;;  %v4740_v52 = vld [vmem:[%s8740_s12 + $0xcd] sm:$0xff] }
 0x4f2   : > { %5438 = vmatpush.bf16.msrb.mxu2 %v8634_v46 }
 0x4f3   : > { %v3577_v16 = vadd.f32 %v3535_v42, %v3291_v9  ;;  %v4868_v57 = vpop.f32.mrf.mxu0  ;;  %v5026_v42 = vld [vmem:[%s8740_s12 + $0xce] sm:$0xff] }
 0x4f4   : > { %v5154_v5 = vpop.f32.mrf.mxu1 }
 0x4f5   : > { %8236 = vmatmul.msk.bf16.gmra.mxu2 %vm367_vm0, %v4483_v10  ;;  %v3863_v50 = vadd.f32 %v3821_v20, %v3577_v16  ;;  %v8636_v10 = vld [vmem:[%s11224_s1 + $0x130] sm:$0xff] }
 0x4f6   : > { %8268 = vmatmul.msk.bf16.gmra.mxu3 %vm367_vm0, %v4484_v59  ;;  %8300 = vmatmul.msk.bf16.gmra.mxu0 %vm367_vm0, %v4770_v48  ;;  %v5027_v48 = vld [vmem:[%s8740_s12 + $0xd6] sm:$0xff] }
 0x4f7   : > { %v10175_v41 = vadd.f32 %v4107_v43, %v3863_v50  ;;  %8332 = vmatmul.msk.bf16.gmra.mxu1 %vm367_vm0, %v5056_v12  ;;  %5724 = vmatpush.bf16.msrb.mxu3 %v8636_v10  ;;  %v4485_v12 = vpack.c.bf16 %v4455_v30, %v4454_v60  ;;  %v4771_v50 = vpack.c.bf16 %v4741_v8, %v4740_v52  ;;  %v4457_v8 = vld [vmem:[%s8740_s12 + $0xe4] sm:$0xff] }
 0x4f8   : > { %v4296_v19 = vpop.f32.mrf.mxu2 }
 0x4f9   : > { %v4396_v22 = vadd.f32 %v4296_v19, %v9818_v18  ;;  %v4582_v20 = vpop.f32.mrf.mxu3 }
 0x4fb   : > { %v4682_v6 = vadd.f32 %v4582_v20, %v4396_v22  ;;  %v4870_v53 = vpop.f32.mrf.mxu0 }
 0x4fc   : > { %v5156_v32 = vpop.f32.mrf.mxu1 }
 0x4fd   : > { %v4968_v43 = vadd.f32 %v4868_v57, %v4682_v6 }
 0x4ff   : > { %v10184_v40 = vadd.f32 %v5154_v5, %v4968_v43  ;;  %v5057_v5 = vpack.c.bf16 %v5027_v48, %v5026_v42  ;;  %v5029_v48 = vld [vmem:[%s8740_s12 + $0xe6] sm:$0xff] }
 0x500   : > { %v4298_v9 = vpop.f32.mrf.mxu2 }
 0x501   : > { %v4397_v18 = vadd.f32 %v4298_v9, %v9831_v1  ;;  %v4584_v16 = vpop.f32.mrf.mxu3  ;;  %v4743_v9 = vld [vmem:[%s8740_s12 + $0xe5] sm:$0xff] }
 0x503   : > { %v4683_v57 = vadd.f32 %v4584_v16, %v4397_v18  ;;  %v4873_v46 = vpop.f32.mrf.mxu0 }
 0x504   : > { %v5159_v10 = vpop.f32.mrf.mxu1 }
 0x505   : > { %8237 = vmatmul.msk.bf16.gmra.mxu2 %vm367_vm0, %v4484_v59  ;;  %v4969_v19 = vadd.f32 %v4870_v53, %v4683_v57  ;;  %v4456_v53 = vld [vmem:[%s8740_s12 + $0xdc] sm:$0xff]  ;;  %v4772_v57 = vpack.c.bf16 %v4743_v9, %v4742_v58  ;;  %v4459_v58 = vld [vmem:[%s8740_s12 + $0xf4] sm:$0xff] }
 0x506   : > { %8269 = vmatmul.msk.bf16.gmra.mxu3 %vm367_vm0, %v4485_v12  ;;  %8301 = vmatmul.msk.bf16.gmra.mxu0 %vm367_vm0, %v4771_v50  ;;  %v4486_v50 = vpack.c.bf16 %v4457_v8, %v4456_v53  ;;  %v4744_v9 = vld [vmem:[%s8740_s12 + $0xed] sm:$0xff] }
 0x507   : > { %v10197_v1 = vadd.f32 %v5156_v32, %v4969_v19  ;;  %8333 = vmatmul.msk.bf16.gmra.mxu1 %vm367_vm0, %v5057_v5  ;;  %v5028_v32 = vld [vmem:[%s8740_s12 + $0xde] sm:$0xff] }
 0x508   : > { %v4301_v22 = vpop.f32.mrf.mxu2  ;;  %v5058_v19 = vpack.c.bf16 %v5029_v48, %v5028_v32  ;;  %v5031_v48 = vld [vmem:[%s8740_s12 + $0xf6] sm:$0xff] }
 0x509   : > { %v4398_v20 = vadd.f32 %v4301_v22, %v9838_v4  ;;  %v4587_v6 = vpop.f32.mrf.mxu3 }
 0x50b   : > { %v4684_v43 = vadd.f32 %v4587_v6, %v4398_v20  ;;  %v4875_v60 = vpop.f32.mrf.mxu0 }
 0x50c   : > { %v5161_v59 = vpop.f32.mrf.mxu1 }
 0x50d   : > { %v4970_v30 = vadd.f32 %v4873_v46, %v4684_v43 }
 0x50f   : > { %v10202_v52 = vadd.f32 %v5159_v10, %v4970_v30 }
 0x510   : > { %v4303_v42 = vpop.f32.mrf.mxu2 }
 0x511   : > { %v4399_v18 = vadd.f32 %v4303_v42, %v9849_v27  ;;  %v4589_v16 = vpop.f32.mrf.mxu3  ;;  %v4745_v42 = vld [vmem:[%s8740_s12 + $0xf5] sm:$0xff] }
 0x513   : > { %v4685_v4 = vadd.f32 %v4589_v16, %v4399_v18  ;;  %v4878_v5 = vpop.f32.mrf.mxu0 }
 0x514   : > { %v5164_v22 = vpop.f32.mrf.mxu1 }
 0x515   : > { %8238 = vmatmul.msk.bf16.gmra.mxu2 %vm367_vm0, %v4485_v12  ;;  %v4971_v46 = vadd.f32 %v4875_v60, %v4685_v4  ;;  %v4458_v60 = vld [vmem:[%s8740_s12 + $0xec] sm:$0xff]  ;;  %v4773_v4 = vpack.c.bf16 %v4745_v42, %v4744_v9  ;;  %v4461_v9 = vld [vmem:[%s8740_s12 + $0x104] sm:$0xff] }
 0x516   : > { %8270 = vmatmul.msk.bf16.gmra.mxu3 %vm367_vm0, %v4486_v50  ;;  %8302 = vmatmul.msk.bf16.gmra.mxu0 %vm367_vm0, %v4772_v57  ;;  %v4487_v57 = vpack.c.bf16 %v4459_v58, %v4458_v60  ;;  %v4746_v42 = vld [vmem:[%s8740_s12 + $0xfd] sm:$0xff] }
 0x517   : > { %v10213_v27 = vadd.f32 %v5161_v59, %v4971_v46  ;;  %8334 = vmatmul.msk.bf16.gmra.mxu1 %vm367_vm0, %v5058_v19  ;;  %v5030_v59 = vld [vmem:[%s8740_s12 + $0xee] sm:$0xff] }
 0x518   : > { %v4306_v10 = vpop.f32.mrf.mxu2  ;;  %v5059_v46 = vpack.c.bf16 %v5031_v48, %v5030_v59  ;;  %v5033_v48 = vld [vmem:[%s8740_s12 + $0x106] sm:$0xff] }
 0x519   : > { %v4400_v20 = vadd.f32 %v4306_v10, %v9856_v26  ;;  %v4592_v6 = vpop.f32.mrf.mxu3 }
 0x51b   : > { %v4686_v43 = vadd.f32 %v4592_v6, %v4400_v20  ;;  %v4880_v30 = vpop.f32.mrf.mxu0 }
 0x51c   : > { %v5166_v12 = vpop.f32.mrf.mxu1 }
 0x51d   : > { %v4972_v53 = vadd.f32 %v4878_v5, %v4686_v43 }
 0x51f   : > { %v10218_v8 = vadd.f32 %v5164_v22, %v4972_v53 }
 0x520   : > { %v4308_v32 = vpop.f32.mrf.mxu2 }
 0x521   : > { %v4401_v18 = vadd.f32 %v4308_v32, %v9867_v51  ;;  %v4594_v16 = vpop.f32.mrf.mxu3  ;;  %v4747_v32 = vld [vmem:[%s8740_s12 + $0x105] sm:$0xff] }
 0x523   : > { %v4687_v26 = vadd.f32 %v4594_v16, %v4401_v18  ;;  %v4883_v19 = vpop.f32.mrf.mxu0 }
 0x524   : > { %v5169_v10 = vpop.f32.mrf.mxu1 }
 0x525   : > { %8239 = vmatmul.msk.bf16.gmra.mxu2 %vm367_vm0, %v4486_v50  ;;  %v4973_v5 = vadd.f32 %v4880_v30, %v4687_v26  ;;  %v4460_v30 = vld [vmem:[%s8740_s12 + $0xfc] sm:$0xff]  ;;  %v4774_v26 = vpack.c.bf16 %v4747_v32, %v4746_v42  ;;  %v4463_v42 = vld [vmem:[%s8740_s12 + $0x114] sm:$0xff] }
 0x526   : > { %8271 = vmatmul.msk.bf16.gmra.mxu3 %vm367_vm0, %v4487_v57  ;;  %8303 = vmatmul.msk.bf16.gmra.mxu0 %vm367_vm0, %v4773_v4  ;;  %v4488_v4 = vpack.c.bf16 %v4461_v9, %v4460_v30  ;;  %v4748_v32 = vld [vmem:[%s8740_s12 + $0x10d] sm:$0xff] }
 0x527   : > { %v10229_v51 = vadd.f32 %v5166_v12, %v4973_v5  ;;  %8335 = vmatmul.msk.bf16.gmra.mxu1 %vm367_vm0, %v5059_v46  ;;  %v5032_v12 = vld [vmem:[%s8740_s12 + $0xfe] sm:$0xff] }
 0x528   : > { %v4311_v22 = vpop.f32.mrf.mxu2  ;;  %v5060_v5 = vpack.c.bf16 %v5033_v48, %v5032_v12  ;;  %v5035_v48 = vld [vmem:[%s8740_s12 + $0x116] sm:$0xff] }
 0x529   : > { %v4402_v20 = vadd.f32 %v4311_v22, %v9874_v28  ;;  %v4597_v6 = vpop.f32.mrf.mxu3 }
 0x52b   : > { %v4688_v43 = vadd.f32 %v4597_v6, %v4402_v20  ;;  %v4885_v53 = vpop.f32.mrf.mxu0 }
 0x52c   : > { %v5171_v50 = vpop.f32.mrf.mxu1 }
 0x52d   : > { %v4974_v60 = vadd.f32 %v4883_v19, %v4688_v43 }
 0x52f   : > { %v10234_v58 = vadd.f32 %v5169_v10, %v4974_v60 }
 0x530   : > { %v4313_v59 = vpop.f32.mrf.mxu2 }
 0x531   : > { %v4403_v18 = vadd.f32 %v4313_v59, %v9885_v11  ;;  %v4599_v16 = vpop.f32.mrf.mxu3  ;;  %v4749_v59 = vld [vmem:[%s8740_s12 + $0x115] sm:$0xff] }
 0x533   : > { %v4689_v28 = vadd.f32 %v4599_v16, %v4403_v18  ;;  %v4888_v46 = vpop.f32.mrf.mxu0 }
 0x534   : > { %v5174_v22 = vpop.f32.mrf.mxu1 }
 0x535   : > { %8240 = vmatmul.msk.bf16.gmra.mxu2 %vm367_vm0, %v4487_v57  ;;  %v4975_v19 = vadd.f32 %v4885_v53, %v4689_v28  ;;  %v4462_v53 = vld [vmem:[%s8740_s12 + $0x10c] sm:$0xff]  ;;  %v4775_v28 = vpack.c.bf16 %v4749_v59, %v4748_v32  ;;  %v4465_v32 = vld [vmem:[%s8740_s12 + $0x124] sm:$0xff] }
 0x536   : > { %8272 = vmatmul.msk.bf16.gmra.mxu3 %vm367_vm0, %v4488_v4  ;;  %8304 = vmatmul.msk.bf16.gmra.mxu0 %vm367_vm0, %v4774_v26  ;;  %v4489_v26 = vpack.c.bf16 %v4463_v42, %v4462_v53  ;;  %v4750_v59 = vld [vmem:[%s8740_s12 + $0x11d] sm:$0xff] }
 0x537   : > { %v10245_v11 = vadd.f32 %v5171_v50, %v4975_v19  ;;  %8336 = vmatmul.msk.bf16.gmra.mxu1 %vm367_vm0, %v5060_v5  ;;  %v5034_v50 = vld [vmem:[%s8740_s12 + $0x10e] sm:$0xff] }
 0x538   : > { %v4316_v10 = vpop.f32.mrf.mxu2  ;;  %v5061_v19 = vpack.c.bf16 %v5035_v48, %v5034_v50  ;;  %v5037_v48 = vld [vmem:[%s8740_s12 + $0x126] sm:$0xff] }
 0x539   : > { %v4404_v20 = vadd.f32 %v4316_v10, %v9892_v24  ;;  %v4602_v6 = vpop.f32.mrf.mxu3 }
 0x53b   : > { %v4690_v43 = vadd.f32 %v4602_v6, %v4404_v20  ;;  %v4890_v60 = vpop.f32.mrf.mxu0 }
 0x53c   : > { %v5176_v57 = vpop.f32.mrf.mxu1 }
 0x53d   : > { %v4976_v30 = vadd.f32 %v4888_v46, %v4690_v43 }
 0x53f   : > { %v10250_v9 = vadd.f32 %v5174_v22, %v4976_v30 }
 0x540   : > { %v4318_v12 = vpop.f32.mrf.mxu2 }
 0x541   : > { %v4405_v18 = vadd.f32 %v4318_v12, %v9903_v36  ;;  %v4604_v16 = vpop.f32.mrf.mxu3  ;;  %v4751_v12 = vld [vmem:[%s8740_s12 + $0x125] sm:$0xff] }
 0x543   : > { %v4691_v24 = vadd.f32 %v4604_v16, %v4405_v18  ;;  %v4893_v5 = vpop.f32.mrf.mxu0 }
 0x544   : > { %v5179_v10 = vpop.f32.mrf.mxu1 }
 0x545   : > { %8241 = vmatmul.msk.bf16.gmra.mxu2 %vm367_vm0, %v4488_v4  ;;  %v4977_v46 = vadd.f32 %v4890_v60, %v4691_v24  ;;  %v4464_v60 = vld [vmem:[%s8740_s12 + $0x11c] sm:$0xff]  ;;  %v4776_v24 = vpack.c.bf16 %v4751_v12, %v4750_v59  ;;  %v4467_v59 = vld [vmem:[%s8740_s12 + $0x134] sm:$0xff] }
 0x546   : > { %8273 = vmatmul.msk.bf16.gmra.mxu3 %vm367_vm0, %v4489_v26  ;;  %8305 = vmatmul.msk.bf16.gmra.mxu0 %vm367_vm0, %v4775_v28  ;;  %v4490_v28 = vpack.c.bf16 %v4465_v32, %v4464_v60  ;;  %v4752_v12 = vld [vmem:[%s8740_s12 + $0x12d] sm:$0xff] }
 0x547   : > { %v10261_v36 = vadd.f32 %v5176_v57, %v4977_v46  ;;  %8337 = vmatmul.msk.bf16.gmra.mxu1 %vm367_vm0, %v5061_v19  ;;  %v5036_v57 = vld [vmem:[%s8740_s12 + $0x11e] sm:$0xff] }
 0x548   : > { %v4321_v22 = vpop.f32.mrf.mxu2  ;;  %v5062_v46 = vpack.c.bf16 %v5037_v48, %v5036_v57  ;;  %v5039_v48 = vld [vmem:[%s8740_s12 + $0x136] sm:$0xff] }
 0x549   : > { %v4406_v20 = vadd.f32 %v4321_v22, %v9910_v33  ;;  %v4607_v6 = vpop.f32.mrf.mxu3 }
 0x54b   : > { %v4692_v43 = vadd.f32 %v4607_v6, %v4406_v20  ;;  %v4895_v30 = vpop.f32.mrf.mxu0 }
 0x54c   : > { %v5181_v4 = vpop.f32.mrf.mxu1 }
 0x54d   : > { %v4978_v53 = vadd.f32 %v4893_v5, %v4692_v43 }
 0x54f   : > { %v10266_v42 = vadd.f32 %v5179_v10, %v4978_v53 }
 0x550   : > { %v4323_v50 = vpop.f32.mrf.mxu2 }
 0x551   : > { %v4407_v18 = vadd.f32 %v4323_v50, %v9921_v0  ;;  %v4609_v16 = vpop.f32.mrf.mxu3  ;;  %v4753_v50 = vld [vmem:[%s8740_s12 + $0x135] sm:$0xff] }
 0x553   : > { %v4693_v33 = vadd.f32 %v4609_v16, %v4407_v18  ;;  %v4898_v19 = vpop.f32.mrf.mxu0 }
 0x554   : > { %v5184_v22 = vpop.f32.mrf.mxu1 }
 0x555   : > { %8242 = vmatmul.msk.bf16.gmra.mxu2 %vm367_vm0, %v4489_v26  ;;  %v4979_v5 = vadd.f32 %v4895_v30, %v4693_v33  ;;  %v4466_v30 = vld [vmem:[%s8740_s12 + $0x12c] sm:$0xff]  ;;  %v4777_v33 = vpack.c.bf16 %v4753_v50, %v4752_v12  ;;  %v4469_v12 = vld [vmem:[%s8740_s12 + $0x144] sm:$0xff] }
 0x556   : > { %8274 = vmatmul.msk.bf16.gmra.mxu3 %vm367_vm0, %v4490_v28  ;;  %8306 = vmatmul.msk.bf16.gmra.mxu0 %vm367_vm0, %v4776_v24  ;;  %v4491_v24 = vpack.c.bf16 %v4467_v59, %v4466_v30  ;;  %v4754_v50 = vld [vmem:[%s8740_s12 + $0x13d] sm:$0xff] }
 0x557   : > { %v10277_v0 = vadd.f32 %v5181_v4, %v4979_v5  ;;  %8338 = vmatmul.msk.bf16.gmra.mxu1 %vm367_vm0, %v5062_v46  ;;  %v5038_v4 = vld [vmem:[%s8740_s12 + $0x12e] sm:$0xff] }
 0x558   : > { %v4326_v10 = vpop.f32.mrf.mxu2  ;;  %v5063_v5 = vpack.c.bf16 %v5039_v48, %v5038_v4  ;;  %v5041_v48 = vld [vmem:[%s8740_s12 + $0x146] sm:$0xff] }
 0x559   : > { %v4408_v20 = vadd.f32 %v4326_v10, %v9928_v45  ;;  %v4612_v6 = vpop.f32.mrf.mxu3 }
 0x55b   : > { %v4694_v43 = vadd.f32 %v4612_v6, %v4408_v20  ;;  %v4900_v53 = vpop.f32.mrf.mxu0 }
 0x55c   : > { %v5186_v26 = vpop.f32.mrf.mxu1 }
 0x55d   : > { %v4980_v60 = vadd.f32 %v4898_v19, %v4694_v43 }
 0x55f   : > { %v10282_v32 = vadd.f32 %v5184_v22, %v4980_v60 }
 0x560   : > { %v4328_v57 = vpop.f32.mrf.mxu2 }
 0x561   : > { %v4409_v18 = vadd.f32 %v4328_v57, %v9939_v31  ;;  %v4614_v16 = vpop.f32.mrf.mxu3  ;;  %v4755_v57 = vld [vmem:[%s8740_s12 + $0x145] sm:$0xff] }
 0x563   : > { %v4695_v45 = vadd.f32 %v4614_v16, %v4409_v18  ;;  %v4903_v46 = vpop.f32.mrf.mxu0 }
 0x564   : > { %v5189_v10 = vpop.f32.mrf.mxu1 }
 0x565   : > { %8243 = vmatmul.msk.bf16.gmra.mxu2 %vm367_vm0, %v4490_v28  ;;  %v4981_v19 = vadd.f32 %v4900_v53, %v4695_v45  ;;  %v4468_v53 = vld [vmem:[%s8740_s12 + $0x13c] sm:$0xff]  ;;  %v4778_v45 = vpack.c.bf16 %v4755_v57, %v4754_v50  ;;  %v4471_v50 = vld [vmem:[%s8740_s12 + $0x154] sm:$0xff] }
 0x566   : > { %8275 = vmatmul.msk.bf16.gmra.mxu3 %vm367_vm0, %v4491_v24  ;;  %8307 = vmatmul.msk.bf16.gmra.mxu0 %vm367_vm0, %v4777_v33  ;;  %v4492_v33 = vpack.c.bf16 %v4469_v12, %v4468_v53  ;;  %v4756_v57 = vld [vmem:[%s8740_s12 + $0x14d] sm:$0xff] }
 0x567   : > { %v10293_v31 = vadd.f32 %v5186_v26, %v4981_v19  ;;  %8339 = vmatmul.msk.bf16.gmra.mxu1 %vm367_vm0, %v5063_v5  ;;  %v5040_v26 = vld [vmem:[%s8740_s12 + $0x13e] sm:$0xff] }
 0x568   : > { %v4331_v22 = vpop.f32.mrf.mxu2  ;;  %v5064_v19 = vpack.c.bf16 %v5041_v48, %v5040_v26  ;;  %v5043_v48 = vld [vmem:[%s8740_s12 + $0x156] sm:$0xff] }
 0x569   : > { %v4410_v20 = vadd.f32 %v4331_v22, %v9946_v56  ;;  %v4617_v6 = vpop.f32.mrf.mxu3 }
 0x56b   : > { %v4696_v43 = vadd.f32 %v4617_v6, %v4410_v20  ;;  %v4905_v60 = vpop.f32.mrf.mxu0 }
 0x56c   : > { %v5191_v28 = vpop.f32.mrf.mxu1 }
 0x56d   : > { %v4982_v30 = vadd.f32 %v4903_v46, %v4696_v43 }
 0x56f   : > { %v10298_v59 = vadd.f32 %v5189_v10, %v4982_v30 }
 0x570   : > { %v4333_v4 = vpop.f32.mrf.mxu2 }
 0x571   : > { %v4411_v18 = vadd.f32 %v4333_v4, %v9957_v2  ;;  %v4619_v16 = vpop.f32.mrf.mxu3  ;;  %v4757_v4 = vld [vmem:[%s8740_s12 + $0x155] sm:$0xff] }
 0x573   : > { %v4697_v56 = vadd.f32 %v4619_v16, %v4411_v18  ;;  %v4908_v5 = vpop.f32.mrf.mxu0 }
 0x574   : > { %v5194_v22 = vpop.f32.mrf.mxu1 }
 0x575   : > { %8244 = vmatmul.msk.bf16.gmra.mxu2 %vm367_vm0, %v4491_v24  ;;  %v4983_v46 = vadd.f32 %v4905_v60, %v4697_v56  ;;  %v4470_v60 = vld [vmem:[%s8740_s12 + $0x14c] sm:$0xff]  ;;  %v4779_v56 = vpack.c.bf16 %v4757_v4, %v4756_v57  ;;  %v4758_v4 = vld [vmem:[%s8740_s12 + $0x15d] sm:$0xff] }
 0x576   : > { %8276 = vmatmul.msk.bf16.gmra.mxu3 %vm367_vm0, %v4492_v33  ;;  %8308 = vmatmul.msk.bf16.gmra.mxu0 %vm367_vm0, %v4778_v45  ;;  %v4493_v45 = vpack.c.bf16 %v4471_v50, %v4470_v60  ;;  %v4473_v50 = vld [vmem:[%s8740_s12 + $0x164] sm:$0xff] }
 0x577   : > { %v10309_v2 = vadd.f32 %v5191_v28, %v4983_v46  ;;  %8340 = vmatmul.msk.bf16.gmra.mxu1 %vm367_vm0, %v5064_v19  ;;  %v5042_v28 = vld [vmem:[%s8740_s12 + $0x14e] sm:$0xff] }
 0x578   : > { %v4336_v10 = vpop.f32.mrf.mxu2  ;;  %v5065_v46 = vpack.c.bf16 %v5043_v48, %v5042_v28  ;;  %v5044_v48 = vld [vmem:[%s8740_s12 + $0x15e] sm:$0xff] }
 0x579   : > { %v4412_v20 = vadd.f32 %v4336_v10, %v9964_v47  ;;  %v4622_v6 = vpop.f32.mrf.mxu3 }
 0x57b   : > { %v4698_v43 = vadd.f32 %v4622_v6, %v4412_v20  ;;  %v4910_v30 = vpop.f32.mrf.mxu0 }
 0x57c   : > { %v5196_v24 = vpop.f32.mrf.mxu1 }
 0x57d   : > { %v4984_v53 = vadd.f32 %v4908_v5, %v4698_v43 }
 0x57f   : > { %v10314_v12 = vadd.f32 %v5194_v22, %v4984_v53 }
 0x580   : > { %v4338_v26 = vpop.f32.mrf.mxu2 }
 0x581   : > { %v4413_v18 = vadd.f32 %v4338_v26, %v9975_v61  ;;  %v4624_v16 = vpop.f32.mrf.mxu3  ;;  %v4759_v26 = vld [vmem:[%s8740_s12 + $0x165] sm:$0xff] }
 0x583   : > { %v4699_v47 = vadd.f32 %v4624_v16, %v4413_v18  ;;  %v4913_v19 = vpop.f32.mrf.mxu0  ;;  %v5045_v18 = vld [vmem:[%s8740_s12 + $0x166] sm:$0xff] }
 0x584   : > { %v5199_v5 = vpop.f32.mrf.mxu1 }
 0x585   : > { %8245 = vmatmul.msk.bf16.gmra.mxu2 %vm367_vm0, %v4492_v33  ;;  %v4985_v22 = vadd.f32 %v4910_v30, %v4699_v47  ;;  %v4472_v30 = vld [vmem:[%s8740_s12 + $0x15c] sm:$0xff]  ;;  %v4780_v47 = vpack.c.bf16 %v4759_v26, %v4758_v4  ;;  %v4474_v4 = vld [vmem:[%s8740_s12 + $0x16c] sm:$0xff]  ;;  %v4475_v26 = vld [vmem:[%s8740_s12 + $0x174] sm:$0xff] }
 0x586   : > { %8277 = vmatmul.msk.bf16.gmra.mxu3 %vm367_vm0, %v4493_v45  ;;  %8309 = vmatmul.msk.bf16.gmra.mxu0 %vm367_vm0, %v4779_v56  ;;  %v4494_v56 = vpack.c.bf16 %v4473_v50, %v4472_v30 }
 0x587   : > { %v10325_v10 = vadd.f32 %v5196_v24, %v4985_v22  ;;  %8341 = vmatmul.msk.bf16.gmra.mxu1 %vm367_vm0, %v5065_v46  ;;  %v8640_v24 = vld [vmem:[%s11224_s1 + $0x150] sm:$0xff]  ;;  %v5066_v22 = vpack.c.bf16 %v5045_v18, %v5044_v48  ;;  %v8647_v18 = vld [vmem:[%s11224_s1 + $0x188] sm:$0xff] }
 0x588   : > { %v4341_v61 = vpop.f32.mrf.mxu2  ;;  %6296 = vmatpush.bf16.msrb.mxu1 %v8640_v24  ;;  %v4761_v48 = vld [vmem:[%s8740_s12 + $0x175] sm:$0xff]  ;;  %7153 = vmatpush.bf16.msra.mxu0 %v8647_v18 }
 0x589   : > { %v4414_v20 = vadd.f32 %v4341_v61, %v9983_v34  ;;  %v4627_v6 = vpop.f32.mrf.mxu3 }
 0x58b   : > { %v4700_v43 = vadd.f32 %v4627_v6, %v4414_v20  ;;  %v4915_v53 = vpop.f32.mrf.mxu0 }
 0x58c   : > { %v5201_v33 = vpop.f32.mrf.mxu1 }
 0x58d   : > { %v4986_v60 = vadd.f32 %v4913_v19, %v4700_v43 }
 0x58f   : > { %v10331_v57 = vadd.f32 %v5199_v5, %v4986_v60 }
 0x590   : > { %v4343_v28 = vpop.f32.mrf.mxu2 }
 0x591   : > { %v4415_v34 = vadd.f32 %v4343_v28, %v9999_v13  ;;  %v4629_v16 = vpop.f32.mrf.mxu3  ;;  %v8643_v13 = vld [vmem:[%s11224_s1 + $0x168] sm:$0xff] }
 0x592   : > { %6581 = vmatpush.bf16.msra.mxu2 %v8643_v13  ;;  %v4760_v28 = vld [vmem:[%s8740_s12 + $0x16d] sm:$0xff] }
 0x593   : > { %v4701_v19 = vadd.f32 %v4629_v16, %v4415_v34  ;;  %v4918_v46 = vpop.f32.mrf.mxu0  ;;  %v5046_v16 = vld [vmem:[%s8740_s12 + $0x16e] sm:$0xff] }
 0x594   : > { %v5204_v5 = vpop.f32.mrf.mxu1 }
 0x595   : > { %8246 = vmatmul.msk.bf16.gmra.mxu2 %vm367_vm0, %v4493_v45  ;;  %v4987_v61 = vadd.f32 %v4915_v53, %v4701_v19  ;;  %v8645_v45 = vld [vmem:[%s11224_s1 + $0x178] sm:$0xff] }
 0x596   : > { %8278 = vmatmul.msk.bf16.gmra.mxu3 %vm367_vm0, %v4494_v56  ;;  %8310 = vmatmul.msk.bf16.gmra.mxu0 %vm367_vm0, %v4780_v47  ;;  %v5047_v47 = vld [vmem:[%s8740_s12 + $0x176] sm:$0xff] }
 0x597   : > { %v10347_v20 = vadd.f32 %v5201_v33, %v4987_v61  ;;  %8342 = vmatmul.msk.bf16.gmra.mxu1 %vm367_vm0, %v5066_v22  ;;  %6867 = vmatpush.bf16.msra.mxu3 %v8645_v45  ;;  %v4495_v22 = vpack.c.bf16 %v4475_v26, %v4474_v4  ;;  %v4781_v61 = vpack.c.bf16 %v4761_v48, %v4760_v28  ;;  %v5294_v26 = vld [vmem:[%s8740_s12 + $0x3f] sm:$0xff]  ;;  %v5295_v28 = vld [vmem:[%s8740_s12 + $0x47] sm:$0xff] }
 0x598   : > { %v4346_v6 = vpop.f32.mrf.mxu2  ;;  %v5580_v48 = vld [vmem:[%s8740_s12 + $0x40] sm:$0xff] }
 0x599   : > { %v4416_v43 = vadd.f32 %v4346_v6, %v10010_v55  ;;  %v4632_v53 = vpop.f32.mrf.mxu3 }
 0x59b   : > { %v4702_v60 = vadd.f32 %v4632_v53, %v4416_v43  ;;  %v4920_v30 = vpop.f32.mrf.mxu0 }
 0x59c   : > { %v5206_v50 = vpop.f32.mrf.mxu1 }
 0x59d   : > { %v4988_v33 = vadd.f32 %v4918_v46, %v4702_v60 }
 0x59f   : > { %v10356_v24 = vadd.f32 %v5204_v5, %v4988_v33  ;;  %v5067_v5 = vpack.c.bf16 %v5047_v47, %v5046_v16  ;;  %v5867_v16 = vld [vmem:[%s8740_s12 + $0x58] sm:$0xff] }
 0x5a0   : > { %v4348_v34 = vpop.f32.mrf.mxu2 }
 0x5a1   : > { %v4417_v55 = vadd.f32 %v4348_v34, %v10023_v15  ;;  %v4634_v19 = vpop.f32.mrf.mxu3  ;;  %v5581_v34 = vld [vmem:[%s8740_s12 + $0x48] sm:$0xff] }
 0x5a3   : > { %v4703_v46 = vadd.f32 %v4634_v19, %v4417_v55  ;;  %v4923_v13 = vpop.f32.mrf.mxu0  ;;  %v6152_v55 = vld [vmem:[%s8740_s12 + $0x51] sm:$0xff]  ;;  %v6153_v19 = vld [vmem:[%s8740_s12 + $0x59] sm:$0xff] }
 0x5a4   : > { %v5209_v45 = vpop.f32.mrf.mxu1 }
 0x5a5   : > { %8247 = vmatmul.msk.bf16.gmra.mxu2 %vm367_vm0, %v4494_v56  ;;  %v4989_v6 = vadd.f32 %v4920_v30, %v4703_v46  ;;  %v5620_v46 = vpack.c.bf16 %v5581_v34, %v5580_v48 }
 0x5a6   : > { %8279 = vmatmul.msk.bf16.gmra.mxu3 %vm367_vm0, %v4495_v22  ;;  %8311 = vmatmul.msk.bf16.gmra.mxu0 %vm367_vm0, %v4781_v61 }
 0x5a7   : > { %v10369_v15 = vadd.f32 %v5206_v50, %v4989_v6  ;;  %8343 = vmatmul.msk.bf16.gmra.mxu1 %vm367_vm0, %v5067_v5  ;;  %v5866_v50 = vld [vmem:[%s8740_s12 + $0x50] sm:$0xff] }
 0x5a8   : > { %v4351_v43 = vpop.f32.mrf.mxu2  ;;  %v5906_v5 = vpack.c.bf16 %v5867_v16, %v5866_v50  ;;  %v5297_v50 = vld [vmem:[%s8740_s12 + $0x57] sm:$0xff] }
 0x5a9   : > { %v4418_v53 = vadd.f32 %v4351_v43, %v10030_v25  ;;  %v4637_v60 = vpop.f32.mrf.mxu3  ;;  %v5334_v25 = vpack.c.bf16 %v5295_v28, %v5294_v26 }
 0x5ab   : > { %v4704_v33 = vadd.f32 %v4637_v60, %v4418_v53  ;;  %v4925_v56 = vpop.f32.mrf.mxu0 }
 0x5ac   : > { %v5211_v30 = vpop.f32.mrf.mxu1 }
 0x5ad   : > { %v4990_v4 = vadd.f32 %v4923_v13, %v4704_v33  ;;  %v6192_v13 = vpack.c.bf16 %v6153_v19, %v6152_v55  ;;  %v5869_v55 = vld [vmem:[%s8740_s12 + $0x68] sm:$0xff] }
 0x5af   : > { %v10376_v18 = vadd.f32 %v5209_v45, %v4990_v4 }
 0x5b0   : > { %v4353_v47 = vpop.f32.mrf.mxu2 }
 0x5b1   : > { %v4419_v22 = vadd.f32 %v4353_v47, %v10041_v39  ;;  %v4639_v61 = vpop.f32.mrf.mxu3  ;;  %v5868_v47 = vld [vmem:[%s8740_s12 + $0x60] sm:$0xff] }
 0x5b3   : > { %v4705_v6 = vadd.f32 %v4639_v61, %v4419_v22  ;;  %v4928_v43 = vpop.f32.mrf.mxu0  ;;  %v6155_v22 = vld [vmem:[%s8740_s12 + $0x69] sm:$0xff] }
 0x5b4   : > { %v5214_v53 = vpop.f32.mrf.mxu1 }
 0x5b5   : > { %8356 = vmatmul.msk.bf16.vlgmr.msrb.gmra.mxu2 %vm367_vm0, %v5334_v25  ;;  %v4991_v45 = vadd.f32 %v4925_v56, %v4705_v6  ;;  %v5296_v56 = vld [vmem:[%s8740_s12 + $0x4f] sm:$0xff]  ;;  %v5907_v6 = vpack.c.bf16 %v5869_v55, %v5868_v47  ;;  %v5299_v47 = vld [vmem:[%s8740_s12 + $0x67] sm:$0xff] }
 0x5b6   : > { %8388 = vmatmul.msk.bf16.vlgmr.msrb.gmra.mxu3 %vm367_vm0, %v5620_v46  ;;  %8420 = vmatmul.msk.bf16.vlgmr.msrb.gmra.mxu0 %vm367_vm0, %v5906_v5  ;;  %v5335_v46 = vpack.c.bf16 %v5297_v50, %v5296_v56 }
 0x5b7   : > { %v10387_v39 = vadd.f32 %v5211_v30, %v4991_v45  ;;  %8452 = vmatmul.msk.bf16.vlgmr.msrb.gmra.mxu1 %vm367_vm0, %v6192_v13  ;;  %v6154_v30 = vld [vmem:[%s8740_s12 + $0x61] sm:$0xff] }
 0x5b8   : > { %v4356_v60 = vpop.f32.mrf.mxu2  ;;  %v6193_v45 = vpack.c.bf16 %v6155_v22, %v6154_v30  ;;  %v6157_v22 = vld [vmem:[%s8740_s12 + $0x79] sm:$0xff] }
 0x5b9   : > { %v4420_v33 = vadd.f32 %v4356_v60, %v10046_v37  ;;  %v4642_v4 = vpop.f32.mrf.mxu3 }
 0x5bb   : > { %v4706_v26 = vadd.f32 %v4642_v4, %v4420_v33  ;;  %v4930_v28 = vpop.f32.mrf.mxu0 }
 0x5bc   : > { %v5216_v48 = vpop.f32.mrf.mxu1 }
 0x5bd   : > { %v4992_v34 = vadd.f32 %v4928_v43, %v4706_v26 }
 0x5bf   : > { %v10393_v16 = vadd.f32 %v5214_v53, %v4992_v34 }
 0x5c0   : > { %v4358_v19 = vpop.f32.mrf.mxu2 }
 0x5c1   : > { %v4421_v61 = vadd.f32 %v4358_v19, %v10057_v63  ;;  %v4644_v25 = vpop.f32.mrf.mxu3  ;;  %v5871_v19 = vld [vmem:[%s8740_s12 + $0x78] sm:$0xff] }
 0x5c3   : > { %v4707_v37 = vadd.f32 %v4644_v25, %v4421_v61  ;;  %v4933_v13 = vpop.f32.mrf.mxu0 }
 0x5c4   : > { %v5219_v43 = vpop.f32.mrf.mxu1 }
 0x5c5   : > { %8357 = vmatmul.msk.bf16.gmra.mxu2 %vm367_vm0, %v5335_v46  ;;  %v4993_v53 = vadd.f32 %v4930_v28, %v4707_v37  ;;  %v5298_v28 = vld [vmem:[%s8740_s12 + $0x5f] sm:$0xff] }
 0x5c6   : > { %8389 = vmatmul.msk.bf16.gmra.mxu3 %vm367_vm0, %v5906_v5  ;;  %8421 = vmatmul.msk.bf16.gmra.mxu0 %vm367_vm0, %v5907_v6  ;;  %v5870_v5 = vld [vmem:[%s8740_s12 + $0x70] sm:$0xff]  ;;  %v5336_v46 = vpack.c.bf16 %v5299_v47, %v5298_v28 }
 0x5c7   : > { %v10403_v63 = vadd.f32 %v5216_v48, %v4993_v53  ;;  %8453 = vmatmul.msk.bf16.gmra.mxu1 %vm367_vm0, %v6193_v45  ;;  %v6156_v48 = vld [vmem:[%s8740_s12 + $0x71] sm:$0xff]  ;;  %v5908_v37 = vpack.c.bf16 %v5871_v19, %v5870_v5 }
 0x5c8   : > { %v4361_v60 = vpop.f32.mrf.mxu2  ;;  %v6194_v53 = vpack.c.bf16 %v6157_v22, %v6156_v48  ;;  %v5301_v5 = vld [vmem:[%s8740_s12 + $0x77] sm:$0xff]  ;;  %v6159_v22 = vld [vmem:[%s8740_s12 + $0x89] sm:$0xff] }
 0x5c9   : > { %v4422_v33 = vadd.f32 %v4361_v60, %v10062_v38  ;;  %v4647_v4 = vpop.f32.mrf.mxu3 }
 0x5cb   : > { %v4708_v26 = vadd.f32 %v4647_v4, %v4422_v33  ;;  %v4935_v34 = vpop.f32.mrf.mxu0 }
 0x5cc   : > { %v5221_v56 = vpop.f32.mrf.mxu1 }
 0x5cd   : > { %v4994_v50 = vadd.f32 %v4933_v13, %v4708_v26 }
 0x5cf   : > { %v10409_v55 = vadd.f32 %v5219_v43, %v4994_v50 }
 0x5d0   : > { %v4363_v30 = vpop.f32.mrf.mxu2 }
 0x5d1   : > { %v4423_v61 = vadd.f32 %v4363_v30, %v10073_v23  ;;  %v4649_v25 = vpop.f32.mrf.mxu3  ;;  %v5873_v30 = vld [vmem:[%s8740_s12 + $0x88] sm:$0xff] }
 0x5d3   : > { %v4709_v38 = vadd.f32 %v4649_v25, %v4423_v61  ;;  %v4938_v45 = vpop.f32.mrf.mxu0 }
 0x5d4   : > { %v5224_v13 = vpop.f32.mrf.mxu1 }
 0x5d5   : > { %8358 = vmatmul.msk.bf16.gmra.mxu2 %vm367_vm0, %v5336_v46  ;;  %v4995_v43 = vadd.f32 %v4935_v34, %v4709_v38  ;;  %v5300_v34 = vld [vmem:[%s8740_s12 + $0x6f] sm:$0xff] }
 0x5d6   : > { %8390 = vmatmul.msk.bf16.gmra.mxu3 %vm367_vm0, %v5907_v6  ;;  %8422 = vmatmul.msk.bf16.gmra.mxu0 %vm367_vm0, %v5908_v37  ;;  %v5872_v6 = vld [vmem:[%s8740_s12 + $0x80] sm:$0xff]  ;;  %v5337_v46 = vpack.c.bf16 %v5301_v5, %v5300_v34 }
 0x5d7   : > { %v10419_v23 = vadd.f32 %v5221_v56, %v4995_v43  ;;  %8454 = vmatmul.msk.bf16.gmra.mxu1 %vm367_vm0, %v6194_v53  ;;  %v6158_v56 = vld [vmem:[%s8740_s12 + $0x81] sm:$0xff]  ;;  %v5909_v38 = vpack.c.bf16 %v5873_v30, %v5872_v6 }
 0x5d8   : > { %v4366_v60 = vpop.f32.mrf.mxu2  ;;  %v6195_v43 = vpack.c.bf16 %v6159_v22, %v6158_v56  ;;  %v5303_v6 = vld [vmem:[%s8740_s12 + $0x87] sm:$0xff]  ;;  %v6161_v22 = vld [vmem:[%s8740_s12 + $0x99] sm:$0xff] }
 0x5d9   : > { %v4424_v33 = vadd.f32 %v4366_v60, %v10078_v54  ;;  %v4652_v4 = vpop.f32.mrf.mxu3 }
 0x5db   : > { %v4710_v26 = vadd.f32 %v4652_v4, %v4424_v33  ;;  %v4940_v50 = vpop.f32.mrf.mxu0 }
 0x5dc   : > { %v5226_v28 = vpop.f32.mrf.mxu1 }
 0x5dd   : > { %v4996_v47 = vadd.f32 %v4938_v45, %v4710_v26 }
 0x5df   : > { %v10425_v19 = vadd.f32 %v5224_v13, %v4996_v47 }
 0x5e0   : > { %v4368_v48 = vpop.f32.mrf.mxu2 }
 0x5e1   : > { %v4425_v61 = vadd.f32 %v4368_v48, %v10089_v49  ;;  %v4654_v25 = vpop.f32.mrf.mxu3  ;;  %v5875_v48 = vld [vmem:[%s8740_s12 + $0x98] sm:$0xff] }
 0x5e3   : > { %v4711_v54 = vadd.f32 %v4654_v25, %v4425_v61  ;;  %v4943_v53 = vpop.f32.mrf.mxu0 }
 0x5e4   : > { %v5229_v45 = vpop.f32.mrf.mxu1 }
 0x5e5   : > { %8359 = vmatmul.msk.bf16.gmra.mxu2 %vm367_vm0, %v5337_v46  ;;  %v4997_v13 = vadd.f32 %v4940_v50, %v4711_v54  ;;  %v5302_v50 = vld [vmem:[%s8740_s12 + $0x7f] sm:$0xff] }
 0x5e6   : > { %8391 = vmatmul.msk.bf16.gmra.mxu3 %vm367_vm0, %v5908_v37  ;;  %8423 = vmatmul.msk.bf16.gmra.mxu0 %vm367_vm0, %v5909_v38  ;;  %v5874_v37 = vld [vmem:[%s8740_s12 + $0x90] sm:$0xff]  ;;  %v5338_v46 = vpack.c.bf16 %v5303_v6, %v5302_v50 }
 0x5e7   : > { %v10435_v49 = vadd.f32 %v5226_v28, %v4997_v13  ;;  %8455 = vmatmul.msk.bf16.gmra.mxu1 %vm367_vm0, %v6195_v43  ;;  %v6160_v28 = vld [vmem:[%s8740_s12 + $0x91] sm:$0xff]  ;;  %v5910_v54 = vpack.c.bf16 %v5875_v48, %v5874_v37 }
 0x5e8   : > { %v4371_v60 = vpop.f32.mrf.mxu2  ;;  %v6196_v13 = vpack.c.bf16 %v6161_v22, %v6160_v28  ;;  %v5305_v37 = vld [vmem:[%s8740_s12 + $0x97] sm:$0xff]  ;;  %v6163_v22 = vld [vmem:[%s8740_s12 + $0xa9] sm:$0xff] }
 0x5e9   : > { %v4426_v33 = vadd.f32 %v4371_v60, %v10094_v62  ;;  %v4657_v4 = vpop.f32.mrf.mxu3 }
 0x5eb   : > { %v4712_v26 = vadd.f32 %v4657_v4, %v4426_v33  ;;  %v4945_v47 = vpop.f32.mrf.mxu0 }
 0x5ec   : > { %v5231_v34 = vpop.f32.mrf.mxu1 }
 0x5ed   : > { %v4998_v5 = vadd.f32 %v4943_v53, %v4712_v26 }
 0x5ef   : > { %v10441_v30 = vadd.f32 %v5229_v45, %v4998_v5 }
 0x5f0   : > { %v4373_v56 = vpop.f32.mrf.mxu2 }
 0x5f1   : > { %v4427_v61 = vadd.f32 %v4373_v56, %v10105_v14  ;;  %v4659_v25 = vpop.f32.mrf.mxu3  ;;  %v5877_v56 = vld [vmem:[%s8740_s12 + $0xa8] sm:$0xff] }
 0x5f3   : > { %v4713_v62 = vadd.f32 %v4659_v25, %v4427_v61  ;;  %v4948_v43 = vpop.f32.mrf.mxu0 }
 0x5f4   : > { %v5234_v53 = vpop.f32.mrf.mxu1 }
 0x5f5   : > { %8360 = vmatmul.msk.bf16.gmra.mxu2 %vm367_vm0, %v5338_v46  ;;  %v4999_v45 = vadd.f32 %v4945_v47, %v4713_v62  ;;  %v5304_v47 = vld [vmem:[%s8740_s12 + $0x8f] sm:$0xff] }
 0x5f6   : > { %8392 = vmatmul.msk.bf16.gmra.mxu3 %vm367_vm0, %v5909_v38  ;;  %8424 = vmatmul.msk.bf16.gmra.mxu0 %vm367_vm0, %v5910_v54  ;;  %v5876_v38 = vld [vmem:[%s8740_s12 + $0xa0] sm:$0xff]  ;;  %v5339_v46 = vpack.c.bf16 %v5305_v37, %v5304_v47 }
 0x5f7   : > { %v10451_v14 = vadd.f32 %v5231_v34, %v4999_v45  ;;  %8456 = vmatmul.msk.bf16.gmra.mxu1 %vm367_vm0, %v6196_v13  ;;  %v6162_v34 = vld [vmem:[%s8740_s12 + $0xa1] sm:$0xff]  ;;  %v5911_v62 = vpack.c.bf16 %v5877_v56, %v5876_v38 }
 0x5f8   : > { %v4376_v60 = vpop.f32.mrf.mxu2  ;;  %v6197_v45 = vpack.c.bf16 %v6163_v22, %v6162_v34  ;;  %v5307_v38 = vld [vmem:[%s8740_s12 + $0xa7] sm:$0xff]  ;;  %v6165_v22 = vld [vmem:[%s8740_s12 + $0xb9] sm:$0xff] }
 0x5f9   : > { %v4428_v33 = vadd.f32 %v4376_v60, %v10110_v35  ;;  %v4662_v4 = vpop.f32.mrf.mxu3 }
 0x5fb   : > { %v4714_v26 = vadd.f32 %v4662_v4, %v4428_v33  ;;  %v4950_v5 = vpop.f32.mrf.mxu0 }
 0x5fc   : > { %v5236_v50 = vpop.f32.mrf.mxu1 }
 0x5fd   : > { %v5000_v6 = vadd.f32 %v4948_v43, %v4714_v26 }
 0x5ff   : > { %v10457_v48 = vadd.f32 %v5234_v53, %v5000_v6 }
 0x600   : > { %v4378_v28 = vpop.f32.mrf.mxu2 }
 0x601   : > { %v4429_v61 = vadd.f32 %v4378_v28, %v10121_v44  ;;  %v4664_v25 = vpop.f32.mrf.mxu3  ;;  %v5879_v28 = vld [vmem:[%s8740_s12 + $0xb8] sm:$0xff] }
 0x603   : > { %v4715_v35 = vadd.f32 %v4664_v25, %v4429_v61  ;;  %v4953_v13 = vpop.f32.mrf.mxu0 }
 0x604   : > { %v5239_v43 = vpop.f32.mrf.mxu1 }
 0x605   : > { %8361 = vmatmul.msk.bf16.gmra.mxu2 %vm367_vm0, %v5339_v46  ;;  %v5001_v53 = vadd.f32 %v4950_v5, %v4715_v35  ;;  %v5306_v5 = vld [vmem:[%s8740_s12 + $0x9f] sm:$0xff] }
 0x606   : > { %8393 = vmatmul.msk.bf16.gmra.mxu3 %vm367_vm0, %v5910_v54  ;;  %8425 = vmatmul.msk.bf16.gmra.mxu0 %vm367_vm0, %v5911_v62  ;;  %v5878_v54 = vld [vmem:[%s8740_s12 + $0xb0] sm:$0xff]  ;;  %v5340_v46 = vpack.c.bf16 %v5307_v38, %v5306_v5 }
 0x607   : > { %v10467_v44 = vadd.f32 %v5236_v50, %v5001_v53  ;;  %8457 = vmatmul.msk.bf16.gmra.mxu1 %vm367_vm0, %v6197_v45  ;;  %v6164_v50 = vld [vmem:[%s8740_s12 + $0xb1] sm:$0xff]  ;;  %v5912_v35 = vpack.c.bf16 %v5879_v28, %v5878_v54 }
 0x608   : > { %v4381_v60 = vpop.f32.mrf.mxu2  ;;  %v6198_v53 = vpack.c.bf16 %v6165_v22, %v6164_v50  ;;  %v5309_v54 = vld [vmem:[%s8740_s12 + $0xb7] sm:$0xff]  ;;  %v6167_v22 = vld [vmem:[%s8740_s12 + $0xc9] sm:$0xff] }
 0x609   : > { %v4430_v33 = vadd.f32 %v4381_v60, %v10126_v7  ;;  %v4667_v4 = vpop.f32.mrf.mxu3 }
 0x60b   : > { %v4716_v26 = vadd.f32 %v4667_v4, %v4430_v33  ;;  %v4955_v6 = vpop.f32.mrf.mxu0 }
 0x60c   : > { %v5241_v47 = vpop.f32.mrf.mxu1 }
 0x60d   : > { %v5002_v37 = vadd.f32 %v4953_v13, %v4716_v26 }
 0x60f   : > { %v10473_v56 = vadd.f32 %v5239_v43, %v5002_v37 }
 0x610   : > { %v4383_v34 = vpop.f32.mrf.mxu2 }
 0x611   : > { %v4431_v61 = vadd.f32 %v4383_v34, %v10137_v17  ;;  %v4669_v25 = vpop.f32.mrf.mxu3  ;;  %v5881_v34 = vld [vmem:[%s8740_s12 + $0xc8] sm:$0xff] }
 0x613   : > { %v4717_v7 = vadd.f32 %v4669_v25, %v4431_v61  ;;  %v4958_v45 = vpop.f32.mrf.mxu0 }
 0x614   : > { %v5244_v13 = vpop.f32.mrf.mxu1 }
 0x615   : > { %8362 = vmatmul.msk.bf16.gmra.mxu2 %vm367_vm0, %v5340_v46  ;;  %v5003_v43 = vadd.f32 %v4955_v6, %v4717_v7  ;;  %v5308_v6 = vld [vmem:[%s8740_s12 + $0xaf] sm:$0xff] }
 0x616   : > { %8394 = vmatmul.msk.bf16.gmra.mxu3 %vm367_vm0, %v5911_v62  ;;  %8426 = vmatmul.msk.bf16.gmra.mxu0 %vm367_vm0, %v5912_v35  ;;  %v5880_v62 = vld [vmem:[%s8740_s12 + $0xc0] sm:$0xff]  ;;  %v5341_v46 = vpack.c.bf16 %v5309_v54, %v5308_v6 }
 0x617   : > { %v10483_v17 = vadd.f32 %v5241_v47, %v5003_v43  ;;  %8458 = vmatmul.msk.bf16.gmra.mxu1 %vm367_vm0, %v6198_v53  ;;  %v6166_v47 = vld [vmem:[%s8740_s12 + $0xc1] sm:$0xff]  ;;  %v5913_v7 = vpack.c.bf16 %v5881_v34, %v5880_v62 }
 0x618   : > { %v4386_v60 = vpop.f32.mrf.mxu2  ;;  %v6199_v43 = vpack.c.bf16 %v6167_v22, %v6166_v47  ;;  %v5311_v62 = vld [vmem:[%s8740_s12 + $0xc7] sm:$0xff]  ;;  %v6168_v22 = vld [vmem:[%s8740_s12 + $0xd1] sm:$0xff] }
 0x619   : > { %v4432_v33 = vadd.f32 %v4386_v60, %v10142_v21  ;;  %v4672_v4 = vpop.f32.mrf.mxu3 }
 0x61b   : > { %v4718_v26 = vadd.f32 %v4672_v4, %v4432_v33  ;;  %v4960_v37 = vpop.f32.mrf.mxu0 }
 0x61c   : > { %v5246_v5 = vpop.f32.mrf.mxu1 }
 0x61d   : > { %v5004_v38 = vadd.f32 %v4958_v45, %v4718_v26 }
 0x61f   : > { %v10489_v28 = vadd.f32 %v5244_v13, %v5004_v38 }
 0x620   : > { %v4388_v50 = vpop.f32.mrf.mxu2 }
 0x621   : > { %v4433_v61 = vadd.f32 %v4388_v50, %v10153_v29  ;;  %v4674_v25 = vpop.f32.mrf.mxu3  ;;  %v5883_v50 = vld [vmem:[%s8740_s12 + $0xd8] sm:$0xff] }
 0x623   : > { %v4719_v21 = vadd.f32 %v4674_v25, %v4433_v61  ;;  %v4963_v53 = vpop.f32.mrf.mxu0  ;;  %v6169_v61 = vld [vmem:[%s8740_s12 + $0xd9] sm:$0xff] }
 0x624   : > { %v5249_v45 = vpop.f32.mrf.mxu1 }
 0x625   : > { %8363 = vmatmul.msk.bf16.gmra.mxu2 %vm367_vm0, %v5341_v46  ;;  %v5005_v13 = vadd.f32 %v4960_v37, %v4719_v21  ;;  %v5310_v37 = vld [vmem:[%s8740_s12 + $0xbf] sm:$0xff] }
 0x626   : > { %8395 = vmatmul.msk.bf16.gmra.mxu3 %vm367_vm0, %v5912_v35  ;;  %8427 = vmatmul.msk.bf16.gmra.mxu0 %vm367_vm0, %v5913_v7  ;;  %v5882_v35 = vld [vmem:[%s8740_s12 + $0xd0] sm:$0xff]  ;;  %v5342_v46 = vpack.c.bf16 %v5311_v62, %v5310_v37 }
 0x627   : > { %v10499_v60 = vadd.f32 %v5246_v5, %v5005_v13  ;;  %8459 = vmatmul.msk.bf16.gmra.mxu1 %vm367_vm0, %v6199_v43  ;;  %v8649_v5 = vld [vmem:[%s11226_s3 + $0x8] sm:$0xff]  ;;  %v5914_v21 = vpack.c.bf16 %v5883_v50, %v5882_v35  ;;  %v6200_v13 = vpack.c.bf16 %v6169_v61, %v6168_v22  ;;  %v5313_v50 = vld [vmem:[%s8740_s12 + $0xd7] sm:$0xff]  ;;  %v8646_v61 = vld [vmem:[%s11224_s1 + $0x180] sm:$0xff] }
 0x628   : > { %v4391_v29 = vpop.f32.mrf.mxu2  ;;  %7566 = vmatpush.bf16.msra.mxu1 %v8649_v5  ;;  %v5312_v35 = vld [vmem:[%s8740_s12 + $0xcf] sm:$0xff]  ;;  %7154 = vmatpush.bf16.msra.mxu0 %v8646_v61 }
 0x629   : > { %v4434_v33 = vadd.f32 %v4391_v29, %v10159_v3  ;;  %v4677_v4 = vpop.f32.mrf.mxu3  ;;  %v5885_v22 = vld [vmem:[%s8740_s12 + $0xe8] sm:$0xff] }
 0x62b   : > { %v4720_v26 = vadd.f32 %v4677_v4, %v4434_v33  ;;  %v4965_v38 = vpop.f32.mrf.mxu0  ;;  %v8644_v4 = vld [vmem:[%s11224_s1 + $0x170] sm:$0xff] }
 0x62c   : > { %v5251_v6 = vpop.f32.mrf.mxu1  ;;  %6868 = vmatpush.bf16.msra.mxu3 %v8644_v4 }
 0x62d   : > { %v5006_v54 = vadd.f32 %v4963_v53, %v4720_v26 }
 0x62f   : > { %v10505_v34 = vadd.f32 %v5249_v45, %v5006_v54 }
 0x630   : > { %v4393_v47 = vpop.f32.mrf.mxu2 }
 0x631   : > { %v4435_v3 = vadd.f32 %v4393_v47, %v10175_v41  ;;  %v4679_v25 = vpop.f32.mrf.mxu3  ;;  %v8642_v41 = vld [vmem:[%s11224_s1 + $0x160] sm:$0xff] }
 0x632   : > { %6582 = vmatpush.bf16.msra.mxu2 %v8642_v41  ;;  %v5884_v47 = vld [vmem:[%s8740_s12 + $0xe0] sm:$0xff] }
 0x633   : > { %v4721_v53 = vadd.f32 %v4679_v25, %v4435_v3  ;;  %v6012_v43 = vpop.f32.mrf.mxu0  ;;  %v6170_v25 = vld [vmem:[%s8740_s12 + $0xe1] sm:$0xff] }
 0x634   : > { %v6298_v45 = vpop.f32.mrf.mxu1 }
 0x635   : > { %8364 = vmatmul.msk.bf16.gmra.mxu2 %vm367_vm0, %v5342_v46  ;;  %v5007_v29 = vadd.f32 %v4965_v38, %v4721_v53  ;;  %v6171_v46 = vld [vmem:[%s8740_s12 + $0xe9] sm:$0xff] }
 0x636   : > { %8396 = vmatmul.msk.bf16.gmra.mxu3 %vm367_vm0, %v5913_v7  ;;  %8428 = vmatmul.msk.bf16.gmra.mxu0 %vm367_vm0, %v5914_v21 }
 0x637   : > { %v10521_v33 = vadd.f32 %v5251_v6, %v5007_v29  ;;  %8460 = vmatmul.msk.bf16.gmra.mxu1 %vm367_vm0, %v6200_v13  ;;  %v5343_v13 = vpack.c.bf16 %v5313_v50, %v5312_v35  ;;  %v5915_v29 = vpack.c.bf16 %v5885_v22, %v5884_v47  ;;  %v5315_v22 = vld [vmem:[%s8740_s12 + $0xe7] sm:$0xff] }
 0x638   : > { %v5440_v26 = vpop.f32.mrf.mxu2 }
 0x639   : > { %v5540_v7 = vadd.f32 %v5440_v26, %v10184_v40  ;;  %v5726_v38 = vpop.f32.mrf.mxu3 }
 0x63b   : > { %v5826_v54 = vadd.f32 %v5726_v38, %v5540_v7  ;;  %v6014_v37 = vpop.f32.mrf.mxu0 }
 0x63c   : > { %v6300_v62 = vpop.f32.mrf.mxu1 }
 0x63d   : > { %v6112_v6 = vadd.f32 %v6012_v43, %v5826_v54 }
 0x63f   : > { %v10530_v5 = vadd.f32 %v6298_v45, %v6112_v6  ;;  %v6201_v45 = vpack.c.bf16 %v6171_v46, %v6170_v25  ;;  %v6173_v46 = vld [vmem:[%s8740_s12 + $0xf9] sm:$0xff] }
 0x640   : > { %v5442_v3 = vpop.f32.mrf.mxu2 }
 0x641   : > { %v5541_v40 = vadd.f32 %v5442_v3, %v10197_v1  ;;  %v5728_v53 = vpop.f32.mrf.mxu3  ;;  %v5887_v3 = vld [vmem:[%s8740_s12 + $0xf8] sm:$0xff] }
 0x643   : > { %v5827_v43 = vadd.f32 %v5728_v53, %v5541_v40  ;;  %v6017_v41 = vpop.f32.mrf.mxu0 }
 0x644   : > { %v6303_v4 = vpop.f32.mrf.mxu1 }
 0x645   : > { %8365 = vmatmul.msk.bf16.gmra.mxu2 %vm367_vm0, %v5343_v13  ;;  %v6113_v26 = vadd.f32 %v6014_v37, %v5827_v43  ;;  %v5314_v37 = vld [vmem:[%s8740_s12 + $0xdf] sm:$0xff] }
 0x646   : > { %8397 = vmatmul.msk.bf16.gmra.mxu3 %vm367_vm0, %v5914_v21  ;;  %8429 = vmatmul.msk.bf16.gmra.mxu0 %vm367_vm0, %v5915_v29  ;;  %v5886_v21 = vld [vmem:[%s8740_s12 + $0xf0] sm:$0xff]  ;;  %v5344_v13 = vpack.c.bf16 %v5315_v22, %v5314_v37 }
 0x647   : > { %v10543_v1 = vadd.f32 %v6300_v62, %v6113_v26  ;;  %8461 = vmatmul.msk.bf16.gmra.mxu1 %vm367_vm0, %v6201_v45  ;;  %v6172_v62 = vld [vmem:[%s8740_s12 + $0xf1] sm:$0xff]  ;;  %v5916_v43 = vpack.c.bf16 %v5887_v3, %v5886_v21 }
 0x648   : > { %v5445_v7 = vpop.f32.mrf.mxu2  ;;  %v6202_v26 = vpack.c.bf16 %v6173_v46, %v6172_v62  ;;  %v5317_v21 = vld [vmem:[%s8740_s12 + $0xf7] sm:$0xff]  ;;  %v6175_v46 = vld [vmem:[%s8740_s12 + $0x109] sm:$0xff] }
 0x649   : > { %v5542_v38 = vadd.f32 %v5445_v7, %v10202_v52  ;;  %v5731_v54 = vpop.f32.mrf.mxu3 }
 0x64b   : > { %v5828_v6 = vadd.f32 %v5731_v54, %v5542_v38  ;;  %v6019_v35 = vpop.f32.mrf.mxu0 }
 0x64c   : > { %v6305_v50 = vpop.f32.mrf.mxu1 }
 0x64d   : > { %v6114_v47 = vadd.f32 %v6017_v41, %v5828_v6 }
 0x64f   : > { %v10549_v61 = vadd.f32 %v6303_v4, %v6114_v47 }
 0x650   : > { %v5447_v25 = vpop.f32.mrf.mxu2 }
 0x651   : > { %v5543_v40 = vadd.f32 %v5447_v25, %v10213_v27  ;;  %v5733_v53 = vpop.f32.mrf.mxu3  ;;  %v5889_v25 = vld [vmem:[%s8740_s12 + $0x108] sm:$0xff] }
 0x653   : > { %v5829_v52 = vadd.f32 %v5733_v53, %v5543_v40  ;;  %v6022_v45 = vpop.f32.mrf.mxu0 }
 0x654   : > { %v6308_v41 = vpop.f32.mrf.mxu1 }
 0x655   : > { %8366 = vmatmul.msk.bf16.gmra.mxu2 %vm367_vm0, %v5344_v13  ;;  %v6115_v4 = vadd.f32 %v6019_v35, %v5829_v52  ;;  %v5316_v35 = vld [vmem:[%s8740_s12 + $0xef] sm:$0xff] }
 0x656   : > { %8398 = vmatmul.msk.bf16.gmra.mxu3 %vm367_vm0, %v5915_v29  ;;  %8430 = vmatmul.msk.bf16.gmra.mxu0 %vm367_vm0, %v5916_v43  ;;  %v5888_v29 = vld [vmem:[%s8740_s12 + $0x100] sm:$0xff]  ;;  %v5345_v13 = vpack.c.bf16 %v5317_v21, %v5316_v35 }
 0x657   : > { %v10559_v27 = vadd.f32 %v6305_v50, %v6115_v4  ;;  %8462 = vmatmul.msk.bf16.gmra.mxu1 %vm367_vm0, %v6202_v26  ;;  %v6174_v50 = vld [vmem:[%s8740_s12 + $0x101] sm:$0xff]  ;;  %v5917_v52 = vpack.c.bf16 %v5889_v25, %v5888_v29 }
 0x658   : > { %v5450_v7 = vpop.f32.mrf.mxu2  ;;  %v6203_v4 = vpack.c.bf16 %v6175_v46, %v6174_v50  ;;  %v5319_v29 = vld [vmem:[%s8740_s12 + $0x107] sm:$0xff]  ;;  %v6177_v46 = vld [vmem:[%s8740_s12 + $0x119] sm:$0xff] }
 0x659   : > { %v5544_v38 = vadd.f32 %v5450_v7, %v10218_v8  ;;  %v5736_v54 = vpop.f32.mrf.mxu3 }
 0x65b   : > { %v5830_v6 = vadd.f32 %v5736_v54, %v5544_v38  ;;  %v6024_v47 = vpop.f32.mrf.mxu0 }
 0x65c   : > { %v6310_v37 = vpop.f32.mrf.mxu1 }
 0x65d   : > { %v6116_v22 = vadd.f32 %v6022_v45, %v5830_v6 }
 0x65f   : > { %v10565_v3 = vadd.f32 %v6308_v41, %v6116_v22 }
 0x660   : > { %v5452_v62 = vpop.f32.mrf.mxu2 }
 0x661   : > { %v5545_v40 = vadd.f32 %v5452_v62, %v10229_v51  ;;  %v5738_v53 = vpop.f32.mrf.mxu3  ;;  %v5891_v62 = vld [vmem:[%s8740_s12 + $0x118] sm:$0xff] }
 0x663   : > { %v5831_v8 = vadd.f32 %v5738_v53, %v5545_v40  ;;  %v6027_v26 = vpop.f32.mrf.mxu0 }
 0x664   : > { %v6313_v45 = vpop.f32.mrf.mxu1 }
 0x665   : > { %8367 = vmatmul.msk.bf16.gmra.mxu2 %vm367_vm0, %v5345_v13  ;;  %v6117_v41 = vadd.f32 %v6024_v47, %v5831_v8  ;;  %v5318_v47 = vld [vmem:[%s8740_s12 + $0xff] sm:$0xff] }
 0x666   : > { %8399 = vmatmul.msk.bf16.gmra.mxu3 %vm367_vm0, %v5916_v43  ;;  %8431 = vmatmul.msk.bf16.gmra.mxu0 %vm367_vm0, %v5917_v52  ;;  %v5890_v43 = vld [vmem:[%s8740_s12 + $0x110] sm:$0xff]  ;;  %v5346_v13 = vpack.c.bf16 %v5319_v29, %v5318_v47 }
 0x667   : > { %v10575_v51 = vadd.f32 %v6310_v37, %v6117_v41  ;;  %8463 = vmatmul.msk.bf16.gmra.mxu1 %vm367_vm0, %v6203_v4  ;;  %v6176_v37 = vld [vmem:[%s8740_s12 + $0x111] sm:$0xff]  ;;  %v5918_v8 = vpack.c.bf16 %v5891_v62, %v5890_v43 }
 0x668   : > { %v5455_v7 = vpop.f32.mrf.mxu2  ;;  %v6204_v41 = vpack.c.bf16 %v6177_v46, %v6176_v37  ;;  %v5321_v43 = vld [vmem:[%s8740_s12 + $0x117] sm:$0xff]  ;;  %v6179_v46 = vld [vmem:[%s8740_s12 + $0x129] sm:$0xff] }
 0x669   : > { %v5546_v38 = vadd.f32 %v5455_v7, %v10234_v58  ;;  %v5741_v54 = vpop.f32.mrf.mxu3 }
 0x66b   : > { %v5832_v6 = vadd.f32 %v5741_v54, %v5546_v38  ;;  %v6029_v22 = vpop.f32.mrf.mxu0 }
 0x66c   : > { %v6315_v35 = vpop.f32.mrf.mxu1 }
 0x66d   : > { %v6118_v21 = vadd.f32 %v6027_v26, %v5832_v6 }
 0x66f   : > { %v10581_v25 = vadd.f32 %v6313_v45, %v6118_v21 }
 0x670   : > { %v5457_v50 = vpop.f32.mrf.mxu2 }
 0x671   : > { %v5547_v40 = vadd.f32 %v5457_v50, %v10245_v11  ;;  %v5743_v53 = vpop.f32.mrf.mxu3  ;;  %v5893_v50 = vld [vmem:[%s8740_s12 + $0x128] sm:$0xff] }
 0x673   : > { %v5833_v58 = vadd.f32 %v5743_v53, %v5547_v40  ;;  %v6032_v4 = vpop.f32.mrf.mxu0 }
 0x674   : > { %v6318_v26 = vpop.f32.mrf.mxu1 }
 0x675   : > { %8368 = vmatmul.msk.bf16.gmra.mxu2 %vm367_vm0, %v5346_v13  ;;  %v6119_v45 = vadd.f32 %v6029_v22, %v5833_v58  ;;  %v5320_v22 = vld [vmem:[%s8740_s12 + $0x10f] sm:$0xff] }
 0x676   : > { %8400 = vmatmul.msk.bf16.gmra.mxu3 %vm367_vm0, %v5917_v52  ;;  %8432 = vmatmul.msk.bf16.gmra.mxu0 %vm367_vm0, %v5918_v8  ;;  %v5892_v52 = vld [vmem:[%s8740_s12 + $0x120] sm:$0xff]  ;;  %v5347_v13 = vpack.c.bf16 %v5321_v43, %v5320_v22 }
 0x677   : > { %v10591_v11 = vadd.f32 %v6315_v35, %v6119_v45  ;;  %8464 = vmatmul.msk.bf16.gmra.mxu1 %vm367_vm0, %v6204_v41  ;;  %v6178_v35 = vld [vmem:[%s8740_s12 + $0x121] sm:$0xff]  ;;  %v5919_v58 = vpack.c.bf16 %v5893_v50, %v5892_v52 }
 0x678   : > { %v5460_v7 = vpop.f32.mrf.mxu2  ;;  %v6205_v45 = vpack.c.bf16 %v6179_v46, %v6178_v35  ;;  %v5323_v52 = vld [vmem:[%s8740_s12 + $0x127] sm:$0xff]  ;;  %v6181_v46 = vld [vmem:[%s8740_s12 + $0x139] sm:$0xff] }
 0x679   : > { %v5548_v38 = vadd.f32 %v5460_v7, %v10250_v9  ;;  %v5746_v54 = vpop.f32.mrf.mxu3 }
 0x67b   : > { %v5834_v6 = vadd.f32 %v5746_v54, %v5548_v38  ;;  %v6034_v21 = vpop.f32.mrf.mxu0 }
 0x67c   : > { %v6320_v47 = vpop.f32.mrf.mxu1 }
 0x67d   : > { %v6120_v29 = vadd.f32 %v6032_v4, %v5834_v6 }
 0x67f   : > { %v10597_v62 = vadd.f32 %v6318_v26, %v6120_v29 }
 0x680   : > { %v5462_v37 = vpop.f32.mrf.mxu2 }
 0x681   : > { %v5549_v40 = vadd.f32 %v5462_v37, %v10261_v36  ;;  %v5748_v53 = vpop.f32.mrf.mxu3  ;;  %v5895_v37 = vld [vmem:[%s8740_s12 + $0x138] sm:$0xff] }
 0x683   : > { %v5835_v9 = vadd.f32 %v5748_v53, %v5549_v40  ;;  %v6037_v41 = vpop.f32.mrf.mxu0 }
 0x684   : > { %v6323_v4 = vpop.f32.mrf.mxu1 }
 0x685   : > { %8369 = vmatmul.msk.bf16.gmra.mxu2 %vm367_vm0, %v5347_v13  ;;  %v6121_v26 = vadd.f32 %v6034_v21, %v5835_v9  ;;  %v5322_v21 = vld [vmem:[%s8740_s12 + $0x11f] sm:$0xff] }
 0x686   : > { %8401 = vmatmul.msk.bf16.gmra.mxu3 %vm367_vm0, %v5918_v8  ;;  %8433 = vmatmul.msk.bf16.gmra.mxu0 %vm367_vm0, %v5919_v58  ;;  %v5894_v8 = vld [vmem:[%s8740_s12 + $0x130] sm:$0xff]  ;;  %v5348_v13 = vpack.c.bf16 %v5323_v52, %v5322_v21 }
 0x687   : > { %v10607_v36 = vadd.f32 %v6320_v47, %v6121_v26  ;;  %8465 = vmatmul.msk.bf16.gmra.mxu1 %vm367_vm0, %v6205_v45  ;;  %v6180_v47 = vld [vmem:[%s8740_s12 + $0x131] sm:$0xff]  ;;  %v5920_v9 = vpack.c.bf16 %v5895_v37, %v5894_v8 }
 0x688   : > { %v5465_v7 = vpop.f32.mrf.mxu2  ;;  %v6206_v26 = vpack.c.bf16 %v6181_v46, %v6180_v47  ;;  %v5325_v8 = vld [vmem:[%s8740_s12 + $0x137] sm:$0xff]  ;;  %v6183_v46 = vld [vmem:[%s8740_s12 + $0x149] sm:$0xff] }
 0x689   : > { %v5550_v38 = vadd.f32 %v5465_v7, %v10266_v42  ;;  %v5751_v54 = vpop.f32.mrf.mxu3 }
 0x68b   : > { %v5836_v6 = vadd.f32 %v5751_v54, %v5550_v38  ;;  %v6039_v29 = vpop.f32.mrf.mxu0 }
 0x68c   : > { %v6325_v22 = vpop.f32.mrf.mxu1 }
 0x68d   : > { %v6122_v43 = vadd.f32 %v6037_v41, %v5836_v6 }
 0x68f   : > { %v10613_v50 = vadd.f32 %v6323_v4, %v6122_v43 }
 0x690   : > { %v5467_v35 = vpop.f32.mrf.mxu2 }
 0x691   : > { %v5551_v40 = vadd.f32 %v5467_v35, %v10277_v0  ;;  %v5753_v53 = vpop.f32.mrf.mxu3  ;;  %v5897_v35 = vld [vmem:[%s8740_s12 + $0x148] sm:$0xff] }
 0x693   : > { %v5837_v42 = vadd.f32 %v5753_v53, %v5551_v40  ;;  %v6042_v45 = vpop.f32.mrf.mxu0 }
 0x694   : > { %v6328_v41 = vpop.f32.mrf.mxu1 }
 0x695   : > { %8370 = vmatmul.msk.bf16.gmra.mxu2 %vm367_vm0, %v5348_v13  ;;  %v6123_v4 = vadd.f32 %v6039_v29, %v5837_v42  ;;  %v5324_v29 = vld [vmem:[%s8740_s12 + $0x12f] sm:$0xff] }
 0x696   : > { %8402 = vmatmul.msk.bf16.gmra.mxu3 %vm367_vm0, %v5919_v58  ;;  %8434 = vmatmul.msk.bf16.gmra.mxu0 %vm367_vm0, %v5920_v9  ;;  %v5896_v58 = vld [vmem:[%s8740_s12 + $0x140] sm:$0xff]  ;;  %v5349_v13 = vpack.c.bf16 %v5325_v8, %v5324_v29 }
 0x697   : > { %v10623_v0 = vadd.f32 %v6325_v22, %v6123_v4  ;;  %8466 = vmatmul.msk.bf16.gmra.mxu1 %vm367_vm0, %v6206_v26  ;;  %v6182_v22 = vld [vmem:[%s8740_s12 + $0x141] sm:$0xff]  ;;  %v5921_v42 = vpack.c.bf16 %v5897_v35, %v5896_v58 }
 0x698   : > { %v5470_v7 = vpop.f32.mrf.mxu2  ;;  %v6207_v4 = vpack.c.bf16 %v6183_v46, %v6182_v22  ;;  %v5327_v58 = vld [vmem:[%s8740_s12 + $0x147] sm:$0xff]  ;;  %v6185_v46 = vld [vmem:[%s8740_s12 + $0x159] sm:$0xff] }
 0x699   : > { %v5552_v38 = vadd.f32 %v5470_v7, %v10282_v32  ;;  %v5756_v54 = vpop.f32.mrf.mxu3 }
 0x69b   : > { %v5838_v6 = vadd.f32 %v5756_v54, %v5552_v38  ;;  %v6044_v43 = vpop.f32.mrf.mxu0 }
 0x69c   : > { %v6330_v21 = vpop.f32.mrf.mxu1 }
 0x69d   : > { %v6124_v52 = vadd.f32 %v6042_v45, %v5838_v6 }
 0x69f   : > { %v10629_v37 = vadd.f32 %v6328_v41, %v6124_v52 }
 0x6a0   : > { %v5472_v47 = vpop.f32.mrf.mxu2 }
 0x6a1   : > { %v5553_v40 = vadd.f32 %v5472_v47, %v10293_v31  ;;  %v5758_v53 = vpop.f32.mrf.mxu3  ;;  %v5899_v47 = vld [vmem:[%s8740_s12 + $0x158] sm:$0xff] }
 0x6a3   : > { %v5839_v32 = vadd.f32 %v5758_v53, %v5553_v40  ;;  %v6047_v26 = vpop.f32.mrf.mxu0 }
 0x6a4   : > { %v6333_v45 = vpop.f32.mrf.mxu1 }
 0x6a5   : > { %8371 = vmatmul.msk.bf16.gmra.mxu2 %vm367_vm0, %v5349_v13  ;;  %v6125_v41 = vadd.f32 %v6044_v43, %v5839_v32  ;;  %v5326_v43 = vld [vmem:[%s8740_s12 + $0x13f] sm:$0xff] }
 0x6a6   : > { %8403 = vmatmul.msk.bf16.gmra.mxu3 %vm367_vm0, %v5920_v9  ;;  %8435 = vmatmul.msk.bf16.gmra.mxu0 %vm367_vm0, %v5921_v42  ;;  %v5898_v9 = vld [vmem:[%s8740_s12 + $0x150] sm:$0xff]  ;;  %v5350_v13 = vpack.c.bf16 %v5327_v58, %v5326_v43 }
 0x6a7   : > { %v10639_v31 = vadd.f32 %v6330_v21, %v6125_v41  ;;  %8467 = vmatmul.msk.bf16.gmra.mxu1 %vm367_vm0, %v6207_v4  ;;  %v6184_v21 = vld [vmem:[%s8740_s12 + $0x151] sm:$0xff]  ;;  %v5922_v32 = vpack.c.bf16 %v5899_v47, %v5898_v9  ;;  %v5900_v47 = vld [vmem:[%s8740_s12 + $0x160] sm:$0xff] }
 0x6a8   : > { %v5475_v7 = vpop.f32.mrf.mxu2  ;;  %v6208_v41 = vpack.c.bf16 %v6185_v46, %v6184_v21  ;;  %v5328_v58 = vld [vmem:[%s8740_s12 + $0x14f] sm:$0xff]  ;;  %v5329_v9 = vld [vmem:[%s8740_s12 + $0x157] sm:$0xff]  ;;  %v6186_v21 = vld [vmem:[%s8740_s12 + $0x161] sm:$0xff] }
 0x6a9   : > { %v5554_v38 = vadd.f32 %v5475_v7, %v10298_v59  ;;  %v5761_v54 = vpop.f32.mrf.mxu3  ;;  %v6187_v46 = vld [vmem:[%s8740_s12 + $0x169] sm:$0xff] }
 0x6ab   : > { %v5840_v6 = vadd.f32 %v5761_v54, %v5554_v38  ;;  %v6049_v52 = vpop.f32.mrf.mxu0 }
 0x6ac   : > { %v6335_v29 = vpop.f32.mrf.mxu1 }
 0x6ad   : > { %v6126_v8 = vadd.f32 %v6047_v26, %v5840_v6 }
 0x6af   : > { %v10645_v35 = vadd.f32 %v6333_v45, %v6126_v8 }
 0x6b0   : > { %v5477_v22 = vpop.f32.mrf.mxu2 }
 0x6b1   : > { %v5555_v40 = vadd.f32 %v5477_v22, %v10309_v2  ;;  %v5763_v53 = vpop.f32.mrf.mxu3  ;;  %v5901_v22 = vld [vmem:[%s8740_s12 + $0x168] sm:$0xff] }
 0x6b3   : > { %v5841_v59 = vadd.f32 %v5763_v53, %v5555_v40  ;;  %v6052_v4 = vpop.f32.mrf.mxu0 }
 0x6b4   : > { %v6338_v26 = vpop.f32.mrf.mxu1 }
 0x6b5   : > { %8372 = vmatmul.msk.bf16.gmra.mxu2 %vm367_vm0, %v5350_v13  ;;  %v6127_v45 = vadd.f32 %v6049_v52, %v5841_v59  ;;  %v5351_v13 = vpack.c.bf16 %v5329_v9, %v5328_v58  ;;  %v5330_v9 = vld [vmem:[%s8740_s12 + $0x15f] sm:$0xff] }
 0x6b6   : > { %8404 = vmatmul.msk.bf16.gmra.mxu3 %vm367_vm0, %v5921_v42  ;;  %8436 = vmatmul.msk.bf16.gmra.mxu0 %vm367_vm0, %v5922_v32 }
 0x6b7   : > { %v10655_v2 = vadd.f32 %v6335_v29, %v6127_v45  ;;  %8468 = vmatmul.msk.bf16.gmra.mxu1 %vm367_vm0, %v6208_v41  ;;  %v6209_v45 = vpack.c.bf16 %v6187_v46, %v6186_v21  ;;  %v6188_v46 = vld [vmem:[%s8740_s12 + $0x171] sm:$0xff] }
 0x6b8   : > { %v5480_v7 = vpop.f32.mrf.mxu2 }
 0x6b9   : > { %v5556_v38 = vadd.f32 %v5480_v7, %v10314_v12  ;;  %v5766_v54 = vpop.f32.mrf.mxu3  ;;  %v5923_v12 = vpack.c.bf16 %v5901_v22, %v5900_v47  ;;  %v5903_v22 = vld [vmem:[%s8740_s12 + $0x178] sm:$0xff] }
 0x6bb   : > { %v5842_v6 = vadd.f32 %v5766_v54, %v5556_v38  ;;  %v6054_v8 = vpop.f32.mrf.mxu0 }
 0x6bc   : > { %v10659_v43 = vpop.f32.mrf.mxu1 }
 0x6bd   : > { %v6128_v52 = vadd.f32 %v6052_v4, %v5842_v6 }
 0x6bf   : > { %v10663_v42 = vadd.f32 %v6338_v26, %v6128_v52 }
 0x6c0   : > { %v5482_v29 = vpop.f32.mrf.mxu2 }
 0x6c1   : > { %v5557_v40 = vadd.f32 %v5482_v29, %v10325_v10  ;;  %v5768_v53 = vpop.f32.mrf.mxu3  ;;  %v8648_v29 = vld [vmem:[%s11226_s3] sm:$0xff] }
 0x6c2   : > { %7567 = vmatpush.bf16.msra.mxu1 %v8648_v29 }
 0x6c3   : > { %v5843_v59 = vadd.f32 %v5768_v53, %v5557_v40  ;;  %v6057_v41 = vpop.f32.mrf.mxu0  ;;  %v6189_v40 = vld [vmem:[%s8740_s12 + $0x179] sm:$0xff] }
 0x6c4   : > { %v6343_v4 = vpop.f32.mrf.mxu1 }
 0x6c5   : > { %8373 = vmatmul.msk.bf16.gmra.mxu2 %vm367_vm0, %v5351_v13  ;;  %v10671_v26 = vadd.f32 %v6054_v8, %v5843_v59  ;;  %v5331_v8 = vld [vmem:[%s8740_s12 + $0x167] sm:$0xff] }
 0x6c6   : > { %8405 = vmatmul.msk.bf16.gmra.mxu3 %vm367_vm0, %v5922_v32  ;;  %8437 = vmatmul.msk.bf16.gmra.mxu0 %vm367_vm0, %v5923_v12  ;;  %v5902_v32 = vld [vmem:[%s8740_s12 + $0x170] sm:$0xff]  ;;  %v5352_v13 = vpack.c.bf16 %v5331_v8, %v5330_v9 }
 0x6c7   : > { %8469 = vmatmul.msk.bf16.gmra.mxu1 %vm367_vm0, %v6209_v45  ;;  %v5924_v59 = vpack.c.bf16 %v5903_v22, %v5902_v32  ;;  %v5332_v22 = vld [vmem:[%s8740_s12 + $0x16f] sm:$0xff] }
 0x6c8   : > { %v5485_v10 = vpop.f32.mrf.mxu2 }
 0x6c9   : > { %v5558_v7 = vadd.f32 %v5485_v10, %v10331_v57  ;;  %v5771_v38 = vpop.f32.mrf.mxu3 }
 0x6cb   : > { %v5844_v54 = vadd.f32 %v5771_v38, %v5558_v7  ;;  %v6059_v6 = vpop.f32.mrf.mxu0 }
 0x6cc   : > { %v10677_v52 = vpop.f32.mrf.mxu1 }
 0x6cd   : > { %v6130_v58 = vadd.f32 %v6057_v41, %v5844_v54 }
 0x6cf   : > { %v10681_v47 = vadd.f32 %v6343_v4, %v6130_v58  ;;  %v6210_v4 = vpack.c.bf16 %v6189_v40, %v6188_v46  ;;  %v6190_v40 = vld [vmem:[%s8740_s12 + $0x181] sm:$0xff] }
 0x6d0   : > { %v5487_v21 = vpop.f32.mrf.mxu2 }
 0x6d1   : > { %v5559_v57 = vadd.f32 %v5487_v21, %v10347_v20  ;;  %v5773_v53 = vpop.f32.mrf.mxu3  ;;  %v5905_v21 = vld [vmem:[%s8740_s12 + $0x188] sm:$0xff] }
 0x6d3   : > { %v5845_v41 = vadd.f32 %v5773_v53, %v5559_v57  ;;  %v6062_v45 = vpop.f32.mrf.mxu0  ;;  %v6191_v57 = vld [vmem:[%s8740_s12 + $0x189] sm:$0xff] }
 0x6d4   : > { %v6348_v10 = vpop.f32.mrf.mxu1 }
 0x6d5   : > { %8374 = vmatmul.msk.bf16.gmra.mxu2 %vm367_vm0, %v5352_v13  ;;  %v10692_v7 = vadd.f32 %v6059_v6, %v5845_v41  ;;  %v5333_v6 = vld [vmem:[%s8740_s12 + $0x177] sm:$0xff] }
 0x6d6   : > { %8406 = vmatmul.msk.bf16.gmra.mxu3 %vm367_vm0, %v5923_v12  ;;  %8438 = vmatmul.msk.bf16.gmra.mxu0 %vm367_vm0, %v5924_v59  ;;  %v5904_v12 = vld [vmem:[%s8740_s12 + $0x180] sm:$0xff]  ;;  %v5353_v41 = vpack.c.bf16 %v5333_v6, %v5332_v22 }
 0x6d7   : > { %8470 = vmatmul.msk.bf16.gmra.mxu1 %vm367_vm0, %v6210_v4 }
 0x6d8   : > { %v5490_v20 = vpop.f32.mrf.mxu2 }
 0x6d9   : > { %v5560_v38 = vadd.f32 %v5490_v20, %v10356_v24  ;;  %v5776_v54 = vpop.f32.mrf.mxu3  ;;  %v5925_v24 = vpack.c.bf16 %v5905_v21, %v5904_v12  ;;  %v6438_v21 = vld [vmem:[%s8740_s12 + $0x52] sm:$0xff] }
 0x6db   : > { %v5846_v58 = vadd.f32 %v5776_v54, %v5560_v38  ;;  %v6064_v9 = vpop.f32.mrf.mxu0  ;;  %v6211_v38 = vpack.c.bf16 %v6191_v57, %v6190_v40  ;;  %v7010_v57 = vld [vmem:[%s8740_s12 + $0x54] sm:$0xff] }
 0x6dc   : > { %v10698_v8 = vpop.f32.mrf.mxu1 }
 0x6dd   : > { %v6132_v32 = vadd.f32 %v6062_v45, %v5846_v58 }
 0x6df   : > { %v10702_v29 = vadd.f32 %v6348_v10, %v6132_v32 }
 0x6e0   : > { %v5492_v46 = vpop.f32.mrf.mxu2 }
 0x6e1   : > { %v5561_v53 = vadd.f32 %v5492_v46, %v10369_v15  ;;  %v5778_v13 = vpop.f32.mrf.mxu3  ;;  %v6724_v46 = vld [vmem:[%s8740_s12 + $0x53] sm:$0xff] }
 0x6e3   : > { %v5847_v4 = vadd.f32 %v5778_v13, %v5561_v53  ;;  %v6067_v20 = vpop.f32.mrf.mxu0  ;;  %v7011_v53 = vld [vmem:[%s8740_s12 + $0x5c] sm:$0xff] }
 0x6e4   : > { %v6353_v45 = vpop.f32.mrf.mxu1 }
 0x6e5   : > { %8375 = vmatmul.msk.bf16.gmra.mxu2 %vm367_vm0, %v5353_v41  ;;  %v10710_v10 = vadd.f32 %v6064_v9, %v5847_v4  ;;  %v6439_v9 = vld [vmem:[%s8740_s12 + $0x5a] sm:$0xff] }
 0x6e6   : > { %8407 = vmatmul.msk.bf16.gmra.mxu3 %vm367_vm0, %v5924_v59  ;;  %8439 = vmatmul.msk.bf16.gmra.mxu0 %vm367_vm0, %v5925_v24  ;;  %v6725_v59 = vld [vmem:[%s8740_s12 + $0x5b] sm:$0xff]  ;;  %v6478_v4 = vpack.c.bf16 %v6439_v9, %v6438_v21 }
 0x6e7   : > { %8471 = vmatmul.msk.bf16.gmra.mxu1 %vm367_vm0, %v6211_v38  ;;  %v7050_v38 = vpack.c.bf16 %v7011_v53, %v7010_v57  ;;  %v6441_v57 = vld [vmem:[%s8740_s12 + $0x6a] sm:$0xff] }
 0x6e8   : > { %v5495_v15 = vpop.f32.mrf.mxu2  ;;  %v6726_v53 = vld [vmem:[%s8740_s12 + $0x63] sm:$0xff] }
 0x6e9   : > { %v5562_v54 = vadd.f32 %v5495_v15, %v10376_v18  ;;  %v5781_v58 = vpop.f32.mrf.mxu3  ;;  %v6764_v18 = vpack.c.bf16 %v6725_v59, %v6724_v46  ;;  %v6440_v59 = vld [vmem:[%s8740_s12 + $0x62] sm:$0xff] }
 0x6eb   : > { %v5848_v32 = vadd.f32 %v5781_v58, %v5562_v54  ;;  %v6069_v22 = vpop.f32.mrf.mxu0 }
 0x6ec   : > { %v10716_v6 = vpop.f32.mrf.mxu1 }
 0x6ed   : > { %v6134_v12 = vadd.f32 %v6067_v20, %v5848_v32 }
 0x6ef   : > { %v10721_v40 = vadd.f32 %v6353_v45, %v6134_v12 }
 0x6f0   : > { %v5497_v13 = vpop.f32.mrf.mxu2 }
 0x6f1   : > { %v5563_v41 = vadd.f32 %v5497_v13, %v10387_v39  ;;  %v5783_v24 = vpop.f32.mrf.mxu3 }
 0x6f3   : > { %v5849_v15 = vadd.f32 %v5783_v24, %v5563_v41  ;;  %v6072_v20 = vpop.f32.mrf.mxu0  ;;  %v7012_v41 = vld [vmem:[%s8740_s12 + $0x64] sm:$0xff]  ;;  %v7013_v24 = vld [vmem:[%s8740_s12 + $0x6c] sm:$0xff] }
 0x6f4   : > { %v6358_v54 = vpop.f32.mrf.mxu1 }
 0x6f5   : > { %8484 = vmatmul.msk.bf16.vlgmr.msra.gmra.mxu2 %vm367_vm0, %v6478_v4  ;;  %v10728_v45 = vadd.f32 %v6069_v22, %v5849_v15  ;;  %v6727_v22 = vld [vmem:[%s8740_s12 + $0x6b] sm:$0xff]  ;;  %v6479_v15 = vpack.c.bf16 %v6441_v57, %v6440_v59 }
 0x6f6   : > { %8516 = vmatmul.msk.bf16.vlgmr.msra.gmra.mxu3 %vm367_vm0, %v6764_v18  ;;  %8548 = vmatmul.msk.bf16.vlgmr.msra.gmra.mxu0 %vm367_vm0, %v7050_v38 }
 0x6f8   : > { %v5500_v39 = vpop.f32.mrf.mxu2 }
 0x6f9   : > { %v5564_v58 = vadd.f32 %v5500_v39, %v10393_v16  ;;  %v5786_v32 = vpop.f32.mrf.mxu3  ;;  %v6765_v16 = vpack.c.bf16 %v6727_v22, %v6726_v53  ;;  %v7051_v39 = vpack.c.bf16 %v7013_v24, %v7012_v41  ;;  %v6442_v41 = vld [vmem:[%s8740_s12 + $0x72] sm:$0xff]  ;;  %v6443_v24 = vld [vmem:[%s8740_s12 + $0x7a] sm:$0xff] }
 0x6fb   : > { %v5850_v12 = vadd.f32 %v5786_v32, %v5564_v58  ;;  %v6074_v21 = vpop.f32.mrf.mxu0 }
 0x6fc   : > { %v10733_v9 = vpop.f32.mrf.mxu1 }
 0x6fd   : > { %11229 = vst [vmem:[#allocation2_spill] sm:$0xff] %v10733_v9  ;;  %v6136_v46 = vadd.f32 %v6072_v20, %v5850_v12  ;;  %v6480_v9 = vpack.c.bf16 %v6443_v24, %v6442_v41 }
 0x6ff   : > { %v10738_v13 = vadd.f32 %v6358_v54, %v6136_v46 }
 0x700   : > { %v5502_v4 = vpop.f32.mrf.mxu2 }
 0x701   : > { %v5565_v18 = vadd.f32 %v5502_v4, %v10403_v63  ;;  %v5788_v38 = vpop.f32.mrf.mxu3  ;;  %v6728_v4 = vld [vmem:[%s8740_s12 + $0x73] sm:$0xff] }
 0x703   : > { %v5851_v58 = vadd.f32 %v5788_v38, %v5565_v18  ;;  %v6077_v20 = vpop.f32.mrf.mxu0  ;;  %v7014_v38 = vld [vmem:[%s8740_s12 + $0x74] sm:$0xff] }
 0x704   : > { %v6363_v32 = vpop.f32.mrf.mxu1 }
 0x705   : > { %8485 = vmatmul.msk.bf16.gmra.mxu2 %vm367_vm0, %v6479_v15  ;;  %v10745_v54 = vadd.f32 %v6074_v21, %v5851_v58  ;;  %v6729_v21 = vld [vmem:[%s8740_s12 + $0x7b] sm:$0xff] }
 0x706   : > { %8517 = vmatmul.msk.bf16.gmra.mxu3 %vm367_vm0, %v6765_v16  ;;  %8549 = vmatmul.msk.bf16.gmra.mxu0 %vm367_vm0, %v7051_v39  ;;  %v7015_v15 = vld [vmem:[%s8740_s12 + $0x7c] sm:$0xff] }
 0x708   : > { %v5505_v63 = vpop.f32.mrf.mxu2 }
 0x709   : > { %v5566_v12 = vadd.f32 %v5505_v63, %v10409_v55  ;;  %v5791_v46 = vpop.f32.mrf.mxu3  ;;  %v6766_v55 = vpack.c.bf16 %v6729_v21, %v6728_v4  ;;  %v7052_v63 = vpack.c.bf16 %v7015_v15, %v7014_v38  ;;  %v6444_v38 = vld [vmem:[%s8740_s12 + $0x82] sm:$0xff]  ;;  %v6445_v15 = vld [vmem:[%s8740_s12 + $0x8a] sm:$0xff] }
 0x70b   : > { %v5852_v59 = vadd.f32 %v5791_v46, %v5566_v12  ;;  %v6079_v57 = vpop.f32.mrf.mxu0 }
 0x70c   : > { %v10750_v53 = vpop.f32.mrf.mxu1 }
 0x70d   : > { %11230 = vst [vmem:[#allocation3_spill] sm:$0xff] %v10750_v53  ;;  %v6138_v22 = vadd.f32 %v6077_v20, %v5852_v59  ;;  %v6481_v53 = vpack.c.bf16 %v6445_v15, %v6444_v38 }
 0x70f   : > { %v10755_v18 = vadd.f32 %v6363_v32, %v6138_v22 }
 0x710   : > { %v5507_v16 = vpop.f32.mrf.mxu2 }
 0x711   : > { %v5567_v39 = vadd.f32 %v5507_v16, %v10419_v23  ;;  %v5793_v58 = vpop.f32.mrf.mxu3 }
 0x713   : > { %v5853_v12 = vadd.f32 %v5793_v58, %v5567_v39  ;;  %v6082_v20 = vpop.f32.mrf.mxu0  ;;  %v7016_v39 = vld [vmem:[%s8740_s12 + $0x84] sm:$0xff]  ;;  %v7017_v58 = vld [vmem:[%s8740_s12 + $0x8c] sm:$0xff] }
 0x714   : > { %v6368_v46 = vpop.f32.mrf.mxu1 }
 0x715   : > { %8486 = vmatmul.msk.bf16.gmra.mxu2 %vm367_vm0, %v6480_v9  ;;  %v10762_v32 = vadd.f32 %v6079_v57, %v5853_v12  ;;  %v6730_v9 = vld [vmem:[%s8740_s12 + $0x83] sm:$0xff]  ;;  %v6731_v57 = vld [vmem:[%s8740_s12 + $0x8b] sm:$0xff] }
 0x716   : > { %8518 = vmatmul.msk.bf16.gmra.mxu3 %vm367_vm0, %v6766_v55  ;;  %8550 = vmatmul.msk.bf16.gmra.mxu0 %vm367_vm0, %v7052_v63 }
 0x718   : > { %v5510_v23 = vpop.f32.mrf.mxu2 }
 0x719   : > { %v5568_v59 = vadd.f32 %v5510_v23, %v10425_v19  ;;  %v5796_v22 = vpop.f32.mrf.mxu3  ;;  %v6767_v19 = vpack.c.bf16 %v6731_v57, %v6730_v9  ;;  %v7053_v23 = vpack.c.bf16 %v7017_v58, %v7016_v39  ;;  %v6446_v39 = vld [vmem:[%s8740_s12 + $0x92] sm:$0xff]  ;;  %v6447_v58 = vld [vmem:[%s8740_s12 + $0x9a] sm:$0xff] }
 0x71b   : > { %v5854_v41 = vadd.f32 %v5796_v22, %v5568_v59  ;;  %v6084_v24 = vpop.f32.mrf.mxu0 }
 0x71c   : > { %v10767_v4 = vpop.f32.mrf.mxu1 }
 0x71d   : > { %11231 = vst [vmem:[#allocation4_spill] sm:$0xff] %v10767_v4  ;;  %v6140_v21 = vadd.f32 %v6082_v20, %v5854_v41  ;;  %v6482_v4 = vpack.c.bf16 %v6447_v58, %v6446_v39 }
 0x71f   : > { %v10772_v16 = vadd.f32 %v6368_v46, %v6140_v21 }
 0x720   : > { %v5512_v55 = vpop.f32.mrf.mxu2 }
 0x721   : > { %v5569_v63 = vadd.f32 %v5512_v55, %v10435_v49  ;;  %v5798_v12 = vpop.f32.mrf.mxu3 }
 0x723   : > { %v5855_v59 = vadd.f32 %v5798_v12, %v5569_v63  ;;  %v6087_v20 = vpop.f32.mrf.mxu0  ;;  %v7018_v63 = vld [vmem:[%s8740_s12 + $0x94] sm:$0xff]  ;;  %v7019_v12 = vld [vmem:[%s8740_s12 + $0x9c] sm:$0xff] }
 0x724   : > { %v6373_v22 = vpop.f32.mrf.mxu1 }
 0x725   : > { %8487 = vmatmul.msk.bf16.gmra.mxu2 %vm367_vm0, %v6481_v53  ;;  %v10779_v46 = vadd.f32 %v6084_v24, %v5855_v59  ;;  %v6732_v53 = vld [vmem:[%s8740_s12 + $0x93] sm:$0xff]  ;;  %v6733_v24 = vld [vmem:[%s8740_s12 + $0x9b] sm:$0xff] }
 0x726   : > { %8519 = vmatmul.msk.bf16.gmra.mxu3 %vm367_vm0, %v6767_v19  ;;  %8551 = vmatmul.msk.bf16.gmra.mxu0 %vm367_vm0, %v7053_v23 }
 0x728   : > { %v5515_v49 = vpop.f32.mrf.mxu2 }
 0x729   : > { %v5570_v41 = vadd.f32 %v5515_v49, %v10441_v30  ;;  %v5801_v21 = vpop.f32.mrf.mxu3  ;;  %v6768_v30 = vpack.c.bf16 %v6733_v24, %v6732_v53  ;;  %v7054_v49 = vpack.c.bf16 %v7019_v12, %v7018_v63  ;;  %v6448_v63 = vld [vmem:[%s8740_s12 + $0xa2] sm:$0xff]  ;;  %v6449_v12 = vld [vmem:[%s8740_s12 + $0xaa] sm:$0xff] }
 0x72b   : > { %v5856_v38 = vadd.f32 %v5801_v21, %v5570_v41  ;;  %v6089_v15 = vpop.f32.mrf.mxu0 }
 0x72c   : > { %v10784_v9 = vpop.f32.mrf.mxu1 }
 0x72d   : > { %11232 = vst [vmem:[#allocation5_spill] sm:$0xff] %v10784_v9  ;;  %v6142_v57 = vadd.f32 %v6087_v20, %v5856_v38  ;;  %v6483_v9 = vpack.c.bf16 %v6449_v12, %v6448_v63 }
 0x72f   : > { %v10789_v55 = vadd.f32 %v6373_v22, %v6142_v57 }
 0x730   : > { %v5517_v19 = vpop.f32.mrf.mxu2 }
 0x731   : > { %v5571_v23 = vadd.f32 %v5517_v19, %v10451_v14  ;;  %v5803_v59 = vpop.f32.mrf.mxu3 }
 0x733   : > { %v5857_v41 = vadd.f32 %v5803_v59, %v5571_v23  ;;  %v6092_v20 = vpop.f32.mrf.mxu0  ;;  %v7020_v23 = vld [vmem:[%s8740_s12 + $0xa4] sm:$0xff]  ;;  %v7021_v59 = vld [vmem:[%s8740_s12 + $0xac] sm:$0xff] }
 0x734   : > { %v6378_v21 = vpop.f32.mrf.mxu1 }
 0x735   : > { %8488 = vmatmul.msk.bf16.gmra.mxu2 %vm367_vm0, %v6482_v4  ;;  %v10796_v22 = vadd.f32 %v6089_v15, %v5857_v41  ;;  %v6734_v4 = vld [vmem:[%s8740_s12 + $0xa3] sm:$0xff]  ;;  %v6735_v15 = vld [vmem:[%s8740_s12 + $0xab] sm:$0xff] }
 0x736   : > { %8520 = vmatmul.msk.bf16.gmra.mxu3 %vm367_vm0, %v6768_v30  ;;  %8552 = vmatmul.msk.bf16.gmra.mxu0 %vm367_vm0, %v7054_v49 }
 0x738   : > { %v5520_v14 = vpop.f32.mrf.mxu2 }
 0x739   : > { %v5572_v38 = vadd.f32 %v5520_v14, %v10457_v48  ;;  %v5806_v57 = vpop.f32.mrf.mxu3  ;;  %v6769_v48 = vpack.c.bf16 %v6735_v15, %v6734_v4  ;;  %v7055_v14 = vpack.c.bf16 %v7021_v59, %v7020_v23  ;;  %v6450_v15 = vld [vmem:[%s8740_s12 + $0xb2] sm:$0xff]  ;;  %v6451_v23 = vld [vmem:[%s8740_s12 + $0xba] sm:$0xff] }
 0x73a   : > { %v6736_v59 = vld [vmem:[%s8740_s12 + $0xb3] sm:$0xff] }
 0x73b   : > { %v5858_v39 = vadd.f32 %v5806_v57, %v5572_v38  ;;  %v6094_v58 = vpop.f32.mrf.mxu0 }
 0x73c   : > { %v10801_v53 = vpop.f32.mrf.mxu1 }
 0x73d   : > { %11233 = vst [vmem:[#allocation6_spill] sm:$0xff] %v10801_v53  ;;  %v6144_v24 = vadd.f32 %v6092_v20, %v5858_v39  ;;  %v6484_v53 = vpack.c.bf16 %v6451_v23, %v6450_v15 }
 0x73f   : > { %v10806_v19 = vadd.f32 %v6378_v21, %v6144_v24 }
 0x740   : > { %v5522_v30 = vpop.f32.mrf.mxu2 }
 0x741   : > { %v5573_v49 = vadd.f32 %v5522_v30, %v10467_v44  ;;  %v5808_v41 = vpop.f32.mrf.mxu3 }
 0x743   : > { %v5859_v38 = vadd.f32 %v5808_v41, %v5573_v49  ;;  %v6097_v20 = vpop.f32.mrf.mxu0  ;;  %v7022_v49 = vld [vmem:[%s8740_s12 + $0xb4] sm:$0xff]  ;;  %v7023_v41 = vld [vmem:[%s8740_s12 + $0xbc] sm:$0xff] }
 0x744   : > { %v6383_v57 = vpop.f32.mrf.mxu1 }
 0x745   : > { %8489 = vmatmul.msk.bf16.gmra.mxu2 %vm367_vm0, %v6483_v9  ;;  %v10813_v21 = vadd.f32 %v6094_v58, %v5859_v38  ;;  %v6737_v58 = vld [vmem:[%s8740_s12 + $0xbb] sm:$0xff] }
 0x746   : > { %8521 = vmatmul.msk.bf16.gmra.mxu3 %vm367_vm0, %v6769_v48  ;;  %8553 = vmatmul.msk.bf16.gmra.mxu0 %vm367_vm0, %v7055_v14 }
 0x748   : > { %v5525_v44 = vpop.f32.mrf.mxu2 }
 0x749   : > { %v5574_v39 = vadd.f32 %v5525_v44, %v10473_v56  ;;  %v5811_v24 = vpop.f32.mrf.mxu3  ;;  %v6770_v56 = vpack.c.bf16 %v6737_v58, %v6736_v59  ;;  %v7056_v44 = vpack.c.bf16 %v7023_v41, %v7022_v49  ;;  %v6452_v58 = vld [vmem:[%s8740_s12 + $0xc2] sm:$0xff]  ;;  %v6453_v49 = vld [vmem:[%s8740_s12 + $0xca] sm:$0xff] }
 0x74a   : > { %v6738_v41 = vld [vmem:[%s8740_s12 + $0xc3] sm:$0xff] }
 0x74b   : > { %v5860_v63 = vadd.f32 %v5811_v24, %v5574_v39  ;;  %v6099_v12 = vpop.f32.mrf.mxu0 }
 0x74c   : > { %v10821_v30 = vpop.f32.mrf.mxu1 }
 0x74d   : > { %v6146_v4 = vadd.f32 %v6097_v20, %v5860_v63  ;;  %11234 = vst [vmem:[#allocation7_spill] sm:$0xff] %v10821_v30 }
 0x74f   : > { %v10823_v9 = vadd.f32 %v6383_v57, %v6146_v4 }
 0x750   : > { %v5527_v48 = vpop.f32.mrf.mxu2 }
 0x751   : > { %v5575_v14 = vadd.f32 %v5527_v48, %v10483_v17  ;;  %v5813_v38 = vpop.f32.mrf.mxu3  ;;  %v7024_v48 = vld [vmem:[%s8740_s12 + $0xc4] sm:$0xff] }
 0x753   : > { %v5861_v20 = vadd.f32 %v5813_v38, %v5575_v14  ;;  %v6102_v39 = vpop.f32.mrf.mxu0  ;;  %v7025_v14 = vld [vmem:[%s8740_s12 + $0xcc] sm:$0xff] }
 0x754   : > { %v6388_v24 = vpop.f32.mrf.mxu1 }
 0x755   : > { %8490 = vmatmul.msk.bf16.gmra.mxu2 %vm367_vm0, %v6484_v53  ;;  %v10830_v57 = vadd.f32 %v6099_v12, %v5861_v20  ;;  %v6739_v12 = vld [vmem:[%s8740_s12 + $0xcb] sm:$0xff]  ;;  %v6485_v20 = vpack.c.bf16 %v6453_v49, %v6452_v58 }
 0x756   : > { %8522 = vmatmul.msk.bf16.gmra.mxu3 %vm367_vm0, %v6770_v56  ;;  %8554 = vmatmul.msk.bf16.gmra.mxu0 %vm367_vm0, %v7056_v44  ;;  %v6771_v30 = vpack.c.bf16 %v6739_v12, %v6738_v41  ;;  %v6454_v12 = vld [vmem:[%s8740_s12 + $0xd2] sm:$0xff] }
 0x758   : > { %v5530_v17 = vpop.f32.mrf.mxu2 }
 0x759   : > { %v5576_v63 = vadd.f32 %v5530_v17, %v10489_v28  ;;  %v5816_v4 = vpop.f32.mrf.mxu3  ;;  %v7057_v17 = vpack.c.bf16 %v7025_v14, %v7024_v48  ;;  %v6455_v48 = vld [vmem:[%s8740_s12 + $0xda] sm:$0xff] }
 0x75a   : > { %v6740_v14 = vld [vmem:[%s8740_s12 + $0xd3] sm:$0xff] }
 0x75b   : > { %v5862_v15 = vadd.f32 %v5816_v4, %v5576_v63  ;;  %v6104_v23 = vpop.f32.mrf.mxu0 }
 0x75c   : > { %v10844_v28 = vpop.f32.mrf.mxu1 }
 0x75d   : > { %v6148_v59 = vadd.f32 %v6102_v39, %v5862_v15  ;;  %11235 = vst [vmem:[#allocation8_spill] sm:$0xff] %v10844_v28 }
 0x75f   : > { %v10838_v53 = vadd.f32 %v6388_v24, %v6148_v59 }
 0x760   : > { %v5532_v38 = vpop.f32.mrf.mxu2 }
 0x761   : > { %v5577_v56 = vadd.f32 %v5532_v38, %v10499_v60  ;;  %v5818_v44 = vpop.f32.mrf.mxu3 }
 0x763   : > { %v5863_v39 = vadd.f32 %v5818_v44, %v5577_v56  ;;  %v6107_v63 = vpop.f32.mrf.mxu0  ;;  %v7026_v56 = vld [vmem:[%s8740_s12 + $0xd4] sm:$0xff]  ;;  %v7027_v44 = vld [vmem:[%s8740_s12 + $0xdc] sm:$0xff] }
 0x764   : > { %v6393_v49 = vpop.f32.mrf.mxu1 }
 0x765   : > { %8491 = vmatmul.msk.bf16.gmra.mxu2 %vm367_vm0, %v6485_v20  ;;  %v10847_v24 = vadd.f32 %v6104_v23, %v5863_v39  ;;  %v6741_v23 = vld [vmem:[%s8740_s12 + $0xdb] sm:$0xff]  ;;  %v6486_v39 = vpack.c.bf16 %v6455_v48, %v6454_v12 }
 0x766   : > { %8523 = vmatmul.msk.bf16.gmra.mxu3 %vm367_vm0, %v6771_v30  ;;  %8555 = vmatmul.msk.bf16.gmra.mxu0 %vm367_vm0, %v7057_v17  ;;  %v10870_v48 = vld [vmem:[%s11225_s2] ss:$0 sm:$0xff] }
 0x768   : > { %v5535_v60 = vpop.f32.mrf.mxu2 }
 0x769   : > { %v5578_v4 = vadd.f32 %v5535_v60, %v10505_v34  ;;  %v5821_v15 = vpop.f32.mrf.mxu3  ;;  %v6772_v34 = vpack.c.bf16 %v6741_v23, %v6740_v14  ;;  %v7058_v60 = vpack.c.bf16 %v7027_v44, %v7026_v56  ;;  %v6456_v14 = vld [vmem:[%s8740_s12 + $0xe2] sm:$0xff]  ;;  %v6457_v23 = vld [vmem:[%s8740_s12 + $0xea] sm:$0xff] }
 0x76a   : > { %v6742_v56 = vld [vmem:[%s8740_s12 + $0xe3] sm:$0xff]  ;;  %v6743_v44 = vld [vmem:[%s8740_s12 + $0xeb] sm:$0xff] }
 0x76b   : > { %v5864_v59 = vadd.f32 %v5821_v15, %v5578_v4  ;;  %v6109_v58 = vpop.f32.mrf.mxu0 }
 0x76d   : > { %v6150_v41 = vadd.f32 %v6107_v63, %v5864_v59 }
 0x76f   : > { %v10855_v38 = vadd.f32 %v6393_v49, %v6150_v41 }
 0x770   : > { %v5537_v20 = vpop.f32.mrf.mxu2 }
 0x771   : > { %11236 = vst [vmem:[#allocation9_spill] sm:$0xff] %v10855_v38  ;;  %v5579_v30 = vadd.f32 %v5537_v20, %v10521_v33  ;;  %v5823_v17 = vpop.f32.mrf.mxu3  ;;  %v7028_v20 = vld [vmem:[%s8740_s12 + $0xe4] sm:$0xff] }
 0x773   : > { %v5865_v4 = vadd.f32 %v5823_v17, %v5579_v30  ;;  %v7156_v63 = vpop.f32.mrf.mxu0  ;;  %v7029_v30 = vld [vmem:[%s8740_s12 + $0xec] sm:$0xff] }
 0x775   : > { %8492 = vmatmul.msk.bf16.gmra.mxu2 %vm367_vm0, %v6486_v39  ;;  %v10862_v15 = vadd.f32 %v6109_v58, %v5865_v4  ;;  %v7059_v4 = vpack.c.bf16 %v7029_v30, %v7028_v20 }
 0x776   : > { %8524 = vmatmul.msk.bf16.gmra.mxu3 %vm367_vm0, %v6772_v34  ;;  %8556 = vmatmul.msk.bf16.gmra.mxu0 %vm367_vm0, %v7058_v60  ;;  %v6773_v60 = vpack.c.bf16 %v6743_v44, %v6742_v56 }
 0x777   : > { %11237 = vst [vmem:[#allocation10_spill] sm:$0xff] %v10862_v15 }
 0x778   : > { %v6584_v33 = vpop.f32.mrf.mxu2 }
 0x779   : > { %v6684_v59 = vadd.f32 %v6584_v33, %v10530_v5  ;;  %v6870_v49 = vpop.f32.mrf.mxu3  ;;  %v6487_v5 = vpack.c.bf16 %v6457_v23, %v6456_v14 }
 0x77b   : > { %v6970_v41 = vadd.f32 %v6870_v49, %v6684_v59  ;;  %v7158_v12 = vpop.f32.mrf.mxu0 }
 0x77d   : > { %v7256_v58 = vadd.f32 %v7156_v63, %v6970_v41 }
 0x77f   : > { %v7300_v33 = vadd.f32 %v10870_v48, %v7256_v58 }
 0x780   : > { %v6586_v17 = vpop.f32.mrf.mxu2 }
 0x781   : > { %v6685_v39 = vadd.f32 %v6586_v17, %v10543_v1  ;;  %v6872_v34 = vpop.f32.mrf.mxu3  ;;  %v7380_v63 = vmul.f32 0.01, %v7300_v33  ;;  %vm7340_vm1 = vcmp.ge.f32.partialorder %v7300_v33, 0.0  ;;  %v6458_v17 = vld [vmem:[%s8740_s12 + $0xf2] sm:$0xff] }
 0x783   : > { %v6971_v59 = vadd.f32 %v6872_v34, %v6685_v39  ;;  %v7161_v49 = vpop.f32.mrf.mxu0  ;;  %v7420_v56 = vsel %vm7340_vm1, %v7300_v33, %v7380_v63  ;;  %v6459_v39 = vld [vmem:[%s8740_s12 + $0xfa] sm:$0xff] }
 0x785   : > { %v7257_v15 = vadd.f32 %v7158_v12, %v6971_v59  ;;  %8493 = vmatmul.msk.bf16.gmra.mxu2 %vm367_vm0, %v6487_v5  ;;  %v6745_v5 = vld [vmem:[%s8740_s12 + $0xfb] sm:$0xff] }
 0x786   : > { %8525 = vmatmul.msk.bf16.gmra.mxu3 %vm367_vm0, %v6773_v60  ;;  %8557 = vmatmul.msk.bf16.gmra.mxu0 %vm367_vm0, %v7059_v4  ;;  %v7030_v60 = vld [vmem:[%s8740_s12 + $0xf4] sm:$0xff]  ;;  %v7031_v4 = vld [vmem:[%s8740_s12 + $0xfc] sm:$0xff] }
 0x787   : > { %v7301_v1 = vadd.f32 %v10870_v48, %v7257_v15  ;;  %v6744_v15 = vld [vmem:[%s8740_s12 + $0xf3] sm:$0xff]  ;;  %v7060_v33 = vpack.c.bf16 %v7031_v4, %v7030_v60  ;;  %v6747_v60 = vld [vmem:[%s8740_s12 + $0x10b] sm:$0xff] }
 0x788   : > { %v6589_v41 = vpop.f32.mrf.mxu2  ;;  %v7032_v4 = vld [vmem:[%s8740_s12 + $0x104] sm:$0xff] }
 0x789   : > { %vm7341_vm2 = vcmp.ge.f32.partialorder %v7301_v1, 0.0  ;;  %v7381_v14 = vmul.f32 0.01, %v7301_v1  ;;  %v6686_v12 = vadd.f32 %v6589_v41, %v10549_v61  ;;  %v6875_v23 = vpop.f32.mrf.mxu3  ;;  %v6488_v61 = vpack.c.bf16 %v6459_v39, %v6458_v17  ;;  %v6460_v39 = vld [vmem:[%s8740_s12 + $0x102] sm:$0xff] }
 0x78a   : > { %v6774_v41 = vpack.c.bf16 %v6745_v5, %v6744_v15  ;;  %v6461_v15 = vld [vmem:[%s8740_s12 + $0x10a] sm:$0xff] }
 0x78b   : > { %v7421_v58 = vsel %vm7341_vm2, %v7301_v1, %v7381_v14  ;;  %v6972_v44 = vadd.f32 %v6875_v23, %v6686_v12  ;;  %v7163_v20 = vpop.f32.mrf.mxu0 }
 0x78c   : > { %v7460_v30 = vpack.c.bf16 %v7421_v58, %v7420_v56 }
 0x78d   : > { %v7258_v34 = vadd.f32 %v7161_v49, %v6972_v44 }
 0x78e   : > { %8576 = vmatmul.msk.bf16.vlgmr.msra.gmra.mxu1 %vm367_vm0, %v7460_v30 }
 0x78f   : > { %v7302_v63 = vadd.f32 %v10870_v48, %v7258_v34  ;;  %v6746_v34 = vld [vmem:[%s8740_s12 + $0x103] sm:$0xff] }
 0x790   : > { %v6591_v59 = vpop.f32.mrf.mxu2 }
 0x791   : > { %v6687_v38 = vadd.f32 %v6591_v59, %v10559_v27  ;;  %v6877_v28 = vpop.f32.mrf.mxu3  ;;  %v7382_v49 = vmul.f32 0.01, %v7302_v63  ;;  %vm7342_vm3 = vcmp.ge.f32.partialorder %v7302_v63, 0.0  ;;  %v7033_v59 = vld [vmem:[%s8740_s12 + $0x10c] sm:$0xff] }
 0x793   : > { %v6973_v1 = vadd.f32 %v6877_v28, %v6687_v38  ;;  %v7166_v14 = vpop.f32.mrf.mxu0 }
 0x795   : > { %v7259_v12 = vadd.f32 %v7163_v20, %v6973_v1  ;;  %8494 = vmatmul.msk.bf16.gmra.mxu2 %vm367_vm0, %v6488_v61  ;;  %v7422_v20 = vsel %vm7342_vm3, %v7302_v63, %v7382_v49  ;;  %v6775_v1 = vpack.c.bf16 %v6747_v60, %v6746_v34  ;;  %v6463_v34 = vld [vmem:[%s8740_s12 + $0x11a] sm:$0xff] }
 0x796   : > { %8526 = vmatmul.msk.bf16.gmra.mxu3 %vm367_vm0, %v6774_v41  ;;  %8558 = vmatmul.msk.bf16.gmra.mxu0 %vm367_vm0, %v7060_v33 }
 0x797   : > { %v7303_v27 = vadd.f32 %v10870_v48, %v7259_v12  ;;  %v7061_v12 = vpack.c.bf16 %v7033_v59, %v7032_v4  ;;  %v6749_v4 = vld [vmem:[%s8740_s12 + $0x11b] sm:$0xff] }
 0x798   : > { %v6594_v23 = vpop.f32.mrf.mxu2  ;;  %v7034_v59 = vld [vmem:[%s8740_s12 + $0x114] sm:$0xff] }
 0x799   : > { %vm7343_vm4 = vcmp.ge.f32.partialorder %v7303_v27, 0.0  ;;  %v7383_v28 = vmul.f32 0.01, %v7303_v27  ;;  %v6688_v38 = vadd.f32 %v6594_v23, %v10565_v3  ;;  %v6880_v56 = vpop.f32.mrf.mxu3  ;;  %v6489_v3 = vpack.c.bf16 %v6461_v15, %v6460_v39  ;;  %v6462_v15 = vld [vmem:[%s8740_s12 + $0x112] sm:$0xff] }
 0x79b   : > { %v6974_v58 = vadd.f32 %v6880_v56, %v6688_v38  ;;  %v7168_v44 = vpop.f32.mrf.mxu0  ;;  %v7423_v30 = vsel %vm7343_vm4, %v7303_v27, %v7383_v28  ;;  %vm7669_vm4 = vcmask 228352  }
 0x79c   : > { %v7461_v17 = vpack.c.bf16 %v7423_v30, %v7422_v20 }
 0x79d   : > { %v7260_v5 = vadd.f32 %v7166_v14, %v6974_v58 }
 0x79e   : > { %8577 = vmatmul.msk.bf16.gmra.mxu1 %vm367_vm0, %v7461_v17 }
 0x79f   : > { %v7304_v63 = vadd.f32 %v10870_v48, %v7260_v5  ;;  %v6748_v5 = vld [vmem:[%s8740_s12 + $0x113] sm:$0xff] }
 0x7a0   : > { %v6596_v61 = vpop.f32.mrf.mxu2 }
 0x7a1   : > { %v6689_v41 = vadd.f32 %v6596_v61, %v10575_v51  ;;  %v6882_v33 = vpop.f32.mrf.mxu3  ;;  %v7384_v14 = vmul.f32 0.01, %v7304_v63  ;;  %vm7344_vm5 = vcmp.ge.f32.partialorder %v7304_v63, 0.0  ;;  %v7035_v61 = vld [vmem:[%s8740_s12 + $0x11c] sm:$0xff] }
 0x7a3   : > { %v6975_v49 = vadd.f32 %v6882_v33, %v6689_v41  ;;  %v7171_v27 = vpop.f32.mrf.mxu0  ;;  %v7424_v30 = vsel %vm7344_vm5, %v7304_v63, %v7384_v14 }
 0x7a5   : > { %v7261_v23 = vadd.f32 %v7168_v44, %v6975_v49  ;;  %8495 = vmatmul.msk.bf16.gmra.mxu2 %vm367_vm0, %v6489_v3 }
 0x7a6   : > { %8527 = vmatmul.msk.bf16.gmra.mxu3 %vm367_vm0, %v6775_v1  ;;  %8559 = vmatmul.msk.bf16.gmra.mxu0 %vm367_vm0, %v7061_v12  ;;  %v6776_v1 = vpack.c.bf16 %v6749_v4, %v6748_v5  ;;  %v7062_v12 = vpack.c.bf16 %v7035_v61, %v7034_v59  ;;  %v7036_v4 = vld [vmem:[%s8740_s12 + $0x124] sm:$0xff]  ;;  %v7037_v59 = vld [vmem:[%s8740_s12 + $0x12c] sm:$0xff] }
 0x7a7   : > { %v7305_v51 = vadd.f32 %v10870_v48, %v7261_v23 }
 0x7a8   : > { %v6599_v28 = vpop.f32.mrf.mxu2 }
 0x7a9   : > { %vm7345_vm6 = vcmp.ge.f32.partialorder %v7305_v51, 0.0  ;;  %v7385_v38 = vmul.f32 0.01, %v7305_v51  ;;  %v6690_v56 = vadd.f32 %v6599_v28, %v10581_v25  ;;  %v6885_v58 = vpop.f32.mrf.mxu3  ;;  %v6490_v25 = vpack.c.bf16 %v6463_v34, %v6462_v15  ;;  %v6465_v15 = vld [vmem:[%s8740_s12 + $0x12a] sm:$0xff] }
 0x7aa   : > { %v6750_v34 = vld [vmem:[%s8740_s12 + $0x123] sm:$0xff] }
 0x7ab   : > { %v6976_v44 = vadd.f32 %v6885_v58, %v6690_v56  ;;  %v7173_v20 = vpop.f32.mrf.mxu0  ;;  %v7425_v17 = vsel %vm7345_vm6, %v7305_v51, %v7385_v38 }
 0x7ac   : > { %v7462_v39 = vpack.c.bf16 %v7425_v17, %v7424_v30 }
 0x7ad   : > { %v7262_v60 = vadd.f32 %v7171_v27, %v6976_v44 }
 0x7ae   : > { %8578 = vmatmul.msk.bf16.gmra.mxu1 %vm367_vm0, %v7462_v39  ;;  %v6464_v39 = vld [vmem:[%s8740_s12 + $0x122] sm:$0xff] }
 0x7af   : > { %v7306_v63 = vadd.f32 %v10870_v48, %v7262_v60  ;;  %v6751_v60 = vld [vmem:[%s8740_s12 + $0x12b] sm:$0xff] }
 0x7b0   : > { %v6601_v41 = vpop.f32.mrf.mxu2 }
 0x7b1   : > { %v6691_v33 = vadd.f32 %v6601_v41, %v10591_v11  ;;  %v6887_v3 = vpop.f32.mrf.mxu3  ;;  %v7386_v27 = vmul.f32 0.01, %v7306_v63  ;;  %vm7346_vm7 = vcmp.ge.f32.partialorder %v7306_v63, 0.0 }
 0x7b3   : > { %v6977_v49 = vadd.f32 %v6887_v3, %v6691_v33  ;;  %v7176_v23 = vpop.f32.mrf.mxu0  ;;  %v6777_v3 = vpack.c.bf16 %v6751_v60, %v6750_v34  ;;  %v7038_v34 = vld [vmem:[%s8740_s12 + $0x134] sm:$0xff] }
 0x7b5   : > { %v7263_v14 = vadd.f32 %v7173_v20, %v6977_v49  ;;  %8496 = vmatmul.msk.bf16.gmra.mxu2 %vm367_vm0, %v6490_v25  ;;  %v7426_v20 = vsel %vm7346_vm7, %v7306_v63, %v7386_v27  ;;  %v7063_v25 = vpack.c.bf16 %v7037_v59, %v7036_v4 }
 0x7b6   : > { %8528 = vmatmul.msk.bf16.gmra.mxu3 %vm367_vm0, %v6776_v1  ;;  %8560 = vmatmul.msk.bf16.gmra.mxu0 %vm367_vm0, %v7062_v12 }
 0x7b7   : > { %v7307_v11 = vadd.f32 %v10870_v48, %v7263_v14 }
 0x7b8   : > { %v6604_v51 = vpop.f32.mrf.mxu2 }
 0x7b9   : > { %vm7347_vm8 = vcmp.ge.f32.partialorder %v7307_v11, 0.0  ;;  %v7387_v28 = vmul.f32 0.01, %v7307_v11  ;;  %v6692_v38 = vadd.f32 %v6604_v51, %v10597_v62  ;;  %v6890_v56 = vpop.f32.mrf.mxu3  ;;  %v6491_v62 = vpack.c.bf16 %v6465_v15, %v6464_v39  ;;  %v6753_v15 = vld [vmem:[%s8740_s12 + $0x13b] sm:$0xff] }
 0x7bb   : > { %v6978_v58 = vadd.f32 %v6890_v56, %v6692_v38  ;;  %v7178_v44 = vpop.f32.mrf.mxu0  ;;  %v7427_v30 = vsel %vm7347_vm8, %v7307_v11, %v7387_v28 }
 0x7bc   : > { %v7463_v17 = vpack.c.bf16 %v7427_v30, %v7426_v20  ;;  %v6466_v20 = vld [vmem:[%s8740_s12 + $0x132] sm:$0xff]  ;;  %v6467_v30 = vld [vmem:[%s8740_s12 + $0x13a] sm:$0xff] }
 0x7bd   : > { %v7264_v5 = vadd.f32 %v7176_v23, %v6978_v58 }
 0x7be   : > { %8579 = vmatmul.msk.bf16.gmra.mxu1 %vm367_vm0, %v7463_v17  ;;  %v6752_v17 = vld [vmem:[%s8740_s12 + $0x133] sm:$0xff] }
 0x7bf   : > { %v7308_v1 = vadd.f32 %v10870_v48, %v7264_v5  ;;  %v7039_v5 = vld [vmem:[%s8740_s12 + $0x13c] sm:$0xff] }
 0x7c0   : > { %v6606_v61 = vpop.f32.mrf.mxu2 }
 0x7c1   : > { %v6693_v41 = vadd.f32 %v6606_v61, %v10607_v36  ;;  %v6892_v33 = vpop.f32.mrf.mxu3  ;;  %v7388_v23 = vmul.f32 0.01, %v7308_v1  ;;  %vm7348_vm9 = vcmp.ge.f32.partialorder %v7308_v1, 0.0  ;;  %v6778_v61 = vpack.c.bf16 %v6753_v15, %v6752_v17 }
 0x7c3   : > { %v6979_v12 = vadd.f32 %v6892_v33, %v6693_v41  ;;  %v7181_v63 = vpop.f32.mrf.mxu0  ;;  %v7428_v56 = vsel %vm7348_vm9, %v7308_v1, %v7388_v23  ;;  %v7064_v41 = vpack.c.bf16 %v7039_v5, %v7038_v34 }
 0x7c5   : > { %v7265_v49 = vadd.f32 %v7178_v44, %v6979_v12  ;;  %8497 = vmatmul.msk.bf16.gmra.mxu2 %vm367_vm0, %v6491_v62 }
 0x7c6   : > { %8529 = vmatmul.msk.bf16.gmra.mxu3 %vm367_vm0, %v6777_v3  ;;  %8561 = vmatmul.msk.bf16.gmra.mxu0 %vm367_vm0, %v7063_v25 }
 0x7c7   : > { %v7309_v36 = vadd.f32 %v10870_v48, %v7265_v49 }
 0x7c8   : > { %v6609_v14 = vpop.f32.mrf.mxu2 }
 0x7c9   : > { %vm7349_vm10 = vcmp.ge.f32.partialorder %v7309_v36, 0.0  ;;  %v7389_v27 = vmul.f32 0.01, %v7309_v36  ;;  %v6694_v11 = vadd.f32 %v6609_v14, %v10613_v50  ;;  %v6895_v51 = vpop.f32.mrf.mxu3  ;;  %v6492_v50 = vpack.c.bf16 %v6467_v30, %v6466_v20  ;;  %v7040_v20 = vld [vmem:[%s8740_s12 + $0x144] sm:$0xff]  ;;  %v7041_v30 = vld [vmem:[%s8740_s12 + $0x14c] sm:$0xff] }
 0x7ca   : > { %v7065_v5 = vpack.c.bf16 %v7041_v30, %v7040_v20 }
 0x7cb   : > { %v6980_v28 = vadd.f32 %v6895_v51, %v6694_v11  ;;  %v7183_v38 = vpop.f32.mrf.mxu0  ;;  %v7429_v58 = vsel %vm7349_vm10, %v7309_v36, %v7389_v27 }
 0x7cc   : > { %v7464_v44 = vpack.c.bf16 %v7429_v58, %v7428_v56  ;;  %v6754_v56 = vld [vmem:[%s8740_s12 + $0x143] sm:$0xff] }
 0x7cd   : > { %v7266_v39 = vadd.f32 %v7181_v63, %v6980_v28  ;;  %v6468_v28 = vld [vmem:[%s8740_s12 + $0x142] sm:$0xff] }
 0x7ce   : > { %8580 = vmatmul.msk.bf16.gmra.mxu1 %vm367_vm0, %v7464_v44  ;;  %v6755_v44 = vld [vmem:[%s8740_s12 + $0x14b] sm:$0xff] }
 0x7cf   : > { %v7310_v33 = vadd.f32 %v10870_v48, %v7266_v39  ;;  %v6779_v34 = vpack.c.bf16 %v6755_v44, %v6754_v56 }
 0x7d0   : > { %v6611_v60 = vpop.f32.mrf.mxu2 }
 0x7d1   : > { %v6695_v4 = vadd.f32 %v6611_v60, %v10623_v0  ;;  %v6897_v59 = vpop.f32.mrf.mxu3  ;;  %v7390_v1 = vmul.f32 0.01, %v7310_v33  ;;  %vm7350_vm11 = vcmp.ge.f32.partialorder %v7310_v33, 0.0 }
 0x7d3   : > { %v6981_v62 = vadd.f32 %v6897_v59, %v6695_v4  ;;  %v7186_v3 = vpop.f32.mrf.mxu0  ;;  %v7430_v27 = vsel %vm7350_vm11, %v7310_v33, %v7390_v1 }
 0x7d5   : > { %v7267_v25 = vadd.f32 %v7183_v38, %v6981_v62  ;;  %8498 = vmatmul.msk.bf16.gmra.mxu2 %vm367_vm0, %v6492_v50  ;;  %v6469_v38 = vld [vmem:[%s8740_s12 + $0x14a] sm:$0xff] }
 0x7d6   : > { %8530 = vmatmul.msk.bf16.gmra.mxu3 %vm367_vm0, %v6778_v61  ;;  %8562 = vmatmul.msk.bf16.gmra.mxu0 %vm367_vm0, %v7064_v41 }
 0x7d7   : > { %v7311_v0 = vadd.f32 %v10870_v48, %v7267_v25 }
 0x7d8   : > { %v6614_v12 = vpop.f32.mrf.mxu2 }
 0x7d9   : > { %vm7351_vm12 = vcmp.ge.f32.partialorder %v7311_v0, 0.0  ;;  %v7391_v63 = vmul.f32 0.01, %v7311_v0  ;;  %v6696_v49 = vadd.f32 %v6614_v12, %v10629_v37  ;;  %v6900_v23 = vpop.f32.mrf.mxu3  ;;  %v6493_v37 = vpack.c.bf16 %v6469_v38, %v6468_v28 }
 0x7db   : > { %v6982_v36 = vadd.f32 %v6900_v23, %v6696_v49  ;;  %v7188_v14 = vpop.f32.mrf.mxu0  ;;  %v7431_v11 = vsel %vm7351_vm12, %v7311_v0, %v7391_v63  ;;  %v6470_v49 = vld [vmem:[%s8740_s12 + $0x152] sm:$0xff]  ;;  %v6471_v23 = vld [vmem:[%s8740_s12 + $0x15a] sm:$0xff] }
 0x7dc   : > { %v7465_v51 = vpack.c.bf16 %v7431_v11, %v7430_v27  ;;  %v6757_v27 = vld [vmem:[%s8740_s12 + $0x15b] sm:$0xff] }
 0x7dd   : > { %v7268_v58 = vadd.f32 %v7186_v3, %v6982_v36  ;;  %v6756_v36 = vld [vmem:[%s8740_s12 + $0x153] sm:$0xff] }
 0x7de   : > { %8581 = vmatmul.msk.bf16.gmra.mxu1 %vm367_vm0, %v7465_v51  ;;  %v7042_v11 = vld [vmem:[%s8740_s12 + $0x154] sm:$0xff]  ;;  %v7043_v51 = vld [vmem:[%s8740_s12 + $0x15c] sm:$0xff] }
 0x7df   : > { %v7312_v60 = vadd.f32 %v10870_v48, %v7268_v58  ;;  %v6780_v58 = vpack.c.bf16 %v6757_v27, %v6756_v36  ;;  %v7066_v44 = vpack.c.bf16 %v7043_v51, %v7042_v11  ;;  %v10992_v27 = vpop.f32.mrf.mxu1 }
 0x7e0   : > { %v6616_v17 = vpop.f32.mrf.mxu2 }
 0x7e1   : > { %v6697_v39 = vadd.f32 %v6616_v17, %v10639_v31  ;;  %v6902_v15 = vpop.f32.mrf.mxu3  ;;  %v7392_v61 = vmul.f32 0.01, %v7312_v60  ;;  %vm7352_vm13 = vcmp.ge.f32.partialorder %v7312_v60, 0.0 }
 0x7e3   : > { %v6983_v4 = vadd.f32 %v6902_v15, %v6697_v39  ;;  %v7191_v59 = vpop.f32.mrf.mxu0  ;;  %v7432_v0 = vsel %vm7352_vm13, %v7312_v60, %v7392_v61 }
 0x7e5   : > { %v7269_v50 = vadd.f32 %v7188_v14, %v6983_v4  ;;  %8499 = vmatmul.msk.bf16.gmra.mxu2 %vm367_vm0, %v6493_v37 }
 0x7e6   : > { %8531 = vmatmul.msk.bf16.gmra.mxu3 %vm367_vm0, %v6779_v34  ;;  %8563 = vmatmul.msk.bf16.gmra.mxu0 %vm367_vm0, %v7065_v5 }
 0x7e7   : > { %v7313_v31 = vadd.f32 %v10870_v48, %v7269_v50 }
 0x7e8   : > { %v6619_v41 = vpop.f32.mrf.mxu2 }
 0x7e9   : > { %vm7353_vm14 = vcmp.ge.f32.partialorder %v7313_v31, 0.0  ;;  %v7393_v33 = vmul.f32 0.01, %v7313_v31  ;;  %v6698_v62 = vadd.f32 %v6619_v41, %v10645_v35  ;;  %v6905_v3 = vpop.f32.mrf.mxu3  ;;  %v6494_v35 = vpack.c.bf16 %v6471_v23, %v6470_v49  ;;  %v6472_v41 = vld [vmem:[%s8740_s12 + $0x162] sm:$0xff] }
 0x7eb   : > { %v6984_v25 = vadd.f32 %v6905_v3, %v6698_v62  ;;  %v7193_v1 = vpop.f32.mrf.mxu0  ;;  %v7433_v12 = vsel %vm7353_vm14, %v7313_v31, %v7393_v33  ;;  %v6473_v33 = vld [vmem:[%s8740_s12 + $0x16a] sm:$0xff]  ;;  %v6415_v3 = vadd.f32 %v10659_v43, %v10671_v26 }
 0x7ec   : > { %v7466_v63 = vpack.c.bf16 %v7433_v12, %v7432_v0  ;;  %v6758_v62 = vld [vmem:[%s8740_s12 + $0x163] sm:$0xff]  ;;  %v7045_v12 = vld [vmem:[%s8740_s12 + $0x16c] sm:$0xff]  ;;  %v6495_v23 = vpack.c.bf16 %v6473_v33, %v6472_v41 }
 0x7ed   : > { %v7270_v14 = vadd.f32 %v7191_v59, %v6984_v25  ;;  %v7044_v0 = vld [vmem:[%s8740_s12 + $0x164] sm:$0xff] }
 0x7ee   : > { %8582 = vmatmul.msk.bf16.gmra.mxu1 %vm367_vm0, %v7466_v63 }
 0x7ef   : > { %v7314_v20 = vadd.f32 %v10870_v48, %v7270_v14  ;;  %v7067_v14 = vpack.c.bf16 %v7045_v12, %v7044_v0 }
 0x7f0   : > { %v6621_v28 = vpop.f32.mrf.mxu2 }
 0x7f1   : > { %v6699_v38 = vadd.f32 %v6621_v28, %v10655_v2  ;;  %v6907_v56 = vpop.f32.mrf.mxu3  ;;  %v7394_v15 = vmul.f32 0.01, %v7314_v20  ;;  %vm7354_vm15 = vcmp.ge.f32.partialorder %v7314_v20, 0.0 }
 0x7f3   : > { %v6985_v30 = vadd.f32 %v6907_v56, %v6699_v38  ;;  %v7196_v17 = vpop.f32.mrf.mxu0  ;;  %v7434_v50 = vsel %vm7354_vm15, %v7314_v20, %v7394_v15 }
 0x7f5   : > { %v7271_v39 = vadd.f32 %v7193_v1, %v6985_v30  ;;  %8500 = vmatmul.msk.bf16.gmra.mxu2 %vm367_vm0, %v6494_v35  ;;  %v6759_v1 = vld [vmem:[%s8740_s12 + $0x16b] sm:$0xff]  ;;  %v11003_v35 = vld [vmem:[%s11227_s4] ss:$0 sm:$0xff] }
 0x7f6   : > { %8532 = vmatmul.msk.bf16.gmra.mxu3 %vm367_vm0, %v6780_v58  ;;  %8564 = vmatmul.msk.bf16.gmra.mxu0 %vm367_vm0, %v7066_v44  ;;  %v6781_v36 = vpack.c.bf16 %v6759_v1, %v6758_v62 }
 0x7f7   : > { %v7315_v2 = vadd.f32 %v10870_v48, %v7271_v39 }
 0x7f8   : > { %v6624_v37 = vpop.f32.mrf.mxu2 }
 0x7f9   : > { %vm7355_vm1 = vcmp.ge.f32.partialorder %v7315_v2, 0.0  ;;  %v7395_v34 = vmul.f32 0.01, %v7315_v2  ;;  %v6700_v5 = vadd.f32 %v6624_v37, %v10663_v42  ;;  %v6910_v60 = vpop.f32.mrf.mxu3 }
 0x7fb   : > { %v6986_v4 = vadd.f32 %v6910_v60, %v6700_v5  ;;  %v7198_v59 = vpop.f32.mrf.mxu0  ;;  %v7435_v61 = vsel %vm7355_vm1, %v7315_v2, %v7395_v34  ;;  %v6475_v5 = vld [vmem:[%s8740_s12 + $0x17a] sm:$0xff] }
 0x7fc   : > { %v7467_v31 = vpack.c.bf16 %v7435_v61, %v7434_v50  ;;  %v6760_v60 = vld [vmem:[%s8740_s12 + $0x173] sm:$0xff]  ;;  %v6761_v50 = vld [vmem:[%s8740_s12 + $0x17b] sm:$0xff] }
 0x7fd   : > { %v7272_v25 = vadd.f32 %v7196_v17, %v6986_v4  ;;  %v6417_v4 = vadd.f32 %v10677_v52, %v10692_v7  ;;  %v7046_v61 = vld [vmem:[%s8740_s12 + $0x174] sm:$0xff] }
 0x7fe   : > { %8583 = vmatmul.msk.bf16.gmra.mxu1 %vm367_vm0, %v7467_v31  ;;  %v7047_v31 = vld [vmem:[%s8740_s12 + $0x17c] sm:$0xff] }
 0x7ff   : > { %v7316_v11 = vadd.f32 %v10870_v48, %v7272_v25  ;;  %v6782_v25 = vpack.c.bf16 %v6761_v50, %v6760_v60  ;;  %v7068_v1 = vpack.c.bf16 %v7047_v31, %v7046_v61 }
 0x800   : > { %v6626_v63 = vpop.f32.mrf.mxu2 }
 0x801   : > { %v6701_v42 = vadd.f32 %v6626_v63, %v6415_v3  ;;  %v6912_v49 = vpop.f32.mrf.mxu3  ;;  %v7396_v43 = vmul.f32 0.01, %v7316_v11  ;;  %vm7356_vm2 = vcmp.ge.f32.partialorder %v7316_v11, 0.0 }
 0x803   : > { %v6987_v51 = vadd.f32 %v6912_v49, %v6701_v42  ;;  %v7201_v28 = vpop.f32.mrf.mxu0  ;;  %v7436_v15 = vsel %vm7356_vm2, %v7316_v11, %v7396_v43 }
 0x805   : > { %v7273_v38 = vadd.f32 %v7198_v59, %v6987_v51  ;;  %8501 = vmatmul.msk.bf16.gmra.mxu2 %vm367_vm0, %v6495_v23 }
 0x806   : > { %8533 = vmatmul.msk.bf16.gmra.mxu3 %vm367_vm0, %v6781_v36  ;;  %8565 = vmatmul.msk.bf16.gmra.mxu0 %vm367_vm0, %v7067_v14 }
 0x807   : > { %v7317_v26 = vadd.f32 %v10870_v48, %v7273_v38 }
 0x808   : > { %v6629_v56 = vpop.f32.mrf.mxu2 }
 0x809   : > { %vm7357_vm3 = vcmp.ge.f32.partialorder %v7317_v26, 0.0  ;;  %v7397_v58 = vmul.f32 0.01, %v7317_v26  ;;  %v6702_v44 = vadd.f32 %v6629_v56, %v10681_v47  ;;  %v6915_v20 = vpop.f32.mrf.mxu3  ;;  %v6474_v47 = vld [vmem:[%s8740_s12 + $0x172] sm:$0xff] }
 0x80a   : > { %v6496_v3 = vpack.c.bf16 %v6475_v5, %v6474_v47 }
 0x80b   : > { %v6988_v30 = vadd.f32 %v6915_v20, %v6702_v44  ;;  %v7569_v17 = vpop.f32.mrf.mxu1  ;;  %v7203_v39 = vpop.f32.mrf.mxu0  ;;  %v7437_v2 = vsel %vm7357_vm3, %v7317_v26, %v7397_v58  ;;  %v6476_v20 = vld [vmem:[%s8740_s12 + $0x182] sm:$0xff] }
 0x80c   : > { %v7570_v37 = vadd.f32 %v11003_v35, %v7569_v17  ;;  %v7468_v34 = vpack.c.bf16 %v7437_v2, %v7436_v15  ;;  %v6762_v17 = vld [vmem:[%s8740_s12 + $0x183] sm:$0xff]  ;;  %v6763_v15 = vld [vmem:[%s8740_s12 + $0x18b] sm:$0xff] }
 0x80d   : > { %v7274_v59 = vadd.f32 %v7201_v28, %v6988_v30  ;;  %v6477_v30 = vld [vmem:[%s8740_s12 + $0x18a] sm:$0xff] }
 0x80e   : > { %7670 = vst.msk [vmem:[%s11009_s19] sm:$0xff] %vm7669_vm4, %v7570_v37  ;;  %8584 = vmatmul.msk.bf16.gmra.mxu1 %vm367_vm0, %v7468_v34  ;;  %v7048_v2 = vld [vmem:[%s8740_s12 + $0x184] sm:$0xff]  ;;  %v7049_v37 = vld [vmem:[%s8740_s12 + $0x18c] sm:$0xff]  ;;  %v6497_v60 = vpack.c.bf16 %v6477_v30, %v6476_v20 }
 0x80f   : > { %v7318_v0 = vadd.f32 %v10870_v48, %v7274_v59  ;;  %v7069_v59 = vpack.c.bf16 %v7049_v37, %v7048_v2 }
 0x810   : > { %v6631_v41 = vpop.f32.mrf.mxu2 }
 0x811   : > { %v6703_v33 = vadd.f32 %v6631_v41, %v6417_v4  ;;  %v6917_v62 = vpop.f32.mrf.mxu3  ;;  %v7398_v52 = vmul.f32 0.01, %v7318_v0  ;;  %vm7358_vm5 = vcmp.ge.f32.partialorder %v7318_v0, 0.0  ;;  %v6783_v4 = vpack.c.bf16 %v6763_v15, %v6762_v17 }
 0x813   : > { %v6989_v12 = vadd.f32 %v6917_v62, %v6703_v33  ;;  %v7571_v63 = vpop.f32.mrf.mxu1  ;;  %v7206_v42 = vpop.f32.mrf.mxu0  ;;  %v7438_v26 = vsel %vm7358_vm5, %v7318_v0, %v7398_v52 }
 0x814   : > { %v7572_v49 = vadd.f32 %v11003_v35, %v7571_v63 }
 0x815   : > { %v7275_v23 = vadd.f32 %v7203_v39, %v6989_v12  ;;  %8502 = vmatmul.msk.bf16.gmra.mxu2 %vm367_vm0, %v6496_v3 }
 0x816   : > { %7671 = vst.msk [vmem:[%s11009_s19 + $0x8] sm:$0xff] %vm7669_vm4, %v7572_v49  ;;  %8534 = vmatmul.msk.bf16.gmra.mxu3 %vm367_vm0, %v6782_v25  ;;  %8566 = vmatmul.msk.bf16.gmra.mxu0 %vm367_vm0, %v7068_v1 }
 0x817   : > { %v7319_v7 = vadd.f32 %v10870_v48, %v7275_v23 }
 0x818   : > { %v6634_v36 = vpop.f32.mrf.mxu2 }
 0x819   : > { %vm7359_vm6 = vcmp.ge.f32.partialorder %v7319_v7, 0.0  ;;  %v7399_v14 = vmul.f32 0.01, %v7319_v7  ;;  %v6704_v11 = vadd.f32 %v6634_v36, %v10702_v29  ;;  %v6920_v51 = vpop.f32.mrf.mxu3  ;;  %v6419_v29 = vadd.f32 %v10698_v8, %v10710_v10 }
 0x81a   : > { %v6421_v36 = vadd.f32 %v10716_v6, %v10728_v45 }
 0x81b   : > { %v6990_v28 = vadd.f32 %v6920_v51, %v6704_v11  ;;  %v7574_v38 = vpop.f32.mrf.mxu1  ;;  %v7208_v43 = vpop.f32.mrf.mxu0  ;;  %v7439_v56 = vsel %vm7359_vm6, %v7319_v7, %v7399_v14 }
 0x81c   : > { %v7575_v58 = vadd.f32 %v11003_v35, %v7574_v38  ;;  %v7469_v44 = vpack.c.bf16 %v7439_v56, %v7438_v26 }
 0x81d   : > { %v7276_v39 = vadd.f32 %v7206_v42, %v6990_v28 }
 0x81e   : > { %7672 = vst.msk [vmem:[%s11009_s19 + $0x10] sm:$0xff] %vm7669_vm4, %v7575_v58  ;;  %8585 = vmatmul.msk.bf16.gmra.mxu1 %vm367_vm0, %v7469_v44 }
 0x81f   : > { %v7320_v50 = vadd.f32 %v10870_v48, %v7276_v39 }
 0x820   : > { %v6636_v34 = vpop.f32.mrf.mxu2 }
 0x821   : > { %v6705_v47 = vadd.f32 %v6636_v34, %v6419_v29  ;;  %v6922_v5 = vpop.f32.mrf.mxu3  ;;  %v7400_v8 = vmul.f32 0.01, %v7320_v50  ;;  %vm7360_vm7 = vcmp.ge.f32.partialorder %v7320_v50, 0.0 }
 0x823   : > { %v6991_v61 = vadd.f32 %v6922_v5, %v6705_v47  ;;  %v7576_v31 = vpop.f32.mrf.mxu1  ;;  %v7211_v41 = vpop.f32.mrf.mxu0  ;;  %v7440_v49 = vsel %vm7360_vm7, %v7320_v50, %v7400_v8  ;;  %v11238_v5 = vld [vmem:[#allocation2_spill] sm:$0xff] }
 0x824   : > { %v7577_v33 = vadd.f32 %v11003_v35, %v7576_v31 }
 0x825   : > { %v7277_v62 = vadd.f32 %v7208_v43, %v6991_v61  ;;  %8503 = vmatmul.msk.bf16.gmra.mxu2 %vm367_vm0, %v6497_v60  ;;  %v6423_v60 = vadd.f32 %v11238_v5, %v10745_v54 }
 0x826   : > { %7673 = vst.msk [vmem:[%s11009_s19 + $0x18] sm:$0xff] %vm7669_vm4, %v7577_v33  ;;  %8535 = vmatmul.msk.bf16.gmra.mxu3 %vm367_vm0, %v6783_v4  ;;  %8567 = vmatmul.msk.bf16.gmra.mxu0 %vm367_vm0, %v7069_v59 }
 0x827   : > { %v7321_v10 = vadd.f32 %v10870_v48, %v7277_v62 }
 0x828   : > { %v6639_v3 = vpop.f32.mrf.mxu2 }
 0x829   : > { %vm7361_vm8 = vcmp.ge.f32.partialorder %v7321_v10, 0.0  ;;  %v7401_v25 = vmul.f32 0.01, %v7321_v10  ;;  %v6706_v1 = vadd.f32 %v6639_v3, %v10721_v40  ;;  %v6925_v0 = vpop.f32.mrf.mxu3 }
 0x82b   : > { %v6992_v12 = vadd.f32 %v6925_v0, %v6706_v1  ;;  %v7579_v63 = vpop.f32.mrf.mxu1  ;;  %v7213_v42 = vpop.f32.mrf.mxu0  ;;  %v7441_v23 = vsel %vm7361_vm8, %v7321_v10, %v7401_v25 }
 0x82c   : > { %v7580_v52 = vadd.f32 %v11003_v35, %v7579_v63  ;;  %v7470_v7 = vpack.c.bf16 %v7441_v23, %v7440_v49 }
 0x82d   : > { %v7278_v14 = vadd.f32 %v7211_v41, %v6992_v12 }
 0x82e   : > { %7674 = vst.msk [vmem:[%s11009_s19 + $0x20] sm:$0xff] %vm7669_vm4, %v7580_v52  ;;  %8586 = vmatmul.msk.bf16.gmra.mxu1 %vm367_vm0, %v7470_v7 }
 0x82f   : > { %v7322_v28 = vadd.f32 %v10870_v48, %v7278_v14 }
 0x830   : > { %v6641_v11 = vpop.f32.mrf.mxu2 }
 0x831   : > { %v6707_v40 = vadd.f32 %v6641_v11, %v6421_v36  ;;  %v6927_v51 = vpop.f32.mrf.mxu3  ;;  %v7402_v44 = vmul.f32 0.01, %v7322_v28  ;;  %vm7362_vm9 = vcmp.ge.f32.partialorder %v7322_v28, 0.0  ;;  %v11239_v36 = vld [vmem:[#allocation3_spill] sm:$0xff] }
 0x832   : > { %v6425_v14 = vadd.f32 %v11239_v36, %v10762_v32 }
 0x833   : > { %v6993_v38 = vadd.f32 %v6927_v51, %v6707_v40  ;;  %v7581_v43 = vpop.f32.mrf.mxu1  ;;  %v7216_v26 = vpop.f32.mrf.mxu0  ;;  %v7442_v2 = vsel %vm7362_vm9, %v7322_v28, %v7402_v44 }
 0x834   : > { %v7582_v56 = vadd.f32 %v11003_v35, %v7581_v43 }
 0x835   : > { %v7279_v58 = vadd.f32 %v7213_v42, %v6993_v38 }
 0x836   : > { %7675 = vst.msk [vmem:[%s11009_s19 + $0x28] sm:$0xff] %vm7669_vm4, %v7582_v56 }
 0x837   : > { %v7323_v20 = vadd.f32 %v10870_v48, %v7279_v58 }
 0x838   : > { %v6644_v6 = vpop.f32.mrf.mxu2 }
 0x839   : > { %vm7363_vm10 = vcmp.ge.f32.partialorder %v7323_v20, 0.0  ;;  %v7403_v45 = vmul.f32 0.01, %v7323_v20  ;;  %v6708_v30 = vadd.f32 %v6644_v6, %v10738_v13  ;;  %v6930_v17 = vpop.f32.mrf.mxu3 }
 0x83b   : > { %v6994_v29 = vadd.f32 %v6930_v17, %v6708_v30  ;;  %v7584_v39 = vpop.f32.mrf.mxu1  ;;  %v7218_v15 = vpop.f32.mrf.mxu0  ;;  %v7443_v37 = vsel %vm7363_vm10, %v7323_v20, %v7403_v45 }
 0x83c   : > { %v7585_v34 = vadd.f32 %v11003_v35, %v7584_v39  ;;  %v7471_v47 = vpack.c.bf16 %v7443_v37, %v7442_v2 }
 0x83d   : > { %v7280_v4 = vadd.f32 %v7216_v26, %v6994_v29 }
 0x83e   : > { %7676 = vst.msk [vmem:[%s11009_s19 + $0x30] sm:$0xff] %vm7669_vm4, %v7585_v34  ;;  %8587 = vmatmul.msk.bf16.gmra.mxu1 %vm367_vm0, %v7471_v47  ;;  %v11240_v47 = vld [vmem:[#allocation4_spill] sm:$0xff] }
 0x83f   : > { %v7324_v61 = vadd.f32 %v10870_v48, %v7280_v4  ;;  %v6427_v5 = vadd.f32 %v11240_v47, %v10779_v46 }
 0x840   : > { %v6646_v59 = vpop.f32.mrf.mxu2 }
 0x841   : > { %v6709_v13 = vadd.f32 %v6646_v59, %v6423_v60  ;;  %v6932_v50 = vpop.f32.mrf.mxu3  ;;  %v7404_v10 = vmul.f32 0.01, %v7324_v61  ;;  %vm7364_vm11 = vcmp.ge.f32.partialorder %v7324_v61, 0.0 }
 0x843   : > { %v6995_v31 = vadd.f32 %v6932_v50, %v6709_v13  ;;  %v7586_v41 = vpop.f32.mrf.mxu1  ;;  %v7221_v33 = vpop.f32.mrf.mxu0  ;;  %v7444_v49 = vsel %vm7364_vm11, %v7324_v61, %v7404_v10 }
 0x844   : > { %v7587_v62 = vadd.f32 %v11003_v35, %v7586_v41 }
 0x845   : > { %v7281_v8 = vadd.f32 %v7218_v15, %v6995_v31 }
 0x846   : > { %7677 = vst.msk [vmem:[%s11009_s19 + $0x38] sm:$0xff] %vm7669_vm4, %v7587_v62 }
 0x847   : > { %v7325_v3 = vadd.f32 %v10870_v48, %v7281_v8 }
 0x848   : > { %v6649_v54 = vpop.f32.mrf.mxu2 }
 0x849   : > { %vm7365_vm12 = vcmp.ge.f32.partialorder %v7325_v3, 0.0  ;;  %v7405_v25 = vmul.f32 0.01, %v7325_v3  ;;  %v6710_v1 = vadd.f32 %v6649_v54, %v10755_v18  ;;  %v6935_v0 = vpop.f32.mrf.mxu3 }
 0x84b   : > { %v6996_v12 = vadd.f32 %v6935_v0, %v6710_v1  ;;  %v7589_v63 = vpop.f32.mrf.mxu1  ;;  %v7223_v42 = vpop.f32.mrf.mxu0  ;;  %v7445_v23 = vsel %vm7365_vm12, %v7325_v3, %v7405_v25 }
 0x84c   : > { %v7590_v52 = vadd.f32 %v11003_v35, %v7589_v63  ;;  %v7472_v7 = vpack.c.bf16 %v7445_v23, %v7444_v49 }
 0x84d   : > { %v7282_v11 = vadd.f32 %v7221_v33, %v6996_v12 }
 0x84e   : > { %7678 = vst.msk [vmem:[%s11009_s19 + $0x40] sm:$0xff] %vm7669_vm4, %v7590_v52  ;;  %8588 = vmatmul.msk.bf16.gmra.mxu1 %vm367_vm0, %v7472_v7 }
 0x84f   : > { %v7326_v28 = vadd.f32 %v10870_v48, %v7282_v11 }
 0x850   : > { %v6651_v40 = vpop.f32.mrf.mxu2 }
 0x851   : > { %v6711_v18 = vadd.f32 %v6651_v40, %v6425_v14  ;;  %v6937_v51 = vpop.f32.mrf.mxu3  ;;  %v7406_v44 = vmul.f32 0.01, %v7326_v28  ;;  %vm7366_vm13 = vcmp.ge.f32.partialorder %v7326_v28, 0.0  ;;  %v11110_v14 = vld [vmem:[%s11225_s2] ss:$0 sm:$0xff] }
 0x853   : > { %v6997_v38 = vadd.f32 %v6937_v51, %v6711_v18  ;;  %v7591_v43 = vpop.f32.mrf.mxu1  ;;  %v7226_v26 = vpop.f32.mrf.mxu0  ;;  %v7446_v15 = vsel %vm7366_vm13, %v7326_v28, %v7406_v44 }
 0x854   : > { %v7592_v56 = vadd.f32 %v11003_v35, %v7591_v43 }
 0x855   : > { %v7283_v58 = vadd.f32 %v7223_v42, %v6997_v38 }
 0x856   : > { %7679 = vst.msk [vmem:[%s11009_s19 + $0x48] sm:$0xff] %vm7669_vm4, %v7592_v56 }
 0x857   : > { %v7327_v20 = vadd.f32 %v10870_v48, %v7283_v58 }
 0x858   : > { %v6654_v32 = vpop.f32.mrf.mxu2 }
 0x859   : > { %vm7367_vm14 = vcmp.ge.f32.partialorder %v7327_v20, 0.0  ;;  %v7407_v6 = vmul.f32 0.01, %v7327_v20  ;;  %v6712_v45 = vadd.f32 %v6654_v32, %v10772_v16  ;;  %v6940_v30 = vpop.f32.mrf.mxu3 }
 0x85b   : > { %v6998_v17 = vadd.f32 %v6940_v30, %v6712_v45  ;;  %v7594_v29 = vpop.f32.mrf.mxu1  ;;  %v7228_v39 = vpop.f32.mrf.mxu0  ;;  %v7447_v2 = vsel %vm7367_vm14, %v7327_v20, %v7407_v6 }
 0x85c   : > { %v7595_v37 = vadd.f32 %v11003_v35, %v7594_v29  ;;  %v7473_v34 = vpack.c.bf16 %v7447_v2, %v7446_v15 }
 0x85d   : > { %v7284_v60 = vadd.f32 %v7226_v26, %v6998_v17 }
 0x85e   : > { %7680 = vst.msk [vmem:[%s11009_s19 + $0x50] sm:$0xff] %vm7669_vm4, %v7595_v37  ;;  %8589 = vmatmul.msk.bf16.gmra.mxu1 %vm367_vm0, %v7473_v34 }
 0x85f   : > { %v7328_v13 = vadd.f32 %v10870_v48, %v7284_v60 }
 0x860   : > { %v6656_v4 = vpop.f32.mrf.mxu2 }
 0x861   : > { %v6713_v16 = vadd.f32 %v6656_v4, %v6427_v5  ;;  %v6942_v59 = vpop.f32.mrf.mxu3  ;;  %v7408_v62 = vmul.f32 0.01, %v7328_v13  ;;  %vm7368_vm15 = vcmp.ge.f32.partialorder %v7328_v13, 0.0 }
 0x863   : > { %v6999_v50 = vadd.f32 %v6942_v59, %v6713_v16  ;;  %v7596_v61 = vpop.f32.mrf.mxu1  ;;  %v7231_v31 = vpop.f32.mrf.mxu0  ;;  %v7448_v12 = vsel %vm7368_vm15, %v7328_v13, %v7408_v62 }
 0x864   : > { %v7597_v41 = vadd.f32 %v11003_v35, %v7596_v61 }
 0x865   : > { %v7285_v33 = vadd.f32 %v7228_v39, %v6999_v50  ;;  %v11242_v39 = vld [vmem:[#allocation6_spill] sm:$0xff] }
 0x866   : > { %7681 = vst.msk [vmem:[%s11009_s19 + $0x58] sm:$0xff] %vm7669_vm4, %v7597_v41  ;;  %v6431_v15 = vadd.f32 %v11242_v39, %v10813_v21 }
 0x867   : > { %v7329_v8 = vadd.f32 %v10870_v48, %v7285_v33  ;;  %v11241_v48 = vld [vmem:[#allocation5_spill] sm:$0xff] }
 0x868   : > { %v6659_v46 = vpop.f32.mrf.mxu2  ;;  %v6429_v23 = vadd.f32 %v11241_v48, %v10796_v22 }
 0x869   : > { %vm7369_vm1 = vcmp.ge.f32.partialorder %v7329_v8, 0.0  ;;  %v7409_v10 = vmul.f32 0.01, %v7329_v8  ;;  %v6714_v3 = vadd.f32 %v6659_v46, %v10789_v55  ;;  %v6945_v54 = vpop.f32.mrf.mxu3 }
 0x86b   : > { %v7000_v25 = vadd.f32 %v6945_v54, %v6714_v3  ;;  %v7599_v1 = vpop.f32.mrf.mxu1  ;;  %v7233_v0 = vpop.f32.mrf.mxu0  ;;  %v7449_v63 = vsel %vm7369_vm1, %v7329_v8, %v7409_v10 }
 0x86c   : > { %v7600_v42 = vadd.f32 %v11003_v35, %v7599_v1  ;;  %v7474_v49 = vpack.c.bf16 %v7449_v63, %v7448_v12 }
 0x86d   : > { %v7286_v52 = vadd.f32 %v7231_v31, %v7000_v25  ;;  %v11243_v25 = vld [vmem:[#allocation7_spill] sm:$0xff] }
 0x86e   : > { %7682 = vst.msk [vmem:[%s11009_s19 + $0x60] sm:$0xff] %vm7669_vm4, %v7600_v42  ;;  %8590 = vmatmul.msk.bf16.gmra.mxu1 %vm367_vm0, %v7474_v49  ;;  %v6433_v1 = vadd.f32 %v11243_v25, %v10830_v57 }
 0x86f   : > { %v7330_v11 = vadd.f32 %v11110_v14, %v7286_v52 }
 0x870   : > { %v6661_v7 = vpop.f32.mrf.mxu2 }
 0x871   : > { %v6715_v55 = vadd.f32 %v6661_v7, %v6429_v23  ;;  %v6947_v36 = vpop.f32.mrf.mxu3  ;;  %v7410_v22 = vmul.f32 0.01, %v7330_v11  ;;  %vm7370_vm2 = vcmp.ge.f32.partialorder %v7330_v11, 0.0 }
 0x873   : > { %v7001_v40 = vadd.f32 %v6947_v36, %v6715_v55  ;;  %v7601_v18 = vpop.f32.mrf.mxu1  ;;  %v7236_v51 = vpop.f32.mrf.mxu0  ;;  %v7450_v45 = vsel %vm7370_vm2, %v7330_v11, %v7410_v22 }
 0x874   : > { %v7602_v28 = vadd.f32 %v11003_v35, %v7601_v18 }
 0x875   : > { %v7287_v38 = vadd.f32 %v7233_v0, %v7001_v40 }
 0x876   : > { %7683 = vst.msk [vmem:[%s11009_s19 + $0x68] sm:$0xff] %vm7669_vm4, %v7602_v28 }
 0x877   : > { %v7331_v43 = vadd.f32 %v11110_v14, %v7287_v38 }
 0x878   : > { %v6664_v26 = vpop.f32.mrf.mxu2 }
 0x879   : > { %vm7371_vm3 = vcmp.ge.f32.partialorder %v7331_v43, 0.0  ;;  %v7411_v56 = vmul.f32 0.01, %v7331_v43  ;;  %v6716_v58 = vadd.f32 %v6664_v26, %v10806_v19  ;;  %v6950_v44 = vpop.f32.mrf.mxu3 }
 0x87b   : > { %v7002_v20 = vadd.f32 %v6950_v44, %v6716_v58  ;;  %v7604_v32 = vpop.f32.mrf.mxu1  ;;  %v7238_v6 = vpop.f32.mrf.mxu0  ;;  %v7451_v30 = vsel %vm7371_vm3, %v7331_v43, %v7411_v56  ;;  %v11244_v56 = vld [vmem:[#allocation8_spill] sm:$0xff] }
 0x87c   : > { %v7605_v17 = vadd.f32 %v11003_v35, %v7604_v32  ;;  %v7475_v29 = vpack.c.bf16 %v7451_v30, %v7450_v45  ;;  %v6435_v58 = vadd.f32 %v11244_v56, %v10847_v24 }
 0x87d   : > { %v7288_v2 = vadd.f32 %v7236_v51, %v7002_v20 }
 0x87e   : > { %7684 = vst.msk [vmem:[%s11009_s19 + $0x70] sm:$0xff] %vm7669_vm4, %v7605_v17  ;;  %8591 = vmatmul.msk.bf16.gmra.mxu1 %vm367_vm0, %v7475_v29 }
 0x87f   : > { %v7332_v47 = vadd.f32 %v11110_v14, %v7288_v2 }
 0x880   : > { %v6666_v37 = vpop.f32.mrf.mxu2 }
 0x881   : > { %v6717_v19 = vadd.f32 %v6666_v37, %v6431_v15  ;;  %v6952_v34 = vpop.f32.mrf.mxu3  ;;  %v7412_v13 = vmul.f32 0.01, %v7332_v47  ;;  %vm7372_vm5 = vcmp.ge.f32.partialorder %v7332_v47, 0.0 }
 0x883   : > { %v7003_v5 = vadd.f32 %v6952_v34, %v6717_v19  ;;  %v7606_v60 = vpop.f32.mrf.mxu1  ;;  %v7241_v4 = vpop.f32.mrf.mxu0  ;;  %v7452_v8 = vsel %vm7372_vm5, %v7332_v47, %v7412_v13  ;;  %v11245_v19 = vld [vmem:[#allocation9_spill] sm:$0xff] }
 0x884   : > { %v7607_v16 = vadd.f32 %v11003_v35, %v7606_v60 }
 0x885   : > { %v7289_v59 = vadd.f32 %v7238_v6, %v7003_v5 }
 0x886   : > { %7685 = vst.msk [vmem:[%s11009_s19 + $0x78] sm:$0xff] %vm7669_vm4, %v7607_v16 }
 0x887   : > { %v7333_v50 = vadd.f32 %v11110_v14, %v7289_v59 }
 0x888   : > { %v6669_v21 = vpop.f32.mrf.mxu2 }
 0x889   : > { %vm7373_vm6 = vcmp.ge.f32.partialorder %v7333_v50, 0.0  ;;  %v7413_v61 = vmul.f32 0.01, %v7333_v50  ;;  %v6718_v31 = vadd.f32 %v6669_v21, %v10823_v9  ;;  %v6955_v41 = vpop.f32.mrf.mxu3  ;;  %v11246_v21 = vld [vmem:[#allocation10_spill] sm:$0xff] }
 0x88b   : > { %v7004_v33 = vadd.f32 %v6955_v41, %v6718_v31  ;;  %v7609_v62 = vpop.f32.mrf.mxu1  ;;  %v7453_v46 = vsel %vm7373_vm6, %v7333_v50, %v7413_v61  ;;  %v7243_v3 = vpop.f32.mrf.mxu0  ;;  %v6437_v61 = vadd.f32 %v10992_v27, %v11246_v21 }
 0x88c   : > { %v7610_v10 = vadd.f32 %v11003_v35, %v7609_v62  ;;  %v7476_v54 = vpack.c.bf16 %v7453_v46, %v7452_v8 }
 0x88d   : > { %v7290_v0 = vadd.f32 %v7241_v4, %v7004_v33 }
 0x88e   : > { %7686 = vst.msk [vmem:[%s11009_s19 + $0x80] sm:$0xff] %vm7669_vm4, %v7610_v10  ;;  %8592 = vmatmul.msk.bf16.gmra.mxu1 %vm367_vm0, %v7476_v54 }
 0x88f   : > { %v7334_v42 = vadd.f32 %v11110_v14, %v7290_v0 }
 0x890   : > { %v6671_v12 = vpop.f32.mrf.mxu2 }
 0x891   : > { %v6719_v9 = vadd.f32 %v6671_v12, %v6433_v1  ;;  %v6957_v63 = vpop.f32.mrf.mxu3  ;;  %v7414_v55 = vmul.f32 0.01, %v7334_v42  ;;  %vm7374_vm7 = vcmp.ge.f32.partialorder %v7334_v42, 0.0 }
 0x893   : > { %v7005_v49 = vadd.f32 %v6957_v63, %v6719_v9  ;;  %v7611_v48 = vpop.f32.mrf.mxu1  ;;  %v7246_v7 = vpop.f32.mrf.mxu0  ;;  %v7454_v38 = vsel %vm7374_vm7, %v7334_v42, %v7414_v55 }
 0x894   : > { %v7612_v23 = vadd.f32 %v11003_v35, %v7611_v48 }
 0x895   : > { %v7291_v52 = vadd.f32 %v7243_v3, %v7005_v49 }
 0x896   : > { %7687 = vst.msk [vmem:[%s11009_s19 + $0x88] sm:$0xff] %vm7669_vm4, %v7612_v23 }
 0x897   : > { %v7335_v36 = vadd.f32 %v11110_v14, %v7291_v52 }
 0x898   : > { %v6674_v57 = vpop.f32.mrf.mxu2 }
 0x899   : > { %vm7375_vm8 = vcmp.ge.f32.partialorder %v7335_v36, 0.0  ;;  %v7415_v11 = vmul.f32 0.01, %v7335_v36  ;;  %v6720_v40 = vadd.f32 %v6674_v57, %v10838_v53  ;;  %v6960_v18 = vpop.f32.mrf.mxu3 }
 0x89b   : > { %v7006_v51 = vadd.f32 %v6960_v18, %v6720_v40  ;;  %v7614_v28 = vpop.f32.mrf.mxu1  ;;  %v7455_v22 = vsel %vm7375_vm8, %v7335_v36, %v7415_v11  ;;  %v7248_v20 = vpop.f32.mrf.mxu0 }
 0x89c   : > { %v7615_v43 = vadd.f32 %v11003_v35, %v7614_v28  ;;  %v7477_v26 = vpack.c.bf16 %v7455_v22, %v7454_v38 }
 0x89d   : > { %v7292_v44 = vadd.f32 %v7246_v7, %v7006_v51 }
 0x89e   : > { %7688 = vst.msk [vmem:[%s11009_s19 + $0x90] sm:$0xff] %vm7669_vm4, %v7615_v43  ;;  %8593 = vmatmul.msk.bf16.gmra.mxu1 %vm367_vm0, %v7477_v26 }
 0x89f   : > { %v7336_v45 = vadd.f32 %v11110_v14, %v7292_v44 }
 0x8a0   : > { %v6676_v32 = vpop.f32.mrf.mxu2 }
 0x8a1   : > { %v6721_v53 = vadd.f32 %v6676_v32, %v6435_v58  ;;  %v6962_v6 = vpop.f32.mrf.mxu3  ;;  %v7416_v15 = vmul.f32 0.01, %v7336_v45  ;;  %vm7376_vm9 = vcmp.ge.f32.partialorder %v7336_v45, 0.0 }
 0x8a3   : > { %v7007_v30 = vadd.f32 %v6962_v6, %v6721_v53  ;;  %v7616_v17 = vpop.f32.mrf.mxu1  ;;  %v7251_v5 = vpop.f32.mrf.mxu0  ;;  %v7456_v16 = vsel %vm7376_vm9, %v7336_v45, %v7416_v15 }
 0x8a4   : > { %v7617_v29 = vadd.f32 %v11003_v35, %v7616_v17 }
 0x8a5   : > { %v7293_v39 = vadd.f32 %v7248_v20, %v7007_v30 }
 0x8a6   : > { %7689 = vst.msk [vmem:[%s11009_s19 + $0x98] sm:$0xff] %vm7669_vm4, %v7617_v29 }
 0x8a7   : > { %v7337_v2 = vadd.f32 %v11110_v14, %v7293_v39 }
 0x8a8   : > { %v6679_v24 = vpop.f32.mrf.mxu2 }
 0x8a9   : > { %vm7377_vm10 = vcmp.ge.f32.partialorder %v7337_v2, 0.0  ;;  %v7417_v37 = vmul.f32 0.01, %v7337_v2  ;;  %v6722_v34 = vadd.f32 %v6679_v24, %v11245_v19  ;;  %v6965_v47 = vpop.f32.mrf.mxu3 }
 0x8ab   : > { %v7008_v60 = vadd.f32 %v6965_v47, %v6722_v34  ;;  %v7619_v4 = vpop.f32.mrf.mxu1  ;;  %v7457_v59 = vsel %vm7377_vm10, %v7337_v2, %v7417_v37  ;;  %v7253_v3 = vpop.f32.mrf.mxu0 }
 0x8ac   : > { %v7620_v13 = vadd.f32 %v11003_v35, %v7619_v4  ;;  %v7478_v50 = vpack.c.bf16 %v7457_v59, %v7456_v16 }
 0x8ad   : > { %v7294_v31 = vadd.f32 %v7251_v5, %v7008_v60 }
 0x8ae   : > { %7690 = vst.msk [vmem:[%s11009_s19 + $0xa0] sm:$0xff] %vm7669_vm4, %v7620_v13  ;;  %8594 = vmatmul.msk.bf16.gmra.mxu1 %vm367_vm0, %v7478_v50 }
 0x8af   : > { %v7338_v8 = vadd.f32 %v11110_v14, %v7294_v31 }
 0x8b0   : > { %v6681_v41 = vpop.f32.mrf.mxu2 }
 0x8b1   : > { %v6723_v33 = vadd.f32 %v6681_v41, %v6437_v61  ;;  %v6967_v62 = vpop.f32.mrf.mxu3  ;;  %v7418_v1 = vmul.f32 0.01, %v7338_v8  ;;  %vm7378_vm11 = vcmp.ge.f32.partialorder %v7338_v8, 0.0 }
 0x8b3   : > { %v7009_v46 = vadd.f32 %v6967_v62, %v6723_v33  ;;  %v7621_v10 = vpop.f32.mrf.mxu1  ;;  %v7458_v9 = vsel %vm7378_vm11, %v7338_v8, %v7418_v1 }
 0x8b4   : > { %v7622_v54 = vadd.f32 %v11003_v35, %v7621_v10 }
 0x8b5   : > { %v7295_v25 = vadd.f32 %v7253_v3, %v7009_v46 }
 0x8b6   : > { %7691 = vst.msk [vmem:[%s11009_s19 + $0xa8] sm:$0xff] %vm7669_vm4, %v7622_v54 }
 0x8b7   : > { %v7339_v0 = vadd.f32 %v11110_v14, %v7295_v25 }
 0x8b9   : > { %vm7379_vm12 = vcmp.ge.f32.partialorder %v7339_v0, 0.0  ;;  %v7419_v27 = vmul.f32 0.01, %v7339_v0 }
 0x8bb   : > { %v7624_v12 = vpop.f32.mrf.mxu1  ;;  %v7459_v63 = vsel %vm7379_vm12, %v7339_v0, %v7419_v27 }
 0x8bc   : > { %v7625_v42 = vadd.f32 %v11003_v35, %v7624_v12  ;;  %v7479_v49 = vpack.c.bf16 %v7459_v63, %v7458_v9 }
 0x8be   : > { %7692 = vst.msk [vmem:[%s11009_s19 + $0xb0] sm:$0xff] %vm7669_vm4, %v7625_v42  ;;  %8595 = vmatmul.msk.bf16.gmra.mxu1 %vm367_vm0, %v7479_v49 }
 0x8c3   : > { %v7626_v48 = vpop.f32.mrf.mxu1 }
 0x8c4   : > { %v7627_v14 = vadd.f32 %v11003_v35, %v7626_v48 }
 0x8c6   : > { %7693 = vst.msk [vmem:[%s11009_s19 + $0xb8] sm:$0xff] %vm7669_vm4, %v7627_v14 }
 0x8cb   : > { %v7629_v23 = vpop.f32.mrf.mxu1 }
 0x8cc   : > { %v7630_v52 = vadd.f32 %v11003_v35, %v7629_v23 }
 0x8ce   : > { %7694 = vst.msk [vmem:[%s11009_s19 + $0xc0] sm:$0xff] %vm7669_vm4, %v7630_v52 }
 0x8d3   : > { %v7631_v7 = vpop.f32.mrf.mxu1 }
 0x8d4   : > { %v7632_v55 = vadd.f32 %v11003_v35, %v7631_v7 }
 0x8d6   : > { %7695 = vst.msk [vmem:[%s11009_s19 + $0xc8] sm:$0xff] %vm7669_vm4, %v7632_v55 }
 0x8db   : > { %v7634_v36 = vpop.f32.mrf.mxu1 }
 0x8dc   : > { %v7635_v57 = vadd.f32 %v11003_v35, %v7634_v36 }
 0x8de   : > { %7696 = vst.msk [vmem:[%s11009_s19 + $0xd0] sm:$0xff] %vm7669_vm4, %v7635_v57 }
 0x8e3   : > { %v7636_v11 = vpop.f32.mrf.mxu1 }
 0x8e4   : > { %v7637_v40 = vadd.f32 %v11003_v35, %v7636_v11 }
 0x8e6   : > { %7697 = vst.msk [vmem:[%s11009_s19 + $0xd8] sm:$0xff] %vm7669_vm4, %v7637_v40 }
 0x8eb   : > { %v7639_v18 = vpop.f32.mrf.mxu1 }
 0x8ec   : > { %v7640_v51 = vadd.f32 %v11003_v35, %v7639_v18 }
 0x8ee   : > { %7698 = vst.msk [vmem:[%s11009_s19 + $0xe0] sm:$0xff] %vm7669_vm4, %v7640_v51 }
 0x8f3   : > { %v7641_v28 = vpop.f32.mrf.mxu1 }
 0x8f4   : > { %v7642_v38 = vadd.f32 %v11003_v35, %v7641_v28 }
 0x8f6   : > { %7699 = vst.msk [vmem:[%s11009_s19 + $0xe8] sm:$0xff] %vm7669_vm4, %v7642_v38 }
 0x8fb   : > { %v7644_v22 = vpop.f32.mrf.mxu1 }
 0x8fc   : > { %v7645_v43 = vadd.f32 %v11003_v35, %v7644_v22 }
 0x8fe   : > { %7700 = vst.msk [vmem:[%s11009_s19 + $0xf0] sm:$0xff] %vm7669_vm4, %v7645_v43 }
 0x903   : > { %v7646_v26 = vpop.f32.mrf.mxu1 }
 0x904   : > { %v7647_v56 = vadd.f32 %v11003_v35, %v7646_v26 }
 0x906   : > { %7701 = vst.msk [vmem:[%s11009_s19 + $0xf8] sm:$0xff] %vm7669_vm4, %v7647_v56 }
 0x90b   : > { %v7649_v58 = vpop.f32.mrf.mxu1 }
 0x90c   : > { %v7650_v44 = vadd.f32 %v11003_v35, %v7649_v58 }
 0x90e   : > { %7702 = vst.msk [vmem:[%s11009_s19 + $0x100] sm:$0xff] %vm7669_vm4, %v7650_v44 }
 0x913   : > { %v7651_v20 = vpop.f32.mrf.mxu1 }
 0x914   : > { %v7652_v32 = vadd.f32 %v11003_v35, %v7651_v20 }
 0x916   : > { %7703 = vst.msk [vmem:[%s11009_s19 + $0x108] sm:$0xff] %vm7669_vm4, %v7652_v32 }
 0x91b   : > { %v7654_v53 = vpop.f32.mrf.mxu1 }
 0x91c   : > { %v7655_v6 = vadd.f32 %v11003_v35, %v7654_v53 }
 0x91e   : > { %7704 = vst.msk [vmem:[%s11009_s19 + $0x110] sm:$0xff] %vm7669_vm4, %v7655_v6 }
 0x923   : > { %v7656_v45 = vpop.f32.mrf.mxu1 }
 0x924   : > { %v7657_v30 = vadd.f32 %v11003_v35, %v7656_v45 }
 0x926   : > { %7705 = vst.msk [vmem:[%s11009_s19 + $0x118] sm:$0xff] %vm7669_vm4, %v7657_v30 }
 0x92b   : > { %v7659_v17 = vpop.f32.mrf.mxu1 }
 0x92c   : > { %v7660_v29 = vadd.f32 %v11003_v35, %v7659_v17 }
 0x92e   : > { %7706 = vst.msk [vmem:[%s11009_s19 + $0x120] sm:$0xff] %vm7669_vm4, %v7660_v29 }
 0x933   : > { %v7661_v39 = vpop.f32.mrf.mxu1 }
 0x934   : > { %v7662_v15 = vadd.f32 %v11003_v35, %v7661_v39 }
 0x936   : > { %7707 = vst.msk [vmem:[%s11009_s19 + $0x128] sm:$0xff] %vm7669_vm4, %v7662_v15 }
 0x93b   : > { %v7664_v2 = vpop.f32.mrf.mxu1 }
 0x93c   : > { %v7665_v24 = vadd.f32 %v11003_v35, %v7664_v2 }
 0x93e   : > { %7708 = vst.msk [vmem:[%s11009_s19 + $0x130] sm:$0xff] %vm7669_vm4, %v7665_v24 }
 0x943   : > { %v7666_v37 = vpop.f32.mrf.mxu1 }
 0x944   : > { %v7667_v19 = vadd.f32 %v11003_v35, %v7666_v37 }
 0x946   : > { %7709 = vst.msk [vmem:[%s11009_s19 + $0x138] sm:$0xff] %vm7669_vm4, %v7667_v19 }
 0x947 PF: > { %s15_s18 = sadd.s32 1, %s8673_s18  }
 0x948   : > { %p12_p4 = scmp.ge.s32.totalorder %s15_s18, 4  }
 0x94a   :  { %14 = sbr.rel (!%p12_p4) target bundleno = 1 (0x1), region = 94 }

</bundles_post_ra>
